<compile_context>
chip_gen: v5e
topology: v5e:2x2
jax: 0.10.0
libtpu: 0.0.40
codegen_flags: <defaults>
</compile_context>

<pallas_src>
import functools

import jax
import jax.numpy as jnp
from jax.experimental import pallas as pl
from jax.experimental.pallas import tpu as pltpu

# Configuration (matches the PyTorch script's `configuration` dict).
T_IN = 10        # T_in
STEP = 10        # Step (output channels)
MODES = 8        # Modes (modes1 == modes2)
WIDTH = 32       # Width

_INV_SQRT2 = 0.7071067811865476
_VMEM_LIMIT = 48 * 1024 * 1024


def _gelu_exact(x):
    # torch.nn.functional.gelu default (erf-based, NOT tanh approx)
    return 0.5 * x * (1.0 + jax.lax.erf(x * _INV_SQRT2))


def _cparams(sem):
    return pltpu.CompilerParams(dimension_semantics=sem,
                                vmem_limit_bytes=_VMEM_LIMIT)


def _lane_tile(S, max_tile, min_steps=1):
    """Largest multiple of 128 dividing S, <= max_tile, with >= min_steps."""
    assert S % 128 == 0
    best = 128
    for t in range(128, S + 1, 128):
        if S % t == 0 and t <= max_tile and S // t >= min_steps:
            best = t
    return best


# ----------------------------------------------------------------------------
# Pallas kernels (channels-first blocks: rows = channels, lanes = spatial)
# ----------------------------------------------------------------------------
def _lift_kernel(x_ref, g_ref, w_ref, wg_ref, b_ref, o_ref):
    # fc0 lift with the coordinate-grid bias folded in (no (W, S) HBM buffer).
    # x: (1, T_in, ts)  g: (2, ts)  w: (W, T_in)  wg: (W, 2)  b: (W, 1)
    y = jnp.dot(w_ref[...], x_ref[0], preferred_element_type=jnp.float32)
    g = g_ref[...]
    y = y + wg_ref[:, 0:1] * g[0:1, :] + wg_ref[:, 1:2] * g[1:2, :]
    o_ref[0] = (y + b_ref[...]).astype(o_ref.dtype)


def _fwd_dft_mix_kernel(x_ref, ert_ref, eit_ref, wr_ref, wi_ref,
                        or_ref, oi_ref, accr, acci):
    # Truncated forward DFT (accumulated over spatial tiles) fused with the
    # complex per-mode channel mixing at the last spatial step.
    # x: (1, C, ts)  ert/eit: (ts, 128)  wr/wi: (Ci, Co, 128)  out: (1, Co, 128)
    s = pl.program_id(1)

    @pl.when(s == 0)
    def _():
        accr[...] = jnp.zeros_like(accr)
        acci[...] = jnp.zeros_like(acci)

    x = x_ref[0]                                              # (C, ts)
    accr[...] += jnp.dot(x, ert_ref[...], preferred_element_type=jnp.float32)
    acci[...] += jnp.dot(x, eit_ref[...], preferred_element_type=jnp.float32)

    @pl.when(s == pl.num_programs(1) - 1)
    def _():
        xr = accr[...][:, None, :]                            # (Ci, 1, 128)
        xi = acci[...][:, None, :]
        wr = wr_ref[...]                                      # (Ci, Co, 128)
        wi = wi_ref[...]
        or_ref[0] = jnp.sum(xr * wr - xi * wi, axis=0).astype(or_ref.dtype)
        oi_ref[0] = jnp.sum(xr * wi + xi * wr, axis=0).astype(oi_ref.dtype)


def _inv_dft_conv_gelu_kernel(x_ref, w_ref, b_ref, omr_ref, omi_ref,
                              dr_ref, di_ref, o_ref):
    # gelu(W @ x + b + inverse-DFT(om)) — the spectral residual field is
    # reconstructed per tile from 128 modes and never written to HBM.
    # x/o: (1, C, ts)  w: (C, C)  b: (C, 1)  omr/omi: (1, C, 128)  dr/di: (128, ts)
    spec = (jnp.dot(omr_ref[0], dr_ref[...], preferred_element_type=jnp.float32)
            - jnp.dot(omi_ref[0], di_ref[...], preferred_element_type=jnp.float32))
    y = jnp.dot(w_ref[...], x_ref[0], preferred_element_type=jnp.float32)
    y = y + b_ref[...] + spec
    # TODO(synk): erf GeLU is ~20 VPU ops/elem; revisit if the bundle dump
    #             shows vmul saturated with vld/vst slack on v6e/v7x.
    o_ref[0] = _gelu_exact(y).astype(o_ref.dtype)


def _head_kernel(x_ref, w1_ref, b1_ref, w2_ref, b2_ref, o_ref):
    # fc2(gelu(fc1(x))) fused; the (128, ts) intermediate never leaves VMEM.
    h = jnp.dot(w1_ref[...], x_ref[0], preferred_element_type=jnp.float32)
    h = _gelu_exact(h + b1_ref[...])
    y = jnp.dot(w2_ref[...], h, preferred_element_type=jnp.float32)
    o_ref[0] = (y + b2_ref[...]).astype(o_ref.dtype)


# ----------------------------------------------------------------------------
# pallas_call wrappers
# ----------------------------------------------------------------------------
def lift_fc0(x_cf, grid2, w_lift, w_grid, bias):
    # x_cf: (B, T_in, Sp)  grid2: (2, Sp)  ->  (B, W, Sp)
    B, Tin, Sp = x_cf.shape
    C = w_lift.shape[0]
    ts = _lane_tile(Sp, 16384, min_steps=2 if B == 1 else 1)
    grid = (B, Sp // ts)
    return pl.pallas_call(
        _lift_kernel,
        grid=grid,
        in_specs=[pl.BlockSpec((1, Tin, ts), lambda b, s: (b, 0, s)),
                  pl.BlockSpec((2, ts), lambda b, s: (0, s)),
                  pl.BlockSpec((C, Tin), lambda b, s: (0, 0)),
                  pl.BlockSpec((C, 2), lambda b, s: (0, 0)),
                  pl.BlockSpec((C, 1), lambda b, s: (0, 0))],
        out_specs=pl.BlockSpec((1, C, ts), lambda b, s: (b, 0, s)),
        out_shape=jax.ShapeDtypeStruct((B, C, Sp), x_cf.dtype),
        compiler_params=_cparams(("parallel", "parallel")),
    )(x_cf, grid2, w_lift, w_grid, bias.reshape(C, 1))


def fwd_dft_mix(h, ert, eit, wr, wi):
    # h: (B, C, Sp)  ert/eit: (Sp, 128)  wr/wi: (C, C, 128)  -> omR/omI (B, C, 128)
    B, C, Sp = h.shape
    P = ert.shape[1]
    ts = _lane_tile(Sp, 8192)
    grid = (B, Sp // ts)
    return pl.pallas_call(
        _fwd_dft_mix_kernel,
        grid=grid,
        in_specs=[pl.BlockSpec((1, C, ts), lambda b, s: (b, 0, s)),
                  pl.BlockSpec((ts, P), lambda b, s: (s, 0)),
                  pl.BlockSpec((ts, P), lambda b, s: (s, 0)),
                  pl.BlockSpec((C, C, P), lambda b, s: (0, 0, 0)),
                  pl.BlockSpec((C, C, P), lambda b, s: (0, 0, 0))],
        out_specs=[pl.BlockSpec((1, C, P), lambda b, s: (b, 0, 0)),
                   pl.BlockSpec((1, C, P), lambda b, s: (b, 0, 0))],
        out_shape=[jax.ShapeDtypeStruct((B, C, P), jnp.float32),
                   jax.ShapeDtypeStruct((B, C, P), jnp.float32)],
        scratch_shapes=[pltpu.VMEM((C, P), jnp.float32),
                        pltpu.VMEM((C, P), jnp.float32)],
        compiler_params=_cparams(("parallel", "arbitrary")),
    )(h, ert, eit, wr, wi)


def inv_dft_conv_gelu(h, wT, b, omr, omi, dr, di):
    # gelu(Conv1x1(h) + irDFT(om)), channels-first.  (B, C, Sp)
    B, C, Sp = h.shape
    P = dr.shape[0]
    ts = _lane_tile(Sp, 8192, min_steps=2 if B == 1 else 1)
    grid = (B, Sp // ts)
    act = pl.BlockSpec((1, C, ts), lambda bb, s: (bb, 0, s))
    return pl.pallas_call(
        _inv_dft_conv_gelu_kernel,
        grid=grid,
        in_specs=[act,
                  pl.BlockSpec((C, C), lambda bb, s: (0, 0)),
                  pl.BlockSpec((C, 1), lambda bb, s: (0, 0)),
                  pl.BlockSpec((1, C, P), lambda bb, s: (bb, 0, 0)),
                  pl.BlockSpec((1, C, P), lambda bb, s: (bb, 0, 0)),
                  pl.BlockSpec((P, ts), lambda bb, s: (0, s)),
                  pl.BlockSpec((P, ts), lambda bb, s: (0, s))],
        out_specs=act,
        out_shape=jax.ShapeDtypeStruct((B, C, Sp), h.dtype),
        compiler_params=_cparams(("parallel", "parallel")),
    )(h, wT, b.reshape(C, 1), omr, omi, dr, di)


def fc_head(x_cf, w1T, b1, w2T, b2):
    # fused fc1 + GeLU + fc2, channels-first.  (B, C, Sp) -> (B, STEP, Sp)
    B, C, Sp = x_cf.shape
    H = w1T.shape[0]
    O = w2T.shape[0]
    ts = _lane_tile(Sp, 16384, min_steps=2 if B == 1 else 1)
    grid = (B, Sp // ts)
    return pl.pallas_call(
        _head_kernel,
        grid=grid,
        in_specs=[pl.BlockSpec((1, C, ts), lambda b, s: (b, 0, s)),
                  pl.BlockSpec((H, C), lambda b, s: (0, 0)),
                  pl.BlockSpec((H, 1), lambda b, s: (0, 0)),
                  pl.BlockSpec((O, H), lambda b, s: (0, 0)),
                  pl.BlockSpec((O, 1), lambda b, s: (0, 0))],
        out_specs=pl.BlockSpec((1, O, ts), lambda b, s: (b, 0, s)),
        out_shape=jax.ShapeDtypeStruct((B, O, Sp), x_cf.dtype),
        compiler_params=_cparams(("parallel", "parallel")),
    )(x_cf, w1T, b1.reshape(H, 1), w2T, b2.reshape(O, 1))


# ----------------------------------------------------------------------------
# Truncated DFT bases (replaces rfft2/irfft2 for the 128 retained modes)
# ----------------------------------------------------------------------------
def _dft_bases(X, Y, S_pad):
    m = MODES
    kx = jnp.concatenate([jnp.arange(m), jnp.arange(X - m, X)]).astype(jnp.float32)
    ky = jnp.arange(m, dtype=jnp.float32)
    xs = jnp.arange(X, dtype=jnp.float32)
    ys = jnp.arange(Y, dtype=jnp.float32)
    tx = 2.0 * jnp.pi * kx[:, None] * xs[None, :] / X              # (2m, X)
    ty = 2.0 * jnp.pi * ky[:, None] * ys[None, :] / Y              # (m, Y)
    theta = (tx[:, None, :, None] + ty[None, :, None, :]).reshape(2 * m * m, X * Y)
    # Forward transform: x_ft[p] = sum_s x[s] * exp(-i*theta[p,s])
    ert = jnp.cos(theta).T                                         # (S, 128)
    eit = (-jnp.sin(theta)).T                                      # (S, 128)
    # Inverse transform (matches irfft2 with only these modes non-zero):
    # out[s] = sum_p c_ky * Re(om[p] * exp(+i*theta[p,s])) / (X*Y)
    c = jnp.where(ky == 0, 1.0, 2.0)
    cc = jnp.broadcast_to(c[None, :], (2 * m, m)).reshape(2 * m * m, 1)
    dr = cc * jnp.cos(theta) / (X * Y)                             # (128, S)
    di = cc * jnp.sin(theta) / (X * Y)                             # (128, S)
    pad = S_pad - X * Y
    if pad:
        # Zero basis rows for the padded positions -> padding never leaks into
        # the spectral path.
        ert = jnp.pad(ert, ((0, pad), (0, 0)))
        eit = jnp.pad(eit, ((0, pad), (0, 0)))
        dr = jnp.pad(dr, ((0, 0), (0, pad)))
        di = jnp.pad(di, ((0, 0), (0, pad)))
    return ert, eit, dr, di


def pack_spectral_weights(w1r, w1i, w2r, w2i):
    # (Ci, Co, m, m) -> (Ci, Co, 2*m*m): both frequency corners on lanes.
    def flat(w):
        ci, co, m1, m2 = w.shape
        return w.reshape(ci, co, m1 * m2)
    wr = jnp.concatenate([flat(w1r), flat(w2r)], axis=-1)
    wi = jnp.concatenate([flat(w1i), flat(w2i)], axis=-1)
    return wr, wi


# ----------------------------------------------------------------------------
# FNO2d forward
# ----------------------------------------------------------------------------
def get_grid(B, X, Y, dtype=jnp.float32):
    # Equivalent of get_grid(): x_grid in [-1.5, 1.5], y_grid in [-2.0, 2.0]
    gx = jnp.linspace(-1.5, 1.5, X, dtype=dtype)
    gy = jnp.linspace(-2.0, 2.0, Y, dtype=dtype)
    gridx = jnp.broadcast_to(gx.reshape(1, X, 1, 1), (B, X, Y, 1))
    gridy = jnp.broadcast_to(gy.reshape(1, 1, Y, 1), (B, X, Y, 1))
    return jnp.concatenate([gridx, gridy], axis=-1)


def fno2d_forward(params, x):
    # x: (B, X, Y, T_in)  ->  (B, X, Y, STEP)
    B, X, Y, _ = x.shape
    assert X >= 2 * MODES and Y >= 2 * MODES, "spatial dims must cover 2*MODES"
    S = X * Y
    Sp = pl.cdiv(S, 128) * 128            # lane-dense padded spatial extent

    # channels-first layout, flattened (padded) spatial dim on the lane axis
    x_cf = jnp.transpose(x, (0, 3, 1, 2)).reshape(B, T_IN, S)
    gx = jnp.linspace(-1.5, 1.5, X, dtype=x.dtype)
    gy = jnp.linspace(-2.0, 2.0, Y, dtype=x.dtype)
    grid2 = jnp.stack([jnp.broadcast_to(gx[:, None], (X, Y)).reshape(S),
                       jnp.broadcast_to(gy[None, :], (X, Y)).reshape(S)], 0)
    if Sp != S:
        x_cf = jnp.pad(x_cf, ((0, 0), (0, 0), (0, Sp - S)))
        grid2 = jnp.pad(grid2, ((0, 0), (0, Sp - S)))

    ert, eit, dr, di = _dft_bases(X, Y, Sp)          # shared by all 3 layers

    fc0_wT = params['fc0_w'].T                        # (W, T_in+2)
    h = lift_fc0(x_cf, grid2, fc0_wT[:, :T_IN], fc0_wT[:, T_IN:],
                 params['fc0_b'])                     # (B, W, Sp)

    for k in range(3):
        wr, wi = pack_spectral_weights(params[f'conv{k}_w1r'],
                                       params[f'conv{k}_w1i'],
                                       params[f'conv{k}_w2r'],
                                       params[f'conv{k}_w2i'])
        # forward truncated DFT + complex channel mixing (one Pallas kernel)
        omr, omi = fwd_dft_mix(h, ert, eit, wr, wi)   # (B, W, 128) x2
        # inverse DFT + Conv1x1 + bias + GeLU (one Pallas kernel)
        h = inv_dft_conv_gelu(h, params[f'w{k}_w'].T, params[f'w{k}_b'],
                              omr, omi, dr, di)       # (B, W, Sp)

    out_cf = fc_head(h, params['fc1_w'].T, params['fc1_b'],
                     params['fc2_w'].T, params['fc2_b'])    # (B, STEP, Sp)
    out_cf = out_cf[:, :, :S]
    return jnp.transpose(out_cf.reshape(B, STEP, X, Y), (0, 2, 3, 1))


# ----------------------------------------------------------------------------
# Pure-JAX reference (FFT-based, verifies the Pallas truncated-DFT path)
# ----------------------------------------------------------------------------
def fno2d_reference(params, x):
    B, X, Y, _ = x.shape
    grid = get_grid(B, X, Y, x.dtype)
    h = jnp.concatenate([x, grid], axis=-1)
    h = h @ params['fc0_w'] + params['fc0_b']
    h = jnp.transpose(h, (0, 3, 1, 2))

    def spec_ref(xc, w1r, w1i, w2r, w2i):
        Bc, C, Xs, Ys = xc.shape
        xft = jnp.fft.rfft2(xc)
        w1 = w1r + 1j * w1i
        w2 = w2r + 1j * w2i
        out = jnp.zeros((Bc, WIDTH, Xs, Ys // 2 + 1), dtype=jnp.complex64)
        out = out.at[:, :, :MODES, :MODES].set(
            jnp.einsum('bixy,ioxy->boxy', xft[:, :, :MODES, :MODES], w1))
        out = out.at[:, :, Xs - MODES:, :MODES].set(
            jnp.einsum('bixy,ioxy->boxy', xft[:, :, Xs - MODES:, :MODES], w2))
        return jnp.fft.irfft2(out, s=(Xs, Ys))

    for k in range(3):
        x1 = spec_ref(h, params[f'conv{k}_w1r'], params[f'conv{k}_w1i'],
                      params[f'conv{k}_w2r'], params[f'conv{k}_w2i'])
        x2 = (jnp.einsum('bixy,io->boxy', h, params[f'w{k}_w'])
              + params[f'w{k}_b'][None, :, None, None])
        h = _gelu_exact(x1 + x2)

    h = jnp.transpose(h, (0, 2, 3, 1))
    h = _gelu_exact(h @ params['fc1_w'] + params['fc1_b'])
    h = h @ params['fc2_w'] + params['fc2_b']
    return h


# ----------------------------------------------------------------------------
# Deterministic parameter init (shapes from FNO2d.__init__)
# ----------------------------------------------------------------------------
def init_params(key):
    keys = jax.random.split(key, 32)
    p = {}
    idx = 0

    def lin(fan_in, fan_out):
        nonlocal idx
        bound = 1.0 / (fan_in ** 0.5)
        w = jax.random.uniform(keys[idx], (fan_in, fan_out), jnp.float32,
                               -bound, bound)
        b = jax.random.uniform(keys[idx + 1], (fan_out,), jnp.float32,
                               -bound, bound)
        idx += 2
        return w, b

    p['fc0_w'], p['fc0_b'] = lin(T_IN + 2, WIDTH)

    scale = 1.0 / (WIDTH * WIDTH)
    for k in range(3):
        for wname in ('w1', 'w2'):
            # torch.rand(..., dtype=cfloat): real & imag ~ U[0,1), scaled
            p[f'conv{k}_{wname}r'] = scale * jax.random.uniform(
                keys[idx], (WIDTH, WIDTH, MODES, MODES), jnp.float32)
            p[f'conv{k}_{wname}i'] = scale * jax.random.uniform(
                keys[idx + 1], (WIDTH, WIDTH, MODES, MODES), jnp.float32)
            idx += 2
        p[f'w{k}_w'], p[f'w{k}_b'] = lin(WIDTH, WIDTH)   # 1x1 conv == linear

    p['fc1_w'], p['fc1_b'] = lin(WIDTH, 128)
    p['fc2_w'], p['fc2_b'] = lin(128, STEP)
    return p


if __name__ == "__main__":
    key = jax.random.PRNGKey(0)
    pkey, xkey = jax.random.split(key)
    params = init_params(pkey)

    B, X, Y = 2, 16, 16
    x = jax.random.normal(xkey, (B, X, Y, T_IN), jnp.float32)

    fwd = jax.jit(functools.partial(fno2d_forward, params))
    out = jax.block_until_ready(fwd(x))
    assert out.shape == (B, X, Y, STEP), out.shape

    ref = fno2d_reference(params, x)
    err = float(jnp.max(jnp.abs(out - ref)))
    assert err < 1e-3, f"mismatch vs reference: {err}"

    print("KERNEL_OK")
</pallas_src>

<mosaic_0001>
module attributes {stable_mosaic.version = 11 : i64} {
  func.func @_lift_kernel(%arg0: i32, %arg1: i32, %arg2: memref<1x10x256xf32, #tpu.memory_space<vmem>>, %arg3: memref<2x256xf32, #tpu.memory_space<vmem>>, %arg4: memref<32x10xf32, #tpu.memory_space<vmem>>, %arg5: memref<32x2xf32, #tpu.memory_space<vmem>>, %arg6: memref<32x1xf32, #tpu.memory_space<vmem>>, %arg7: memref<1x32x256xf32, #tpu.memory_space<vmem>>) attributes {dimension_semantics = [#tpu.dimension_semantics<parallel>, #tpu.dimension_semantics<parallel>], iteration_bounds = array<i64: 2, 1>, scalar_prefetch = 0 : i64, scratch_operands = 0 : i64, tpu.core_type = #tpu.core_type<tc>, window_params = [{transform_indices = @transform_0, window_bounds = array<i64: 1, 10, 256>}, {transform_indices = @transform_1, window_bounds = array<i64: 2, 256>}, {pipeline_mode = #tpu.pipeline_mode<synchronous>, transform_indices = @transform_2, window_bounds = array<i64: 32, 10>}, {pipeline_mode = #tpu.pipeline_mode<synchronous>, transform_indices = @transform_3, window_bounds = array<i64: 32, 2>}, {pipeline_mode = #tpu.pipeline_mode<synchronous>, transform_indices = @transform_4, window_bounds = array<i64: 32, 1>}, {transform_indices = @transform_5, window_bounds = array<i64: 1, 32, 256>}]} {
    %c0 = arith.constant 0 : index
    %c0_0 = arith.constant 0 : index
    %0 = vector.load %arg4[%c0, %c0_0] : memref<32x10xf32, #tpu.memory_space<vmem>>, vector<32x10xf32>
    %c0_1 = arith.constant 0 : index
    %c0_2 = arith.constant 0 : index
    %c0_3 = arith.constant 0 : index
    %1 = vector.load %arg2[%c0_1, %c0_2, %c0_3] : memref<1x10x256xf32, #tpu.memory_space<vmem>>, vector<1x10x256xf32>
    %2 = vector.shape_cast %1 : vector<1x10x256xf32> to vector<10x256xf32>
    %cst = arith.constant dense<0.000000e+00> : vector<32x256xf32>
    %3 = tpu.matmul %0, %2, %cst {dimension_numbers = #tpu.dot_dimension_numbers<[1], [0], [0], [1], [0, 0, 1, 1], [], []>} : vector<32x10xf32>, vector<10x256xf32>, vector<32x256xf32> -> vector<32x256xf32>
    %c0_4 = arith.constant 0 : index
    %c0_5 = arith.constant 0 : index
    %4 = vector.load %arg3[%c0_4, %c0_5] : memref<2x256xf32, #tpu.memory_space<vmem>>, vector<2x256xf32>
    %c0_6 = arith.constant 0 : index
    %c0_7 = arith.constant 0 : index
    %5 = vector.load %arg5[%c0_6, %c0_7] : memref<32x2xf32, #tpu.memory_space<vmem>>, vector<32x1xf32>
    %6 = vector.extract_strided_slice %4 {offsets = [0, 0], sizes = [1, 256], strides = [1, 1]} : vector<2x256xf32> to vector<1x256xf32>
    %7 = vector.broadcast %5 : vector<32x1xf32> to vector<32x256xf32>
    %8 = vector.broadcast %6 : vector<1x256xf32> to vector<32x256xf32>
    %9 = arith.mulf %7, %8 : vector<32x256xf32>
    %10 = arith.addf %3, %9 : vector<32x256xf32>
    %c0_8 = arith.constant 0 : index
    %c1 = arith.constant 1 : index
    %11 = vector.load %arg5[%c0_8, %c1] : memref<32x2xf32, #tpu.memory_space<vmem>>, vector<32x1xf32>
    %12 = vector.extract_strided_slice %4 {offsets = [1, 0], sizes = [1, 256], strides = [1, 1]} : vector<2x256xf32> to vector<1x256xf32>
    %13 = vector.broadcast %11 : vector<32x1xf32> to vector<32x256xf32>
    %14 = vector.broadcast %12 : vector<1x256xf32> to vector<32x256xf32>
    %15 = arith.mulf %13, %14 : vector<32x256xf32>
    %16 = arith.addf %10, %15 : vector<32x256xf32>
    %c0_9 = arith.constant 0 : index
    %c0_10 = arith.constant 0 : index
    %17 = vector.load %arg6[%c0_9, %c0_10] : memref<32x1xf32, #tpu.memory_space<vmem>>, vector<32x1xf32>
    %18 = vector.broadcast %17 : vector<32x1xf32> to vector<32x256xf32>
    %19 = arith.addf %16, %18 : vector<32x256xf32>
    %c0_11 = arith.constant 0 : index
    %c0_12 = arith.constant 0 : index
    %c0_13 = arith.constant 0 : index
    %20 = vector.load %arg7[%c0_11, %c0_12, %c0_13] : memref<1x32x256xf32, #tpu.memory_space<vmem>>, vector<1x32x256xf32>
    %21 = vector.shape_cast %20 : vector<1x32x256xf32> to vector<32x256xf32>
    %22 = vector.shape_cast %19 : vector<32x256xf32> to vector<1x32x256xf32>
    tpu.vector_store %arg7[%c0_11, %c0_12, %c0_13], %22 {strides = array<i32>} : memref<1x32x256xf32, #tpu.memory_space<vmem>>, vector<1x32x256xf32>,
    return
  }
  func.func @transform_0(%arg0: i32, %arg1: i32) -> (i32, i32, i32) {
    %c0_i32 = arith.constant 0 : i32
    %c0_i32_0 = arith.constant 0 : i32
    return %arg0, %c0_i32, %arg1 : i32, i32, i32
  }
  func.func @transform_1(%arg0: i32, %arg1: i32) -> (i32, i32) {
    %c0_i32 = arith.constant 0 : i32
    %c0_i32_0 = arith.constant 0 : i32
    return %c0_i32, %arg1 : i32, i32
  }
  func.func @transform_2(%arg0: i32, %arg1: i32) -> (i32, i32) {
    %c0_i32 = arith.constant 0 : i32
    %c0_i32_0 = arith.constant 0 : i32
    %c0_i32_1 = arith.constant 0 : i32
    return %c0_i32, %c0_i32_0 : i32, i32
  }
  func.func @transform_3(%arg0: i32, %arg1: i32) -> (i32, i32) {
    %c0_i32 = arith.constant 0 : i32
    %c0_i32_0 = arith.constant 0 : i32
    %c0_i32_1 = arith.constant 0 : i32
    return %c0_i32, %c0_i32_0 : i32, i32
  }
  func.func @transform_4(%arg0: i32, %arg1: i32) -> (i32, i32) {
    %c0_i32 = arith.constant 0 : i32
    %c0_i32_0 = arith.constant 0 : i32
    %c0_i32_1 = arith.constant 0 : i32
    return %c0_i32, %c0_i32_0 : i32, i32
  }
  func.func @transform_5(%arg0: i32, %arg1: i32) -> (i32, i32, i32) {
    %c0_i32 = arith.constant 0 : i32
    %c0_i32_0 = arith.constant 0 : i32
    return %arg0, %c0_i32, %arg1 : i32, i32, i32
  }
}

module attributes {stable_mosaic.version = 11 : i64} {
  func.func @_inv_dft_conv_gelu_kernel(%arg0: i32, %arg1: i32, %arg2: memref<1x32x256xf32, #tpu.memory_space<vmem>>, %arg3: memref<32x32xf32, #tpu.memory_space<vmem>>, %arg4: memref<32x1xf32, #tpu.memory_space<vmem>>, %arg5: memref<1x32x128xf32, #tpu.memory_space<vmem>>, %arg6: memref<1x32x128xf32, #tpu.memory_space<vmem>>, %arg7: memref<128x256xf32, #tpu.memory_space<vmem>>, %arg8: memref<128x256xf32, #tpu.memory_space<vmem>>, %arg9: memref<1x32x256xf32, #tpu.memory_space<vmem>>) attributes {dimension_semantics = [#tpu.dimension_semantics<parallel>, #tpu.dimension_semantics<parallel>], iteration_bounds = array<i64: 2, 1>, scalar_prefetch = 0 : i64, scratch_operands = 0 : i64, tpu.core_type = #tpu.core_type<tc>, window_params = [{transform_indices = @transform_0, window_bounds = array<i64: 1, 32, 256>}, {pipeline_mode = #tpu.pipeline_mode<synchronous>, transform_indices = @transform_1, window_bounds = array<i64: 32, 32>}, {pipeline_mode = #tpu.pipeline_mode<synchronous>, transform_indices = @transform_2, window_bounds = array<i64: 32, 1>}, {transform_indices = @transform_3, window_bounds = array<i64: 1, 32, 128>}, {transform_indices = @transform_4, window_bounds = array<i64: 1, 32, 128>}, {transform_indices = @transform_5, window_bounds = array<i64: 128, 256>}, {transform_indices = @transform_6, window_bounds = array<i64: 128, 256>}, {transform_indices = @transform_7, window_bounds = array<i64: 1, 32, 256>}]} {
    %c0 = arith.constant 0 : index
    %c0_0 = arith.constant 0 : index
    %c0_1 = arith.constant 0 : index
    %0 = vector.load %arg5[%c0, %c0_0, %c0_1] : memref<1x32x128xf32, #tpu.memory_space<vmem>>, vector<1x32x128xf32>
    %1 = vector.shape_cast %0 : vector<1x32x128xf32> to vector<32x128xf32>
    %c0_2 = arith.constant 0 : index
    %c0_3 = arith.constant 0 : index
    %2 = vector.load %arg7[%c0_2, %c0_3] : memref<128x256xf32, #tpu.memory_space<vmem>>, vector<128x256xf32>
    %cst = arith.constant dense<0.000000e+00> : vector<32x256xf32>
    %3 = tpu.matmul %1, %2, %cst {dimension_numbers = #tpu.dot_dimension_numbers<[1], [0], [0], [1], [0, 0, 1, 1], [], []>} : vector<32x128xf32>, vector<128x256xf32>, vector<32x256xf32> -> vector<32x256xf32>
    %c0_4 = arith.constant 0 : index
    %c0_5 = arith.constant 0 : index
    %c0_6 = arith.constant 0 : index
    %4 = vector.load %arg6[%c0_4, %c0_5, %c0_6] : memref<1x32x128xf32, #tpu.memory_space<vmem>>, vector<1x32x128xf32>
    %5 = vector.shape_cast %4 : vector<1x32x128xf32> to vector<32x128xf32>
    %c0_7 = arith.constant 0 : index
    %c0_8 = arith.constant 0 : index
    %6 = vector.load %arg8[%c0_7, %c0_8] : memref<128x256xf32, #tpu.memory_space<vmem>>, vector<128x256xf32>
    %cst_9 = arith.constant dense<0.000000e+00> : vector<32x256xf32>
    %7 = tpu.matmul %5, %6, %cst_9 {dimension_numbers = #tpu.dot_dimension_numbers<[1], [0], [0], [1], [0, 0, 1, 1], [], []>} : vector<32x128xf32>, vector<128x256xf32>, vector<32x256xf32> -> vector<32x256xf32>
    %8 = arith.subf %3, %7 : vector<32x256xf32>
    %c0_10 = arith.constant 0 : index
    %c0_11 = arith.constant 0 : index
    %9 = vector.load %arg3[%c0_10, %c0_11] : memref<32x32xf32, #tpu.memory_space<vmem>>, vector<32x32xf32>
    %c0_12 = arith.constant 0 : index
    %c0_13 = arith.constant 0 : index
    %c0_14 = arith.constant 0 : index
    %10 = vector.load %arg2[%c0_12, %c0_13, %c0_14] : memref<1x32x256xf32, #tpu.memory_space<vmem>>, vector<1x32x256xf32>
    %11 = vector.shape_cast %10 : vector<1x32x256xf32> to vector<32x256xf32>
    %cst_15 = arith.constant dense<0.000000e+00> : vector<32x256xf32>
    %12 = tpu.matmul %9, %11, %cst_15 {dimension_numbers = #tpu.dot_dimension_numbers<[1], [0], [0], [1], [0, 0, 1, 1], [], []>} : vector<32x32xf32>, vector<32x256xf32>, vector<32x256xf32> -> vector<32x256xf32>
    %c0_16 = arith.constant 0 : index
    %c0_17 = arith.constant 0 : index
    %13 = vector.load %arg4[%c0_16, %c0_17] : memref<32x1xf32, #tpu.memory_space<vmem>>, vector<32x1xf32>
    %14 = vector.broadcast %13 : vector<32x1xf32> to vector<32x256xf32>
    %15 = arith.addf %12, %14 : vector<32x256xf32>
    %16 = arith.addf %15, %8 : vector<32x256xf32>
    %cst_18 = arith.constant 5.000000e-01 : f32
    %17 = vector.broadcast %cst_18 : f32 to vector<32x256xf32>
    %18 = arith.mulf %17, %16 : vector<32x256xf32>
    %cst_19 = arith.constant 0.707106769 : f32
    %19 = vector.broadcast %cst_19 : f32 to vector<32x256xf32>
    %20 = arith.mulf %16, %19 : vector<32x256xf32>
    %21 = math.erf %20 : vector<32x256xf32>
    %cst_20 = arith.constant 1.000000e+00 : f32
    %22 = vector.broadcast %cst_20 : f32 to vector<32x256xf32>
    %23 = arith.addf %22, %21 : vector<32x256xf32>
    %24 = arith.mulf %18, %23 : vector<32x256xf32>
    %c0_21 = arith.constant 0 : index
    %c0_22 = arith.constant 0 : index
    %c0_23 = arith.constant 0 : index
    %25 = vector.load %arg9[%c0_21, %c0_22, %c0_23] : memref<1x32x256xf32, #tpu.memory_space<vmem>>, vector<1x32x256xf32>
    %26 = vector.shape_cast %25 : vector<1x32x256xf32> to vector<32x256xf32>
    %27 = vector.shape_cast %24 : vector<32x256xf32> to vector<1x32x256xf32>
    tpu.vector_store %arg9[%c0_21, %c0_22, %c0_23], %27 {strides = array<i32>} : memref<1x32x256xf32, #tpu.memory_space<vmem>>, vector<1x32x256xf32>,
    return
  }
  func.func @transform_0(%arg0: i32, %arg1: i32) -> (i32, i32, i32) {
    %c0_i32 = arith.constant 0 : i32
    %c0_i32_0 = arith.constant 0 : i32
    return %arg0, %c0_i32, %arg1 : i32, i32, i32
  }
  func.func @transform_1(%arg0: i32, %arg1: i32) -> (i32, i32) {
    %c0_i32 = arith.constant 0 : i32
    %c0_i32_0 = arith.constant 0 : i32
    %c0_i32_1 = arith.constant 0 : i32
    return %c0_i32, %c0_i32_0 : i32, i32
  }
  func.func @transform_2(%arg0: i32, %arg1: i32) -> (i32, i32) {
    %c0_i32 = arith.constant 0 : i32
    %c0_i32_0 = arith.constant 0 : i32
    %c0_i32_1 = arith.constant 0 : i32
    return %c0_i32, %c0_i32_0 : i32, i32
  }
  func.func @transform_3(%arg0: i32, %arg1: i32) -> (i32, i32, i32) {
    %c0_i32 = arith.constant 0 : i32
    %c0_i32_0 = arith.constant 0 : i32
    %c0_i32_1 = arith.constant 0 : i32
    return %arg0, %c0_i32, %c0_i32_0 : i32, i32, i32
  }
  func.func @transform_4(%arg0: i32, %arg1: i32) -> (i32, i32, i32) {
    %c0_i32 = arith.constant 0 : i32
    %c0_i32_0 = arith.constant 0 : i32
    %c0_i32_1 = arith.constant 0 : i32
    return %arg0, %c0_i32, %c0_i32_0 : i32, i32, i32
  }
  func.func @transform_5(%arg0: i32, %arg1: i32) -> (i32, i32) {
    %c0_i32 = arith.constant 0 : i32
    %c0_i32_0 = arith.constant 0 : i32
    return %c0_i32, %arg1 : i32, i32
  }
  func.func @transform_6(%arg0: i32, %arg1: i32) -> (i32, i32) {
    %c0_i32 = arith.constant 0 : i32
    %c0_i32_0 = arith.constant 0 : i32
    return %c0_i32, %arg1 : i32, i32
  }
  func.func @transform_7(%arg0: i32, %arg1: i32) -> (i32, i32, i32) {
    %c0_i32 = arith.constant 0 : i32
    %c0_i32_0 = arith.constant 0 : i32
    return %arg0, %c0_i32, %arg1 : i32, i32, i32
  }
}

module attributes {stable_mosaic.version = 11 : i64} {
  func.func @_fwd_dft_mix_kernel(%arg0: i32, %arg1: i32, %arg2: memref<1x32x256xf32, #tpu.memory_space<vmem>>, %arg3: memref<256x128xf32, #tpu.memory_space<vmem>>, %arg4: memref<256x128xf32, #tpu.memory_space<vmem>>, %arg5: memref<32x32x128xf32, #tpu.memory_space<vmem>>, %arg6: memref<32x32x128xf32, #tpu.memory_space<vmem>>, %arg7: memref<1x32x128xf32, #tpu.memory_space<vmem>>, %arg8: memref<1x32x128xf32, #tpu.memory_space<vmem>>, %arg9: memref<32x128xf32, #tpu.memory_space<vmem>>, %arg10: memref<32x128xf32, #tpu.memory_space<vmem>>) attributes {dimension_semantics = [#tpu.dimension_semantics<parallel>, #tpu.dimension_semantics<arbitrary>], iteration_bounds = array<i64: 2, 1>, scalar_prefetch = 0 : i64, scratch_operands = 2 : i64, tpu.core_type = #tpu.core_type<tc>, window_params = [{transform_indices = @transform_0, window_bounds = array<i64: 1, 32, 256>}, {transform_indices = @transform_1, window_bounds = array<i64: 256, 128>}, {transform_indices = @transform_2, window_bounds = array<i64: 256, 128>}, {pipeline_mode = #tpu.pipeline_mode<synchronous>, transform_indices = @transform_3, window_bounds = array<i64: 32, 32, 128>}, {pipeline_mode = #tpu.pipeline_mode<synchronous>, transform_indices = @transform_4, window_bounds = array<i64: 32, 32, 128>}, {transform_indices = @transform_5, window_bounds = array<i64: 1, 32, 128>}, {transform_indices = @transform_6, window_bounds = array<i64: 1, 32, 128>}]} {
    %c0_i32 = arith.constant 0 : i32
    %0 = arith.cmpi eq, %arg1, %c0_i32 : i32
    %1 = arith.extui %0 : i1 to i32
    %c0_i32_0 = arith.constant 0 : i32
    %2 = arith.cmpi ne, %1, %c0_i32_0 : i32
    scf.if %2 {
      %cst_18 = arith.constant 0.000000e+00 : f32
      %18 = vector.broadcast %cst_18 : f32 to vector<32x128xf32>
      %c0_19 = arith.constant 0 : index
      %c0_20 = arith.constant 0 : index
      %19 = vector.load %arg9[%c0_19, %c0_20] : memref<32x128xf32, #tpu.memory_space<vmem>>, vector<32x128xf32>
      tpu.vector_store %arg9[%c0_19, %c0_20], %18 {strides = array<i32>} : memref<32x128xf32, #tpu.memory_space<vmem>>, vector<32x128xf32>,
      %cst_21 = arith.constant 0.000000e+00 : f32
      %20 = vector.broadcast %cst_21 : f32 to vector<32x128xf32>
      %c0_22 = arith.constant 0 : index
      %c0_23 = arith.constant 0 : index
      %21 = vector.load %arg10[%c0_22, %c0_23] : memref<32x128xf32, #tpu.memory_space<vmem>>, vector<32x128xf32>
      tpu.vector_store %arg10[%c0_22, %c0_23], %20 {strides = array<i32>} : memref<32x128xf32, #tpu.memory_space<vmem>>, vector<32x128xf32>,
    } else {
    }
    %c0 = arith.constant 0 : index
    %c0_1 = arith.constant 0 : index
    %c0_2 = arith.constant 0 : index
    %3 = vector.load %arg2[%c0, %c0_1, %c0_2] : memref<1x32x256xf32, #tpu.memory_space<vmem>>, vector<1x32x256xf32>
    %4 = vector.shape_cast %3 : vector<1x32x256xf32> to vector<32x256xf32>
    %c0_3 = arith.constant 0 : index
    %c0_4 = arith.constant 0 : index
    %5 = vector.load %arg9[%c0_3, %c0_4] : memref<32x128xf32, #tpu.memory_space<vmem>>, vector<32x128xf32>
    %c0_5 = arith.constant 0 : index
    %c0_6 = arith.constant 0 : index
    %6 = vector.load %arg3[%c0_5, %c0_6] : memref<256x128xf32, #tpu.memory_space<vmem>>, vector<256x128xf32>
    %cst = arith.constant dense<0.000000e+00> : vector<32x128xf32>
    %7 = tpu.matmul %4, %6, %cst {dimension_numbers = #tpu.dot_dimension_numbers<[1], [0], [0], [1], [0, 0, 1, 1], [], []>} : vector<32x256xf32>, vector<256x128xf32>, vector<32x128xf32> -> vector<32x128xf32>
    %8 = arith.addf %5, %7 : vector<32x128xf32>
    %c0_7 = arith.constant 0 : index
    %c0_8 = arith.constant 0 : index
    %9 = vector.load %arg9[%c0_7, %c0_8] : memref<32x128xf32, #tpu.memory_space<vmem>>, vector<32x128xf32>
    tpu.vector_store %arg9[%c0_7, %c0_8], %8 {strides = array<i32>} : memref<32x128xf32, #tpu.memory_space<vmem>>, vector<32x128xf32>,
    %c0_9 = arith.constant 0 : index
    %c0_10 = arith.constant 0 : index
    %10 = vector.load %arg10[%c0_9, %c0_10] : memref<32x128xf32, #tpu.memory_space<vmem>>, vector<32x128xf32>
    %c0_11 = arith.constant 0 : index
    %c0_12 = arith.constant 0 : index
    %11 = vector.load %arg4[%c0_11, %c0_12] : memref<256x128xf32, #tpu.memory_space<vmem>>, vector<256x128xf32>
    %cst_13 = arith.constant dense<0.000000e+00> : vector<32x128xf32>
    %12 = tpu.matmul %4, %11, %cst_13 {dimension_numbers = #tpu.dot_dimension_numbers<[1], [0], [0], [1], [0, 0, 1, 1], [], []>} : vector<32x256xf32>, vector<256x128xf32>, vector<32x128xf32> -> vector<32x128xf32>
    %13 = arith.addf %10, %12 : vector<32x128xf32>
    %c0_14 = arith.constant 0 : index
    %c0_15 = arith.constant 0 : index
    %14 = vector.load %arg10[%c0_14, %c0_15] : memref<32x128xf32, #tpu.memory_space<vmem>>, vector<32x128xf32>
    tpu.vector_store %arg10[%c0_14, %c0_15], %13 {strides = array<i32>} : memref<32x128xf32, #tpu.memory_space<vmem>>, vector<32x128xf32>,
    %c0_i32_16 = arith.constant 0 : i32
    %15 = arith.cmpi eq, %arg1, %c0_i32_16 : i32
    %16 = arith.extui %15 : i1 to i32
    %c0_i32_17 = arith.constant 0 : i32
    %17 = arith.cmpi ne, %16, %c0_i32_17 : i32
    scf.if %17 {
      %c0_18 = arith.constant 0 : index
      %c0_19 = arith.constant 0 : index
      %18 = vector.load %arg9[%c0_18, %c0_19] : memref<32x128xf32, #tpu.memory_space<vmem>>, vector<32x128xf32>
      %19 = vector.shape_cast %18 : vector<32x128xf32> to vector<32x1x128xf32>
      %c0_20 = arith.constant 0 : index
      %c0_21 = arith.constant 0 : index
      %20 = vector.load %arg10[%c0_20, %c0_21] : memref<32x128xf32, #tpu.memory_space<vmem>>, vector<32x128xf32>
      %21 = vector.shape_cast %20 : vector<32x128xf32> to vector<32x1x128xf32>
      %c0_22 = arith.constant 0 : index
      %c0_23 = arith.constant 0 : index
      %c0_24 = arith.constant 0 : index
      %22 = vector.load %arg5[%c0_22, %c0_23, %c0_24] : memref<32x32x128xf32, #tpu.memory_space<vmem>>, vector<32x32x128xf32>
      %c0_25 = arith.constant 0 : index
      %c0_26 = arith.constant 0 : index
      %c0_27 = arith.constant 0 : index
      %23 = vector.load %arg6[%c0_25, %c0_26, %c0_27] : memref<32x32x128xf32, #tpu.memory_space<vmem>>, vector<32x32x128xf32>
      %24 = vector.broadcast %19 : vector<32x1x128xf32> to vector<32x32x128xf32>
      %25 = arith.mulf %24, %22 : vector<32x32x128xf32>
      %26 = vector.broadcast %21 : vector<32x1x128xf32> to vector<32x32x128xf32>
      %27 = arith.mulf %26, %23 : vector<32x32x128xf32>
      %28 = arith.subf %25, %27 : vector<32x32x128xf32>
      %cst_28 = arith.constant dense<0.000000e+00> : vector<32x128xf32>
      %29 = vector.multi_reduction <add>, %28, %cst_28 [0] : vector<32x32x128xf32> to vector<32x128xf32>
      %c0_29 = arith.constant 0 : index
      %c0_30 = arith.constant 0 : index
      %c0_31 = arith.constant 0 : index
      %30 = vector.load %arg7[%c0_29, %c0_30, %c0_31] : memref<1x32x128xf32, #tpu.memory_space<vmem>>, vector<1x32x128xf32>
      %31 = vector.shape_cast %30 : vector<1x32x128xf32> to vector<32x128xf32>
      %32 = vector.shape_cast %29 : vector<32x128xf32> to vector<1x32x128xf32>
      tpu.vector_store %arg7[%c0_29, %c0_30, %c0_31], %32 {strides = array<i32>} : memref<1x32x128xf32, #tpu.memory_space<vmem>>, vector<1x32x128xf32>,
      %33 = vector.broadcast %19 : vector<32x1x128xf32> to vector<32x32x128xf32>
      %34 = arith.mulf %33, %23 : vector<32x32x128xf32>
      %35 = vector.broadcast %21 : vector<32x1x128xf32> to vector<32x32x128xf32>
      %36 = arith.mulf %35, %22 : vector<32x32x128xf32>
      %37 = arith.addf %34, %36 : vector<32x32x128xf32>
      %cst_32 = arith.constant dense<0.000000e+00> : vector<32x128xf32>
      %38 = vector.multi_reduction <add>, %37, %cst_32 [0] : vector<32x32x128xf32> to vector<32x128xf32>
      %c0_33 = arith.constant 0 : index
      %c0_34 = arith.constant 0 : index
      %c0_35 = arith.constant 0 : index
      %39 = vector.load %arg8[%c0_33, %c0_34, %c0_35] : memref<1x32x128xf32, #tpu.memory_space<vmem>>, vector<1x32x128xf32>
      %40 = vector.shape_cast %39 : vector<1x32x128xf32> to vector<32x128xf32>
      %41 = vector.shape_cast %38 : vector<32x128xf32> to vector<1x32x128xf32>
      tpu.vector_store %arg8[%c0_33, %c0_34, %c0_35], %41 {strides = array<i32>} : memref<1x32x128xf32, #tpu.memory_space<vmem>>, vector<1x32x128xf32>,
    } else {
    }
    return
  }
  func.func @transform_0(%arg0: i32, %arg1: i32) -> (i32, i32, i32) {
    %c0_i32 = arith.constant 0 : i32
    %c0_i32_0 = arith.constant 0 : i32
    return %arg0, %c0_i32, %arg1 : i32, i32, i32
  }
  func.func @transform_1(%arg0: i32, %arg1: i32) -> (i32, i32) {
    %c0_i32 = arith.constant 0 : i32
    %c0_i32_0 = arith.constant 0 : i32
    return %arg1, %c0_i32 : i32, i32
  }
  func.func @transform_2(%arg0: i32, %arg1: i32) -> (i32, i32) {
    %c0_i32 = arith.constant 0 : i32
    %c0_i32_0 = arith.constant 0 : i32
    return %arg1, %c0_i32 : i32, i32
  }
  func.func @transform_3(%arg0: i32, %arg1: i32) -> (i32, i32, i32) {
    %c0_i32 = arith.constant 0 : i32
    %c0_i32_0 = arith.constant 0 : i32
    %c0_i32_1 = arith.constant 0 : i32
    %c0_i32_2 = arith.constant 0 : i32
    return %c0_i32, %c0_i32_0, %c0_i32_1 : i32, i32, i32
  }
  func.func @transform_4(%arg0: i32, %arg1: i32) -> (i32, i32, i32) {
    %c0_i32 = arith.constant 0 : i32
    %c0_i32_0 = arith.constant 0 : i32
    %c0_i32_1 = arith.constant 0 : i32
    %c0_i32_2 = arith.constant 0 : i32
    return %c0_i32, %c0_i32_0, %c0_i32_1 : i32, i32, i32
  }
  func.func @transform_5(%arg0: i32, %arg1: i32) -> (i32, i32, i32) {
    %c0_i32 = arith.constant 0 : i32
    %c0_i32_0 = arith.constant 0 : i32
    %c0_i32_1 = arith.constant 0 : i32
    return %arg0, %c0_i32, %c0_i32_0 : i32, i32, i32
  }
  func.func @transform_6(%arg0: i32, %arg1: i32) -> (i32, i32, i32) {
    %c0_i32 = arith.constant 0 : i32
    %c0_i32_0 = arith.constant 0 : i32
    %c0_i32_1 = arith.constant 0 : i32
    return %arg0, %c0_i32, %c0_i32_0 : i32, i32, i32
  }
}

module attributes {stable_mosaic.version = 11 : i64} {
  func.func @_head_kernel(%arg0: i32, %arg1: i32, %arg2: memref<1x32x256xf32, #tpu.memory_space<vmem>>, %arg3: memref<128x32xf32, #tpu.memory_space<vmem>>, %arg4: memref<128x1xf32, #tpu.memory_space<vmem>>, %arg5: memref<10x128xf32, #tpu.memory_space<vmem>>, %arg6: memref<10x1xf32, #tpu.memory_space<vmem>>, %arg7: memref<1x10x256xf32, #tpu.memory_space<vmem>>) attributes {dimension_semantics = [#tpu.dimension_semantics<parallel>, #tpu.dimension_semantics<parallel>], iteration_bounds = array<i64: 2, 1>, scalar_prefetch = 0 : i64, scratch_operands = 0 : i64, tpu.core_type = #tpu.core_type<tc>, window_params = [{transform_indices = @transform_0, window_bounds = array<i64: 1, 32, 256>}, {pipeline_mode = #tpu.pipeline_mode<synchronous>, transform_indices = @transform_1, window_bounds = array<i64: 128, 32>}, {pipeline_mode = #tpu.pipeline_mode<synchronous>, transform_indices = @transform_2, window_bounds = array<i64: 128, 1>}, {pipeline_mode = #tpu.pipeline_mode<synchronous>, transform_indices = @transform_3, window_bounds = array<i64: 10, 128>}, {pipeline_mode = #tpu.pipeline_mode<synchronous>, transform_indices = @transform_4, window_bounds = array<i64: 10, 1>}, {transform_indices = @transform_5, window_bounds = array<i64: 1, 10, 256>}]} {
    %c0 = arith.constant 0 : index
    %c0_0 = arith.constant 0 : index
    %0 = vector.load %arg3[%c0, %c0_0] : memref<128x32xf32, #tpu.memory_space<vmem>>, vector<128x32xf32>
    %c0_1 = arith.constant 0 : index
    %c0_2 = arith.constant 0 : index
    %c0_3 = arith.constant 0 : index
    %1 = vector.load %arg2[%c0_1, %c0_2, %c0_3] : memref<1x32x256xf32, #tpu.memory_space<vmem>>, vector<1x32x256xf32>
    %2 = vector.shape_cast %1 : vector<1x32x256xf32> to vector<32x256xf32>
    %cst = arith.constant dense<0.000000e+00> : vector<128x256xf32>
    %3 = tpu.matmul %0, %2, %cst {dimension_numbers = #tpu.dot_dimension_numbers<[1], [0], [0], [1], [0, 0, 1, 1], [], []>} : vector<128x32xf32>, vector<32x256xf32>, vector<128x256xf32> -> vector<128x256xf32>
    %c0_4 = arith.constant 0 : index
    %c0_5 = arith.constant 0 : index
    %4 = vector.load %arg4[%c0_4, %c0_5] : memref<128x1xf32, #tpu.memory_space<vmem>>, vector<128x1xf32>
    %5 = vector.broadcast %4 : vector<128x1xf32> to vector<128x256xf32>
    %6 = arith.addf %3, %5 : vector<128x256xf32>
    %cst_6 = arith.constant 5.000000e-01 : f32
    %7 = vector.broadcast %cst_6 : f32 to vector<128x256xf32>
    %8 = arith.mulf %7, %6 : vector<128x256xf32>
    %cst_7 = arith.constant 0.707106769 : f32
    %9 = vector.broadcast %cst_7 : f32 to vector<128x256xf32>
    %10 = arith.mulf %6, %9 : vector<128x256xf32>
    %11 = math.erf %10 : vector<128x256xf32>
    %cst_8 = arith.constant 1.000000e+00 : f32
    %12 = vector.broadcast %cst_8 : f32 to vector<128x256xf32>
    %13 = arith.addf %12, %11 : vector<128x256xf32>
    %14 = arith.mulf %8, %13 : vector<128x256xf32>
    %c0_9 = arith.constant 0 : index
    %c0_10 = arith.constant 0 : index
    %15 = vector.load %arg5[%c0_9, %c0_10] : memref<10x128xf32, #tpu.memory_space<vmem>>, vector<10x128xf32>
    %cst_11 = arith.constant dense<0.000000e+00> : vector<10x256xf32>
    %16 = tpu.matmul %15, %14, %cst_11 {dimension_numbers = #tpu.dot_dimension_numbers<[1], [0], [0], [1], [0, 0, 1, 1], [], []>} : vector<10x128xf32>, vector<128x256xf32>, vector<10x256xf32> -> vector<10x256xf32>
    %c0_12 = arith.constant 0 : index
    %c0_13 = arith.constant 0 : index
    %17 = vector.load %arg6[%c0_12, %c0_13] : memref<10x1xf32, #tpu.memory_space<vmem>>, vector<10x1xf32>
    %18 = vector.broadcast %17 : vector<10x1xf32> to vector<10x256xf32>
    %19 = arith.addf %16, %18 : vector<10x256xf32>
    %c0_14 = arith.constant 0 : index
    %c0_15 = arith.constant 0 : index
    %c0_16 = arith.constant 0 : index
    %20 = vector.load %arg7[%c0_14, %c0_15, %c0_16] : memref<1x10x256xf32, #tpu.memory_space<vmem>>, vector<1x10x256xf32>
    %21 = vector.shape_cast %20 : vector<1x10x256xf32> to vector<10x256xf32>
    %22 = vector.shape_cast %19 : vector<10x256xf32> to vector<1x10x256xf32>
    tpu.vector_store %arg7[%c0_14, %c0_15, %c0_16], %22 {strides = array<i32>} : memref<1x10x256xf32, #tpu.memory_space<vmem>>, vector<1x10x256xf32>,
    return
  }
  func.func @transform_0(%arg0: i32, %arg1: i32) -> (i32, i32, i32) {
    %c0_i32 = arith.constant 0 : i32
    %c0_i32_0 = arith.constant 0 : i32
    return %arg0, %c0_i32, %arg1 : i32, i32, i32
  }
  func.func @transform_1(%arg0: i32, %arg1: i32) -> (i32, i32) {
    %c0_i32 = arith.constant 0 : i32
    %c0_i32_0 = arith.constant 0 : i32
    %c0_i32_1 = arith.constant 0 : i32
    return %c0_i32, %c0_i32_0 : i32, i32
  }
  func.func @transform_2(%arg0: i32, %arg1: i32) -> (i32, i32) {
    %c0_i32 = arith.constant 0 : i32
    %c0_i32_0 = arith.constant 0 : i32
    %c0_i32_1 = arith.constant 0 : i32
    return %c0_i32, %c0_i32_0 : i32, i32
  }
  func.func @transform_3(%arg0: i32, %arg1: i32) -> (i32, i32) {
    %c0_i32 = arith.constant 0 : i32
    %c0_i32_0 = arith.constant 0 : i32
    %c0_i32_1 = arith.constant 0 : i32
    return %c0_i32, %c0_i32_0 : i32, i32
  }
  func.func @transform_4(%arg0: i32, %arg1: i32) -> (i32, i32) {
    %c0_i32 = arith.constant 0 : i32
    %c0_i32_0 = arith.constant 0 : i32
    %c0_i32_1 = arith.constant 0 : i32
    return %c0_i32, %c0_i32_0 : i32, i32
  }
  func.func @transform_5(%arg0: i32, %arg1: i32) -> (i32, i32, i32) {
    %c0_i32 = arith.constant 0 : i32
    %c0_i32_0 = arith.constant 0 : i32
    return %arg0, %c0_i32, %arg1 : i32, i32, i32
  }
}

</mosaic_0001>

<bundles_post_ra>
// kernel: mul.57
= control target key start
LH: loop header
LB: loop body
LE: loop exit
PB: predicated region body
PF: predicated region fallthrough
CT: control target
= control target key end

     0   :  { %s131_s10 = smov 120   ;;  %s132_s11 = smov 104   ;;  %vm3_vm0 = vcmask 64512   ;;  %vm9_vm1 = vcmask 1048512   ;;  %vm15_vm2 = vcmask 982912   ;;  %vm21_vm3 = vcmask 917312   ;;  %s207_s0 = inlined_call_operand.vmem [shape: f32[16,8], index: 0, kind: input, shape index: {}]   ;;  %s208_s1 = inlined_call_operand.vmem [shape: f32[128], index: 1, kind: output, shape index: {}]  }
   0x1   :  { %v101_v0 = vld [vmem:[%s207_s0 + $0xf] sm:$0x1]   ;;  %v103_v1 = vld [vmem:[%s207_s0 + $0xd] sm:$0x1]   ;;  %v105_v2 = vld [vmem:[%s207_s0 + $0xb] sm:$0x1]  }
   0x2   :  { %7 = vrot.lane.b32.xlu0 %v101_v0, %s131_s10  ;;  %19 = vrot.lane.b32.xlu1 %v103_v1, %s132_s11  ;;  %s133_s14 = smov 88   ;;  %v102_v3 = vld [vmem:[%s207_s0 + $0xe] sm:$0x1]   ;;  %v104_v4 = vld [vmem:[%s207_s0 + $0xc] sm:$0x1]   ;;  %s134_s19 = smov 112  }
   0x3   :  { %31 = vrot.lane.b32.xlu2 %v105_v2, %s133_s14  ;;  %s135_s20 = smov 96   ;;  %v106_v5 = vld [vmem:[%s207_s0 + $0xa] sm:$0x1]   ;;  %s136_s23 = smov 80   ;;  %v107_v6 = vld [vmem:[%s207_s0 + $0x9] sm:$0x1]  }
   0x4   :  { %v108_v7 = vld [vmem:[%s207_s0 + $0x8] sm:$0x1]   ;;  %s137_s28 = smov 72   ;;  %s138_s29 = smov 64   ;;  %v109_v8 = vld [vmem:[%s207_s0 + $0x7] sm:$0x1]  }
   0x5   :  { %s139_s3 = smov 56   ;;  %v110_v9 = vld [vmem:[%s207_s0 + $0x6] sm:$0x1]   ;;  %v111_v10 = vld [vmem:[%s207_s0 + $0x5] sm:$0x1]   ;;  %s140_s8 = smov 48  }
   0x6   :  { %s141_s9 = smov 40   ;;  %v112_v11 = vld [vmem:[%s207_s0 + $0x4] sm:$0x1]   ;;  %s142_s12 = smov 32   ;;  %v113_v12 = vld [vmem:[%s207_s0 + $0x3] sm:$0x1]  }
   0x7   :  { %v114_v13 = vld [vmem:[%s207_s0 + $0x2] sm:$0x1]   ;;  %s143_s17 = smov 24   ;;  %s144_s18 = smov 16   ;;  %v115_v14 = vld [vmem:[%s207_s0 + $0x1] sm:$0x1]  }
   0x8   :  { %s145_s21 = smov 8   ;;  %v2_v15 = vld [vmem:[%s207_s0] sm:$0x1]   ;;  %vm27_vm4 = vcmask 851712   ;;  %vm33_vm5 = vcmask 786112   ;;  %vm39_vm6 = vcmask 720512  }
   0x9   :  { %4 = vst.msk [vmem:[#allocation0] sm:$0x1] %vm3_vm0, %v2_v15   ;;  %vm45_vm7 = vcmask 654912   ;;  %vm51_vm8 = vcmask 589312   ;;  %vm57_vm9 = vcmask 523712   ;;  %vm63_vm10 = vcmask 458112  }
   0xa   :  { %13 = vrot.lane.b32.xlu0 %v102_v3, %s134_s19  ;;  %25 = vrot.lane.b32.xlu1 %v104_v4, %s135_s20  ;;  %vm69_vm11 = vcmask 392512   ;;  %vm75_vm12 = vcmask 326912   ;;  %vm81_vm13 = vcmask 261312   ;;  %vm87_vm14 = vcmask 195712  }
   0xb   :  { %37 = vrot.lane.b32.xlu2 %v106_v5, %s136_s23  ;;  %vm93_vm15 = vcmask 130112  }
  0x12   :  { %43 = vrot.lane.b32.xlu0 %v107_v6, %s137_s28  ;;  %49 = vrot.lane.b32.xlu1 %v108_v7, %s138_s29 }
  0x13   :  { %55 = vrot.lane.b32.xlu2 %v109_v8, %s139_s3 }
  0x1a   :  { %61 = vrot.lane.b32.xlu0 %v110_v9, %s140_s8  ;;  %67 = vrot.lane.b32.xlu1 %v111_v10, %s141_s9 }
  0x1b   :  { %73 = vrot.lane.b32.xlu2 %v112_v11, %s142_s12 }
  0x22   :  { %79 = vrot.lane.b32.xlu0 %v113_v12, %s143_s17  ;;  %85 = vrot.lane.b32.xlu1 %v114_v13, %s144_s18 }
  0x23   :  { %91 = vrot.lane.b32.xlu2 %v115_v14, %s145_s21 }
  0x5d   :  { %v32_v16 = vpop.permute.xlu2 %31  }
  0x65   :  { %v38_v17 = vpop.permute.xlu2 %37  }
  0x6d   :  { %v56_v18 = vpop.permute.xlu2 %55  }
  0x74   :  { %v8_v19 = vpop.permute.xlu0 %7   ;;  %v20_v20 = vpop.permute.xlu1 %19  }
  0x75   :  { %10 = vst.msk [vmem:[#allocation0] sm:$0x1] %vm9_vm1, %v8_v19   ;;  %v74_v21 = vpop.permute.xlu2 %73  }
  0x7c   :  { %v14_v22 = vpop.permute.xlu0 %13   ;;  %v26_v23 = vpop.permute.xlu1 %25  }
  0x7d   :  { %16 = vst.msk [vmem:[#allocation0] sm:$0x1] %vm15_vm2, %v14_v22   ;;  %v92_v24 = vpop.permute.xlu2 %91  }
  0x7e   :  { %22 = vst.msk [vmem:[#allocation0] sm:$0x1] %vm21_vm3, %v20_v20  }
  0x7f   :  { %28 = vst.msk [vmem:[#allocation0] sm:$0x1] %vm27_vm4, %v26_v23  }
  0x80   :  { %34 = vst.msk [vmem:[#allocation0] sm:$0x1] %vm33_vm5, %v32_v16  }
  0x81   :  { %40 = vst.msk [vmem:[#allocation0] sm:$0x1] %vm39_vm6, %v38_v17  }
  0x84   :  { %v44_v25 = vpop.permute.xlu0 %43   ;;  %v50_v26 = vpop.permute.xlu1 %49  }
  0x85   :  { %46 = vst.msk [vmem:[#allocation0] sm:$0x1] %vm45_vm7, %v44_v25  }
  0x86   :  { %52 = vst.msk [vmem:[#allocation0] sm:$0x1] %vm51_vm8, %v50_v26  }
  0x87   :  { %58 = vst.msk [vmem:[#allocation0] sm:$0x1] %vm57_vm9, %v56_v18  }
  0x8c   :  { %v62_v27 = vpop.permute.xlu0 %61   ;;  %v68_v28 = vpop.permute.xlu1 %67  }
  0x8d   :  { %64 = vst.msk [vmem:[#allocation0] sm:$0x1] %vm63_vm10, %v62_v27  }
  0x8e   :  { %70 = vst.msk [vmem:[#allocation0] sm:$0x1] %vm69_vm11, %v68_v28  }
  0x8f   :  { %76 = vst.msk [vmem:[#allocation0] sm:$0x1] %vm75_vm12, %v74_v21  }
  0x94   :  { %v80_v29 = vpop.permute.xlu0 %79   ;;  %v86_v30 = vpop.permute.xlu1 %85  }
  0x95   :  { %82 = vst.msk [vmem:[#allocation0] sm:$0x1] %vm81_vm13, %v80_v29  }
  0x96   :  { %88 = vst.msk [vmem:[#allocation0] sm:$0x1] %vm87_vm14, %v86_v30  }
  0x97   :  { %94 = vst.msk [vmem:[#allocation0] sm:$0x1] %vm93_vm15, %v92_v24  }
  0x9e   :  { %v97_v31 = vld [vmem:[#allocation0] sm:$0x1] }
  0x9f   :  { %100 = vst [vmem:[%s208_s1] sm:$0x1] %v97_v31 }

// kernel: fno2d_forward.8
= control target key start
LH: loop header
LB: loop body
LE: loop exit
PB: predicated region body
PF: predicated region fallthrough
CT: control target
= control target key end

     0   :  { %s709_s18 = smov 0   ;;  %s711_s19 = smov 0   ;;  %s803_s0 = inlined_call_operand.vmem [shape: f32[2,10,256], index: 0, kind: input, shape index: {}]   ;;  %s804_s1 = inlined_call_operand.vmem [shape: f32[2,256], index: 1, kind: input, shape index: {}]   ;;  %s805_s2 = inlined_call_operand.vmem [shape: f32[32,10], index: 2, kind: input, shape index: {}]   ;;  %s806_s3 = inlined_call_operand.vmem [shape: f32[32,2], index: 3, kind: input, shape index: {}]   ;;  %s807_s4 = inlined_call_operand.vmem [shape: f32[32,1], index: 4, kind: input, shape index: {}]   ;;  %s808_s5 = inlined_call_operand.vmem [shape: f32[2,32,256], index: 5, kind: output, shape index: {}]  }
   0x1   :  { %s713_s20 = smov 0  }
   0x2 LB: > { %s27_s21 = sadd.s32 1, %s671_s19  ;;  %p597_p0 = scmp.ge.s32.totalorder %s675_s20, 1  ;;  %s675_s20 = sphi %s713_s20, %s15_s20   ;;  %s671_s19 = sphi %s711_s19, %s810_s19   ;;  %s667_s18 = sphi %s709_s18, %s809_s18  }
   0x3   : > { %p29_p1 = scmp.ge.s32.totalorder %s27_s21, 2  ;;  %p219_p2 = scmp.lt.s32.totalorder %s675_s20, 3 }
   0x5   : > { %s812_s21 = smov (%p29_p1, %s27_s21), 0  ;;  %p220_p3 = pnand %p597_p0, %p219_p2 }
   0x6   : > { %p261_p4 = scmp.lt.s32.totalorder (!%p220_p3), %s667_s18, 1 }
   0x7   : > { %223 = sbr.rel (%p220_p3) target bundleno = 169 (0xa9), region = 40 }
   0xc   : > { %v297_v0 = vld [vmem:[%s806_s3 + $0x10] sm:$0xff]  ;;  %v677_v1 = vmov 1   ;;  %v678_v2 = vmov 0   ;;  %s814_s18 = smov (!%p261_p4, %s667_s18), 1  ;;  %v295_v3 = vld [vmem:[%s806_s3] sm:$0xff]  ;;  %vm347_vm0 = vcmask 1041408  }
   0xd   : > { %648 = vset.pattern.permute.xlu0 %v677_v1  ;;  %646 = vset.pattern.permute.xlu1 %v678_v2  ;;  %s614_s26 = sshll.u32 %s814_s18, 5  ;;  %v286_v8 = vld [vmem:[%s805_s2] sm:$0xff]  ;;  %vm334_vm1 = vcmask 80896   ;;  %v288_v9 = vld [vmem:[%s805_s2 + $0x10] sm:$0xff]  ;;  %v298_v10 = vld [vmem:[%s806_s3 + $0x18] sm:$0xff]  ;;  %s615_s6 = sshll.u32 %s814_s18, 6 }
   0xe   : > { %421 = vperm.xlu0 %648, %v297_v0   ;;  %311 = vperm.xlu1 %646, %v297_v0   ;;  %s268_s29 = scalar_lea.vmem %s803_s0, %s614_s26  ;;  %v296_v11 = vld [vmem:[%s806_s3 + $0x8] sm:$0xff]  ;;  %v289_v13 = vld [vmem:[%s805_s2 + $0x18] sm:$0xff]  ;;  %v450_v14 = vld [vmem:[%s807_s4] sm:$0xff]  ;;  %s784_s9 = scalar_lea.vmem %s808_s5, %s615_s6 }
   0xf   : > { %647 = vset.pattern.permute.xlu2 %v677_v1  ;;  %v292_v4 = vld [vmem:[%s268_s29 + $0x10] sm:$0x3]  ;;  %v293_v5 = vld [vmem:[%s268_s29 + $0x18] sm:$0x3]  ;;  %v290_v6 = vld [vmem:[%s268_s29] sm:$0xff] }
  0x10   : > { %413 = vperm.xlu2 %647, %v295_v3   ;;  %602 = vmatpush.msk.msra.mxu0 %vm347_vm0, %v292_v4  ;;  %v291_v7 = vld [vmem:[%s268_s29 + $0x8] sm:$0xff]  ;;  %v453_v15 = vld [vmem:[%s807_s4 + $0x18] sm:$0xff]  ;;  %v452_v16 = vld [vmem:[%s807_s4 + $0x10] sm:$0xff] }
  0x11   : > { %616 = vmatpush.msk.msra.mxu2 %vm347_vm0, %v292_v4  ;;  %607 = vmatpush.msk.msra.mxu1 %vm347_vm0, %v293_v5  ;;  %v287_v12 = vld [vmem:[%s805_s2 + $0x8] sm:$0xff]  ;;  %v294_v21 = vld [vmem:[%s804_s1] sm:$0xf] }
  0x12   : > { %618 = vmatpush.msk.msra.mxu3 %vm347_vm0, %v293_v5  ;;  %369 = vmatpush.msra.mxu0 %v290_v6  ;;  %v451_v17 = vld [vmem:[%s807_s4 + $0x8] sm:$0xff]  ;;  %v320_v23 = vperm.slane %v294_v21, 0  ;;  %v321_v24 = vperm.slane %v294_v21, 2  ;;  %v428_v25 = vperm.slane %v294_v21, 1  ;;  %v429_v27 = vperm.slane %v294_v21, 3 }
  0x13   : > { %617 = vmatpush.msra.mxu2 %v290_v6  ;;  %398 = vmatpush.msra.mxu1 %v291_v7 }
  0x14   : > { %619 = vmatpush.msra.mxu3 %v291_v7  ;;  %603 = vmatmul.msk.f32.vlgmr.msra.gmra.mxu0 %vm334_vm1, %v286_v8  ;;  %v324_v28 = vperm.slane %v320_v23, 0  ;;  %v325_v29 = vperm.slane %v321_v24, 0  ;;  %v432_v31 = vperm.slane %v428_v25, 1  ;;  %v433_v33 = vperm.slane %v429_v27, 1 }
  0x15   : > { %605 = vmatmul.msk.f32.vlgmr.msra.gmra.mxu2 %vm334_vm1, %v288_v9  ;;  %608 = vmatmul.msk.f32.vlgmr.msra.gmra.mxu1 %vm334_vm1, %v286_v8 }
  0x16   : > { %649 = vset.pattern.permute.xlu0 %v678_v2  ;;  %610 = vmatmul.msk.f32.vlgmr.msra.gmra.mxu3 %vm334_vm1, %v288_v9 }
  0x17   : > { %301 = vperm.xlu0 %649, %v295_v3   ;;  %316 = vperm.xlu1 %646, %v298_v10  }
  0x18   : > { %417 = vperm.xlu2 %647, %v296_v11  }
  0x1c   : > { %604 = vmatmul.msk.f32.gmra.mxu0 %vm334_vm1, %v287_v12 }
  0x1d   : > { %606 = vmatmul.msk.f32.gmra.mxu2 %vm334_vm1, %v289_v13  ;;  %609 = vmatmul.msk.f32.gmra.mxu1 %vm334_vm1, %v287_v12 }
  0x1e   : > { %611 = vmatmul.msk.f32.gmra.mxu3 %vm334_vm1, %v289_v13 }
  0x1f   : > { %306 = vperm.xlu0 %649, %v296_v11   ;;  %650 = vset.pattern.permute.xlu1 %v677_v1 }
  0x20   : > { %651 = vset.pattern.permute.xlu2 %v678_v2  ;;  %425 = vperm.xlu1 %650, %v298_v10  }
  0x21   : > { %456 = vperm.xlu2 %651, %v450_v14  }
  0x27   : > { %471 = vperm.xlu0 %649, %v453_v15  }
  0x28   : > { %652 = vset.pattern.permute.xlu1 %v678_v2 }
  0x29   : > { %466 = vperm.xlu2 %651, %v452_v16   ;;  %461 = vperm.xlu1 %652, %v451_v17  }
  0x6a   : > { %v414_v18 = vpop.permute.xlu2 %413 }
  0x6b   : > { %v434_v37 = vmul.f32 %v432_v31, %v414_v18  ;;  %v435_v41 = vmul.f32 %v433_v33, %v414_v18 }
  0x72   : > { %v418_v22 = vpop.permute.xlu2 %417 }
  0x73   : > { %v436_v58 = vmul.f32 %v432_v31, %v418_v22  ;;  %v437_v63 = vmul.f32 %v433_v33, %v418_v22 }
  0x7b   : > { %v457_v35 = vpop.permute.xlu2 %456 }
  0x80   : > { %v312_v19 = vpop.permute.xlu1 %311  ;;  %v422_v20 = vpop.permute.xlu0 %421 }
  0x81   : > { %v330_v46 = vmul.f32 %v324_v28, %v312_v19  ;;  %v331_v49 = vmul.f32 %v325_v29, %v312_v19  ;;  %v438_v52 = vmul.f32 %v432_v31, %v422_v20  ;;  %v439_v57 = vmul.f32 %v433_v33, %v422_v20 }
  0x83   : > { %v467_v62 = vpop.permute.xlu2 %466 }
  0x89   : > { %v317_v26 = vpop.permute.xlu1 %316  ;;  %v302_v30 = vpop.permute.xlu0 %301 }
  0x8a   : > { %v326_v32 = vmul.f32 %v324_v28, %v302_v30  ;;  %v327_v34 = vmul.f32 %v325_v29, %v302_v30  ;;  %v332_v9 = vmul.f32 %v324_v28, %v317_v26  ;;  %v333_v11 = vmul.f32 %v325_v29, %v317_v26 }
  0x91   : > { %v371_v36 = vpop.f32.mrf.mxu0  ;;  %v307_v47 = vpop.permute.xlu0 %306 }
  0x92   : > { %v372_v38 = vadd.f32 %v371_v36, %v326_v32  ;;  %v400_v39 = vpop.f32.mrf.mxu1  ;;  %v426_v40 = vpop.permute.xlu1 %425  ;;  %v328_v50 = vmul.f32 %v324_v28, %v307_v47  ;;  %v329_v53 = vmul.f32 %v325_v29, %v307_v47 }
  0x93   : > { %v401_v42 = vadd.f32 %v400_v39, %v327_v34  ;;  %v440_v13 = vmul.f32 %v432_v31, %v426_v40  ;;  %v441_v16 = vmul.f32 %v433_v33, %v426_v40 }
  0x94   : > { %v442_v43 = vadd.f32 %v434_v37, %v372_v38 }
  0x95   : > { %v443_v44 = vadd.f32 %v435_v41, %v401_v42 }
  0x96   : > { %v474_v45 = vadd.f32 %v457_v35, %v442_v43 }
  0x97   : > { %v475_v48 = vadd.f32 %v457_v35, %v443_v44 }
  0x98   : > { %482 = vst [vmem:[%s784_s9] sm:$0xff] %v474_v45  ;;  %v377_v51 = vpop.f32.mrf.mxu2 }
  0x99   : > { %483 = vst [vmem:[%s784_s9 + $0x8] sm:$0xff] %v475_v48  ;;  %v378_v54 = vadd.f32 %v377_v51, %v330_v46  ;;  %v406_v55 = vpop.f32.mrf.mxu3  ;;  %v374_v56 = vpop.f32.mrf.mxu0 }
  0x9a   : > { %v407_v59 = vadd.f32 %v406_v55, %v331_v49  ;;  %v375_v60 = vadd.f32 %v374_v56, %v328_v50  ;;  %v403_v61 = vpop.f32.mrf.mxu1  ;;  %v472_v19 = vpop.permute.xlu0 %471 }
  0x9b   : > { %v404_v0 = vadd.f32 %v403_v61, %v329_v53  ;;  %v446_v1 = vadd.f32 %v438_v52, %v378_v54  ;;  %v462_v2 = vpop.permute.xlu1 %461 }
  0x9c   : > { %v447_v3 = vadd.f32 %v439_v57, %v407_v59  ;;  %v444_v4 = vadd.f32 %v436_v58, %v375_v60 }
  0x9d   : > { %v478_v5 = vadd.f32 %v467_v62, %v446_v1  ;;  %v445_v6 = vadd.f32 %v437_v63, %v404_v0 }
  0x9e   : > { %v479_v7 = vadd.f32 %v467_v62, %v447_v3  ;;  %v476_v8 = vadd.f32 %v462_v2, %v444_v4 }
  0x9f   : > { %486 = vst [vmem:[%s784_s9 + $0x20] sm:$0xff] %v478_v5  ;;  %v477_v10 = vadd.f32 %v462_v2, %v445_v6 }
  0xa0   : > { %487 = vst [vmem:[%s784_s9 + $0x28] sm:$0xff] %v479_v7  ;;  %v380_v12 = vpop.f32.mrf.mxu2 }
  0xa1   : > { %484 = vst [vmem:[%s784_s9 + $0x10] sm:$0xff] %v476_v8  ;;  %v381_v14 = vadd.f32 %v380_v12, %v332_v9  ;;  %v409_v15 = vpop.f32.mrf.mxu3 }
  0xa2   : > { %485 = vst [vmem:[%s784_s9 + $0x18] sm:$0xff] %v477_v10  ;;  %v410_v17 = vadd.f32 %v409_v15, %v333_v11 }
  0xa3   : > { %v448_v18 = vadd.f32 %v440_v13, %v381_v14 }
  0xa4   : > { %v449_v20 = vadd.f32 %v441_v16, %v410_v17 }
  0xa5   : > { %v480_v21 = vadd.f32 %v472_v19, %v448_v18 }
  0xa6   : > { %v481_v22 = vadd.f32 %v472_v19, %v449_v20 }
  0xa7   : > { %488 = vst [vmem:[%s784_s9 + $0x30] sm:$0xff] %v480_v21 }
  0xa8   : > { %489 = vst [vmem:[%s784_s9 + $0x38] sm:$0xff] %v481_v22 }
  0xa9 PF: > { %s15_s20 = sadd.s32 1, %s675_s20   ;;  %s809_s18 = smov %s671_s19 }
  0xaa   : > { %p12_p5 = scmp.ge.s32.totalorder %s15_s20, 4   ;;  %s810_s19 = smov %s812_s21 }
  0xac   :  { %14 = sbr.rel (!%p12_p5) target bundleno = 2 (0x2), region = 73 }

// kernel: fno2d_forward.10
= control target key start
LH: loop header
LB: loop body
LE: loop exit
PB: predicated region body
PF: predicated region fallthrough
CT: control target
= control target key end

     0   :  { %s1367_s24 = smov 0   ;;  %s1369_s25 = smov 0   ;;  %s1921_s0 = inlined_call_operand.vmem [shape: f32[2,32,256], index: 0, kind: input, shape index: {}]   ;;  %s1922_s1 = inlined_call_operand.vmem [shape: f32[32,32], index: 1, kind: input, shape index: {}]   ;;  %s1923_s2 = inlined_call_operand.vmem [shape: f32[32,1], index: 2, kind: input, shape index: {}]   ;;  %s1924_s3 = inlined_call_operand.vmem [shape: f32[2,32,128], index: 3, kind: input, shape index: {}]   ;;  %s1925_s4 = inlined_call_operand.vmem [shape: f32[2,32,128], index: 4, kind: input, shape index: {}]   ;;  %s1926_s5 = inlined_call_operand.vmem [shape: f32[128,256], index: 5, kind: input, shape index: {}]   ;;  %s1927_s6 = inlined_call_operand.vmem [shape: f32[128,256], index: 6, kind: input, shape index: {}]   ;;  %s1928_s7 = inlined_call_operand.vmem [shape: f32[2,32,256], index: 7, kind: output, shape index: {}]  }
   0x1   :  { %s1371_s26 = smov 0  }
   0x2 LB: > { %s29_s27 = sadd.s32 1, %s1320_s25  ;;  %p1220_p0 = scmp.ge.s32.totalorder %s1324_s26, 1  ;;  %s1324_s26 = sphi %s1371_s26, %s17_s26   ;;  %s1320_s25 = sphi %s1369_s25, %s1934_s25   ;;  %s1316_s24 = sphi %s1367_s24, %s1933_s24  }
   0x3   : > { %p31_p1 = scmp.ge.s32.totalorder %s29_s27, 2  ;;  %p300_p2 = scmp.lt.s32.totalorder %s1324_s26, 3 }
   0x5   : > { %s1936_s27 = smov (%p31_p1, %s29_s27), 0  ;;  %p301_p3 = pnand %p1220_p0, %p300_p2 }
   0x6   : > { %p361_p4 = scmp.lt.s32.totalorder (!%p301_p3), %s1316_s24, 1 }
   0x7   : > { %304 = sbr.rel (%p301_p3) target bundleno = 321 (0x141), region = 48 }
   0xc   : > { %v436_v0 = vld [vmem:[%s1926_s5 + $0xf0] sm:$0xff]  ;;  %v437_v1 = vld [vmem:[%s1926_s5 + $0xf8] sm:$0xff]  ;;  %v434_v4 = vld [vmem:[%s1926_s5 + $0xe0] sm:$0xff]  ;;  %s1938_s24 = smov (!%p361_p4, %s1316_s24), 1  ;;  %vm634_vm0 = vcmask 261120  }
   0xd   : > { %v530_v2 = vld [vmem:[%s1927_s6 + $0xf0] sm:$0xff]  ;;  %438 = vmatpush.msra.mxu0 %v436_v0  ;;  %467 = vmatpush.msra.mxu1 %v437_v1  ;;  %v531_v3 = vld [vmem:[%s1927_s6 + $0xf8] sm:$0xff]  ;;  %v435_v5 = vld [vmem:[%s1926_s5 + $0xe8] sm:$0xff]  ;;  %s1248_s18 = sshll.u32 %s1938_s24, 5  ;;  %s1247_s8 = sshll.u32 %s1938_s24, 6 }
   0xe   : > { %532 = vmatpush.msra.mxu2 %v530_v2  ;;  %561 = vmatpush.msra.mxu3 %v531_v3  ;;  %v528_v6 = vld [vmem:[%s1927_s6 + $0xe0] sm:$0xff]  ;;  %v529_v7 = vld [vmem:[%s1927_s6 + $0xe8] sm:$0xff]  ;;  %v432_v8 = vld [vmem:[%s1926_s5 + $0xd0] sm:$0xff]  ;;  %s1578_s15 = scalar_lea.vmem %s1924_s3, %s1248_s18  ;;  %s1589_s23 = scalar_lea.vmem %s1925_s4, %s1248_s18 }
   0xf   : > { %439 = vmatpush.msra.mxu0 %v434_v4  ;;  %468 = vmatpush.msra.mxu1 %v435_v5  ;;  %v433_v9 = vld [vmem:[%s1926_s5 + $0xd8] sm:$0xff]  ;;  %v526_v10 = vld [vmem:[%s1927_s6 + $0xd0] sm:$0xff]  ;;  %v430_v12 = vld [vmem:[%s1926_s5 + $0xc0] sm:$0xff]  ;;  %s1602_s12 = scalar_lea.vmem %s1921_s0, %s1247_s8  ;;  %s1829_s18 = scalar_lea.vmem %s1928_s7, %s1247_s8 }
  0x10   : > { %v527_v11 = vld [vmem:[%s1927_s6 + $0xd8] sm:$0xff]  ;;  %533 = vmatpush.msra.mxu2 %v528_v6  ;;  %562 = vmatpush.msra.mxu3 %v529_v7  ;;  %v431_v13 = vld [vmem:[%s1926_s5 + $0xc8] sm:$0xff]  ;;  %v524_v14 = vld [vmem:[%s1927_s6 + $0xc0] sm:$0xff] }
  0x11   : > { %440 = vmatpush.msra.mxu0 %v432_v8  ;;  %469 = vmatpush.msra.mxu1 %v433_v9  ;;  %v525_v15 = vld [vmem:[%s1927_s6 + $0xc8] sm:$0xff]  ;;  %v428_v16 = vld [vmem:[%s1926_s5 + $0xb0] sm:$0xff]  ;;  %v429_v17 = vld [vmem:[%s1926_s5 + $0xb8] sm:$0xff] }
  0x12   : > { %534 = vmatpush.msra.mxu2 %v526_v10  ;;  %563 = vmatpush.msra.mxu3 %v527_v11  ;;  %v522_v18 = vld [vmem:[%s1927_s6 + $0xb0] sm:$0xff]  ;;  %v523_v19 = vld [vmem:[%s1927_s6 + $0xb8] sm:$0xff]  ;;  %v426_v20 = vld [vmem:[%s1926_s5 + $0xa0] sm:$0xff] }
  0x13   : > { %441 = vmatpush.msra.mxu0 %v430_v12  ;;  %470 = vmatpush.msra.mxu1 %v431_v13  ;;  %v427_v21 = vld [vmem:[%s1926_s5 + $0xa8] sm:$0xff]  ;;  %v520_v22 = vld [vmem:[%s1927_s6 + $0xa0] sm:$0xff]  ;;  %v424_v24 = vld [vmem:[%s1926_s5 + $0x90] sm:$0xff] }
  0x14   : > { %535 = vmatpush.msra.mxu2 %v524_v14  ;;  %564 = vmatpush.msra.mxu3 %v525_v15  ;;  %v521_v23 = vld [vmem:[%s1927_s6 + $0xa8] sm:$0xff]  ;;  %v425_v25 = vld [vmem:[%s1926_s5 + $0x98] sm:$0xff]  ;;  %v518_v26 = vld [vmem:[%s1927_s6 + $0x90] sm:$0xff]  ;;  %v1326_v14 = vmov 0  }
  0x15   : > { %442 = vmatpush.msra.mxu0 %v428_v16  ;;  %471 = vmatpush.msra.mxu1 %v429_v17  ;;  %v519_v27 = vld [vmem:[%s1927_s6 + $0x98] sm:$0xff]  ;;  %v422_v28 = vld [vmem:[%s1926_s5 + $0x80] sm:$0xff]  ;;  %v423_v29 = vld [vmem:[%s1926_s5 + $0x88] sm:$0xff] }
  0x16   : > { %536 = vmatpush.msra.mxu2 %v522_v18  ;;  %565 = vmatpush.msra.mxu3 %v523_v19  ;;  %v516_v30 = vld [vmem:[%s1927_s6 + $0x80] sm:$0xff]  ;;  %v517_v31 = vld [vmem:[%s1927_s6 + $0x88] sm:$0xff]  ;;  %v420_v32 = vld [vmem:[%s1926_s5 + $0x70] sm:$0xff] }
  0x17   : > { %443 = vmatpush.msra.mxu0 %v426_v20  ;;  %472 = vmatpush.msra.mxu1 %v427_v21  ;;  %v421_v33 = vld [vmem:[%s1926_s5 + $0x78] sm:$0xff]  ;;  %v514_v34 = vld [vmem:[%s1927_s6 + $0x70] sm:$0xff]  ;;  %v418_v36 = vld [vmem:[%s1926_s5 + $0x60] sm:$0xff] }
  0x18   : > { %537 = vmatpush.msra.mxu2 %v520_v22  ;;  %566 = vmatpush.msra.mxu3 %v521_v23  ;;  %v515_v35 = vld [vmem:[%s1927_s6 + $0x78] sm:$0xff]  ;;  %v419_v37 = vld [vmem:[%s1926_s5 + $0x68] sm:$0xff]  ;;  %v512_v38 = vld [vmem:[%s1927_s6 + $0x60] sm:$0xff] }
  0x19   : > { %444 = vmatpush.msra.mxu0 %v424_v24  ;;  %473 = vmatpush.msra.mxu1 %v425_v25  ;;  %v513_v39 = vld [vmem:[%s1927_s6 + $0x68] sm:$0xff]  ;;  %v416_v40 = vld [vmem:[%s1926_s5 + $0x50] sm:$0xff]  ;;  %v417_v41 = vld [vmem:[%s1926_s5 + $0x58] sm:$0xff] }
  0x1a   : > { %538 = vmatpush.msra.mxu2 %v518_v26  ;;  %567 = vmatpush.msra.mxu3 %v519_v27  ;;  %v510_v42 = vld [vmem:[%s1927_s6 + $0x50] sm:$0xff]  ;;  %v511_v43 = vld [vmem:[%s1927_s6 + $0x58] sm:$0xff]  ;;  %v414_v44 = vld [vmem:[%s1926_s5 + $0x40] sm:$0xff] }
  0x1b   : > { %445 = vmatpush.msra.mxu0 %v422_v28  ;;  %474 = vmatpush.msra.mxu1 %v423_v29  ;;  %v415_v45 = vld [vmem:[%s1926_s5 + $0x48] sm:$0xff]  ;;  %v508_v46 = vld [vmem:[%s1927_s6 + $0x40] sm:$0xff]  ;;  %v412_v48 = vld [vmem:[%s1926_s5 + $0x30] sm:$0xff] }
  0x1c   : > { %539 = vmatpush.msra.mxu2 %v516_v30  ;;  %568 = vmatpush.msra.mxu3 %v517_v31  ;;  %v509_v47 = vld [vmem:[%s1927_s6 + $0x48] sm:$0xff]  ;;  %v413_v49 = vld [vmem:[%s1926_s5 + $0x38] sm:$0xff]  ;;  %v506_v50 = vld [vmem:[%s1927_s6 + $0x30] sm:$0xff] }
  0x1d   : > { %446 = vmatpush.msra.mxu0 %v420_v32  ;;  %475 = vmatpush.msra.mxu1 %v421_v33  ;;  %v507_v51 = vld [vmem:[%s1927_s6 + $0x38] sm:$0xff]  ;;  %v410_v52 = vld [vmem:[%s1926_s5 + $0x20] sm:$0xff]  ;;  %v411_v53 = vld [vmem:[%s1926_s5 + $0x28] sm:$0xff] }
  0x1e   : > { %540 = vmatpush.msra.mxu2 %v514_v34  ;;  %569 = vmatpush.msra.mxu3 %v515_v35  ;;  %v504_v54 = vld [vmem:[%s1927_s6 + $0x20] sm:$0xff]  ;;  %v505_v55 = vld [vmem:[%s1927_s6 + $0x28] sm:$0xff]  ;;  %v408_v56 = vld [vmem:[%s1926_s5 + $0x10] sm:$0xff] }
  0x1f   : > { %447 = vmatpush.msra.mxu0 %v418_v36  ;;  %476 = vmatpush.msra.mxu1 %v419_v37  ;;  %v409_v57 = vld [vmem:[%s1926_s5 + $0x18] sm:$0xff]  ;;  %v502_v58 = vld [vmem:[%s1927_s6 + $0x10] sm:$0xff]  ;;  %v406_v60 = vld [vmem:[%s1926_s5] sm:$0xff] }
  0x20   : > { %541 = vmatpush.msra.mxu2 %v512_v38  ;;  %570 = vmatpush.msra.mxu3 %v513_v39  ;;  %v503_v59 = vld [vmem:[%s1927_s6 + $0x18] sm:$0xff]  ;;  %v407_v61 = vld [vmem:[%s1926_s5 + $0x8] sm:$0xff]  ;;  %v500_v62 = vld [vmem:[%s1927_s6] sm:$0xff] }
  0x21   : > { %448 = vmatpush.msra.mxu0 %v416_v40  ;;  %477 = vmatpush.msra.mxu1 %v417_v41  ;;  %v501_v63 = vld [vmem:[%s1927_s6 + $0x8] sm:$0xff]  ;;  %v402_v0 = vld [vmem:[%s1578_s15] sm:$0xff]  ;;  %v608_v2 = vld [vmem:[%s1602_s12 + $0x30] sm:$0xff] }
  0x22   : > { %542 = vmatpush.msra.mxu2 %v510_v42  ;;  %571 = vmatpush.msra.mxu3 %v511_v43  ;;  %v496_v1 = vld [vmem:[%s1589_s23] sm:$0xff]  ;;  %v609_v3 = vld [vmem:[%s1602_s12 + $0x38] sm:$0xff]  ;;  %v607_v5 = vld [vmem:[%s1602_s12 + $0x28] sm:$0xff] }
  0x23   : > { %449 = vmatpush.msra.mxu0 %v414_v44  ;;  %478 = vmatpush.msra.mxu1 %v415_v45  ;;  %v606_v4 = vld [vmem:[%s1602_s12 + $0x20] sm:$0xff]  ;;  %v604_v6 = vld [vmem:[%s1602_s12 + $0x10] sm:$0xff]  ;;  %v605_v7 = vld [vmem:[%s1602_s12 + $0x18] sm:$0xff] }
  0x24   : > { %543 = vmatpush.msra.mxu2 %v508_v46  ;;  %572 = vmatpush.msra.mxu3 %v509_v47  ;;  %v403_v8 = vld [vmem:[%s1578_s15 + $0x8] sm:$0xff]  ;;  %v602_v10 = vld [vmem:[%s1602_s12] sm:$0xff]  ;;  %v612_v12 = vld [vmem:[%s1923_s2 + $0x10] sm:$0xff] }
  0x25   : > { %450 = vmatpush.msra.mxu0 %v412_v48  ;;  %479 = vmatpush.msra.mxu1 %v413_v49  ;;  %v497_v9 = vld [vmem:[%s1589_s23 + $0x8] sm:$0xff]  ;;  %v610_v13 = vld [vmem:[%s1923_s2] sm:$0xff]  ;;  %v404_v15 = vld [vmem:[%s1578_s15 + $0x10] sm:$0xff] }
  0x26   : > { %544 = vmatpush.msra.mxu2 %v506_v50  ;;  %573 = vmatpush.msra.mxu3 %v507_v51  ;;  %v603_v11 = vld [vmem:[%s1602_s12 + $0x8] sm:$0xff]  ;;  %v498_v16 = vld [vmem:[%s1589_s23 + $0x10] sm:$0xff]  ;;  %v613_v17 = vld [vmem:[%s1923_s2 + $0x18] sm:$0xff] }
  0x27   : > { %451 = vmatpush.msra.mxu0 %v410_v52  ;;  %480 = vmatpush.msra.mxu1 %v411_v53  ;;  %v611_v18 = vld [vmem:[%s1923_s2 + $0x8] sm:$0xff]  ;;  %v405_v19 = vld [vmem:[%s1578_s15 + $0x18] sm:$0xff]  ;;  %v598_v21 = vld [vmem:[%s1922_s1] sm:$0xff] }
  0x28   : > { %545 = vmatpush.msra.mxu2 %v504_v54  ;;  %574 = vmatpush.msra.mxu3 %v505_v55  ;;  %v499_v20 = vld [vmem:[%s1589_s23 + $0x18] sm:$0xff]  ;;  %v600_v22 = vld [vmem:[%s1922_s1 + $0x10] sm:$0xff]  ;;  %v599_v23 = vld [vmem:[%s1922_s1 + $0x8] sm:$0xff] }
  0x29   : > { %452 = vmatpush.msra.mxu0 %v408_v56  ;;  %481 = vmatpush.msra.mxu1 %v409_v57  ;;  %v601_v24 = vld [vmem:[%s1922_s1 + $0x18] sm:$0xff] }
  0x2a   : > { %546 = vmatpush.msra.mxu2 %v502_v58  ;;  %575 = vmatpush.msra.mxu3 %v503_v59 }
  0x2b   : > { %453 = vmatpush.msra.mxu0 %v406_v60  ;;  %482 = vmatpush.msra.mxu1 %v407_v61 }
  0x2c   : > { %547 = vmatpush.msra.mxu2 %v500_v62  ;;  %576 = vmatpush.msra.mxu3 %v501_v63 }
  0x2d   : > { %454 = vmatmul.f32.vlgmr.msra.gmra.mxu0 %v402_v0  ;;  %483 = vmatmul.f32.vlgmr.msra.gmra.mxu1 %v402_v0 }
  0x2e   : > { %548 = vmatmul.f32.vlgmr.msra.gmra.mxu2 %v496_v1  ;;  %577 = vmatmul.f32.vlgmr.msra.gmra.mxu3 %v496_v1 }
  0x2f   : > { %1251 = vmatpush.msrb.mxu2 %v608_v2  ;;  %1255 = vmatpush.msrb.mxu3 %v609_v3 }
  0x30   : > { %659 = vmatpush.msrb.mxu0 %v608_v2  ;;  %688 = vmatpush.msrb.mxu1 %v609_v3 }
  0x31   : > { %1252 = vmatpush.msrb.mxu2 %v606_v4  ;;  %1256 = vmatpush.msrb.mxu3 %v607_v5 }
  0x32   : > { %660 = vmatpush.msrb.mxu0 %v606_v4  ;;  %689 = vmatpush.msrb.mxu1 %v607_v5 }
  0x33   : > { %1253 = vmatpush.msrb.mxu2 %v604_v6  ;;  %1257 = vmatpush.msrb.mxu3 %v605_v7 }
  0x34   : > { %661 = vmatpush.msrb.mxu0 %v604_v6  ;;  %690 = vmatpush.msrb.mxu1 %v605_v7 }
  0x35   : > { %457 = vmatmul.f32.gmra.mxu0 %v403_v8  ;;  %486 = vmatmul.f32.gmra.mxu1 %v403_v8 }
  0x36   : > { %551 = vmatmul.f32.gmra.mxu2 %v497_v9  ;;  %580 = vmatmul.f32.gmra.mxu3 %v497_v9 }
  0x37   : > { %1254 = vmatpush.msrb.mxu2 %v602_v10  ;;  %1258 = vmatpush.msrb.mxu3 %v603_v11 }
  0x38   : > { %662 = vmatpush.msrb.mxu0 %v602_v10  ;;  %691 = vmatpush.msrb.mxu1 %v603_v11 }
  0x39   : > { %1285 = vset.pattern.permute.xlu1 %v1326_v14  ;;  %1284 = vset.pattern.permute.xlu0 %v1326_v14 }
  0x3a   : > { %626 = vperm.xlu1 %1285, %v612_v12   ;;  %616 = vperm.xlu0 %1284, %v610_v13  }
  0x3d   : > { %460 = vmatmul.f32.gmra.mxu0 %v404_v15  ;;  %489 = vmatmul.f32.gmra.mxu1 %v404_v15 }
  0x3e   : > { %554 = vmatmul.f32.gmra.mxu2 %v498_v16  ;;  %583 = vmatmul.f32.gmra.mxu3 %v498_v16 }
  0x42   : > { %631 = vperm.xlu1 %1285, %v613_v17   ;;  %621 = vperm.xlu0 %1284, %v611_v18  }
  0x45   : > { %463 = vmatmul.f32.gmra.mxu0 %v405_v19  ;;  %492 = vmatmul.f32.gmra.mxu1 %v405_v19 }
  0x46   : > { %557 = vmatmul.f32.gmra.mxu2 %v499_v20  ;;  %586 = vmatmul.f32.gmra.mxu3 %v499_v20 }
  0x4d   : > { %1229 = vmatmul.msk.f32.vlgmr.msrb.gmra.mxu0 %vm634_vm0, %v598_v21  ;;  %1233 = vmatmul.msk.f32.vlgmr.msrb.gmra.mxu1 %vm634_vm0, %v598_v21 }
  0x4e   : > { %1231 = vmatmul.msk.f32.vlgmr.msrb.gmra.mxu2 %vm634_vm0, %v600_v22  ;;  %1235 = vmatmul.msk.f32.vlgmr.msrb.gmra.mxu3 %vm634_vm0, %v600_v22 }
  0x55   : > { %1230 = vmatmul.msk.f32.gmra.mxu0 %vm634_vm0, %v599_v23  ;;  %1234 = vmatmul.msk.f32.gmra.mxu1 %vm634_vm0, %v599_v23 }
  0x56   : > { %1232 = vmatmul.msk.f32.gmra.mxu2 %vm634_vm0, %v601_v24  ;;  %1236 = vmatmul.msk.f32.gmra.mxu3 %vm634_vm0, %v601_v24 }
  0xaa   : > { %v455_v25 = vpop.f32.mrf.mxu0  ;;  %v484_v26 = vpop.f32.mrf.mxu1 }
  0xac   : > { %v617_v39 = vpop.permute.xlu0 %616  ;;  %v627_v52 = vpop.permute.xlu1 %626 }
  0xb1   : > { %v549_v27 = vpop.f32.mrf.mxu2  ;;  %v578_v28 = vpop.f32.mrf.mxu3 }
  0xb2   : > { %v458_v29 = vpop.f32.mrf.mxu0  ;;  %v1644_v30 = vpop.f32.mrf.mxu1  ;;  %v590_v44 = vsub.f32 %v455_v25, %v549_v27  ;;  %v591_v45 = vsub.f32 %v484_v26, %v578_v28 }
  0xb4   : > { %v1681_v5 = vpop.permute.xlu0 %621 }
  0xb9   : > { %v552_v31 = vpop.f32.mrf.mxu2  ;;  %v1646_v32 = vpop.f32.mrf.mxu3 }
  0xba   : > { %v461_v33 = vpop.f32.mrf.mxu0  ;;  %v490_v34 = vpop.f32.mrf.mxu1  ;;  %v592_v12 = vsub.f32 %v458_v29, %v552_v31 }
  0xc1   : > { %v555_v35 = vpop.f32.mrf.mxu2  ;;  %v584_v36 = vpop.f32.mrf.mxu3 }
  0xc2   : > { %v1648_v37 = vpop.f32.mrf.mxu0  ;;  %v1650_v38 = vpop.f32.mrf.mxu1  ;;  %v594_v57 = vsub.f32 %v461_v33, %v555_v35  ;;  %v595_v58 = vsub.f32 %v490_v34, %v584_v36 }
  0xc9   : > { %v1652_v40 = vpop.f32.mrf.mxu2  ;;  %v1654_v41 = vpop.f32.mrf.mxu3 }
  0xca   : > { %v664_v42 = vpop.f32.mrf.mxu0  ;;  %v693_v43 = vpop.f32.mrf.mxu1 }
  0xcb   : > { %v665_v46 = vadd.f32 %v664_v42, %v617_v39  ;;  %v694_v47 = vadd.f32 %v693_v43, %v617_v39 }
  0xcd   : > { %v1656_v48 = vadd.f32 %v665_v46, %v590_v44  ;;  %v1658_v49 = vadd.f32 %v694_v47, %v591_v45 }
  0xcf   : > { %v1661_v50 = vmul.f32 0.70710677, %v1656_v48  ;;  %v1664_v51 = vmul.f32 0.70710677, %v1658_v49 }
  0xd1   : > { %v729_v53 = vmul.f32 %v1661_v50, %v1661_v50  ;;  %v769_v54 = vmul.f32 %v1664_v51, %v1664_v51  ;;  %v670_v55 = vpop.f32.mrf.mxu2  ;;  %v699_v56 = vpop.f32.mrf.mxu3 }
  0xd2   : > { %v671_v59 = vadd.f32 %v670_v55, %v627_v52  ;;  %v700_v60 = vadd.f32 %v699_v56, %v627_v52  ;;  %v667_v63 = vpop.f32.mrf.mxu0 }
  0xd3   : > { %v1670_v61 = vmin.f32 %v729_v53, 16.0  ;;  %v1672_v62 = vmin.f32 %v769_v54, 16.0  ;;  %v668_v8 = vadd.f32 %v667_v63, %v1681_v5 }
  0xd4   : > { %v1674_v0 = vadd.f32 %v671_v59, %v594_v57  ;;  %v1676_v1 = vadd.f32 %v700_v60, %v595_v58 }
  0xd5   : > { %v731_v2 = vmul.f32 2.1237322e-06, %v1670_v61  ;;  %v742_v3 = vmul.f32 3.8918573e-05, %v1670_v61  ;;  %v771_v4 = vmul.f32 2.1237322e-06, %v1672_v62  ;;  %v1701_v22 = vadd.f32 %v668_v8, %v592_v12 }
  0xd6   : > { %v782_v6 = vmul.f32 3.8918573e-05, %v1672_v62  ;;  %v1685_v7 = vmul.f32 0.70710677, %v1674_v0  ;;  %v1691_v15 = vmul.f32 0.70710677, %v1676_v1 }
  0xd7   : > { %v732_v9 = vadd.f32 0.00028619796, %v731_v2  ;;  %v743_v10 = vadd.f32 0.001143296, %v742_v3  ;;  %v772_v11 = vadd.f32 0.00028619796, %v771_v4 }
  0xd8   : > { %v783_v13 = vadd.f32 0.001143296, %v782_v6  ;;  %v889_v14 = vmul.f32 %v1685_v7, %v1685_v7  ;;  %v929_v21 = vmul.f32 %v1691_v15, %v1691_v15  ;;  %v1712_v42 = vmul.f32 0.70710677, %v1701_v22 }
  0xd9   : > { %v733_v16 = vmul.f32 %v732_v9, %v1670_v61  ;;  %v744_v17 = vmul.f32 %v743_v10, %v1670_v61  ;;  %v773_v18 = vmul.f32 %v772_v11, %v1672_v62  ;;  %v696_v11 = vpop.f32.mrf.mxu1 }
  0xda   : > { %v784_v19 = vmul.f32 %v783_v13, %v1672_v62  ;;  %v1697_v20 = vmin.f32 %v889_v14, 16.0  ;;  %v1708_v34 = vmin.f32 %v929_v21, 16.0 }
  0xdb   : > { %v734_v23 = vadd.f32 0.0036580483, %v733_v16  ;;  %v745_v24 = vadd.f32 0.014752088, %v744_v17  ;;  %v774_v25 = vadd.f32 0.0036580483, %v773_v18  ;;  %v673_v16 = vpop.f32.mrf.mxu2 }
  0xdc   : > { %v785_v26 = vadd.f32 0.014752088, %v784_v19  ;;  %v891_v27 = vmul.f32 2.1237322e-06, %v1697_v20  ;;  %v902_v28 = vmul.f32 3.8918573e-05, %v1697_v20 }
  0xdd   : > { %v735_v29 = vmul.f32 %v734_v23, %v1670_v61  ;;  %v746_v31 = vmul.f32 %v745_v24, %v1670_v61  ;;  %v775_v33 = vmul.f32 %v774_v25, %v1672_v62  ;;  %v931_v53 = vmul.f32 2.1237322e-06, %v1708_v34  ;;  %v1731_v24 = vpop.permute.xlu1 %631 }
  0xde   : > { %v786_v35 = vmul.f32 %v785_v26, %v1672_v62  ;;  %v892_v36 = vadd.f32 0.00028619796, %v891_v27  ;;  %v903_v39 = vadd.f32 0.001143296, %v902_v28  ;;  %v942_v57 = vmul.f32 3.8918573e-05, %v1708_v34 }
  0xdf   : > { %v736_v43 = vadd.f32 0.05243302, %v735_v29  ;;  %v747_v44 = vadd.f32 0.112945676, %v746_v31  ;;  %v776_v45 = vadd.f32 0.05243302, %v775_v33  ;;  %v809_v26 = vmul.f32 %v1712_v42, %v1712_v42 }
  0xe0   : > { %v787_v46 = vadd.f32 0.112945676, %v786_v35  ;;  %v893_v47 = vmul.f32 %v892_v36, %v1697_v20  ;;  %v904_v52 = vmul.f32 %v903_v39, %v1697_v20  ;;  %v932_v63 = vadd.f32 0.00028619796, %v931_v53 }
  0xe1   : > { %v737_v54 = vmul.f32 %v736_v43, %v1670_v61  ;;  %v748_v55 = vmul.f32 %v747_v44, %v1670_v61  ;;  %v777_v56 = vmul.f32 %v776_v45, %v1672_v62  ;;  %v943_v14 = vadd.f32 0.001143296, %v942_v57 }
  0xe2   : > { %v788_v58 = vmul.f32 %v787_v46, %v1672_v62  ;;  %v894_v59 = vadd.f32 0.0036580483, %v893_v47  ;;  %v905_v60 = vadd.f32 0.014752088, %v904_v52  ;;  %v933_v10 = vmul.f32 %v932_v63, %v1708_v34 }
  0xe3   : > { %v738_v2 = vadd.f32 0.18741608, %v737_v54  ;;  %v749_v3 = vadd.f32 0.4994258, %v748_v55  ;;  %v778_v4 = vadd.f32 0.18741608, %v777_v56  ;;  %v697_v27 = vadd.f32 %v696_v11, %v1681_v5 }
  0xe4   : > { %v789_v6 = vadd.f32 0.4994258, %v788_v58  ;;  %v895_v8 = vmul.f32 %v894_v59, %v1697_v20  ;;  %v906_v9 = vmul.f32 %v905_v60, %v1697_v20  ;;  %v934_v25 = vadd.f32 0.0036580483, %v933_v10 }
  0xe5   : > { %v739_v12 = vmul.f32 %v738_v2, %v1670_v61  ;;  %v750_v13 = vmul.f32 %v749_v3, %v1670_v61  ;;  %v779_v17 = vmul.f32 %v778_v4, %v1672_v62  ;;  %v593_v31 = vsub.f32 %v1644_v30, %v1646_v32 }
  0xe6   : > { %v790_v18 = vmul.f32 %v789_v6, %v1672_v62  ;;  %v896_v19 = vadd.f32 0.05243302, %v895_v8  ;;  %v907_v21 = vadd.f32 0.112945676, %v906_v9  ;;  %v674_v62 = vadd.f32 %v673_v16, %v1731_v24 }
  0xe7   : > { %v1729_v23 = vadd.f32 1.0, %v750_v13  ;;  %v740_v33 = vadd.f32 1.1283791, %v739_v12  ;;  %v944_v35 = vmul.f32 %v943_v14, %v1708_v34  ;;  %v596_v36 = vsub.f32 %v1648_v37, %v1652_v40 }
  0xe8   : > { %v1736_v28 = vadd.f32 1.0, %v790_v18  ;;  %v897_v61 = vmul.f32 %v896_v19, %v1697_v20  ;;  %v908_v29 = vmul.f32 %v907_v21, %v1697_v20  ;;  %v1748_v5 = vmul.f32 0.5, %v1656_v48 }
  0xe9   : > { %1286 = vrcp.f32 %v1729_v23  ;;  %v780_v39 = vadd.f32 1.1283791, %v779_v17  ;;  %v1752_v43 = vmul.f32 0.5, %v1658_v49  ;;  %v935_v30 = vmul.f32 %v934_v25, %v1708_v34 }
  0xea   : > { %1288 = vrcp.f32 %v1736_v28  ;;  %v898_v44 = vadd.f32 0.18741608, %v897_v61  ;;  %v1755_v32 = vadd.f32 %v697_v27, %v593_v31  ;;  %v761_v45 = vand.u32 2147483647, %v1729_v23 }
  0xeb   : > { %v909_v46 = vadd.f32 0.4994258, %v908_v29  ;;  %v1758_v47 = vmin.f32 %v809_v26, 16.0  ;;  %v1760_v37 = vadd.f32 %v674_v62, %v596_v36  ;;  %v741_v40 = vmul.f32 %v740_v33, %v1661_v50 }
  0xec   : > { %v763_v48 = vand.u32 2147483648, %v1729_v23  ;;  %v801_v52 = vand.u32 2147483647, %v1736_v28  ;;  %v945_v49 = vadd.f32 0.014752088, %v944_v35  ;;  %vm757_vm1 = vweird.f32 %v1729_v23 }
  0xed   : > { %v781_v53 = vmul.f32 %v780_v39, %v1664_v51  ;;  %v803_v54 = vand.u32 2147483648, %v1736_v28  ;;  %v910_v55 = vmul.f32 %v909_v46, %v1697_v20  ;;  %vm797_vm2 = vweird.f32 %v1736_v28 }
  0xee   : > { %v899_v57 = vmul.f32 %v898_v44, %v1697_v20  ;;  %v936_v58 = vadd.f32 0.05243302, %v935_v30  ;;  %v946_v50 = vmul.f32 %v945_v49, %v1708_v34  ;;  %vm1773_vm3 = vcmp.eq.f32.partialorder %v761_v45, 8.507059e+37 }
  0xef   : > { %v1287_v56 = vpop.eup %1286  ;;  %v1777_v51 = vadd.f32 1.0, %v910_v55  ;;  %v811_v2 = vmul.f32 2.1237322e-06, %v1758_v47  ;;  %v822_v3 = vmul.f32 3.8918573e-05, %v1758_v47  ;;  %v764_v4 = vor.u32 1.1754944e-38, %v763_v48 }
  0xf0   : > { %v1289_v59 = vpop.eup %1288  ;;  %v753_v60 = vmul.f32 %v1287_v56, %v1729_v23  ;;  %vm1782_vm4 = vcmp.eq.f32.partialorder %v801_v52, 8.507059e+37  ;;  %v947_v8 = vadd.f32 0.112945676, %v946_v50  ;;  %v804_v10 = vor.u32 1.1754944e-38, %v803_v54 }
  0xf1   : > { %v793_v6 = vmul.f32 %v1289_v59, %v1736_v28  ;;  %1290 = vrcp.f32 %v1777_v51  ;;  %v1788_v11 = vmul.f32 0.70710677, %v1755_v32  ;;  %v900_v13 = vadd.f32 1.1283791, %v899_v57 }
  0xf2   : > { %v754_v9 = vsub.f32 1.0, %v753_v60  ;;  %v937_v14 = vmul.f32 %v936_v58, %v1708_v34  ;;  %v948_v16 = vmul.f32 %v947_v8, %v1708_v34  ;;  %vm758_vm5 = vweird.f32 %v1287_v56 }
  0xf3   : > { %v794_v12 = vsub.f32 1.0, %v793_v6  ;;  %v812_v18 = vadd.f32 0.00028619796, %v811_v2  ;;  %v823_v19 = vadd.f32 0.001143296, %v822_v3  ;;  %vm798_vm6 = vweird.f32 %v1289_v59  ;;  %vm759_vm7 = vmor %vm757_vm1, %vm758_vm5 }
  0xf4   : > { %v755_v17 = vmul.f32 %v1287_v56, %v754_v9  ;;  %v949_v25 = vadd.f32 0.4994258, %v948_v16  ;;  %v1793_v26 = vmul.f32 0.70710677, %v1760_v37  ;;  %v849_v62 = vmul.f32 %v1788_v11, %v1788_v11  ;;  %vm799_vm8 = vmor %vm797_vm2, %vm798_vm6 }
  0xf5   : > { %v795_v21 = vmul.f32 %v1289_v59, %v794_v12  ;;  %v813_v61 = vmul.f32 %v812_v18, %v1758_v47  ;;  %v824_v29 = vmul.f32 %v823_v19, %v1758_v47  ;;  %v901_v33 = vmul.f32 %v900_v13, %v1685_v7 }
  0xf6   : > { %v756_v27 = vadd.f32 %v1287_v56, %v755_v17  ;;  %v938_v35 = vadd.f32 0.18741608, %v937_v14  ;;  %v950_v36 = vmul.f32 %v949_v25, %v1708_v34  ;;  %v1805_v46 = vmin.f32 %v849_v62, 16.0 }
  0xf7   : > { %v796_v31 = vadd.f32 %v1289_v59, %v795_v21  ;;  %v1291_v39 = vpop.eup %1290  ;;  %v814_v30 = vadd.f32 0.0036580483, %v813_v61  ;;  %v825_v45 = vadd.f32 0.014752088, %v824_v29  ;;  %v921_v7 = vand.u32 2147483647, %v1777_v51 }
  0xf8   : > { %v760_v44 = vsel %vm759_vm7, %v1287_v56, %v756_v27  ;;  %v913_v52 = vmul.f32 %v1291_v39, %v1777_v51  ;;  %v923_v55 = vand.u32 2147483648, %v1777_v51  ;;  %v1814_v28 = vadd.f32 1.0, %v950_v36  ;;  %v702_v36 = vpop.f32.mrf.mxu3 }
  0xf9   : > { %v765_v48 = vsel %vm1773_vm3, %v764_v4, %v760_v44  ;;  %v800_v23 = vsel %vm799_vm8, %v1289_v59, %v796_v31  ;;  %v826_v58 = vmul.f32 %v825_v45, %v1758_v47  ;;  %v851_v50 = vmul.f32 2.1237322e-06, %v1805_v46 }
  0xfa   : > { %v766_v49 = vmul.f32 %v765_v48, %v741_v40  ;;  %v805_v54 = vsel %vm1782_vm4, %v804_v10, %v800_v23  ;;  %v914_v57 = vsub.f32 1.0, %v913_v52  ;;  %vm917_vm9 = vweird.f32 %v1777_v51 }
  0xfb   : > { %v806_v56 = vmul.f32 %v805_v54, %v781_v53  ;;  %1292 = vrcp.f32 %v1814_v28  ;;  %v815_v40 = vmul.f32 %v814_v30, %v1758_v47  ;;  %vm918_vm10 = vweird.f32 %v1291_v39 }
  0xfc   : > { %v1237_v59 = vclamps-f32 %v766_v49, 1.0  ;;  %v915_v63 = vmul.f32 %v1291_v39, %v914_v57  ;;  %v969_v2 = vmul.f32 %v1793_v26, %v1793_v26  ;;  %v939_v3 = vmul.f32 %v938_v35, %v1708_v34  ;;  %vm919_vm12 = vmor %vm917_vm9, %vm918_vm10 }
  0xfd   : > { %v1238_v60 = vclamps-f32 %v806_v56, 1.0  ;;  %v827_v4 = vadd.f32 0.112945676, %v826_v58  ;;  %v852_v6 = vadd.f32 0.00028619796, %v851_v50  ;;  %vm922_vm11 = vcmp.eq.f32.partialorder %v921_v7, 8.507059e+37 }
  0xfe   : > { %v1049_v53 = vadd.f32 1.0, %v1237_v59  ;;  %v916_v8 = vadd.f32 %v1291_v39, %v915_v63  ;;  %v924_v9 = vor.u32 1.1754944e-38, %v923_v55  ;;  %v816_v34 = vadd.f32 0.05243302, %v815_v40 }
  0xff   : > { %v1050_v20 = vadd.f32 1.0, %v1238_v60  ;;  %v828_v12 = vmul.f32 %v827_v4, %v1758_v47  ;;  %v862_v13 = vmul.f32 3.8918573e-05, %v1805_v46  ;;  %v853_v17 = vmul.f32 %v852_v6, %v1805_v46 }
 0x100   : > { %v1057_v10 = vmul.f32 %v1049_v53, %v1748_v5  ;;  %v920_v16 = vsel %vm919_vm12, %v1291_v39, %v916_v8  ;;  %v1838_v18 = vmin.f32 %v969_v2, 16.0  ;;  %v717_v51 = vmul.f32 0.5, %v1674_v0 }
 0x101   : > { %v1058_v14 = vmul.f32 %v1050_v20, %v1752_v43  ;;  %v1293_v19 = vpop.eup %1292  ;;  %v925_v21 = vsel %vm922_vm11, %v924_v9, %v920_v16  ;;  %v829_v25 = vadd.f32 0.4994258, %v828_v12  ;;  %v863_v5 = vadd.f32 0.001143296, %v862_v13 }
 0x102   : > { %1065 = vst [vmem:[%s1829_s18] sm:$0xff] %v1057_v10  ;;  %v926_v27 = vmul.f32 %v925_v21, %v901_v33  ;;  %v940_v61 = vadd.f32 1.1283791, %v939_v3  ;;  %v953_v29 = vmul.f32 %v1293_v19, %v1814_v28  ;;  %v961_v62 = vand.u32 2147483647, %v1814_v28 }
 0x103   : > { %1066 = vst [vmem:[%s1829_s18 + $0x8] sm:$0xff] %v1058_v14  ;;  %v830_v43 = vmul.f32 %v829_v25, %v1758_v47  ;;  %v864_v31 = vmul.f32 %v863_v5, %v1805_v46  ;;  %v971_v35 = vmul.f32 2.1237322e-06, %v1838_v18  ;;  %v817_v30 = vmul.f32 %v816_v34, %v1758_v47 }
 0x104   : > { %v1241_v39 = vclamps-f32 %v926_v27, 1.0  ;;  %v954_v44 = vsub.f32 1.0, %v953_v29  ;;  %v854_v45 = vadd.f32 0.0036580483, %v853_v17  ;;  %v963_v0 = vand.u32 2147483648, %v1814_v28 }
 0x105   : > { %v1850_v33 = vadd.f32 1.0, %v830_v43  ;;  %v865_v48 = vadd.f32 0.014752088, %v864_v31  ;;  %v982_v23 = vmul.f32 3.8918573e-05, %v1838_v18  ;;  %vm958_vm13 = vweird.f32 %v1293_v19 }
 0x106   : > { %v1053_v52 = vadd.f32 1.0, %v1241_v39  ;;  %v955_v7 = vmul.f32 %v1293_v19, %v954_v44  ;;  %v703_v49 = vadd.f32 %v702_v36, %v1731_v24  ;;  %v597_v54 = vsub.f32 %v1650_v38, %v1654_v41 }
 0x107   : > { %vm957_vm14 = vweird.f32 %v1814_v28  ;;  %1294 = vrcp.f32 %v1850_v33  ;;  %v972_v55 = vadd.f32 0.00028619796, %v971_v35  ;;  %v818_v58 = vadd.f32 0.18741608, %v817_v30 }
 0x108   : > { %v1061_v56 = vmul.f32 %v1053_v52, %v717_v51  ;;  %v956_v57 = vadd.f32 %v1293_v19, %v955_v7  ;;  %v866_v50 = vmul.f32 %v865_v48, %v1805_v46  ;;  %v941_v59 = vmul.f32 %v940_v61, %v1691_v15  ;;  %vm959_vm15 = vmor %vm957_vm14, %vm958_vm13 }
 0x109   : > { %vm962_vm0 = vcmp.eq.f32.partialorder %v961_v62, 8.507059e+37  ;;  %v964_v40 = vor.u32 1.1754944e-38, %v963_v0  ;;  %v983_v60 = vadd.f32 0.001143296, %v982_v23  ;;  %v855_v38 = vmul.f32 %v854_v45, %v1805_v46 }
 0x10a   : > { %1069 = vst [vmem:[%s1829_s18 + $0x20] sm:$0xff] %v1061_v56  ;;  %v960_v24 = vsel %vm959_vm15, %v1293_v19, %v956_v57  ;;  %v867_v41 = vadd.f32 0.112945676, %v866_v50  ;;  %v1862_v28 = vadd.f32 %v703_v49, %v597_v54  ;;  %v973_v2 = vmul.f32 %v972_v55, %v1838_v18 }
 0x10b   : > { %v965_v63 = vsel %vm962_vm0, %v964_v40, %v960_v24  ;;  %v984_v53 = vmul.f32 %v983_v60, %v1838_v18  ;;  %v819_v4 = vmul.f32 %v818_v58, %v1758_v47  ;;  %v718_v9 = vmul.f32 0.5, %v1676_v1 }
 0x10c   : > { %v966_v3 = vmul.f32 %v965_v63, %v941_v59  ;;  %v868_v15 = vmul.f32 %v867_v41, %v1805_v46  ;;  %v1869_v8 = vmul.f32 0.70710677, %v1862_v28  ;;  %v856_v12 = vadd.f32 0.05243302, %v855_v38 }
 0x10d   : > { %v1295_v6 = vpop.eup %1294  ;;  %v985_v20 = vadd.f32 0.014752088, %v984_v53  ;;  %v974_v14 = vadd.f32 0.0036580483, %v973_v2  ;;  %v820_v19 = vadd.f32 1.1283791, %v819_v4  ;;  %vm837_vm2 = vweird.f32 %v1850_v33 }
 0x10e   : > { %v1242_v10 = vclamps-f32 %v966_v3, 1.0  ;;  %v833_v34 = vmul.f32 %v1295_v6, %v1850_v33  ;;  %v869_v13 = vadd.f32 0.4994258, %v868_v15  ;;  %v1009_v47 = vmul.f32 %v1869_v8, %v1869_v8 }
 0x10f   : > { %v986_v16 = vmul.f32 %v985_v20, %v1838_v18  ;;  %v841_v25 = vand.u32 2147483647, %v1850_v33  ;;  %v843_v5 = vand.u32 2147483648, %v1850_v33  ;;  %vm838_vm1 = vweird.f32 %v1295_v6 }
 0x110   : > { %v1054_v17 = vadd.f32 1.0, %v1242_v10  ;;  %v834_v21 = vsub.f32 1.0, %v833_v34  ;;  %v870_v1 = vmul.f32 %v869_v13, %v1805_v46  ;;  %v1879_v27 = vmin.f32 %v1009_v47, 16.0  ;;  %vm839_vm3 = vmor %vm837_vm2, %vm838_vm1 }
 0x111   : > { %v987_v51 = vadd.f32 0.112945676, %v986_v16  ;;  %v857_v62 = vmul.f32 %v856_v12, %v1805_v46  ;;  %v975_v31 = vmul.f32 %v974_v14, %v1838_v18  ;;  %v821_v30 = vmul.f32 %v820_v19, %v1712_v42 }
 0x112   : > { %v1062_v61 = vmul.f32 %v1054_v17, %v718_v9  ;;  %v835_v29 = vmul.f32 %v1295_v6, %v834_v21  ;;  %v871_v43 = vadd.f32 1.0, %v870_v1  ;;  %v1011_v36 = vmul.f32 2.1237322e-06, %v1879_v27 }
 0x113   : > { %v988_v35 = vmul.f32 %v987_v51, %v1838_v18  ;;  %v1022_v44 = vmul.f32 3.8918573e-05, %v1879_v27  ;;  %v844_v45 = vor.u32 1.1754944e-38, %v843_v5  ;;  %vm842_vm4 = vcmp.eq.f32.partialorder %v841_v25, 8.507059e+37 }
 0x114   : > { %1070 = vst [vmem:[%s1829_s18 + $0x28] sm:$0xff] %v1062_v61  ;;  %v836_v39 = vadd.f32 %v1295_v6, %v835_v29  ;;  %1296 = vrcp.f32 %v871_v43  ;;  %v1012_v23 = vadd.f32 0.00028619796, %v1011_v36  ;;  %v858_v7 = vadd.f32 0.18741608, %v857_v62 }
 0x115   : > { %v989_v48 = vadd.f32 0.4994258, %v988_v35  ;;  %v976_v49 = vadd.f32 0.05243302, %v975_v31  ;;  %v1023_v54 = vadd.f32 0.001143296, %v1022_v44  ;;  %vm877_vm6 = vweird.f32 %v871_v43 }
 0x116   : > { %v840_v0 = vsel %vm839_vm3, %v1295_v6, %v836_v39  ;;  %v1013_v33 = vmul.f32 %v1012_v23, %v1879_v27  ;;  %v859_v59 = vmul.f32 %v858_v7, %v1805_v46  ;;  %v715_v24 = vmul.f32 0.5, %v1701_v22 }
 0x117   : > { %v845_v52 = vsel %vm842_vm4, %v844_v45, %v840_v0  ;;  %v990_v56 = vmul.f32 %v989_v48, %v1838_v18  ;;  %v1024_v57 = vmul.f32 %v1023_v54, %v1879_v27  ;;  %v977_v40 = vmul.f32 %v976_v49, %v1838_v18 }
 0x118   : > { %v846_v55 = vmul.f32 %v845_v52, %v821_v30  ;;  %v1014_v63 = vadd.f32 0.0036580483, %v1013_v33  ;;  %v860_v4 = vadd.f32 1.1283791, %v859_v59  ;;  %v883_v15 = vand.u32 2147483648, %v871_v43 }
 0x119   : > { %v991_v42 = vadd.f32 1.0, %v990_v56  ;;  %v1025_v60 = vadd.f32 0.014752088, %v1024_v57  ;;  %v978_v6 = vadd.f32 0.18741608, %v977_v40  ;;  %v716_v36 = vmul.f32 0.5, %v1755_v32 }
 0x11a   : > { %v1239_v58 = vclamps-f32 %v846_v55, 1.0  ;;  %v1297_v50 = vpop.eup %1296  ;;  %v881_v46 = vand.u32 2147483647, %v871_v43  ;;  %v1015_v10 = vmul.f32 %v1014_v63, %v1879_v27  ;;  %v884_v13 = vor.u32 1.1754944e-38, %v883_v15 }
 0x11b   : > { %v873_v41 = vmul.f32 %v1297_v50, %v871_v43  ;;  %1298 = vrcp.f32 %v991_v42  ;;  %v1026_v3 = vmul.f32 %v1025_v60, %v1879_v27  ;;  %vm878_vm5 = vweird.f32 %v1297_v50 }
 0x11c   : > { %v1051_v38 = vadd.f32 1.0, %v1239_v58  ;;  %vm879_vm7 = vmor %vm877_vm6, %vm878_vm5  ;;  %v979_v14 = vmul.f32 %v978_v6, %v1838_v18  ;;  %v861_v47 = vmul.f32 %v860_v4, %v1788_v11  ;;  %vm882_vm8 = vcmp.eq.f32.partialorder %v881_v46, 8.507059e+37 }
 0x11d   : > { %v874_v53 = vsub.f32 1.0, %v873_v41  ;;  %v1027_v9 = vadd.f32 0.112945676, %v1026_v3  ;;  %v1016_v5 = vadd.f32 0.05243302, %v1015_v10  ;;  %v1003_v51 = vand.u32 2147483648, %v991_v42 }
 0x11e   : > { %v1059_v2 = vmul.f32 %v1051_v38, %v715_v24  ;;  %v980_v29 = vadd.f32 1.1283791, %v979_v14  ;;  %v1001_v43 = vand.u32 2147483647, %v991_v42  ;;  %vm997_vm10 = vweird.f32 %v991_v42 }
 0x11f   : > { %v875_v20 = vmul.f32 %v1297_v50, %v874_v53  ;;  %v1028_v12 = vmul.f32 %v1027_v9, %v1879_v27  ;;  %v1017_v11 = vmul.f32 %v1016_v5, %v1879_v27  ;;  %v1004_v44 = vor.u32 1.1754944e-38, %v1003_v51 }
 0x120   : > { %1067 = vst [vmem:[%s1829_s18 + $0x10] sm:$0xff] %v1059_v2  ;;  %v981_v30 = vmul.f32 %v980_v29, %v1793_v26  ;;  %vm1002_vm12 = vcmp.eq.f32.partialorder %v1001_v43, 8.507059e+37  ;;  %v719_v54 = vmul.f32 0.5, %v1760_v37  ;;  %v720_v41 = vmul.f32 0.5, %v1862_v28 }
 0x121   : > { %v1299_v34 = vpop.eup %1298  ;;  %v876_v22 = vadd.f32 %v1297_v50, %v875_v20  ;;  %v1029_v19 = vadd.f32 0.4994258, %v1028_v12  ;;  %v1018_v52 = vadd.f32 0.18741608, %v1017_v11 }
 0x122   : > { %v993_v16 = vmul.f32 %v1299_v34, %v991_v42  ;;  %vm998_vm9 = vweird.f32 %v1299_v34 }
 0x123   : > { %v880_v17 = vsel %vm879_vm7, %v1297_v50, %v876_v22  ;;  %v1030_v61 = vmul.f32 %v1029_v19, %v1879_v27  ;;  %vm999_vm11 = vmor %vm997_vm10, %vm998_vm9  ;;  %v1019_v32 = vmul.f32 %v1018_v52, %v1879_v27 }
 0x124   : > { %v885_v21 = vsel %vm882_vm8, %v884_v13, %v880_v17  ;;  %v994_v25 = vsub.f32 1.0, %v993_v16 }
 0x125   : > { %v886_v1 = vmul.f32 %v885_v21, %v861_v47  ;;  %v1031_v35 = vadd.f32 1.0, %v1030_v61  ;;  %v1020_v26 = vadd.f32 1.1283791, %v1019_v32 }
 0x126   : > { %v995_v62 = vmul.f32 %v1299_v34, %v994_v25 }
 0x127   : > { %v1240_v31 = vclamps-f32 %v886_v1, 1.0  ;;  %1300 = vrcp.f32 %v1031_v35  ;;  %v1043_v58 = vand.u32 2147483648, %v1031_v35  ;;  %v1041_v50 = vand.u32 2147483647, %v1031_v35 }
 0x128   : > { %v996_v18 = vadd.f32 %v1299_v34, %v995_v62  ;;  %vm1037_vm14 = vweird.f32 %v1031_v35  ;;  %v1021_v60 = vmul.f32 %v1020_v26, %v1869_v8 }
 0x129   : > { %v1052_v39 = vadd.f32 1.0, %v1240_v31  ;;  %v1044_v40 = vor.u32 1.1754944e-38, %v1043_v58  ;;  %vm1042_vm0 = vcmp.eq.f32.partialorder %v1041_v50, 8.507059e+37 }
 0x12a   : > { %v1000_v45 = vsel %vm999_vm11, %v1299_v34, %v996_v18 }
 0x12b   : > { %v1060_v0 = vmul.f32 %v1052_v39, %v716_v36  ;;  %v1005_v48 = vsel %vm1002_vm12, %v1004_v44, %v1000_v45 }
 0x12c   : > { %v1006_v23 = vmul.f32 %v1005_v48, %v981_v30 }
 0x12d   : > { %1068 = vst [vmem:[%s1829_s18 + $0x18] sm:$0xff] %v1060_v0  ;;  %v1301_v49 = vpop.eup %1300 }
 0x12e   : > { %v1243_v7 = vclamps-f32 %v1006_v23, 1.0  ;;  %v1033_v56 = vmul.f32 %v1301_v49, %v1031_v35  ;;  %vm1038_vm13 = vweird.f32 %v1301_v49 }
 0x12f   : > { %vm1039_vm15 = vmor %vm1037_vm14, %vm1038_vm13 }
 0x130   : > { %v1055_v55 = vadd.f32 1.0, %v1243_v7  ;;  %v1034_v57 = vsub.f32 1.0, %v1033_v56 }
 0x132   : > { %v1063_v33 = vmul.f32 %v1055_v55, %v719_v54  ;;  %v1035_v42 = vmul.f32 %v1301_v49, %v1034_v57 }
 0x134   : > { %1071 = vst [vmem:[%s1829_s18 + $0x30] sm:$0xff] %v1063_v33  ;;  %v1036_v59 = vadd.f32 %v1301_v49, %v1035_v42 }
 0x136   : > { %v1040_v37 = vsel %vm1039_vm15, %v1301_v49, %v1036_v59 }
 0x137   : > { %v1045_v24 = vsel %vm1042_vm0, %v1044_v40, %v1040_v37 }
 0x138   : > { %v1046_v27 = vmul.f32 %v1045_v24, %v1021_v60 }
 0x13a   : > { %v1244_v38 = vclamps-f32 %v1046_v27, 1.0 }
 0x13c   : > { %v1056_v63 = vadd.f32 1.0, %v1244_v38 }
 0x13e   : > { %v1064_v2 = vmul.f32 %v1056_v63, %v720_v41 }
 0x140   : > { %1072 = vst [vmem:[%s1829_s18 + $0x38] sm:$0xff] %v1064_v2 }
 0x141 PF: > { %s17_s26 = sadd.s32 1, %s1324_s26   ;;  %s1933_s24 = smov %s1320_s25 }
 0x142   : > { %p14_p5 = scmp.ge.s32.totalorder %s17_s26, 4   ;;  %s1934_s25 = smov %s1936_s27 }
 0x144   :  { %16 = sbr.rel (!%p14_p5) target bundleno = 2 (0x2), region = 90 }

// kernel: fno2d_forward.15
= control target key start
LH: loop header
LB: loop body
LE: loop exit
PB: predicated region body
PF: predicated region fallthrough
CT: control target
= control target key end

     0   :  { %s2354_s18 = smov 0   ;;  %s2356_s19 = smov 0   ;;  %s3890_s0 = inlined_call_operand.vmem [shape: f32[2,32,256], index: 0, kind: input, shape index: {}]   ;;  %s3891_s1 = inlined_call_operand.vmem [shape: f32[128,32], index: 1, kind: input, shape index: {}]   ;;  %s3892_s2 = inlined_call_operand.vmem [shape: f32[128,1], index: 2, kind: input, shape index: {}]   ;;  %s3893_s3 = inlined_call_operand.vmem [shape: f32[10,128], index: 3, kind: input, shape index: {}]   ;;  %s3894_s4 = inlined_call_operand.vmem [shape: f32[10,1], index: 4, kind: input, shape index: {}]   ;;  %s3895_s5 = inlined_call_operand.vmem [shape: f32[2,10,256], index: 5, kind: output, shape index: {}]  }
   0x1   :  { %s2358_s20 = smov 0  }
   0x2 LB: > { %s27_s21 = sadd.s32 1, %s2317_s19  ;;  %p2126_p0 = scmp.ge.s32.totalorder %s2321_s20, 1  ;;  %s2321_s20 = sphi %s2358_s20, %s15_s20   ;;  %s2317_s19 = sphi %s2356_s19, %s4129_s19   ;;  %s2313_s18 = sphi %s2354_s18, %s4128_s18  }
   0x3   : > { %p29_p1 = scmp.ge.s32.totalorder %s27_s21, 2  ;;  %p208_p2 = scmp.lt.s32.totalorder %s2321_s20, 3 }
   0x5   : > { %s4131_s21 = smov (%p29_p1, %s27_s21), 0  ;;  %p209_p3 = pnand %p2126_p0, %p208_p2 }
   0x7   : > { %212 = sbr.rel (%p209_p3) target bundleno = 666 (0x29a), region = 40 }
   0xc   : > { %v303_v0 = vld [vmem:[%s3892_s2 + $0x78] sm:$0xff]  ;;  %p245_p4 = scmp.lt.s32.totalorder %s2313_s18, 1  ;;  %v301_v1 = vld [vmem:[%s3892_s2 + $0x68] sm:$0xff]  ;;  %v2323_v2 = vmov 0   ;;  %v302_v8 = vld [vmem:[%s3892_s2 + $0x70] sm:$0xff]  ;;  %vm384_vm0 = vcmask 261120  }
   0xd   : > { %2232 = vset.pattern.permute.xlu0 %v2323_v2  ;;  %2233 = vset.pattern.permute.xlu1 %v2323_v2  ;;  %v299_v3 = vld [vmem:[%s3892_s2 + $0x58] sm:$0xff]  ;;  %v264_v13 = vld [vmem:[%s3891_s1] sm:$0xff]  ;;  %v274_v14 = vld [vmem:[%s3891_s1 + $0x50] sm:$0xff] }
   0xe   : > { %381 = vperm.xlu0 %2232, %v303_v0   ;;  %s4133_s18 = smov (!%p245_p4, %s2313_s18), 1  ;;  %371 = vperm.xlu1 %2233, %v301_v1   ;;  %v2399_v15 = vld [vmem:[%s3891_s1 + $0x48] sm:$0xff]  ;;  %v300_v16 = vld [vmem:[%s3892_s2 + $0x60] sm:$0xff]  ;;  %v298_v17 = vld [vmem:[%s3892_s2 + $0x50] sm:$0xff] }
   0xf   : > { %2234 = vset.pattern.permute.xlu2 %v2323_v2  ;;  %s2197_s28 = sshll.u32 %s4133_s18, 6  ;;  %v297_v18 = vld [vmem:[%s3892_s2 + $0x48] sm:$0xff]  ;;  %v275_v20 = vld [vmem:[%s3891_s1 + $0x58] sm:$0xff]  ;;  %v296_v21 = vld [vmem:[%s3892_s2 + $0x40] sm:$0xff]  ;;  %s2198_s10 = sshll.u32 %s4133_s18, 5 }
  0x10   : > { %361 = vperm.xlu2 %2234, %v299_v3   ;;  %s252_s6 = scalar_lea.vmem %s3890_s0, %s2197_s28  ;;  %v265_v19 = vld [vmem:[%s3891_s1 + $0x8] sm:$0xff]  ;;  %v295_v22 = vld [vmem:[%s3892_s2 + $0x38] sm:$0xff]  ;;  %v294_v23 = vld [vmem:[%s3892_s2 + $0x30] sm:$0xff]  ;;  %s262_s13 = scalar_lea.vmem %s3895_s5, %s2198_s10 }
  0x11   : > { %v286_v4 = vld [vmem:[%s252_s6 + $0x30] sm:$0xff]  ;;  %v287_v5 = vld [vmem:[%s252_s6 + $0x38] sm:$0xff]  ;;  %v284_v6 = vld [vmem:[%s252_s6 + $0x20] sm:$0xff] }
  0x12   : > { %445 = vmatpush.msra.mxu0 %v286_v4  ;;  %2199 = vmatpush.msra.mxu2 %v286_v4  ;;  %v285_v7 = vld [vmem:[%s252_s6 + $0x28] sm:$0xff]  ;;  %v282_v9 = vld [vmem:[%s252_s6 + $0x10] sm:$0xff]  ;;  %v283_v10 = vld [vmem:[%s252_s6 + $0x18] sm:$0xff] }
  0x13   : > { %510 = vmatpush.msra.mxu1 %v287_v5  ;;  %2203 = vmatpush.msra.mxu3 %v287_v5  ;;  %v280_v11 = vld [vmem:[%s252_s6] sm:$0xff]  ;;  %v281_v12 = vld [vmem:[%s252_s6 + $0x8] sm:$0xff]  ;;  %v266_v24 = vld [vmem:[%s3891_s1 + $0x10] sm:$0xff] }
  0x14   : > { %446 = vmatpush.msra.mxu0 %v284_v6  ;;  %2200 = vmatpush.msra.mxu2 %v284_v6  ;;  %v276_v25 = vld [vmem:[%s3891_s1 + $0x60] sm:$0xff]  ;;  %v293_v26 = vld [vmem:[%s3892_s2 + $0x28] sm:$0xff]  ;;  %v291_v28 = vld [vmem:[%s3892_s2 + $0x18] sm:$0xff] }
  0x15   : > { %511 = vmatpush.msra.mxu1 %v285_v7  ;;  %2204 = vmatpush.msra.mxu3 %v285_v7  ;;  %v292_v27 = vld [vmem:[%s3892_s2 + $0x20] sm:$0xff]  ;;  %v267_v29 = vld [vmem:[%s3891_s1 + $0x18] sm:$0xff]  ;;  %v277_v30 = vld [vmem:[%s3891_s1 + $0x68] sm:$0xff] }
  0x16   : > { %376 = vperm.xlu0 %2232, %v302_v8   ;;  %447 = vmatpush.msra.mxu0 %v282_v9  ;;  %v290_v31 = vld [vmem:[%s3892_s2 + $0x10] sm:$0xff]  ;;  %v289_v32 = vld [vmem:[%s3892_s2 + $0x8] sm:$0xff]  ;;  %v288_v33 = vld [vmem:[%s3892_s2] sm:$0xff] }
  0x17   : > { %2201 = vmatpush.msra.mxu2 %v282_v9  ;;  %512 = vmatpush.msra.mxu1 %v283_v10  ;;  %v268_v34 = vld [vmem:[%s3891_s1 + $0x20] sm:$0xff]  ;;  %v278_v35 = vld [vmem:[%s3891_s1 + $0x70] sm:$0xff]  ;;  %v269_v37 = vld [vmem:[%s3891_s1 + $0x28] sm:$0xff] }
  0x18   : > { %2205 = vmatpush.msra.mxu3 %v283_v10  ;;  %448 = vmatpush.msra.mxu0 %v280_v11  ;;  %v1973_v36 = vld [vmem:[%s3894_s4] sm:$0xff]  ;;  %v279_v38 = vld [vmem:[%s3891_s1 + $0x78] sm:$0xff]  ;;  %v1974_v39 = vld [vmem:[%s3894_s4 + $0x8] sm:$0x3] }
  0x19   : > { %2202 = vmatpush.msra.mxu2 %v280_v11  ;;  %513 = vmatpush.msra.mxu1 %v281_v12  ;;  %v270_v40 = vld [vmem:[%s3891_s1 + $0x30] sm:$0xff]  ;;  %v271_v41 = vld [vmem:[%s3891_s1 + $0x38] sm:$0xff]  ;;  %v272_v42 = vld [vmem:[%s3891_s1 + $0x40] sm:$0xff] }
  0x1a   : > { %2206 = vmatpush.msra.mxu3 %v281_v12  ;;  %2131 = vmatmul.msk.f32.vlgmr.msra.gmra.mxu0 %vm384_vm0, %v264_v13 }
  0x1b   : > { %2141 = vmatmul.msk.f32.vlgmr.msra.gmra.mxu2 %vm384_vm0, %v274_v14  ;;  %2147 = vmatmul.msk.f32.vlgmr.msra.gmra.mxu1 %vm384_vm0, %v264_v13 }
  0x1c   : > { %2156 = vmatmul.msk.f32.vlgmr.msra.gmra.mxu3 %vm384_vm0, %v2399_v15  ;;  %366 = vperm.xlu1 %2233, %v300_v16  }
  0x1d   : > { %356 = vperm.xlu2 %2234, %v298_v17  }
  0x1e   : > { %351 = vperm.xlu0 %2232, %v297_v18  }
  0x22   : > { %2132 = vmatmul.msk.f32.gmra.mxu0 %vm384_vm0, %v265_v19 }
  0x23   : > { %2142 = vmatmul.msk.f32.gmra.mxu2 %vm384_vm0, %v275_v20  ;;  %2148 = vmatmul.msk.f32.gmra.mxu1 %vm384_vm0, %v265_v19 }
  0x24   : > { %2157 = vmatmul.msk.f32.gmra.mxu3 %vm384_vm0, %v274_v14  ;;  %346 = vperm.xlu1 %2233, %v296_v21  }
  0x25   : > { %341 = vperm.xlu2 %2234, %v295_v22  }
  0x26   : > { %336 = vperm.xlu0 %2232, %v294_v23  }
  0x2a   : > { %2133 = vmatmul.msk.f32.gmra.mxu0 %vm384_vm0, %v266_v24 }
  0x2b   : > { %2143 = vmatmul.msk.f32.gmra.mxu2 %vm384_vm0, %v276_v25  ;;  %2149 = vmatmul.msk.f32.gmra.mxu1 %vm384_vm0, %v266_v24 }
  0x2c   : > { %2158 = vmatmul.msk.f32.gmra.mxu3 %vm384_vm0, %v275_v20  ;;  %331 = vperm.xlu1 %2233, %v293_v26  }
  0x2d   : > { %326 = vperm.xlu2 %2234, %v292_v27  }
  0x2e   : > { %321 = vperm.xlu0 %2232, %v291_v28  }
  0x32   : > { %2134 = vmatmul.msk.f32.gmra.mxu0 %vm384_vm0, %v267_v29 }
  0x33   : > { %2144 = vmatmul.msk.f32.gmra.mxu2 %vm384_vm0, %v277_v30  ;;  %2150 = vmatmul.msk.f32.gmra.mxu1 %vm384_vm0, %v267_v29 }
  0x34   : > { %2159 = vmatmul.msk.f32.gmra.mxu3 %vm384_vm0, %v276_v25  ;;  %316 = vperm.xlu1 %2233, %v290_v31  }
  0x35   : > { %311 = vperm.xlu2 %2234, %v289_v32  }
  0x36   : > { %306 = vperm.xlu0 %2232, %v288_v33  }
  0x3a   : > { %2135 = vmatmul.msk.f32.gmra.mxu0 %vm384_vm0, %v268_v34 }
  0x3b   : > { %2145 = vmatmul.msk.f32.gmra.mxu2 %vm384_vm0, %v278_v35  ;;  %2151 = vmatmul.msk.f32.gmra.mxu1 %vm384_vm0, %v268_v34 }
  0x3c   : > { %2160 = vmatmul.msk.f32.gmra.mxu3 %vm384_vm0, %v277_v30  ;;  %1977 = vperm.xlu1 %2233, %v1973_v36  }
  0x3d   : > { %1982 = vperm.xlu2 %2234, %v1974_v39  }
  0x42   : > { %2136 = vmatmul.msk.f32.gmra.mxu0 %vm384_vm0, %v269_v37 }
  0x43   : > { %2146 = vmatmul.msk.f32.gmra.mxu2 %vm384_vm0, %v279_v38  ;;  %2152 = vmatmul.msk.f32.gmra.mxu1 %vm384_vm0, %v269_v37 }
  0x44   : > { %2161 = vmatmul.msk.f32.gmra.mxu3 %vm384_vm0, %v278_v35 }
  0x4a   : > { %2137 = vmatmul.msk.f32.gmra.mxu0 %vm384_vm0, %v270_v40 }
  0x4b   : > { %2153 = vmatmul.msk.f32.gmra.mxu1 %vm384_vm0, %v270_v40 }
  0x4c   : > { %2162 = vmatmul.msk.f32.gmra.mxu3 %vm384_vm0, %v279_v38 }
  0x52   : > { %2138 = vmatmul.msk.f32.gmra.mxu0 %vm384_vm0, %v271_v41 }
  0x53   : > { %2154 = vmatmul.msk.f32.gmra.mxu1 %vm384_vm0, %v271_v41 }
  0x5a   : > { %2139 = vmatmul.msk.f32.gmra.mxu0 %vm384_vm0, %v272_v42 }
  0x5b   : > { %2155 = vmatmul.msk.f32.gmra.mxu1 %vm384_vm0, %v272_v42 }
  0x62   : > { %2140 = vmatmul.msk.f32.gmra.mxu0 %vm384_vm0, %v2399_v15 }
  0x6a   : > { %v2516_v43 = vpop.permute.xlu2 %361 }
  0x77   : > { %v357_v44 = vpop.permute.xlu2 %356 }
  0x7f   : > { %v2522_v47 = vpop.permute.xlu2 %341 }
  0x80   : > { %v2518_v45 = vpop.permute.xlu1 %371  ;;  %v2520_v46 = vpop.permute.xlu0 %381 }
  0x87   : > { %v2528_v50 = vpop.permute.xlu2 %326 }
  0x88   : > { %v2526_v49 = vpop.permute.xlu0 %376 }
  0x8e   : > { %v2524_v48 = vpop.permute.xlu1 %366 }
  0x8f   : > { %v312_v55 = vpop.permute.xlu2 %311 }
  0x90   : > { %v2536_v54 = vpop.permute.xlu0 %351 }
  0x96   : > { %v2530_v51 = vpop.permute.xlu1 %346 }
  0x97   : > { %v2532_v52 = vpop.f32.mrf.mxu0 }
  0x98   : > { %v2534_v53 = vpop.f32.mrf.mxu1  ;;  %v2574_v15 = vpop.permute.xlu0 %336 }
  0x9e   : > { %v480_v56 = vpop.f32.mrf.mxu2  ;;  %v2538_v57 = vpop.permute.xlu1 %331 }
  0x9f   : > { %v2540_v58 = vadd.f32 %v480_v56, %v357_v44  ;;  %v542_v59 = vpop.f32.mrf.mxu3  ;;  %v453_v60 = vpop.f32.mrf.mxu0 }
  0xa0   : > { %v2543_v61 = vadd.f32 %v542_v59, %v2536_v54  ;;  %v2545_v62 = vadd.f32 %v453_v60, %v312_v55  ;;  %v518_v63 = vpop.f32.mrf.mxu1  ;;  %v2609_v38 = vpop.permute.xlu0 %321 }
  0xa1   : > { %v2548_v0 = vmul.f32 0.70710677, %v2540_v58  ;;  %v2550_v1 = vadd.f32 %v518_v63, %v312_v55 }
  0xa2   : > { %3942 = vst [vmem:[#allocation2_spill] sm:$0xff] %v2545_v62  ;;  %v2553_v2 = vmul.f32 0.70710677, %v2543_v61  ;;  %v2563_v6 = vmul.f32 0.70710677, %v2545_v62 }
  0xa3   : > { %v1427_v3 = vmul.f32 %v2548_v0, %v2548_v0  ;;  %v2558_v4 = vmul.f32 0.70710677, %v2550_v1 }
  0xa4   : > { %v1387_v5 = vmul.f32 %v2553_v2, %v2553_v2  ;;  %3943 = vst [vmem:[#allocation3_spill] sm:$0xff] %v2563_v6  ;;  %v707_v17 = vmul.f32 %v2563_v6, %v2563_v6 }
  0xa5   : > { %v2565_v7 = vmin.f32 %v1427_v3, 16.0  ;;  %v747_v8 = vmul.f32 %v2558_v4, %v2558_v4 }
  0xa6   : > { %v2569_v9 = vmin.f32 %v1387_v5, 16.0  ;;  %v483_v10 = vpop.f32.mrf.mxu2  ;;  %v317_v11 = vpop.permute.xlu1 %316  ;;  %v2592_v25 = vmin.f32 %v707_v17, 16.0 }
  0xa7   : > { %v2572_v12 = vadd.f32 %v483_v10, %v2516_v43  ;;  %v545_v13 = vpop.f32.mrf.mxu3  ;;  %v456_v14 = vpop.f32.mrf.mxu0  ;;  %v1429_v16 = vmul.f32 2.1237322e-06, %v2565_v7  ;;  %v2581_v19 = vmin.f32 %v747_v8, 16.0 }
  0xa8   : > { %3944 = vst [vmem:[#allocation4_spill] sm:$0xff] %v2569_v9  ;;  %v2579_v18 = vadd.f32 %v545_v13, %v357_v44  ;;  %v1389_v20 = vmul.f32 2.1237322e-06, %v2569_v9  ;;  %v2587_v22 = vadd.f32 %v456_v14, %v317_v11  ;;  %v521_v31 = vpop.f32.mrf.mxu1  ;;  %v709_v33 = vmul.f32 2.1237322e-06, %v2592_v25 }
  0xa9   : > { %3945 = vst [vmem:[#allocation5_spill] sm:$0xff] %v2581_v19  ;;  %v2585_v21 = vmul.f32 0.70710677, %v2572_v12  ;;  %v1430_v24 = vadd.f32 0.00028619796, %v1429_v16  ;;  %v2606_v36 = vadd.f32 %v521_v31, %v317_v11 }
  0xaa   : > { %3946 = vst [vmem:[#allocation6_spill] sm:$0xff] %v2587_v22  ;;  %v2590_v23 = vmul.f32 0.70710677, %v2579_v18  ;;  %v749_v26 = vmul.f32 2.1237322e-06, %v2581_v19 }
  0xab   : > { %3947 = vst [vmem:[#allocation7_spill] sm:$0xff] %v2592_v25  ;;  %v1507_v27 = vmul.f32 %v2585_v21, %v2585_v21  ;;  %v1390_v28 = vadd.f32 0.00028619796, %v1389_v20  ;;  %v2600_v30 = vmul.f32 0.70710677, %v2587_v22  ;;  %v1431_v32 = vmul.f32 %v1430_v24, %v2565_v7 }
  0xac   : > { %v1467_v29 = vmul.f32 %v2590_v23, %v2590_v23  ;;  %v750_v34 = vadd.f32 0.00028619796, %v749_v26  ;;  %v710_v42 = vadd.f32 0.00028619796, %v709_v33  ;;  %v2618_v56 = vmul.f32 0.70710677, %v2606_v36  ;;  %v307_v26 = vpop.permute.xlu0 %306 }
  0xad   : > { %3948 = vst [vmem:[#allocation8_spill] sm:$0xff] %v2600_v30  ;;  %v2604_v35 = vmin.f32 %v1507_v27, 16.0  ;;  %v1391_v37 = vmul.f32 %v1390_v28, %v2569_v9  ;;  %v787_v40 = vmul.f32 %v2600_v30, %v2600_v30  ;;  %v1432_v41 = vadd.f32 0.0036580483, %v1431_v32 }
  0xae   : > { %v2611_v39 = vmin.f32 %v1467_v29, 16.0  ;;  %v751_v44 = vmul.f32 %v750_v34, %v2581_v19  ;;  %v711_v5 = vmul.f32 %v710_v42, %v2592_v25  ;;  %v827_v11 = vmul.f32 %v2618_v56, %v2618_v56  ;;  %v486_v13 = vpop.f32.mrf.mxu2 }
  0xaf   : > { %v1509_v55 = vmul.f32 2.1237322e-06, %v2604_v35  ;;  %v1392_v59 = vadd.f32 0.0036580483, %v1391_v37  ;;  %v2621_v63 = vmin.f32 %v787_v40, 16.0  ;;  %v1433_v3 = vmul.f32 %v1432_v41, %v2565_v7  ;;  %v548_v37 = vpop.f32.mrf.mxu3 }
  0xb0   : > { %3949 = vst [vmem:[#allocation9_spill] sm:$0xff] %v2611_v39  ;;  %v1469_v60 = vmul.f32 2.1237322e-06, %v2611_v39  ;;  %v752_v8 = vadd.f32 0.0036580483, %v751_v44  ;;  %v2630_v27 = vadd.f32 %v486_v13, %v2524_v48  ;;  %v2634_v31 = vmin.f32 %v827_v11, 16.0 }
  0xb1   : > { %3950 = vst [vmem:[#allocation10_spill] sm:$0xff] %v2621_v63  ;;  %v1510_v10 = vadd.f32 0.00028619796, %v1509_v55  ;;  %v1393_v14 = vmul.f32 %v1392_v59, %v2569_v9  ;;  %v789_v17 = vmul.f32 2.1237322e-06, %v2621_v63  ;;  %v2638_v40 = vadd.f32 %v2534_v53, %v307_v26 }
  0xb2   : > { %v1470_v16 = vadd.f32 0.00028619796, %v1469_v60  ;;  %v1434_v20 = vadd.f32 0.05243302, %v1433_v3  ;;  %v712_v24 = vadd.f32 0.0036580483, %v711_v5  ;;  %v753_v28 = vmul.f32 %v752_v8, %v2581_v19 }
  0xb3   : > { %v1511_v29 = vmul.f32 %v1510_v10, %v2604_v35  ;;  %3951 = vst [vmem:[#allocation11_spill] sm:$0xff] %v2634_v31  ;;  %v1394_v32 = vadd.f32 0.05243302, %v1393_v14  ;;  %v790_v34 = vadd.f32 0.00028619796, %v789_v17  ;;  %v2641_v41 = vmul.f32 0.5, %v2540_v58 }
  0xb4   : > { %v1471_v33 = vmul.f32 %v1470_v16, %v2611_v39  ;;  %3952 = vst [vmem:[#allocation12_spill] sm:$0xff] %v2638_v40  ;;  %v1435_v42 = vmul.f32 %v1434_v20, %v2565_v7  ;;  %v713_v44 = vmul.f32 %v712_v24, %v2592_v25  ;;  %v2646_v55 = vmul.f32 0.70710677, %v2630_v27  ;;  %v459_v16 = vpop.f32.mrf.mxu0 }
  0xb5   : > { %3953 = vst [vmem:[#allocation13_spill] sm:$0xff] %v2641_v41  ;;  %v754_v59 = vadd.f32 0.05243302, %v753_v28  ;;  %v1512_v60 = vadd.f32 0.0036580483, %v1511_v29  ;;  %v2650_v5 = vadd.f32 %v548_v37, %v2516_v43  ;;  %v1395_v53 = vmul.f32 %v1394_v32, %v2569_v9  ;;  %v524_v29 = vpop.f32.mrf.mxu1 }
  0xb6   : > { %v829_v3 = vmul.f32 2.1237322e-06, %v2634_v31  ;;  %v1472_v8 = vadd.f32 0.0036580483, %v1471_v33  ;;  %v791_v58 = vmul.f32 %v790_v34, %v2621_v63  ;;  %v1587_v10 = vmul.f32 %v2646_v55, %v2646_v55 }
  0xb7   : > { %v2657_v11 = vmul.f32 0.5, %v2543_v61  ;;  %v2660_v13 = vmul.f32 0.5, %v2550_v1  ;;  %v2663_v14 = vmul.f32 0.5, %v2572_v12  ;;  %v2666_v43 = vmul.f32 0.70710677, %v2638_v40 }
  0xb8   : > { %v1436_v17 = vadd.f32 0.18741608, %v1435_v42  ;;  %v714_v20 = vadd.f32 0.05243302, %v713_v44  ;;  %v2669_v24 = vadd.f32 %v2532_v52, %v307_v26  ;;  %v2671_v28 = vmin.f32 %v1587_v10, 16.0 }
  0xb9   : > { %3954 = vst [vmem:[#allocation14_spill] sm:$0xff] %v2657_v11  ;;  %v755_v61 = vmul.f32 %v754_v59, %v2581_v19  ;;  %v1513_v1 = vmul.f32 %v1512_v60, %v2604_v35  ;;  %v830_v32 = vadd.f32 0.00028619796, %v829_v3  ;;  %v2676_v12 = vmul.f32 0.70710677, %v2650_v5 }
  0xba   : > { %3955 = vst [vmem:[#allocation15_spill] sm:$0xff] %v2660_v13  ;;  %v1396_v33 = vadd.f32 0.18741608, %v1395_v53  ;;  %v1473_v34 = vmul.f32 %v1472_v8, %v2611_v39  ;;  %v792_v37 = vadd.f32 0.0036580483, %v791_v58  ;;  %v2680_v42 = vadd.f32 %v459_v16, %v2609_v38  ;;  %v489_v58 = vpop.f32.mrf.mxu2 }
  0xbb   : > { %3956 = vst [vmem:[#allocation16_spill] sm:$0xff] %v2663_v14  ;;  %v667_v52 = vmul.f32 %v2666_v43, %v2666_v43  ;;  %v1589_v26 = vmul.f32 2.1237322e-06, %v2671_v28  ;;  %v1547_v44 = vmul.f32 %v2676_v12, %v2676_v12  ;;  %v2688_v59 = vadd.f32 %v524_v29, %v2609_v38 }
  0xbc   : > { %3957 = vst [vmem:[#allocation17_spill] sm:$0xff] %v2666_v43  ;;  %v1437_v60 = vmul.f32 %v1436_v17, %v2565_v7  ;;  %v715_v3 = vmul.f32 %v714_v20, %v2592_v25  ;;  %v2693_v53 = vmul.f32 0.5, %v2579_v18  ;;  %v2696_v8 = vmul.f32 0.5, %v2606_v36 }
  0xbd   : > { %3958 = vst [vmem:[#allocation18_spill] sm:$0xff] %v2669_v24  ;;  %v1514_v10 = vadd.f32 0.05243302, %v1513_v1  ;;  %v831_v16 = vmul.f32 %v830_v32, %v2634_v31  ;;  %v2699_v62 = vmin.f32 %v1547_v44, 16.0  ;;  %v2702_v22 = vmul.f32 0.70710677, %v2680_v42 }
  0xbe   : > { %3959 = vst [vmem:[#allocation19_spill] sm:$0xff] %v2680_v42  ;;  %v1397_v38 = vmul.f32 %v1396_v33, %v2569_v9  ;;  %v756_v17 = vadd.f32 0.18741608, %v755_v61  ;;  %v1474_v29 = vadd.f32 0.05243302, %v1473_v34  ;;  %v793_v18 = vmul.f32 %v792_v37, %v2621_v63 }
  0xbf   : > { %3960 = vst [vmem:[#allocation20_spill] sm:$0xff] %v2693_v53  ;;  %v2706_v20 = vmul.f32 0.70710677, %v2688_v59  ;;  %v2709_v36 = vmin.f32 %v667_v52, 16.0  ;;  %v1590_v6 = vadd.f32 0.00028619796, %v1589_v26  ;;  %v2712_v1 = vadd.f32 %v489_v58, %v2518_v45  ;;  %v551_v52 = vpop.f32.mrf.mxu3 }
  0xc0   : > { %3961 = vst [vmem:[#allocation21_spill] sm:$0xff] %v2696_v8  ;;  %v716_v32 = vadd.f32 0.18741608, %v715_v3  ;;  %v1549_v44 = vmul.f32 2.1237322e-06, %v2699_v62  ;;  %v867_v30 = vmul.f32 %v2702_v22, %v2702_v22  ;;  %v1515_v34 = vmul.f32 %v1514_v10, %v2604_v35 }
  0xc1   : > { %3962 = vst [vmem:[#allocation22_spill] sm:$0xff] %v2702_v22  ;;  %v907_v61 = vmul.f32 %v2706_v20, %v2706_v20  ;;  %v1438_v33 = vadd.f32 1.1283791, %v1437_v60  ;;  %v832_v42 = vadd.f32 0.0036580483, %v831_v16  ;;  %v757_v58 = vmul.f32 %v756_v17, %v2581_v19 }
  0xc2   : > { %3963 = vst [vmem:[#allocation23_spill] sm:$0xff] %v2709_v36  ;;  %v2721_v37 = vmul.f32 0.70710677, %v2669_v24  ;;  %v1398_v26 = vadd.f32 1.1283791, %v1397_v38  ;;  %v1475_v3 = vmul.f32 %v1474_v29, %v2611_v39  ;;  %v1591_v22 = vmul.f32 %v1590_v6, %v2671_v28 }
  0xc3   : > { %v2725_v43 = vmin.f32 %v907_v61, 16.0  ;;  %v794_v40 = vadd.f32 0.05243302, %v793_v18  ;;  %v669_v13 = vmul.f32 2.1237322e-06, %v2709_v36  ;;  %v2732_v16 = vmin.f32 %v867_v30, 16.0 }
  0xc4   : > { %3964 = vst [vmem:[#allocation24_spill] sm:$0xff] %v2721_v37  ;;  %v2730_v60 = vmul.f32 0.70710677, %v2712_v1  ;;  %v1550_v10 = vadd.f32 0.00028619796, %v1549_v44  ;;  %v2736_v38 = vadd.f32 %v551_v52, %v2524_v48  ;;  %v833_v29 = vmul.f32 %v832_v42, %v2634_v31 }
  0xc5   : > { %3965 = vst [vmem:[#allocation25_spill] sm:$0xff] %v2725_v43  ;;  %v909_v24 = vmul.f32 2.1237322e-06, %v2725_v43  ;;  %v1516_v17 = vadd.f32 0.18741608, %v1515_v34  ;;  %v627_v18 = vmul.f32 %v2721_v37, %v2721_v37  ;;  %v2744_v61 = vmul.f32 %v716_v32, %v2592_v25 }
  0xc6   : > { %3966 = vst [vmem:[#allocation26_spill] sm:$0xff] %v2732_v16  ;;  %v1667_v6 = vmul.f32 %v2730_v60, %v2730_v60  ;;  %v758_v44 = vadd.f32 1.1283791, %v757_v58  ;;  %v1476_v30 = vadd.f32 0.18741608, %v1475_v3  ;;  %v2747_v19 = vmul.f32 %v1438_v33, %v2548_v0 }
  0xc7   : > { %3967 = vst [vmem:[#allocation27_spill] sm:$0xff] %v2744_v61  ;;  %v910_v8 = vadd.f32 0.00028619796, %v909_v24  ;;  %v670_v48 = vadd.f32 0.00028619796, %v669_v13  ;;  %v795_v42 = vmul.f32 %v794_v40, %v2621_v63  ;;  %v1551_v37 = vmul.f32 %v1550_v10, %v2699_v62 }
  0xc8   : > { %3968 = vst [vmem:[#allocation28_spill] sm:$0xff] %v2747_v19  ;;  %v1592_v52 = vadd.f32 0.0036580483, %v1591_v22  ;;  %v2749_v34 = vmin.f32 %v1667_v6, 16.0  ;;  %v869_v11 = vmul.f32 2.1237322e-06, %v2732_v16  ;;  %v1517_v32 = vmul.f32 %v1516_v17, %v2604_v35 }
  0xc9   : > { %v2755_v53 = vmul.f32 0.70710677, %v2736_v38  ;;  %v834_v58 = vadd.f32 0.05243302, %v833_v29  ;;  %v2758_v24 = vmin.f32 %v627_v18, 16.0  ;;  %v2762_v22 = vmul.f32 %v1398_v26, %v2553_v2  ;;  %v462_v18 = vpop.f32.mrf.mxu0 }
  0xca   : > { %v1669_v0 = vmul.f32 2.1237322e-06, %v2749_v34  ;;  %v2765_v13 = vmul.f32 %v758_v44, %v2558_v4  ;;  %v911_v40 = vmul.f32 %v910_v8, %v2725_v43  ;;  %v1477_v3 = vmul.f32 %v1476_v30, %v2611_v39  ;;  %v527_v44 = vpop.f32.mrf.mxu1 }
  0xcb   : > { %3969 = vst [vmem:[#allocation29_spill] sm:$0xff] %v2758_v24  ;;  %v1627_v33 = vmul.f32 %v2755_v53, %v2755_v53  ;;  %v671_v10 = vmul.f32 %v670_v48, %v2709_v36  ;;  %v1593_v17 = vmul.f32 %v1592_v52, %v2671_v28  ;;  %v2774_v6 = vmul.f32 0.5, %v2630_v27 }
  0xcc   : > { %3970 = vst [vmem:[#allocation30_spill] sm:$0xff] %v2762_v22  ;;  %v1670_v29 = vadd.f32 0.00028619796, %v1669_v0  ;;  %v1552_v2 = vadd.f32 0.0036580483, %v1551_v37  ;;  %v2785_v27 = vadd.f32 %v462_v18, %v2528_v50  ;;  %v2788_v25 = vadd.f32 %v527_v44, %v2528_v50 }
  0xcd   : > { %3971 = vst [vmem:[#allocation31_spill] sm:$0xff] %v2765_v13  ;;  %v870_v26 = vadd.f32 0.00028619796, %v869_v11  ;;  %v2776_v4 = vmin.f32 %v1627_v33, 16.0  ;;  %v1518_v8 = vadd.f32 1.1283791, %v1517_v32  ;;  %v835_v13 = vmul.f32 %v834_v58, %v2634_v31 }
  0xce   : > { %v2778_v61 = vadd.f32 0.18741608, %v795_v42  ;;  %v629_v30 = vmul.f32 2.1237322e-06, %v2758_v24  ;;  %v912_v48 = vadd.f32 0.0036580483, %v911_v40  ;;  %v1671_v52 = vmul.f32 %v1670_v29, %v2749_v34  ;;  %v492_v29 = vpop.f32.mrf.mxu2 }
  0xcf   : > { %v1629_v0 = vmul.f32 2.1237322e-06, %v2776_v4  ;;  %3973 = vst [vmem:[#allocation33_spill] sm:$0xff] %v2785_v27  ;;  %v1478_v37 = vadd.f32 1.1283791, %v1477_v3  ;;  %v1553_v42 = vmul.f32 %v1552_v2, %v2699_v62  ;;  %v871_v32 = vmul.f32 %v870_v26, %v2732_v16 }
  0xd0   : > { %3972 = vst [vmem:[#allocation32_spill] sm:$0xff] %v2778_v61  ;;  %v672_v11 = vadd.f32 0.0036580483, %v671_v10  ;;  %v1594_v33 = vadd.f32 0.05243302, %v1593_v17  ;;  %v2796_v61 = vmul.f32 %v1518_v8, %v2585_v21  ;;  %v2799_v3 = vmul.f32 0.5, %v2650_v5 }
  0xd1   : > { %v1630_v58 = vadd.f32 0.00028619796, %v1629_v0  ;;  %v2793_v40 = vmul.f32 0.70710677, %v2785_v27  ;;  %v836_v18 = vadd.f32 0.18741608, %v835_v13  ;;  %v913_v50 = vmul.f32 %v912_v48, %v2725_v43 }
  0xd2   : > { %v630_v63 = vadd.f32 0.00028619796, %v629_v30  ;;  %3975 = vst [vmem:[#allocation35_spill] sm:$0xff] %v2799_v3  ;;  %v1672_v10 = vadd.f32 0.0036580483, %v1671_v52  ;;  %v673_v26 = vmul.f32 %v672_v11, %v2709_v36  ;;  %v1595_v44 = vmul.f32 %v1594_v33, %v2671_v28  ;;  %v554_v52 = vpop.f32.mrf.mxu3 }
  0xd3   : > { %3974 = vst [vmem:[#allocation34_spill] sm:$0xff] %v2793_v40  ;;  %v947_v17 = vmul.f32 %v2793_v40, %v2793_v40  ;;  %v2805_v2 = vmul.f32 0.70710677, %v2788_v25  ;;  %v1631_v21 = vmul.f32 %v1630_v58, %v2776_v4  ;;  %v2811_v13 = vadd.f32 %v492_v29, %v2526_v49 }
  0xd4   : > { %v1554_v5 = vadd.f32 0.05243302, %v1553_v42  ;;  %v872_v8 = vadd.f32 0.0036580483, %v871_v32  ;;  %v2818_v0 = vmul.f32 %v1478_v37, %v2590_v23  ;;  %v837_v11 = vmul.f32 %v836_v18, %v2634_v31 }
  0xd5   : > { %v2813_v30 = vmin.f32 %v947_v17, 16.0  ;;  %v987_v48 = vmul.f32 %v2805_v2, %v2805_v2  ;;  %v2822_v33 = vmul.f32 %v630_v63, %v2758_v24  ;;  %v2825_v58 = vmul.f32 0.70710677, %v2811_v13  ;;  %v465_v63 = vpop.f32.mrf.mxu0  ;;  %v530_v24 = vpop.f32.mrf.mxu1 }
  0xd6   : > { %3977 = vst [vmem:[#allocation37_spill] sm:$0xff] %v2818_v0  ;;  %v914_v29 = vadd.f32 0.05243302, %v913_v50  ;;  %v1673_v42 = vmul.f32 %v1672_v10, %v2749_v34  ;;  %v674_v27 = vadd.f32 0.05243302, %v673_v26  ;;  %v2834_v37 = vadd.f32 %v554_v52, %v2518_v45  ;;  %v495_v0 = vpop.f32.mrf.mxu2 }
  0xd7   : > { %3976 = vst [vmem:[#allocation36_spill] sm:$0xff] %v2813_v30  ;;  %v949_v32 = vmul.f32 2.1237322e-06, %v2813_v30  ;;  %v2829_v17 = vmin.f32 %v987_v48, 16.0  ;;  %v1632_v40 = vadd.f32 0.0036580483, %v1631_v21  ;;  %v1747_v23 = vmul.f32 %v2825_v58, %v2825_v58 }
  0xd8   : > { %3978 = vst [vmem:[#allocation38_spill] sm:$0xff] %v2822_v33  ;;  %v1596_v18 = vadd.f32 0.18741608, %v1595_v44  ;;  %v1555_v33 = vmul.f32 %v1554_v5, %v2699_v62  ;;  %v873_v50 = vmul.f32 %v872_v8, %v2732_v16  ;;  %v2840_v48 = vmul.f32 0.5, %v2688_v59 }
  0xd9   : > { %3979 = vst [vmem:[#allocation39_spill] sm:$0xff] %v2829_v17  ;;  %v989_v10 = vmul.f32 2.1237322e-06, %v2829_v17  ;;  %v950_v26 = vadd.f32 0.00028619796, %v949_v32  ;;  %v2842_v21 = vmin.f32 %v1747_v23, 16.0  ;;  %v915_v45 = vmul.f32 %v914_v29, %v2725_v43 }
  0xda   : > { %3980 = vst [vmem:[#allocation40_spill] sm:$0xff] %v2840_v48  ;;  %v2845_v31 = vmul.f32 0.70710677, %v2834_v37  ;;  %v1674_v52 = vadd.f32 0.05243302, %v1673_v42  ;;  %v2849_v5 = vadd.f32 %v465_v63, %v2538_v57  ;;  %v1633_v8 = vmul.f32 %v1632_v40, %v2776_v4 }
  0xdb   : > { %v990_v44 = vadd.f32 0.00028619796, %v989_v10  ;;  %v1749_v22 = vmul.f32 2.1237322e-06, %v2842_v21  ;;  %v2856_v32 = vadd.f32 %v530_v24, %v2538_v57  ;;  %v838_v23 = vadd.f32 1.1283791, %v837_v11 }
  0xdc   : > { %v1707_v59 = vmul.f32 %v2845_v31, %v2845_v31  ;;  %v675_v48 = vmul.f32 %v674_v27, %v2709_v36  ;;  %v1556_v3 = vadd.f32 0.18741608, %v1555_v33  ;;  %v874_v29 = vadd.f32 0.05243302, %v873_v50 }
  0xdd   : > { %v951_v42 = vmul.f32 %v950_v26, %v2813_v30  ;;  %v991_v63 = vmul.f32 %v990_v44, %v2829_v17  ;;  %v2864_v40 = vmul.f32 0.70710677, %v2849_v5  ;;  %v1597_v41 = vmul.f32 %v1596_v18, %v2671_v28 }
  0xde   : > { %v2861_v10 = vmin.f32 %v1707_v59, 16.0  ;;  %v916_v19 = vadd.f32 0.18741608, %v915_v45  ;;  %v1675_v57 = vmul.f32 %v1674_v52, %v2749_v34  ;;  %v1750_v24 = vadd.f32 0.00028619796, %v1749_v22 }
  0xdf   : > { %v1634_v11 = vadd.f32 0.05243302, %v1633_v8  ;;  %v1027_v33 = vmul.f32 %v2864_v40, %v2864_v40  ;;  %v2872_v50 = vmul.f32 0.70710677, %v2856_v32  ;;  %v1557_v26 = vmul.f32 %v1556_v3, %v2699_v62 }
  0xe0   : > { %v1709_v27 = vmul.f32 2.1237322e-06, %v2861_v10  ;;  %v875_v44 = vmul.f32 %v874_v29, %v2732_v16  ;;  %v2877_v59 = vmul.f32 0.5, %v2712_v1  ;;  %v2880_v18 = vadd.f32 %v495_v0, %v2520_v46 }
  0xe1   : > { %v952_v22 = vadd.f32 0.0036580483, %v951_v42  ;;  %v992_v45 = vadd.f32 0.0036580483, %v991_v63  ;;  %v2882_v52 = vmin.f32 %v1027_v33, 16.0  ;;  %v1067_v8 = vmul.f32 %v2872_v50, %v2872_v50 }
  0xe2   : > { %v2887_v36 = vmul.f32 %v838_v23, %v2618_v56  ;;  %v1598_v9 = vadd.f32 1.1283791, %v1597_v41  ;;  %v1751_v3 = vmul.f32 %v1750_v24, %v2842_v21  ;;  %v1710_v29 = vadd.f32 0.00028619796, %v1709_v27  ;;  %v557_v41 = vpop.f32.mrf.mxu3 }
  0xe3   : > { %3981 = vst [vmem:[#allocation41_spill] sm:$0xff] %v2882_v52  ;;  %v2890_v14 = vadd.f32 0.18741608, %v675_v48  ;;  %v917_v1 = vmul.f32 %v916_v19, %v2725_v43  ;;  %v1676_v0 = vadd.f32 0.18741608, %v1675_v57  ;;  %v1635_v42 = vmul.f32 %v1634_v11, %v2776_v4 }
  0xe4   : > { %3982 = vst [vmem:[#allocation42_spill] sm:$0xff] %v2887_v36  ;;  %v2895_v63 = vmul.f32 0.5, %v2736_v38  ;;  %v1029_v33 = vmul.f32 2.1237322e-06, %v2882_v52  ;;  %v2898_v39 = vmin.f32 %v1067_v8, 16.0  ;;  %v953_v48 = vmul.f32 %v952_v22, %v2813_v30  ;;  %v468_v8 = vpop.f32.mrf.mxu0 }
  0xe5   : > { %3983 = vst [vmem:[#allocation43_spill] sm:$0xff] %v2890_v14  ;;  %v2901_v56 = vmul.f32 0.70710677, %v2880_v18  ;;  %v1558_v23 = vadd.f32 1.1283791, %v1557_v26  ;;  %v993_v19 = vmul.f32 %v992_v45, %v2829_v17  ;;  %v2906_v57 = vmul.f32 %v1598_v9, %v2646_v55 }
  0xe6   : > { %3984 = vst [vmem:[#allocation44_spill] sm:$0xff] %v2895_v63  ;;  %v876_v24 = vadd.f32 0.18741608, %v875_v44  ;;  %v1752_v11 = vadd.f32 0.0036580483, %v1751_v3  ;;  %v1711_v38 = vmul.f32 %v1710_v29, %v2861_v10  ;;  %v1677_v36 = vmul.f32 %v1676_v0, %v2749_v34  ;;  %v533_v0 = vpop.f32.mrf.mxu1 }
  0xe7   : > { %v1827_v27 = vmul.f32 %v2901_v56, %v2901_v56  ;;  %v918_v14 = vadd.f32 1.1283791, %v917_v1  ;;  %v1636_v43 = vadd.f32 0.18741608, %v1635_v42  ;;  %v2913_v26 = vadd.f32 %v557_v41, %v2526_v49 }
  0xe8   : > { %v2916_v44 = vmul.f32 0.5, %v2788_v25  ;;  %v1030_v22 = vadd.f32 0.00028619796, %v1029_v33  ;;  %v1069_v9 = vmul.f32 2.1237322e-06, %v2898_v39  ;;  %v2922_v45 = vmul.f32 %v1558_v23, %v2676_v12 }
  0xe9   : > { %v2919_v55 = vmin.f32 %v1827_v27, 16.0  ;;  %v2925_v3 = vmul.f32 %v876_v24, %v2732_v16  ;;  %v954_v29 = vadd.f32 0.05243302, %v953_v48  ;;  %v994_v1 = vadd.f32 0.05243302, %v993_v19 }
  0xea   : > { %3985 = vst [vmem:[#allocation45_spill] sm:$0xff] %v2916_v44  ;;  %v2928_v49 = vmul.f32 0.5, %v2811_v13  ;;  %v1753_v25 = vmul.f32 %v1752_v11, %v2842_v21  ;;  %v1712_v42 = vadd.f32 0.0036580483, %v1711_v38  ;;  %v2932_v33 = vadd.f32 %v468_v8, %v2574_v15 }
  0xeb   : > { %3986 = vst [vmem:[#allocation46_spill] sm:$0xff] %v2922_v45  ;;  %v1678_v41 = vadd.f32 1.1283791, %v1677_v36  ;;  %v1637_v27 = vmul.f32 %v1636_v43, %v2776_v4  ;;  %v1829_v12 = vmul.f32 2.1237322e-06, %v2919_v55  ;;  %v2940_v24 = vmul.f32 %v918_v14, %v2706_v20 }
  0xec   : > { %3987 = vst [vmem:[#allocation47_spill] sm:$0xff] %v2925_v3  ;;  %v2937_v23 = vmul.f32 0.70710677, %v2913_v26  ;;  %v1031_v13 = vmul.f32 %v1030_v22, %v2882_v52  ;;  %v1070_v48 = vadd.f32 0.00028619796, %v1069_v9  ;;  %v2944_v19 = vadd.f32 %v533_v0, %v2574_v15  ;;  %v560_v15 = vpop.f32.mrf.mxu3 }
  0xed   : > { %3988 = vst [vmem:[#allocation48_spill] sm:$0xff] %v2940_v24  ;;  %v955_v11 = vmul.f32 %v954_v29, %v2813_v30  ;;  %v995_v36 = vmul.f32 %v994_v1, %v2829_v17  ;;  %v2949_v43 = vmul.f32 0.5, %v2834_v37  ;;  %v1754_v8 = vadd.f32 0.05243302, %v1753_v25 }
  0xee   : > { %v1787_v38 = vmul.f32 %v2937_v23, %v2937_v23  ;;  %v1713_v14 = vmul.f32 %v1712_v42, %v2861_v10  ;;  %v2955_v20 = vmul.f32 0.5, %v2849_v5  ;;  %v2958_v22 = vmul.f32 0.70710677, %v2932_v33  ;;  %v471_v42 = vpop.f32.mrf.mxu0 }
  0xef   : > { %3989 = vst [vmem:[#allocation49_spill] sm:$0xff] %v2949_v43  ;;  %v2961_v9 = vmul.f32 %v1678_v41, %v2730_v60  ;;  %v1638_v29 = vadd.f32 1.1283791, %v1637_v27  ;;  %v1830_v1 = vadd.f32 0.00028619796, %v1829_v12  ;;  %v1071_v3 = vmul.f32 %v1070_v48, %v2898_v39 }
  0xf0   : > { %3990 = vst [vmem:[#allocation50_spill] sm:$0xff] %v2955_v20  ;;  %v2963_v37 = vmin.f32 %v1787_v38, 16.0  ;;  %v1032_v0 = vadd.f32 0.0036580483, %v1031_v13  ;;  %v1107_v25 = vmul.f32 %v2958_v22, %v2958_v22  ;;  %v2969_v5 = vmul.f32 0.70710677, %v2944_v19 }
  0xf1   : > { %3991 = vst [vmem:[#allocation51_spill] sm:$0xff] %v2958_v22  ;;  %v956_v20 = vadd.f32 0.18741608, %v955_v11  ;;  %v996_v24 = vadd.f32 0.18741608, %v995_v36  ;;  %v2973_v60 = vadd.f32 %v560_v15, %v2520_v46  ;;  %v1755_v41 = vmul.f32 %v1754_v8, %v2842_v21 }
  0xf2   : > { %v1789_v44 = vmul.f32 2.1237322e-06, %v2963_v37  ;;  %v1714_v27 = vadd.f32 0.05243302, %v1713_v14  ;;  %v2976_v12 = vmin.f32 %v1107_v25, 16.0  ;;  %v1147_v13 = vmul.f32 %v2969_v5, %v2969_v5  ;;  %v536_v25 = vpop.f32.mrf.mxu1 }
  0xf3   : > { %v2981_v48 = vmul.f32 %v1638_v29, %v2755_v53  ;;  %v2984_v38 = vmul.f32 0.5, %v2856_v32  ;;  %v1831_v11 = vmul.f32 %v1830_v1, %v2919_v55  ;;  %v1033_v46 = vmul.f32 %v1032_v0, %v2882_v52 }
  0xf4   : > { %3992 = vst [vmem:[#allocation52_spill] sm:$0xff] %v2976_v12  ;;  %v1790_v36 = vadd.f32 0.00028619796, %v1789_v44  ;;  %v1072_v15 = vadd.f32 0.0036580483, %v1071_v3  ;;  %v2990_v14 = vadd.f32 %v471_v42, %v2522_v47  ;;  %v2993_v16 = vmul.f32 0.5, %v2880_v18 }
  0xf5   : > { %3993 = vst [vmem:[#allocation53_spill] sm:$0xff] %v2981_v48  ;;  %v1109_v8 = vmul.f32 2.1237322e-06, %v2976_v12  ;;  %v2996_v29 = vmin.f32 %v1147_v13, 16.0  ;;  %v2999_v32 = vmul.f32 0.70710677, %v2973_v60  ;;  %v3002_v44 = vmul.f32 %v956_v20, %v2813_v30 }
  0xf6   : > { %3994 = vst [vmem:[#allocation54_spill] sm:$0xff] %v2984_v38  ;;  %v1791_v53 = vmul.f32 %v1790_v36, %v2963_v37  ;;  %v997_v3 = vmul.f32 %v996_v24, %v2829_v17  ;;  %v1756_v1 = vadd.f32 0.18741608, %v1755_v41  ;;  %v1715_v0 = vmul.f32 %v1714_v27, %v2861_v10 }
  0xf7   : > { %3995 = vst [vmem:[#allocation55_spill] sm:$0xff] %v3002_v44  ;;  %v1832_v42 = vadd.f32 0.0036580483, %v1831_v11  ;;  %v1110_v22 = vadd.f32 0.00028619796, %v1109_v8  ;;  %v1867_v36 = vmul.f32 %v2999_v32, %v2999_v32  ;;  %v1073_v38 = vmul.f32 %v1072_v15, %v2898_v39  ;;  %v474_v15 = vpop.f32.mrf.mxu0 }
  0xf8   : > { %v1149_v18 = vmul.f32 2.1237322e-06, %v2996_v29  ;;  %v1034_v13 = vadd.f32 0.05243302, %v1033_v46  ;;  %v3011_v45 = vmul.f32 0.5, %v2913_v26  ;;  %v3019_v27 = vadd.f32 %v536_v25, %v2522_v47 }
  0xf9   : > { %v3014_v20 = vmul.f32 0.70710677, %v2990_v14  ;;  %v1792_v24 = vadd.f32 0.0036580483, %v1791_v53  ;;  %v3016_v44 = vmin.f32 %v1867_v36, 16.0  ;;  %v1757_v8 = vmul.f32 %v1756_v1, %v2842_v21 }
  0xfa   : > { %3996 = vst [vmem:[#allocation56_spill] sm:$0xff] %v3011_v45  ;;  %v1150_v41 = vadd.f32 0.00028619796, %v1149_v18  ;;  %v998_v11 = vadd.f32 1.1283791, %v997_v3  ;;  %v1833_v26 = vmul.f32 %v1832_v42, %v2919_v55  ;;  %v1111_v63 = vmul.f32 %v1110_v22, %v2976_v12 }
  0xfb   : > { %3997 = vst [vmem:[#allocation57_spill] sm:$0xff] %v3014_v20  ;;  %v1716_v30 = vadd.f32 0.18741608, %v1715_v0  ;;  %v1187_v46 = vmul.f32 %v3014_v20, %v3014_v20  ;;  %v1869_v18 = vmul.f32 2.1237322e-06, %v3016_v44  ;;  %v1035_v36 = vmul.f32 %v1034_v13, %v2882_v52  ;;  %v539_v13 = vpop.f32.mrf.mxu1 }
  0xfc   : > { %v1151_v53 = vmul.f32 %v1150_v41, %v2996_v29  ;;  %v1074_v47 = vadd.f32 0.05243302, %v1073_v38  ;;  %v3032_v3 = vmul.f32 0.70710677, %v3019_v27  ;;  %v1793_v1 = vmul.f32 %v1792_v24, %v2963_v37 }
  0xfd   : > { %v3029_v25 = vmin.f32 %v1187_v46, 16.0  ;;  %v1870_v20 = vadd.f32 0.00028619796, %v1869_v18  ;;  %v3036_v42 = vadd.f32 %v474_v15, %v2530_v51  ;;  %v3039_v22 = vmul.f32 %v998_v11, %v2805_v2 }
  0xfe   : > { %v1152_v0 = vadd.f32 0.0036580483, %v1151_v53  ;;  %v1758_v41 = vadd.f32 1.1283791, %v1757_v8  ;;  %v1227_v38 = vmul.f32 %v3032_v3, %v3032_v3  ;;  %v1717_v46 = vmul.f32 %v1716_v30, %v2861_v10 }
  0xff   : > { %3998 = vst [vmem:[#allocation58_spill] sm:$0xff] %v3036_v42  ;;  %v1189_v43 = vmul.f32 2.1237322e-06, %v3029_v25  ;;  %v1834_v48 = vadd.f32 0.05243302, %v1833_v26  ;;  %v1871_v53 = vmul.f32 %v1870_v20, %v3016_v44  ;;  %v1075_v8 = vmul.f32 %v1074_v47, %v2898_v39 }
 0x100   : > { %3999 = vst [vmem:[#allocation59_spill] sm:$0xff] %v3039_v22  ;;  %v1112_v45 = vadd.f32 0.0036580483, %v1111_v63  ;;  %v1153_v24 = vmul.f32 %v1152_v0, %v2996_v29  ;;  %v3047_v18 = vmin.f32 %v1227_v38, 16.0  ;;  %v3050_v2 = vmul.f32 0.70710677, %v3036_v42 }
 0x101   : > { %v1190_v15 = vadd.f32 0.00028619796, %v1189_v43  ;;  %v1036_v11 = vadd.f32 0.18741608, %v1035_v36  ;;  %v1794_v22 = vadd.f32 0.05243302, %v1793_v1  ;;  %v3054_v17 = vadd.f32 %v539_v13, %v2530_v51 }
 0x102   : > { %v1154_v30 = vadd.f32 0.05243302, %v1153_v24  ;;  %v1229_v26 = vmul.f32 2.1237322e-06, %v3047_v18  ;;  %v1267_v43 = vmul.f32 %v3050_v2, %v3050_v2  ;;  %v1718_v20 = vadd.f32 1.1283791, %v1717_v46  ;;  %v477_v24 = vpop.f32.mrf.mxu0 }
 0x103   : > { %v1191_v63 = vmul.f32 %v1190_v15, %v3029_v25  ;;  %v1835_v0 = vmul.f32 %v1834_v48, %v2919_v55  ;;  %v3062_v38 = vmul.f32 0.5, %v2932_v33  ;;  %v3065_v36 = vmul.f32 0.5, %v2944_v19 }
 0x104   : > { %v1113_v51 = vmul.f32 %v1112_v45, %v2976_v12  ;;  %v1872_v47 = vadd.f32 0.0036580483, %v1871_v53  ;;  %v1230_v1 = vadd.f32 0.00028619796, %v1229_v26  ;;  %v3068_v13 = vmin.f32 %v1267_v43, 16.0 }
 0x105   : > { %4000 = vst [vmem:[#allocation60_spill] sm:$0xff] %v3062_v38  ;;  %v3071_v15 = vmul.f32 %v1758_v41, %v2825_v58  ;;  %v1037_v46 = vmul.f32 %v1036_v11, %v2882_v52  ;;  %v1795_v48 = vmul.f32 %v1794_v22, %v2963_v37  ;;  %v3076_v33 = vmul.f32 0.70710677, %v3054_v17 }
 0x106   : > { %4001 = vst [vmem:[#allocation61_spill] sm:$0xff] %v3065_v36  ;;  %v1076_v38 = vadd.f32 0.18741608, %v1075_v8  ;;  %v1155_v19 = vmul.f32 %v1154_v30, %v2996_v29  ;;  %v1192_v42 = vadd.f32 0.0036580483, %v1191_v63  ;;  %v3081_v53 = vmul.f32 %v1718_v20, %v2845_v31 }
 0x107   : > { %4002 = vst [vmem:[#allocation62_spill] sm:$0xff] %v3076_v33  ;;  %v1269_v45 = vmul.f32 2.1237322e-06, %v3068_v13  ;;  %v1231_v26 = vmul.f32 %v1230_v1, %v3047_v18  ;;  %v1307_v58 = vmul.f32 %v3076_v33, %v3076_v33  ;;  %v3087_v41 = vadd.f32 %v477_v24, %v2536_v54 }
 0x108   : > { %v1836_v22 = vadd.f32 0.18741608, %v1835_v0  ;;  %v1114_v11 = vadd.f32 0.05243302, %v1113_v51  ;;  %v1873_v8 = vmul.f32 %v1872_v47, %v3016_v44  ;;  %v1038_v30 = vadd.f32 1.1283791, %v1037_v46 }
 0x109   : > { %4003 = vst [vmem:[#allocation63_spill] sm:$0xff] %v3087_v41  ;;  %v1270_v43 = vadd.f32 0.00028619796, %v1269_v45  ;;  %v1796_v63 = vadd.f32 0.18741608, %v1795_v48  ;;  %v3091_v52 = vmul.f32 0.5, %v2973_v60  ;;  %v1077_v20 = vmul.f32 %v1076_v38, %v2898_v39 }
 0x10a   : > { %v3093_v31 = vmin.f32 %v1307_v58, 16.0  ;;  %v1156_v1 = vadd.f32 0.18741608, %v1155_v19  ;;  %v1193_v36 = vmul.f32 %v1192_v42, %v3029_v25  ;;  %v3098_v54 = vmul.f32 0.70710677, %v3087_v41 }
 0x10b   : > { %v1232_v0 = vadd.f32 0.0036580483, %v1231_v26  ;;  %v1271_v51 = vmul.f32 %v1270_v43, %v3068_v13  ;;  %v1840_v24 = vmul.f32 3.8918573e-05, %v2919_v55  ;;  %v1837_v60 = vmul.f32 %v1836_v22, %v2919_v55 }
 0x10c   : > { %4004 = vst [vmem:[#allocation64_spill] sm:$0xff] %v3098_v54  ;;  %v1309_v47 = vmul.f32 2.1237322e-06, %v3093_v31  ;;  %v1115_v46 = vmul.f32 %v1114_v11, %v2976_v12  ;;  %v1874_v48 = vadd.f32 0.05243302, %v1873_v8  ;;  %v3106_v38 = vmul.f32 0.5, %v2990_v14 }
 0x10d   : > { %v1797_v42 = vmul.f32 %v1796_v63, %v2963_v37  ;;  %v1347_v45 = vmul.f32 %v3098_v54, %v3098_v54  ;;  %v1841_v26 = vadd.f32 0.001143296, %v1840_v24  ;;  %v3112_v58 = vmul.f32 %v1038_v30, %v2864_v40 }
 0x10e   : > { %4005 = vst [vmem:[#allocation65_spill] sm:$0xff] %v3106_v38  ;;  %v1310_v19 = vadd.f32 0.00028619796, %v1309_v47  ;;  %v1078_v43 = vadd.f32 1.1283791, %v1077_v20  ;;  %v1157_v41 = vmul.f32 %v1156_v1, %v2996_v29  ;;  %v1233_v11 = vmul.f32 %v1232_v0, %v3047_v18 }
 0x10f   : > { %4006 = vst [vmem:[#allocation66_spill] sm:$0xff] %v3112_v58  ;;  %v1194_v22 = vadd.f32 0.05243302, %v1193_v36  ;;  %v1272_v8 = vadd.f32 0.0036580483, %v1271_v51  ;;  %v1842_v14 = vmul.f32 %v1841_v26, %v2919_v55  ;;  %v1875_v33 = vmul.f32 %v1874_v48, %v3016_v44 }
 0x110   : > { %v1760_v38 = vmul.f32 3.8918573e-05, %v2842_v21  ;;  %v1838_v63 = vadd.f32 1.1283791, %v1837_v60  ;;  %v1116_v47 = vadd.f32 0.18741608, %v1115_v46  ;;  %v1311_v24 = vmul.f32 %v1310_v19, %v3093_v31 }
 0x111   : > { %v1798_v54 = vadd.f32 1.1283791, %v1797_v42  ;;  %v3121_v40 = vmul.f32 0.5, %v3019_v27  ;;  %v3123_v30 = vmin.f32 %v1347_v45, 16.0  ;;  %v1843_v36 = vadd.f32 0.014752088, %v1842_v14 }
 0x112   : > { %v1158_v20 = vadd.f32 1.1283791, %v1157_v41  ;;  %v1195_v1 = vmul.f32 %v1194_v22, %v3029_v25  ;;  %v3127_v0 = vmul.f32 0.5, %v3054_v17  ;;  %v1761_v51 = vadd.f32 0.001143296, %v1760_v38 }
 0x113   : > { %4007 = vst [vmem:[#allocation67_spill] sm:$0xff] %v3121_v40  ;;  %v1234_v60 = vadd.f32 0.05243302, %v1233_v11  ;;  %v1273_v46 = vmul.f32 %v1272_v8, %v3068_v13  ;;  %v1844_v48 = vmul.f32 %v1843_v36, %v2919_v55  ;;  %v1680_v42 = vmul.f32 3.8918573e-05, %v2749_v34 }
 0x114   : > { %4008 = vst [vmem:[#allocation68_spill] sm:$0xff] %v3127_v0  ;;  %v1876_v19 = vadd.f32 0.18741608, %v1875_v33  ;;  %v1312_v27 = vadd.f32 0.0036580483, %v1311_v24  ;;  %v1762_v45 = vmul.f32 %v1761_v51, %v2842_v21  ;;  %v3135_v41 = vmul.f32 %v1078_v43, %v2872_v50 }
 0x115   : > { %v1600_v26 = vmul.f32 3.8918573e-05, %v2671_v28  ;;  %v1349_v17 = vmul.f32 2.1237322e-06, %v3123_v30  ;;  %v1845_v22 = vadd.f32 0.112945676, %v1844_v48  ;;  %v3139_v11 = vmul.f32 %v1838_v63, %v2901_v56 }
 0x116   : > { %4009 = vst [vmem:[#allocation69_spill] sm:$0xff] %v3135_v41  ;;  %v1681_v38 = vadd.f32 0.001143296, %v1680_v42  ;;  %v1196_v8 = vadd.f32 0.18741608, %v1195_v1  ;;  %v1235_v33 = vmul.f32 %v1234_v60, %v3047_v18  ;;  %v1313_v50 = vmul.f32 %v1312_v27, %v3093_v31 }
 0x117   : > { %v1763_v14 = vadd.f32 0.014752088, %v1762_v45  ;;  %v1601_v36 = vadd.f32 0.001143296, %v1600_v26  ;;  %v1274_v24 = vadd.f32 0.05243302, %v1273_v46  ;;  %v1846_v51 = vmul.f32 %v1845_v22, %v2919_v55 }
 0x118   : > { %v1682_v58 = vmul.f32 %v1681_v38, %v2749_v34  ;;  %v1520_v42 = vmul.f32 3.8918573e-05, %v2604_v35  ;;  %v1117_v56 = vmul.f32 %v1116_v47, %v2976_v12  ;;  %v1350_v63 = vadd.f32 0.00028619796, %v1349_v17 }
 0x119   : > { %v1764_v43 = vmul.f32 %v1763_v14, %v2842_v21  ;;  %v1602_v48 = vmul.f32 %v1601_v36, %v2671_v28  ;;  %v1847_v1 = vadd.f32 0.4994258, %v1846_v51  ;;  %v1877_v60 = vmul.f32 %v1876_v19, %v3016_v44 }
 0x11a   : > { %v1683_v45 = vadd.f32 0.014752088, %v1682_v58  ;;  %v1521_v22 = vadd.f32 0.001143296, %v1520_v42  ;;  %v1236_v40 = vadd.f32 0.18741608, %v1235_v33  ;;  %v1275_v38 = vmul.f32 %v1274_v24, %v3068_v13 }
 0x11b   : > { %v1765_v46 = vadd.f32 0.112945676, %v1764_v43  ;;  %v1603_v26 = vadd.f32 0.014752088, %v1602_v48  ;;  %v1848_v27 = vmul.f32 %v1847_v1, %v2919_v55  ;;  %v1314_v36 = vadd.f32 0.05243302, %v1313_v50 }
 0x11c   : > { %v1684_v14 = vmul.f32 %v1683_v45, %v2749_v34  ;;  %v1522_v17 = vmul.f32 %v1521_v22, %v2604_v35  ;;  %v3157_v58 = vmul.f32 %v1798_v54, %v2937_v23  ;;  %v1440_v33 = vmul.f32 3.8918573e-05, %v2565_v7 }
 0x11d   : > { %v1766_v41 = vmul.f32 %v1765_v46, %v2842_v21  ;;  %v1604_v47 = vmul.f32 %v1603_v26, %v2671_v28  ;;  %v3159_v19 = vadd.f32 1.0, %v1848_v27  ;;  %v1351_v24 = vmul.f32 %v1350_v63, %v3123_v30 }
 0x11e   : > { %v1685_v51 = vadd.f32 0.112945676, %v1684_v14  ;;  %v1523_v48 = vadd.f32 0.014752088, %v1522_v17  ;;  %v3163_v50 = vadd.f32 1.1283791, %v1117_v56  ;;  %v1237_v1 = vmul.f32 %v1236_v40, %v3047_v18 }
 0x11f   : > { %v1767_v55 = vadd.f32 0.4994258, %v1766_v41  ;;  %v1605_v43 = vadd.f32 0.112945676, %v1604_v47  ;;  %v1878_v42 = vadd.f32 1.1283791, %v1877_v60  ;;  %2235 = vrcp.f32 %v3159_v19 }
 0x120   : > { %4010 = vst [vmem:[#allocation70_spill] sm:$0xff] %v3163_v50  ;;  %v3168_v23 = vmul.f32 %v1158_v20, %v2969_v5  ;;  %v1276_v54 = vadd.f32 0.18741608, %v1275_v38  ;;  %v1686_v46 = vmul.f32 %v1685_v51, %v2749_v34  ;;  %v3173_v63 = vmul.f32 %v1196_v8, %v3029_v25 }
 0x121   : > { %v1768_v45 = vmul.f32 %v1767_v55, %v2842_v21  ;;  %v1606_v41 = vmul.f32 %v1605_v43, %v2671_v28  ;;  %v1524_v56 = vmul.f32 %v1523_v48, %v2604_v35  ;;  %v1441_v60 = vadd.f32 0.001143296, %v1440_v33 }
 0x122   : > { %4011 = vst [vmem:[#allocation71_spill] sm:$0xff] %v3168_v23  ;;  %v1315_v40 = vmul.f32 %v1314_v36, %v3093_v31  ;;  %v1352_v26 = vadd.f32 0.0036580483, %v1351_v24  ;;  %v1687_v5 = vadd.f32 0.4994258, %v1686_v46  ;;  %v3181_v20 = vmul.f32 %v1878_v42, %v2999_v32 }
 0x123   : > { %4012 = vst [vmem:[#allocation72_spill] sm:$0xff] %v3173_v63  ;;  %v3178_v22 = vadd.f32 1.0, %v1768_v45  ;;  %v3183_v21 = vadd.f32 1.1283791, %v1237_v1  ;;  %v1607_v38 = vadd.f32 0.4994258, %v1606_v41  ;;  %v3186_v8 = vmul.f32 %v1276_v54, %v3068_v13 }
 0x124   : > { %v1525_v27 = vadd.f32 0.112945676, %v1524_v56  ;;  %v1859_v14 = vand.u32 2147483647, %v3159_v19  ;;  %v1861_v47 = vand.u32 2147483648, %v3159_v19  ;;  %v1688_v17 = vmul.f32 %v1687_v5, %v2749_v34 }
 0x125   : > { %2237 = vrcp.f32 %v3178_v22  ;;  %v2236_v36 = vpop.eup %2235  ;;  %v1608_v51 = vmul.f32 %v1607_v38, %v2671_v28  ;;  %v1442_v33 = vmul.f32 %v1441_v60, %v2565_v7  ;;  %v3195_v24 = vadd.f32 0.18741608, %v1315_v40 }
 0x126   : > { %v1526_v32 = vmul.f32 %v1525_v27, %v2604_v35  ;;  %v3198_v55 = vmul.f32 %v1352_v26, %v3123_v30  ;;  %v1851_v43 = vmul.f32 %v2236_v36, %v3159_v19  ;;  %vm1855_vm1 = vweird.f32 %v3159_v19 }
 0x127   : > { %v1779_v48 = vand.u32 2147483647, %v3178_v22  ;;  %v1781_v42 = vand.u32 2147483648, %v3178_v22  ;;  %v3204_v34 = vadd.f32 1.0, %v1688_v17  ;;  %v3206_v28 = vadd.f32 1.0, %v1608_v51 }
 0x128   : > { %v1852_v1 = vsub.f32 1.0, %v1851_v43  ;;  %vm3208_vm2 = vcmp.eq.f32.partialorder %v1859_v14, 8.507059e+37  ;;  %v1862_v45 = vor.u32 1.1754944e-38, %v1861_v47  ;;  %v1527_v46 = vadd.f32 0.4994258, %v1526_v32 }
 0x129   : > { %vm1775_vm3 = vweird.f32 %v3178_v22  ;;  %2239 = vrcp.f32 %v3204_v34  ;;  %v1880_v41 = vmul.f32 3.8918573e-05, %v3016_v44  ;;  %v1443_v56 = vadd.f32 0.014752088, %v1442_v33 }
 0x12a   : > { %v1853_v40 = vmul.f32 %v2236_v36, %v1852_v1  ;;  %vm1856_vm4 = vweird.f32 %v2236_v36  ;;  %v1701_v26 = vand.u32 2147483648, %v3204_v34  ;;  %2241 = vrcp.f32 %v3206_v28 }
 0x12b   : > { %v2238_v60 = vpop.eup %2237  ;;  %vm3218_vm5 = vcmp.eq.f32.partialorder %v1779_v48, 8.507059e+37  ;;  %v1782_v27 = vor.u32 1.1754944e-38, %v1781_v42  ;;  %v1640_v14 = vmul.f32 3.8918573e-05, %v2776_v4  ;;  %v1699_v17 = vand.u32 2147483647, %v3204_v34  ;;  %vm1857_vm6 = vmor %vm1855_vm1, %vm1856_vm4 }
 0x12c   : > { %v1771_v5 = vmul.f32 %v2238_v60, %v3178_v22  ;;  %v1854_v47 = vadd.f32 %v2236_v36, %v1853_v40  ;;  %v1619_v51 = vand.u32 2147483647, %v3206_v28  ;;  %v1528_v32 = vmul.f32 %v1527_v46, %v2604_v35 }
 0x12d   : > { %v1621_v43 = vand.u32 2147483648, %v3206_v28  ;;  %v1881_v48 = vadd.f32 0.001143296, %v1880_v41  ;;  %v1444_v1 = vmul.f32 %v1443_v56, %v2565_v7  ;;  %vm1776_vm7 = vweird.f32 %v2238_v60 }
 0x12e   : > { %v1772_v33 = vsub.f32 1.0, %v1771_v5  ;;  %v1858_v50 = vsel %vm1857_vm6, %v2236_v36, %v1854_v47  ;;  %vm1695_vm8 = vweird.f32 %v3204_v34  ;;  %v1702_v42 = vor.u32 1.1754944e-38, %v1701_v26  ;;  %vm1777_vm12 = vmor %vm1775_vm3, %vm1776_vm7 }
 0x12f   : > { %v3231_v40 = vadd.f32 1.0, %v1528_v32  ;;  %v2240_v63 = vpop.eup %2239  ;;  %v1863_v35 = vsel %vm3208_vm2, %v1862_v45, %v1858_v50  ;;  %vm1615_vm9 = vweird.f32 %v3206_v28  ;;  %v1882_v19 = vmul.f32 %v1881_v48, %v3016_v44 }
 0x130   : > { %v1773_v46 = vmul.f32 %v2238_v60, %v1772_v33  ;;  %v1445_v5 = vadd.f32 0.112945676, %v1444_v1  ;;  %v2242_v41 = vpop.eup %2241  ;;  %v1864_v56 = vmul.f32 %v1863_v35, %v3139_v11  ;;  %v1691_v36 = vmul.f32 %v2240_v63, %v3204_v34 }
 0x131   : > { %vm3239_vm10 = vcmp.eq.f32.partialorder %v1699_v17, 8.507059e+37  ;;  %2243 = vrcp.f32 %v3231_v40  ;;  %v3245_v54 = vmul.f32 3.8918573e-05, %v2861_v10  ;;  %v1611_v45 = vmul.f32 %v2242_v41, %v3206_v28 }
 0x132   : > { %v1774_v50 = vadd.f32 %v2238_v60, %v1773_v46  ;;  %vm3248_vm11 = vcmp.eq.f32.partialorder %v1619_v51, 8.507059e+37  ;;  %v1622_v32 = vor.u32 1.1754944e-38, %v1621_v43  ;;  %v3252_v11 = vadd.f32 0.001143296, %v1640_v14 }
 0x133   : > { %v2193_v33 = vclamps-f32 %v1864_v56, 1.0  ;;  %v1692_v17 = vsub.f32 1.0, %v1691_v36  ;;  %vm1696_vm13 = vweird.f32 %v2240_v63  ;;  %vm1616_vm14 = vweird.f32 %v2242_v41 }
 0x134   : > { %v1778_v48 = vsel %vm1777_vm12, %v2238_v60, %v1774_v50  ;;  %v1612_v1 = vsub.f32 1.0, %v1611_v45  ;;  %v1883_v35 = vadd.f32 0.014752088, %v1882_v19  ;;  %v1446_v46 = vmul.f32 %v1445_v5, %v2565_v7  ;;  %vm1697_vm15 = vmor %vm1695_vm8, %vm1696_vm13 }
 0x135   : > { %v1937_v51 = vadd.f32 1.0, %v2193_v33  ;;  %v1783_v12 = vsel %vm3218_vm5, %v1782_v27, %v1778_v48  ;;  %v1693_v43 = vmul.f32 %v2240_v63, %v1692_v17  ;;  %v1539_v14 = vand.u32 2147483647, %v3231_v40  ;;  %vm1617_vm1 = vmor %vm1615_vm9, %vm1616_vm14 }
 0x136   : > { %v1784_v56 = vmul.f32 %v1783_v12, %v3071_v15  ;;  %v1613_v23 = vmul.f32 %v2242_v41, %v1612_v1  ;;  %v1541_v22 = vand.u32 2147483648, %v3231_v40  ;;  %v1884_v36 = vmul.f32 %v1883_v35, %v3016_v44 }
 0x137   : > { %v2244_v0 = vpop.eup %2243  ;;  %v1969_v60 = vmul.f32 %v1937_v51, %v2993_v16  ;;  %v1694_v19 = vadd.f32 %v2240_v63, %v1693_v43  ;;  %v1447_v50 = vadd.f32 0.4994258, %v1446_v46  ;;  %v1800_v5 = vmul.f32 3.8918573e-05, %v2963_v37 }
 0x138   : > { %v2191_v45 = vclamps-f32 %v1784_v56, 1.0  ;;  %v1614_v38 = vadd.f32 %v2242_v41, %v1613_v23  ;;  %v1531_v12 = vmul.f32 %v2244_v0, %v3231_v40  ;;  %vm1536_vm0 = vweird.f32 %v2244_v0 }
 0x139   : > { %1985 = vmatpush.msrb.mxu2 %v1969_v60  ;;  %v1698_v15 = vsel %vm1697_vm15, %v2240_v63, %v1694_v19  ;;  %v1885_v16 = vadd.f32 0.112945676, %v1884_v36  ;;  %v1448_v27 = vmul.f32 %v1447_v50, %v2565_v7  ;;  %v1801_v33 = vadd.f32 0.001143296, %v1800_v5 }
 0x13a   : > { %v1935_v17 = vadd.f32 1.0, %v2191_v45  ;;  %v1703_v48 = vsel %vm3239_vm10, %v1702_v42, %v1698_v15  ;;  %v1618_v34 = vsel %vm1617_vm1, %v2242_v41, %v1614_v38  ;;  %v1532_v1 = vsub.f32 1.0, %v1531_v12 }
 0x13b   : > { %v1704_v23 = vmul.f32 %v1703_v48, %v2961_v9  ;;  %v1623_v35 = vsel %vm3248_vm11, %v1622_v32, %v1618_v34  ;;  %v1886_v63 = vmul.f32 %v1885_v16, %v3016_v44  ;;  %v3280_v46 = vadd.f32 1.0, %v1448_v27 }
 0x13c   : > { %v1967_v28 = vmul.f32 %v1935_v17, %v2928_v49  ;;  %v1624_v7 = vmul.f32 %v1623_v35, %v2906_v57  ;;  %v1533_v51 = vmul.f32 %v2244_v0, %v1532_v1  ;;  %v1802_v43 = vmul.f32 %v1801_v33, %v2963_v37  ;;  %v4023_v35 = vld [vmem:[#allocation9_spill] sm:$0xff] }
 0x13d   : > { %v2189_v47 = vclamps-f32 %v1704_v23, 1.0  ;;  %vm1535_vm2 = vweird.f32 %v3231_v40  ;;  %v1887_v42 = vadd.f32 0.4994258, %v1886_v63  ;;  %2245 = vrcp.f32 %v3280_v46 }
 0x13e   : > { %1986 = vmatpush.msrb.mxu2 %v1967_v28  ;;  %v2187_v9 = vclamps-f32 %v1624_v7, 1.0  ;;  %v1534_v41 = vadd.f32 %v2244_v0, %v1533_v51  ;;  %vm1540_vm3 = vcmp.eq.f32.partialorder %v1539_v14, 8.507059e+37  ;;  %v1542_v26 = vor.u32 1.1754944e-38, %v1541_v22  ;;  %vm1537_vm4 = vmor %vm1535_vm2, %vm1536_vm0 }
 0x13f   : > { %v1933_v32 = vadd.f32 1.0, %v2189_v47  ;;  %v1888_v49 = vmul.f32 %v1887_v42, %v3016_v44  ;;  %v1803_v57 = vadd.f32 0.014752088, %v1802_v43  ;;  %v1721_v56 = vadd.f32 0.001143296, %v3245_v54 }
 0x140   : > { %v1931_v36 = vadd.f32 1.0, %v2187_v9  ;;  %v1538_v60 = vsel %vm1537_vm4, %v2244_v0, %v1534_v41  ;;  %v1459_v40 = vand.u32 2147483647, %v3280_v46  ;;  %v1461_v19 = vand.u32 2147483648, %v3280_v46 }
 0x141   : > { %v1965_v50 = vmul.f32 %v1933_v32, %v2877_v59  ;;  %v1543_v5 = vsel %vm1540_vm3, %v1542_v26, %v1538_v60  ;;  %v3293_v45 = vadd.f32 1.0, %v1888_v49  ;;  %v1804_v14 = vmul.f32 %v1803_v57, %v2963_v37 }
 0x142   : > { %v3298_v22 = vmul.f32 %v3183_v21, %v3032_v3  ;;  %v1544_v44 = vmul.f32 %v1543_v5, %v2796_v61  ;;  %v1722_v54 = vmul.f32 %v1721_v56, %v2861_v10  ;;  %v1642_v0 = vmul.f32 %v3252_v11, %v2776_v4 }
 0x143   : > { %v2246_v38 = vpop.eup %2245  ;;  %v3305_v12 = vadd.f32 1.1283791, %v3186_v8  ;;  %v1354_v59 = vadd.f32 0.05243302, %v3198_v55  ;;  %1987 = vmatpush.msrb.mxu2 %v1965_v50  ;;  %v1963_v15 = vmul.f32 %v1931_v36, %v2774_v6  ;;  %2247 = vrcp.f32 %v3293_v45 }
 0x144   : > { %v2185_v3 = vclamps-f32 %v1544_v44, 1.0  ;;  %v1451_v21 = vmul.f32 %v2246_v38, %v3280_v46  ;;  %vm3311_vm5 = vcmp.eq.f32.partialorder %v1459_v40, 8.507059e+37  ;;  %v1462_v16 = vor.u32 1.1754944e-38, %v1461_v19 }
 0x145   : > { %v1805_v11 = vadd.f32 0.112945676, %v1804_v14  ;;  %v3317_v8 = vmul.f32 %v3195_v24, %v3093_v31  ;;  %1988 = vmatpush.msrb.mxu2 %v1963_v15  ;;  %v1899_v55 = vand.u32 2147483647, %v3293_v45  ;;  %v1723_v27 = vadd.f32 0.014752088, %v1722_v54 }
 0x146   : > { %v1643_v6 = vadd.f32 0.014752088, %v1642_v0  ;;  %v1929_v33 = vadd.f32 1.0, %v2185_v3  ;;  %v1452_v17 = vsub.f32 1.0, %v1451_v21  ;;  %v1560_v34 = vmul.f32 3.8918573e-05, %v2699_v62 }
 0x147   : > { %v1806_v48 = vmul.f32 %v1805_v11, %v2963_v37  ;;  %vm1456_vm6 = vweird.f32 %v2246_v38  ;;  %v1724_v1 = vmul.f32 %v1723_v27, %v2861_v10  ;;  %v1480_v63 = vmul.f32 3.8918573e-05, %v4023_v35  ;;  %v4024_v24 = vld [vmem:[#allocation16_spill] sm:$0xff] }
 0x148   : > { %v1644_v23 = vmul.f32 %v1643_v6, %v2776_v4  ;;  %v1961_v28 = vmul.f32 %v1929_v33, %v4024_v24  ;;  %v1453_v7 = vmul.f32 %v2246_v38, %v1452_v17  ;;  %v1561_v43 = vadd.f32 0.001143296, %v1560_v34  ;;  %v4026_v3 = vld [vmem:[#allocation28_spill] sm:$0xff] }
 0x149   : > { %v1807_v51 = vadd.f32 0.4994258, %v1806_v48  ;;  %v2248_v47 = vpop.eup %2247  ;;  %vm1455_vm7 = vweird.f32 %v3280_v46  ;;  %v1725_v42 = vadd.f32 0.112945676, %v1724_v1  ;;  %v1481_v41 = vadd.f32 0.001143296, %v1480_v63 }
 0x14a   : > { %v1645_v9 = vadd.f32 0.112945676, %v1644_v23  ;;  %1989 = vmatpush.msrb.mxu2 %v1961_v28  ;;  %v1891_v26 = vmul.f32 %v2248_v47, %v3293_v45  ;;  %v1901_v32 = vand.u32 2147483648, %v3293_v45  ;;  %v1454_v49 = vadd.f32 %v2246_v38, %v1453_v7  ;;  %vm1457_vm8 = vmor %vm1455_vm7, %vm1456_vm6  ;;  %v4025_v46 = vld [vmem:[#allocation4_spill] sm:$0xff] }
 0x14b   : > { %v1808_v57 = vmul.f32 %v1807_v51, %v2963_v37  ;;  %v1726_v56 = vmul.f32 %v1725_v42, %v2861_v10  ;;  %v1562_v60 = vmul.f32 %v1561_v43, %v2699_v62  ;;  %v1400_v40 = vmul.f32 3.8918573e-05, %v4025_v46 }
 0x14c   : > { %v1646_v36 = vmul.f32 %v1645_v9, %v2776_v4  ;;  %v1892_v19 = vsub.f32 1.0, %v1891_v26  ;;  %v1458_v50 = vsel %vm1457_vm8, %v2246_v38, %v1454_v49  ;;  %v1482_v14 = vmul.f32 %v1481_v41, %v4023_v35 }
 0x14d   : > { %v3335_v5 = vadd.f32 1.0, %v1808_v57  ;;  %v1463_v44 = vsel %vm3311_vm5, %v1462_v16, %v1458_v50  ;;  %v1727_v37 = vadd.f32 0.4994258, %v1726_v56  ;;  %v1563_v0 = vadd.f32 0.014752088, %v1562_v60 }
 0x14e   : > { %v1647_v54 = vadd.f32 0.4994258, %v1646_v36  ;;  %v1893_v15 = vmul.f32 %v2248_v47, %v1892_v19  ;;  %vm1896_vm9 = vweird.f32 %v2248_v47  ;;  %v1464_v21 = vmul.f32 %v1463_v44, %v4026_v3 }
 0x14f   : > { %2249 = vrcp.f32 %v3335_v5  ;;  %v1355_v11 = vmul.f32 %v1354_v59, %v3123_v30  ;;  %vm1895_vm10 = vweird.f32 %v3293_v45  ;;  %v1728_v38 = vmul.f32 %v1727_v37, %v2861_v10 }
 0x150   : > { %v1648_v27 = vmul.f32 %v1647_v54, %v2776_v4  ;;  %v1894_v6 = vadd.f32 %v2248_v47, %v1893_v15  ;;  %v2183_v61 = vclamps-f32 %v1464_v21, 1.0  ;;  %v1564_v16 = vmul.f32 %v1563_v0, %v2699_v62  ;;  %vm1897_vm11 = vmor %vm1895_vm10, %vm1896_vm9 }
 0x151   : > { %v1483_v33 = vadd.f32 0.014752088, %v1482_v14  ;;  %vm1900_vm12 = vcmp.eq.f32.partialorder %v1899_v55, 8.507059e+37  ;;  %v1902_v17 = vor.u32 1.1754944e-38, %v1901_v32  ;;  %v3347_v48 = vadd.f32 1.0, %v1728_v38  ;;  %v4027_v55 = vld [vmem:[#allocation13_spill] sm:$0xff] }
 0x152   : > { %v3349_v34 = vadd.f32 1.0, %v1648_v27  ;;  %v1898_v1 = vsel %vm1897_vm11, %v2248_v47, %v1894_v6  ;;  %v1927_v59 = vadd.f32 1.0, %v2183_v61  ;;  %v1819_v45 = vand.u32 2147483647, %v3335_v5 }
 0x153   : > { %v1401_v23 = vadd.f32 0.001143296, %v1400_v40  ;;  %v1903_v10 = vsel %vm1900_vm12, %v1902_v17, %v1898_v1  ;;  %2251 = vrcp.f32 %v3347_v48  ;;  %v1565_v4 = vadd.f32 0.112945676, %v1564_v16 }
 0x154   : > { %v1484_v63 = vmul.f32 %v1483_v33, %v4023_v35  ;;  %v1904_v28 = vmul.f32 %v1903_v10, %v3181_v20  ;;  %v1959_v7 = vmul.f32 %v1927_v59, %v4027_v55  ;;  %v1821_v51 = vand.u32 2147483648, %v3335_v5 }
 0x155   : > { %v2250_v24 = vpop.eup %2249  ;;  %2253 = vrcp.f32 %v3349_v34  ;;  %v3359_v43 = vadd.f32 1.1283791, %v3317_v8  ;;  %v3361_v47 = vadd.f32 0.18741608, %v1355_v11  ;;  %vm1815_vm13 = vweird.f32 %v3335_v5 }
 0x156   : > { %v1811_v42 = vmul.f32 %v2250_v24, %v3335_v5  ;;  %v2194_v9 = vclamps-f32 %v1904_v28, 1.0  ;;  %1990 = vmatpush.msrb.mxu2 %v1959_v7  ;;  %vm3365_vm14 = vcmp.eq.f32.partialorder %v1819_v45, 8.507059e+37  ;;  %v1739_v20 = vand.u32 2147483647, %v3347_v48 }
 0x157   : > { %v1741_v26 = vand.u32 2147483648, %v3347_v48  ;;  %v1566_v8 = vmul.f32 %v1565_v4, %v2699_v62  ;;  %v1485_v49 = vadd.f32 0.112945676, %v1484_v63  ;;  %v1402_v57 = vmul.f32 %v1401_v23, %v4025_v46 }
 0x158   : > { %v1812_v32 = vsub.f32 1.0, %v1811_v42  ;;  %v1938_v56 = vadd.f32 1.0, %v2194_v9  ;;  %vm1816_vm15 = vweird.f32 %v2250_v24  ;;  %v1822_v36 = vor.u32 1.1754944e-38, %v1821_v51 }
 0x159   : > { %vm1735_vm0 = vweird.f32 %v3347_v48  ;;  %v2252_v60 = vpop.eup %2251  ;;  %vm1655_vm1 = vweird.f32 %v3349_v34  ;;  %v1567_v19 = vadd.f32 0.4994258, %v1566_v8  ;;  %v1486_v50 = vmul.f32 %v1485_v49, %v4023_v35  ;;  %vm1817_vm3 = vmor %vm1815_vm13, %vm1816_vm15 }
 0x15a   : > { %v1813_v40 = vmul.f32 %v2250_v24, %v1812_v32  ;;  %v1403_v14 = vadd.f32 0.014752088, %v1402_v57  ;;  %v1970_v37 = vmul.f32 %v1938_v56, %v3091_v52  ;;  %v1731_v54 = vmul.f32 %v2252_v60, %v3347_v48  ;;  %v4035_v56 = vld [vmem:[#allocation56_spill] sm:$0xff] }
 0x15b   : > { %v2254_v44 = vpop.eup %2253  ;;  %vm3378_vm2 = vcmp.eq.f32.partialorder %v1739_v20, 8.507059e+37  ;;  %v1742_v15 = vor.u32 1.1754944e-38, %v1741_v26  ;;  %v1659_v3 = vand.u32 2147483647, %v3349_v34  ;;  %v1661_v38 = vand.u32 2147483648, %v3349_v34  ;;  %v4034_v26 = vld [vmem:[#allocation39_spill] sm:$0xff] }
 0x15c   : > { %v1814_v21 = vadd.f32 %v2250_v24, %v1813_v40  ;;  %v1651_v11 = vmul.f32 %v2254_v44, %v3349_v34  ;;  %v1568_v27 = vmul.f32 %v1567_v19, %v2699_v62  ;;  %2008 = vmatpush.msrb.mxu3 %v1970_v37  ;;  %v1732_v52 = vsub.f32 1.0, %v1731_v54 }
 0x15d   : > { %v1487_v6 = vadd.f32 0.4994258, %v1486_v50  ;;  %v1404_v61 = vmul.f32 %v1403_v14, %v4025_v46  ;;  %v1080_v16 = vmul.f32 3.8918573e-05, %v2898_v39  ;;  %vm1736_vm4 = vweird.f32 %v2252_v60 }
 0x15e   : > { %v1818_v33 = vsel %vm1817_vm3, %v2250_v24, %v1814_v21  ;;  %v1652_v17 = vsub.f32 1.0, %v1651_v11  ;;  %v3391_v1 = vadd.f32 1.0, %v1568_v27  ;;  %v1733_v62 = vmul.f32 %v2252_v60, %v1732_v52  ;;  %vm1737_vm7 = vmor %vm1735_vm0, %vm1736_vm4 }
 0x15f   : > { %v1823_v59 = vsel %vm3365_vm14, %v1822_v36, %v1818_v33  ;;  %v1488_v45 = vmul.f32 %v1487_v6, %v4023_v35  ;;  %v1405_v23 = vadd.f32 0.112945676, %v1404_v61  ;;  %vm1656_vm5 = vweird.f32 %v2254_v44 }
 0x160   : > { %v1824_v5 = vmul.f32 %v1823_v59, %v3157_v58  ;;  %v1653_v10 = vmul.f32 %v2254_v44, %v1652_v17  ;;  %2255 = vrcp.f32 %v3391_v1  ;;  %v1734_v4 = vadd.f32 %v2252_v60, %v1733_v62  ;;  %vm1657_vm8 = vmor %vm1655_vm1, %vm1656_vm5  ;;  %v4039_v17 = vld [vmem:[#allocation49_spill] sm:$0xff] }
 0x161   : > { %vm3398_vm6 = vcmp.eq.f32.partialorder %v1659_v3, 8.507059e+37  ;;  %v3402_v24 = vadd.f32 1.0, %v1488_v45  ;;  %v1081_v28 = vadd.f32 0.001143296, %v1080_v16  ;;  %v1662_v7 = vor.u32 1.1754944e-38, %v1661_v38 }
 0x162   : > { %v2192_v55 = vclamps-f32 %v1824_v5, 1.0  ;;  %v1654_v35 = vadd.f32 %v2254_v44, %v1653_v10  ;;  %v1406_v58 = vmul.f32 %v1405_v23, %v4025_v46  ;;  %v1738_v51 = vsel %vm1737_vm7, %v2252_v60, %v1734_v4  ;;  %v4036_v60 = vld [vmem:[#allocation53_spill] sm:$0xff]  ;;  %v4042_v10 = vld [vmem:[#allocation44_spill] sm:$0xff] }
 0x163   : > { %v1579_v42 = vand.u32 2147483647, %v3391_v1  ;;  %v1581_v9 = vand.u32 2147483648, %v3391_v1  ;;  %2257 = vrcp.f32 %v3402_v24  ;;  %v1743_v20 = vsel %vm3378_vm2, %v1742_v15, %v1738_v51 }
 0x164   : > { %v1936_v41 = vadd.f32 1.0, %v2192_v55  ;;  %v1658_v48 = vsel %vm1657_vm8, %v2254_v44, %v1654_v35  ;;  %v3416_v32 = vmul.f32 3.8918573e-05, %v4034_v26  ;;  %v1744_v8 = vmul.f32 %v1743_v20, %v3081_v53 }
 0x165   : > { %v1663_v34 = vsel %vm3398_vm6, %v1662_v7, %v1658_v48  ;;  %vm1575_vm9 = vweird.f32 %v3391_v1  ;;  %v1082_v49 = vmul.f32 %v1081_v28, %v2898_v39  ;;  %v1407_v19 = vadd.f32 0.4994258, %v1406_v58 }
 0x166   : > { %v2256_v57 = vpop.eup %2255  ;;  %v1968_v36 = vmul.f32 %v1936_v41, %v4035_v56  ;;  %v1664_v40 = vmul.f32 %v1663_v34, %v4036_v60  ;;  %v1320_v50 = vmul.f32 3.8918573e-05, %v3093_v31  ;;  %v2190_v14 = vclamps-f32 %v1744_v8, 1.0  ;;  %v4043_v34 = vld [vmem:[#allocation46_spill] sm:$0xff] }
 0x167   : > { %v1571_v44 = vmul.f32 %v2256_v57, %v3391_v1  ;;  %vm3427_vm10 = vcmp.eq.f32.partialorder %v1579_v42, 8.507059e+37  ;;  %v1582_v37 = vor.u32 1.1754944e-38, %v1581_v9  ;;  %v1499_v54 = vand.u32 2147483647, %v3402_v24 }
 0x168   : > { %2009 = vmatpush.msrb.mxu3 %v1968_v36  ;;  %v2188_v0 = vclamps-f32 %v1664_v40, 1.0  ;;  %v1501_v15 = vand.u32 2147483648, %v3402_v24  ;;  %v1408_v3 = vmul.f32 %v1407_v19, %v4025_v46  ;;  %v1321_v21 = vadd.f32 0.001143296, %v1320_v50 }
 0x169   : > { %v2258_v11 = vpop.eup %2257  ;;  %v1934_v38 = vadd.f32 1.0, %v2190_v14  ;;  %v1572_v27 = vsub.f32 1.0, %v1571_v44  ;;  %vm1576_vm11 = vweird.f32 %v2256_v57  ;;  %v1160_v52 = vmul.f32 3.8918573e-05, %v2996_v29 }
 0x16a   : > { %v1932_v6 = vadd.f32 1.0, %v2188_v0  ;;  %v1491_v61 = vmul.f32 %v2258_v11, %v3402_v24  ;;  %v3436_v16 = vadd.f32 1.0, %v1408_v3  ;;  %v1083_v33 = vadd.f32 0.014752088, %v1082_v49  ;;  %vm1577_vm15 = vmor %vm1575_vm9, %vm1576_vm11 }
 0x16b   : > { %v1966_v59 = vmul.f32 %v1934_v38, %v4039_v17  ;;  %v1573_v62 = vmul.f32 %v2256_v57, %v1572_v27  ;;  %v1322_v45 = vmul.f32 %v1321_v21, %v3093_v31  ;;  %v1240_v46 = vmul.f32 3.8918573e-05, %v3047_v18 }
 0x16c   : > { %v1492_v23 = vsub.f32 1.0, %v1491_v61  ;;  %vm1495_vm12 = vweird.f32 %v3402_v24  ;;  %vm3442_vm13 = vcmp.eq.f32.partialorder %v1499_v54, 8.507059e+37  ;;  %2259 = vrcp.f32 %v3436_v16  ;;  %v4046_v24 = vld [vmem:[#allocation37_spill] sm:$0xff] }
 0x16d   : > { %2010 = vmatpush.msrb.mxu3 %v1966_v59  ;;  %v1964_v4 = vmul.f32 %v1932_v6, %v4042_v10  ;;  %v1574_v63 = vadd.f32 %v2256_v57, %v1573_v62  ;;  %vm1496_vm14 = vweird.f32 %v2258_v11  ;;  %v1323_v28 = vadd.f32 0.014752088, %v1322_v45 }
 0x16e   : > { %v1493_v55 = vmul.f32 %v2258_v11, %v1492_v23  ;;  %v1241_v35 = vadd.f32 0.001143296, %v1240_v46  ;;  %v1161_v7 = vadd.f32 0.001143296, %v1160_v52  ;;  %v1084_v58 = vmul.f32 %v1083_v33, %v2898_v39  ;;  %vm1497_vm0 = vmor %vm1495_vm12, %vm1496_vm14  ;;  %v4047_v33 = vld [vmem:[#allocation35_spill] sm:$0xff] }
 0x16f   : > { %2011 = vmatpush.msrb.mxu3 %v1964_v4  ;;  %v1578_v51 = vsel %vm1577_vm15, %v2256_v57, %v1574_v63  ;;  %v1502_v42 = vor.u32 1.1754944e-38, %v1501_v15  ;;  %v1419_v9 = vand.u32 2147483647, %v3436_v16  ;;  %v1324_v41 = vmul.f32 %v1323_v28, %v3093_v31 }
 0x170   : > { %v1583_v20 = vsel %vm3427_vm10, %v1582_v37, %v1578_v51  ;;  %v1494_v48 = vadd.f32 %v2258_v11, %v1493_v55  ;;  %v1242_v8 = vmul.f32 %v1241_v35, %v3047_v18  ;;  %v1162_v1 = vmul.f32 %v1161_v7, %v2996_v29  ;;  %v4048_v35 = vld [vmem:[#allocation20_spill] sm:$0xff] }
 0x171   : > { %v1584_v49 = vmul.f32 %v1583_v20, %v4043_v34  ;;  %vm1415_vm1 = vweird.f32 %v3436_v16  ;;  %v1325_v57 = vadd.f32 0.112945676, %v1324_v41  ;;  %v1085_v56 = vadd.f32 0.112945676, %v1084_v58 }
 0x172   : > { %v2260_v36 = vpop.eup %2259  ;;  %v1498_v60 = vsel %vm1497_vm0, %v2258_v11, %v1494_v48  ;;  %v1421_v40 = vand.u32 2147483648, %v3436_v16  ;;  %v1243_v19 = vadd.f32 0.014752088, %v1242_v8  ;;  %v1163_v50 = vadd.f32 0.014752088, %v1162_v1  ;;  %v4049_v1 = vld [vmem:[#allocation62_spill] sm:$0xff] }
 0x173   : > { %v2186_v14 = vclamps-f32 %v1584_v49, 1.0  ;;  %v1503_v44 = vsel %vm3442_vm13, %v1502_v42, %v1498_v60  ;;  %v1411_v53 = vmul.f32 %v2260_v36, %v3436_v16  ;;  %vm3467_vm2 = vcmp.eq.f32.partialorder %v1419_v9, 8.507059e+37  ;;  %v4050_v49 = vld [vmem:[#allocation30_spill] sm:$0xff] }
 0x174   : > { %v1504_v54 = vmul.f32 %v1503_v44, %v4046_v24  ;;  %v1326_v0 = vmul.f32 %v1325_v57, %v3093_v31  ;;  %v1244_v15 = vmul.f32 %v1243_v19, %v3047_v18  ;;  %v1164_v3 = vmul.f32 %v1163_v50, %v2996_v29 }
 0x175   : > { %v1930_v21 = vadd.f32 1.0, %v2186_v14  ;;  %v1412_v11 = vsub.f32 1.0, %v1411_v53  ;;  %v1280_v38 = vmul.f32 3.8918573e-05, %v3068_v13  ;;  %v1086_v27 = vmul.f32 %v1085_v56, %v2898_v39 }
 0x176   : > { %v2184_v52 = vclamps-f32 %v1504_v54, 1.0  ;;  %vm1416_vm3 = vweird.f32 %v2260_v36  ;;  %v1327_v6 = vadd.f32 0.4994258, %v1326_v0  ;;  %v1245_v61 = vadd.f32 0.112945676, %v1244_v15  ;;  %v4051_v0 = vld [vmem:[#allocation14_spill] sm:$0xff] }
 0x177   : > { %v1962_v17 = vmul.f32 %v1930_v21, %v4047_v33  ;;  %v1413_v59 = vmul.f32 %v2260_v36, %v1412_v11  ;;  %v1165_v62 = vadd.f32 0.112945676, %v1164_v3  ;;  %v1281_v45 = vadd.f32 0.001143296, %v1280_v38  ;;  %vm1417_vm4 = vmor %vm1415_vm1, %vm1416_vm3 }
 0x178   : > { %v1928_v46 = vadd.f32 1.0, %v2184_v52  ;;  %v1328_v23 = vmul.f32 %v1327_v6, %v3093_v31  ;;  %v1246_v5 = vmul.f32 %v1245_v61, %v3047_v18  ;;  %v1087_v10 = vadd.f32 0.4994258, %v1086_v27 }
 0x179   : > { %2012 = vmatpush.msrb.mxu3 %v1962_v17  ;;  %v1414_v4 = vadd.f32 %v2260_v36, %v1413_v59  ;;  %v1422_v63 = vor.u32 1.1754944e-38, %v1421_v40  ;;  %v1166_v28 = vmul.f32 %v1165_v62, %v2996_v29  ;;  %v1282_v55 = vmul.f32 %v1281_v45, %v3068_v13 }
 0x17a   : > { %v1960_v7 = vmul.f32 %v1928_v46, %v4048_v35  ;;  %v3486_v58 = vadd.f32 1.0, %v1328_v23  ;;  %v1247_v51 = vadd.f32 0.4994258, %v1246_v5  ;;  %v1360_v31 = vmul.f32 3.8918573e-05, %v3123_v30 }
 0x17b   : > { %v1418_v42 = vsel %vm1417_vm4, %v2260_v36, %v1414_v4  ;;  %v1167_v9 = vadd.f32 0.4994258, %v1166_v28  ;;  %v1283_v41 = vadd.f32 0.014752088, %v1282_v55  ;;  %v1088_v20 = vmul.f32 %v1087_v10, %v2898_v39 }
 0x17c   : > { %v3492_v48 = vmul.f32 %v3305_v12, %v3050_v2  ;;  %v1357_v8 = vmul.f32 %v3361_v47, %v3123_v30  ;;  %2013 = vmatpush.msrb.mxu3 %v1960_v7  ;;  %v1423_v16 = vsel %vm3467_vm2, %v1422_v63, %v1418_v42  ;;  %2261 = vrcp.f32 %v3486_v58 }
 0x17d   : > { %v3501_v34 = vmul.f32 %v3359_v43, %v4049_v1  ;;  %v1424_v57 = vmul.f32 %v1423_v16, %v4050_v49  ;;  %v1248_v39 = vmul.f32 %v1247_v51, %v3047_v18  ;;  %v1361_v56 = vadd.f32 0.001143296, %v1360_v31 }
 0x17e   : > { %v1168_v2 = vmul.f32 %v1167_v9, %v2996_v29  ;;  %v1284_v12 = vmul.f32 %v1283_v41, %v3068_v13  ;;  %v3507_v47 = vadd.f32 1.0, %v1088_v20  ;;  %v1001_v36 = vadd.f32 0.001143296, %v3416_v32 }
 0x17f   : > { %v2182_v60 = vclamps-f32 %v1424_v57, 1.0  ;;  %v3510_v40 = vadd.f32 1.0, %v1248_v39  ;;  %v1362_v19 = vmul.f32 %v1361_v56, %v3123_v30  ;;  %v1200_v43 = vmul.f32 3.8918573e-05, %v3029_v25 }
 0x180   : > { %v3514_v50 = vadd.f32 1.1283791, %v1357_v8  ;;  %v1339_v18 = vand.u32 2147483647, %v3486_v58  ;;  %v3517_v14 = vadd.f32 1.0, %v1168_v2  ;;  %2263 = vrcp.f32 %v3507_v47 }
 0x181   : > { %v1926_v29 = vadd.f32 1.0, %v2182_v60  ;;  %v1341_v44 = vand.u32 2147483648, %v3486_v58  ;;  %2265 = vrcp.f32 %v3510_v40  ;;  %v1285_v32 = vadd.f32 0.112945676, %v1284_v12 }
 0x182   : > { %v2262_v53 = vpop.eup %2261  ;;  %v1261_v37 = vand.u32 2147483648, %v3510_v40  ;;  %v1363_v24 = vadd.f32 0.014752088, %v1362_v19  ;;  %2267 = vrcp.f32 %v3517_v14  ;;  %v3525_v54 = vmul.f32 %v1001_v36, %v4034_v26 }
 0x183   : > { %v1958_v15 = vmul.f32 %v1926_v29, %v4051_v0  ;;  %v1331_v3 = vmul.f32 %v2262_v53, %v3486_v58  ;;  %vm1335_vm5 = vweird.f32 %v3486_v58  ;;  %v1201_v21 = vadd.f32 0.001143296, %v1200_v43 }
 0x184   : > { %vm3530_vm6 = vcmp.eq.f32.partialorder %v1339_v18, 8.507059e+37  ;;  %v1259_v38 = vand.u32 2147483647, %v3510_v40  ;;  %v1364_v27 = vmul.f32 %v1363_v24, %v3123_v30  ;;  %v1181_v52 = vand.u32 2147483648, %v3517_v14 }
 0x185   : > { %2014 = vmatpush.msrb.mxu3 %v1958_v15  ;;  %v1332_v6 = vsub.f32 1.0, %v1331_v3  ;;  %v1342_v61 = vor.u32 1.1754944e-38, %v1341_v44  ;;  %v1179_v33 = vand.u32 2147483647, %v3517_v14  ;;  %v1286_v17 = vmul.f32 %v1285_v32, %v3068_v13 }
 0x186   : > { %v3539_v59 = vpop.eup %2263  ;;  %vm1336_vm7 = vweird.f32 %v2262_v53  ;;  %vm1255_vm8 = vweird.f32 %v3510_v40  ;;  %v1262_v62 = vor.u32 1.1754944e-38, %v1261_v37  ;;  %v1365_v45 = vadd.f32 0.112945676, %v1364_v27  ;;  %v4060_v27 = vld [vmem:[#allocation68_spill] sm:$0xff] }
 0x187   : > { %v1099_v46 = vand.u32 2147483647, %v3507_v47  ;;  %v2266_v23 = vpop.eup %2265  ;;  %v1333_v5 = vmul.f32 %v2262_v53, %v1332_v6  ;;  %vm1175_vm9 = vweird.f32 %v3517_v14  ;;  %v1287_v10 = vadd.f32 0.4994258, %v1286_v17  ;;  %vm1337_vm13 = vmor %vm1335_vm5, %vm1336_vm7 }
 0x188   : > { %v1091_v4 = vmul.f32 %v3539_v59, %v3507_v47  ;;  %v1202_v63 = vmul.f32 %v1201_v21, %v3029_v25  ;;  %v2268_v28 = vpop.eup %2267  ;;  %v1251_v55 = vmul.f32 %v2266_v23, %v3510_v40  ;;  %vm3548_vm10 = vcmp.eq.f32.partialorder %v1259_v38, 8.507059e+37 }
 0x189   : > { %v1366_v7 = vmul.f32 %v1365_v45, %v3123_v30  ;;  %v1182_v51 = vor.u32 1.1754944e-38, %v1181_v52  ;;  %v1101_v31 = vand.u32 2147483648, %v3507_v47  ;;  %v1334_v42 = vadd.f32 %v2262_v53, %v1333_v5 }
 0x18a   : > { %v1171_v9 = vmul.f32 %v2268_v28, %v3517_v14  ;;  %vm3555_vm11 = vcmp.eq.f32.partialorder %v1179_v33, 8.507059e+37  ;;  %v1288_v20 = vmul.f32 %v1287_v10, %v3068_v13  ;;  %vm1096_vm12 = vweird.f32 %v3539_v59 }
 0x18b   : > { %v1252_v8 = vsub.f32 1.0, %v1251_v55  ;;  %vm1256_vm14 = vweird.f32 %v2266_v23  ;;  %v1367_v16 = vadd.f32 0.4994258, %v1366_v7  ;;  %v1092_v1 = vsub.f32 1.0, %v1091_v4  ;;  %v4064_v55 = vld [vmem:[#allocation69_spill] sm:$0xff]  ;;  %v4065_v7 = vld [vmem:[#allocation52_spill] sm:$0xff] }
 0x18c   : > { %vm1095_vm15 = vweird.f32 %v3507_v47  ;;  %v1338_v49 = vsel %vm1337_vm13, %v2262_v53, %v1334_v42  ;;  %v1172_v57 = vsub.f32 1.0, %v1171_v9  ;;  %v3565_v39 = vadd.f32 1.0, %v1288_v20  ;;  %vm1257_vm2 = vmor %vm1255_vm8, %vm1256_vm14  ;;  %v4066_v9 = vld [vmem:[#allocation67_spill] sm:$0xff] }
 0x18d   : > { %v1203_v56 = vadd.f32 0.014752088, %v1202_v63  ;;  %v1343_v13 = vsel %vm3530_vm6, %v1342_v61, %v1338_v49  ;;  %v1253_v2 = vmul.f32 %v2266_v23, %v1252_v8  ;;  %v1368_v12 = vmul.f32 %v1367_v16, %v3123_v30  ;;  %v4061_v61 = vld [vmem:[#allocation71_spill] sm:$0xff]  ;;  %vm1097_vm5 = vmor %vm1095_vm15, %vm1096_vm12 }
 0x18e   : > { %v1093_v58 = vmul.f32 %v3539_v59, %v1092_v1  ;;  %v1344_v36 = vmul.f32 %v1343_v13, %v3501_v34  ;;  %v1173_v60 = vmul.f32 %v2268_v28, %v1172_v57  ;;  %vm1176_vm0 = vweird.f32 %v2268_v28  ;;  %v4067_v1 = vld [vmem:[#allocation61_spill] sm:$0xff] }
 0x18f   : > { %2269 = vrcp.f32 %v3565_v39  ;;  %v1254_v19 = vadd.f32 %v2266_v23, %v1253_v2  ;;  %v3573_v43 = vadd.f32 1.0, %v1368_v12  ;;  %vm3575_vm1 = vcmp.eq.f32.partialorder %v1099_v46, 8.507059e+37  ;;  %vm1177_vm3 = vmor %vm1175_vm9, %vm1176_vm0 }
 0x190   : > { %v1102_v29 = vor.u32 1.1754944e-38, %v1101_v31  ;;  %v2180_v44 = vclamps-f32 %v1344_v36, 1.0  ;;  %v1174_v30 = vadd.f32 %v2268_v28, %v1173_v60  ;;  %v1299_v34 = vand.u32 2147483647, %v3565_v39 }
 0x191   : > { %v1301_v32 = vand.u32 2147483648, %v3565_v39  ;;  %v1258_v53 = vsel %vm1257_vm2, %v2266_v23, %v1254_v19  ;;  %2271 = vrcp.f32 %v3573_v43  ;;  %v1094_v37 = vadd.f32 %v3539_v59, %v1093_v58  ;;  %v4068_v58 = vld [vmem:[#allocation25_spill] sm:$0xff] }
 0x192   : > { %v1204_v24 = vmul.f32 %v1203_v56, %v3029_v25  ;;  %v1924_v0 = vadd.f32 1.0, %v2180_v44  ;;  %v1263_v40 = vsel %vm3548_vm10, %v1262_v62, %v1258_v53  ;;  %v1381_v15 = vand.u32 2147483648, %v3573_v43 }
 0x193   : > { %v1178_v3 = vsel %vm1177_vm3, %v2268_v28, %v1174_v30  ;;  %v1264_v21 = vmul.f32 %v1263_v40, %v3298_v22  ;;  %v1379_v11 = vand.u32 2147483647, %v3573_v43  ;;  %vm1295_vm4 = vweird.f32 %v3565_v39 }
 0x194   : > { %v1183_v38 = vsel %vm3555_vm11, %v1182_v51, %v1178_v3  ;;  %v1956_v52 = vmul.f32 %v1924_v0, %v4060_v27  ;;  %v3598_v6 = vor.u32 1.1754944e-38, %v1381_v15  ;;  %v1302_v17 = vor.u32 1.1754944e-38, %v1301_v32 }
 0x195   : > { %v2270_v14 = vpop.eup %2269  ;;  %v1184_v33 = vmul.f32 %v1183_v38, %v4061_v61  ;;  %v2178_v22 = vclamps-f32 %v1264_v21, 1.0  ;;  %vm3606_vm7 = vcmp.eq.f32.partialorder %v1299_v34, 8.507059e+37  ;;  %v1098_v46 = vsel %vm1097_vm5, %v3539_v59, %v1094_v37  ;;  %v4070_v34 = vld [vmem:[#allocation54_spill] sm:$0xff]  ;;  %v4071_v38 = vld [vmem:[#allocation64_spill] sm:$0xff] }
 0x196   : > { %v1291_v62 = vmul.f32 %v2270_v14, %v3565_v39  ;;  %vm1296_vm6 = vweird.f32 %v2270_v14  ;;  %2015 = vmatpush.msrb.mxu3 %v1956_v52  ;;  %vm1375_vm8 = vweird.f32 %v3573_v43  ;;  %v1103_v5 = vsel %vm3575_vm1, %v1102_v29, %v1098_v46  ;;  %v4069_v29 = vld [vmem:[#allocation41_spill] sm:$0xff]  ;;  %v4072_v52 = vld [vmem:[#allocation72_spill] sm:$0xff] }
 0x197   : > { %v2176_v23 = vclamps-f32 %v1184_v33, 1.0  ;;  %v1205_v10 = vadd.f32 0.112945676, %v1204_v24  ;;  %v1003_v47 = vadd.f32 0.014752088, %v3525_v54  ;;  %v2272_v4 = vpop.eup %2271  ;;  %v1922_v63 = vadd.f32 1.0, %v2178_v22  ;;  %vm1297_vm10 = vmor %vm1295_vm4, %vm1296_vm6 }
 0x198   : > { %v1292_v28 = vsub.f32 1.0, %v1291_v62  ;;  %v1104_v35 = vmul.f32 %v1103_v5, %v4064_v55  ;;  %v1120_v51 = vmul.f32 3.8918573e-05, %v4065_v7  ;;  %v1371_v31 = vmul.f32 %v2272_v4, %v3573_v43  ;;  %v4073_v22 = vld [vmem:[#allocation58_spill] sm:$0xff] }
 0x199   : > { %vm1376_vm9 = vweird.f32 %v2272_v4  ;;  %v1920_v59 = vadd.f32 1.0, %v2176_v23  ;;  %v1206_v42 = vmul.f32 %v1205_v10, %v3029_v25  ;;  %v1954_v41 = vmul.f32 %v1922_v63, %v4066_v9  ;;  %v4075_v5 = vld [vmem:[#allocation70_spill] sm:$0xff] }
 0x19a   : > { %v1293_v20 = vmul.f32 %v2270_v14, %v1292_v28  ;;  %v2174_v8 = vclamps-f32 %v1104_v35, 1.0  ;;  %v1004_v16 = vmul.f32 %v1003_v47, %v4034_v26  ;;  %v1372_v54 = vsub.f32 1.0, %v1371_v31  ;;  %vm1377_vm11 = vmor %vm1375_vm8, %vm1376_vm9  ;;  %v4076_v28 = vld [vmem:[#allocation57_spill] sm:$0xff]  ;;  %v4077_v35 = vld [vmem:[#allocation63_spill] sm:$0xff] }
 0x19b   : > { %v1952_v49 = vmul.f32 %v1920_v59, %v4067_v1  ;;  %v1207_v57 = vadd.f32 0.4994258, %v1206_v42  ;;  %v1121_v56 = vadd.f32 0.001143296, %v1120_v51  ;;  %2016 = vmatpush.msrb.mxu3 %v1954_v41  ;;  %v920_v36 = vmul.f32 3.8918573e-05, %v4068_v58 }
 0x19c   : > { %v1294_v13 = vadd.f32 %v2270_v14, %v1293_v20  ;;  %v1918_v2 = vadd.f32 1.0, %v2174_v8  ;;  %v1005_v12 = vadd.f32 0.112945676, %v1004_v16  ;;  %v1373_v60 = vmul.f32 %v2272_v4, %v1372_v54  ;;  %v4078_v31 = vld [vmem:[#allocation11_spill] sm:$0xff] }
 0x19d   : > { %v1208_v19 = vmul.f32 %v1207_v57, %v3029_v25  ;;  %v1122_v18 = vmul.f32 %v1121_v56, %v4065_v7  ;;  %v1040_v44 = vmul.f32 3.8918573e-05, %v4069_v29  ;;  %2017 = vmatpush.msrb.mxu3 %v1952_v49  ;;  %v921_v37 = vadd.f32 0.001143296, %v920_v36 }
 0x19e   : > { %v1298_v30 = vsel %vm1297_vm10, %v2270_v14, %v1294_v13  ;;  %v1950_v32 = vmul.f32 %v1918_v2, %v4070_v34  ;;  %v1006_v53 = vmul.f32 %v1005_v12, %v4034_v26  ;;  %v1374_v24 = vadd.f32 %v2272_v4, %v1373_v60  ;;  %v4081_v60 = vld [vmem:[#allocation36_spill] sm:$0xff] }
 0x19f   : > { %v1303_v0 = vsel %vm3606_vm7, %v1302_v17, %v1298_v30  ;;  %v3633_v40 = vadd.f32 1.0, %v1208_v19  ;;  %v1123_v39 = vadd.f32 0.014752088, %v1122_v18  ;;  %v922_v3 = vmul.f32 %v921_v37, %v4068_v58 }
 0x1a0   : > { %v1304_v25 = vmul.f32 %v1303_v0, %v3492_v48  ;;  %2018 = vmatpush.msrb.mxu3 %v1950_v32  ;;  %v1007_v15 = vadd.f32 0.4994258, %v1006_v53  ;;  %v1041_v21 = vadd.f32 0.001143296, %v1040_v44  ;;  %v1359_v14 = vmul.f32 %v3514_v50, %v4071_v38  ;;  %v4074_v50 = vld [vmem:[#allocation51_spill] sm:$0xff] }
 0x1a1   : > { %v1378_v27 = vsel %vm1377_vm11, %v2272_v4, %v1374_v24  ;;  %vm1380_vm12 = vcmp.eq.f32.partialorder %v1379_v11, 8.507059e+37  ;;  %2273 = vrcp.f32 %v3633_v40  ;;  %v1198_v61 = vadd.f32 1.1283791, %v4072_v52 }
 0x1a2   : > { %v1383_v33 = vsel %vm1380_vm12, %v3598_v6, %v1378_v27  ;;  %v2179_v17 = vclamps-f32 %v1304_v25, 1.0  ;;  %v1008_v48 = vmul.f32 %v1007_v15, %v4034_v26  ;;  %v579_v62 = vmul.f32 0.5, %v4073_v22 }
 0x1a3   : > { %v1384_v45 = vmul.f32 %v1383_v33, %v1359_v14  ;;  %v1124_v46 = vmul.f32 %v1123_v39, %v4065_v7  ;;  %v923_v23 = vadd.f32 0.014752088, %v922_v3  ;;  %v3652_v10 = vmul.f32 %v4075_v5, %v4074_v50 }
 0x1a4   : > { %v1219_v43 = vand.u32 2147483647, %v3633_v40  ;;  %v3655_v11 = vadd.f32 1.0, %v1008_v48  ;;  %v1042_v47 = vmul.f32 %v1041_v21, %v4069_v29  ;;  %v1923_v4 = vadd.f32 1.0, %v2179_v17 }
 0x1a5   : > { %v2181_v6 = vclamps-f32 %v1384_v45, 1.0  ;;  %v1125_v63 = vadd.f32 0.112945676, %v1124_v46  ;;  %v924_v26 = vmul.f32 %v923_v23, %v4068_v58  ;;  %v1199_v55 = vmul.f32 %v1198_v61, %v4076_v28  ;;  %v4084_v45 = vld [vmem:[#allocation5_spill] sm:$0xff] }
 0x1a6   : > { %v581_v51 = vmul.f32 0.5, %v4077_v35  ;;  %2275 = vrcp.f32 %v3655_v11  ;;  %v840_v59 = vmul.f32 3.8918573e-05, %v4078_v31  ;;  %vm1215_vm13 = vweird.f32 %v3633_v40 }
 0x1a7   : > { %v2274_v42 = vpop.eup %2273  ;;  %v1925_v9 = vadd.f32 1.0, %v2181_v6  ;;  %v1126_v41 = vmul.f32 %v1125_v63, %v4065_v7  ;;  %v925_v20 = vadd.f32 0.112945676, %v924_v26  ;;  %vm3666_vm14 = vcmp.eq.f32.partialorder %v1219_v43, 8.507059e+37 }
 0x1a8   : > { %v1211_v8 = vmul.f32 %v2274_v42, %v3633_v40  ;;  %v1221_v54 = vand.u32 2147483648, %v3633_v40  ;;  %v1043_v1 = vadd.f32 0.014752088, %v1042_v47  ;;  %v1955_v57 = vmul.f32 %v1923_v4, %v579_v62  ;;  %v4085_v4 = vld [vmem:[#allocation23_spill] sm:$0xff] }
 0x1a9   : > { %v1957_v49 = vmul.f32 %v1925_v9, %v581_v51  ;;  %v1127_v56 = vadd.f32 0.4994258, %v1126_v41  ;;  %v926_v13 = vmul.f32 %v925_v20, %v4068_v58  ;;  %v841_v36 = vadd.f32 0.001143296, %v840_v59  ;;  %v4086_v9 = vld [vmem:[#allocation59_spill] sm:$0xff] }
 0x1aa   : > { %v1212_v2 = vsub.f32 1.0, %v1211_v8  ;;  %v1044_v12 = vmul.f32 %v1043_v1, %v4069_v29  ;;  %v960_v19 = vmul.f32 3.8918573e-05, %v4081_v60  ;;  %v1019_v18 = vand.u32 2147483647, %v3655_v11 }
 0x1ab   : > { %1991 = vmatpush.msrb.mxu2 %v1957_v49  ;;  %v1021_v44 = vand.u32 2147483648, %v3655_v11  ;;  %v1128_v30 = vmul.f32 %v1127_v56, %v4065_v7  ;;  %v927_v34 = vadd.f32 0.4994258, %v926_v13  ;;  %vm1216_vm15 = vweird.f32 %v2274_v42 }
 0x1ac   : > { %v2276_v32 = vpop.eup %2275  ;;  %v1213_v53 = vmul.f32 %v2274_v42, %v1212_v2  ;;  %v1045_v37 = vadd.f32 0.112945676, %v1044_v12  ;;  %v842_v24 = vmul.f32 %v841_v36, %v4078_v31  ;;  %v1222_v0 = vor.u32 1.1754944e-38, %v1221_v54  ;;  %vm1217_vm0 = vmor %vm1215_vm13, %vm1216_vm15  ;;  %v4089_v54 = vld [vmem:[#allocation65_spill] sm:$0xff]  ;;  %v4100_v2 = vld [vmem:[#allocation66_spill] sm:$0xff] }
 0x1ad   : > { %1992 = vmatpush.msrb.mxu2 %v1955_v57  ;;  %v1011_v39 = vmul.f32 %v2276_v32, %v3655_v11  ;;  %v3679_v25 = vadd.f32 1.0, %v1128_v30  ;;  %v928_v15 = vmul.f32 %v927_v34, %v4068_v58  ;;  %v961_v7 = vadd.f32 0.001143296, %v960_v19 }
 0x1ae   : > { %v1214_v3 = vadd.f32 %v2274_v42, %v1213_v53  ;;  %v1046_v21 = vmul.f32 %v1045_v37, %v4069_v29  ;;  %v843_v38 = vadd.f32 0.014752088, %v842_v24  ;;  %vm1015_vm1 = vweird.f32 %v3655_v11 }
 0x1af   : > { %v1012_v14 = vsub.f32 1.0, %v1011_v39  ;;  %vm3686_vm2 = vcmp.eq.f32.partialorder %v1019_v18, 8.507059e+37  ;;  %2277 = vrcp.f32 %v3679_v25  ;;  %v1022_v61 = vor.u32 1.1754944e-38, %v1021_v44 }
 0x1b0   : > { %v1218_v52 = vsel %vm1217_vm0, %v2274_v42, %v1214_v3  ;;  %v3691_v58 = vadd.f32 1.0, %v928_v15  ;;  %v1047_v33 = vadd.f32 0.4994258, %v1046_v21  ;;  %vm1016_vm3 = vweird.f32 %v2276_v32  ;;  %v4093_v3 = vld [vmem:[#allocation45_spill] sm:$0xff] }
 0x1b1   : > { %v1223_v17 = vsel %vm3666_vm14, %v1222_v0, %v1218_v52  ;;  %v1013_v48 = vmul.f32 %v2276_v32, %v1012_v14  ;;  %v844_v40 = vmul.f32 %v843_v38, %v4078_v31  ;;  %v962_v62 = vmul.f32 %v961_v7, %v4081_v60  ;;  %vm1017_vm4 = vmor %vm1015_vm1, %vm1016_vm3  ;;  %v4092_v0 = vld [vmem:[#allocation26_spill] sm:$0xff] }
 0x1b2   : > { %v1224_v22 = vmul.f32 %v1223_v17, %v1199_v55  ;;  %2279 = vrcp.f32 %v3691_v58  ;;  %v760_v46 = vmul.f32 3.8918573e-05, %v4084_v45  ;;  %v1139_v50 = vand.u32 2147483647, %v3679_v25 }
 0x1b3   : > { %v1014_v23 = vadd.f32 %v2276_v32, %v1013_v48  ;;  %v1141_v5 = vand.u32 2147483648, %v3679_v25  ;;  %v1048_v43 = vmul.f32 %v1047_v33, %v4069_v29  ;;  %vm1135_vm5 = vweird.f32 %v3679_v25 }
 0x1b4   : > { %v2177_v47 = vclamps-f32 %v1224_v22, 1.0  ;;  %v845_v6 = vadd.f32 0.112945676, %v844_v40  ;;  %v680_v63 = vmul.f32 3.8918573e-05, %v4085_v4  ;;  %v941_v35 = vand.u32 2147483648, %v3691_v58 }
 0x1b5   : > { %v2278_v26 = vpop.eup %2277  ;;  %v1018_v28 = vsel %vm1017_vm4, %v2276_v32, %v1014_v23  ;;  %v939_v55 = vand.u32 2147483647, %v3691_v58  ;;  %v3708_v51 = vadd.f32 1.0, %v1048_v43  ;;  %v963_v42 = vadd.f32 0.014752088, %v962_v62 }
 0x1b6   : > { %v1921_v59 = vadd.f32 1.0, %v2177_v47  ;;  %v1023_v29 = vsel %vm3686_vm2, %v1022_v61, %v1018_v28  ;;  %v1131_v11 = vmul.f32 %v2278_v26, %v3679_v25  ;;  %vm3714_vm6 = vcmp.eq.f32.partialorder %v1139_v50, 8.507059e+37 }
 0x1b7   : > { %v1024_v41 = vmul.f32 %v1023_v29, %v4086_v9  ;;  %v1142_v8 = vor.u32 1.1754944e-38, %v1141_v5  ;;  %2281 = vrcp.f32 %v3708_v51  ;;  %vm935_vm7 = vweird.f32 %v3691_v58  ;;  %v4097_v9 = vld [vmem:[#allocation60_spill] sm:$0xff] }
 0x1b8   : > { %v2280_v16 = vpop.eup %2279  ;;  %v1953_v1 = vmul.f32 %v1921_v59, %v4089_v54  ;;  %v1132_v49 = vsub.f32 1.0, %v1131_v11  ;;  %v846_v57 = vmul.f32 %v845_v6, %v4078_v31  ;;  %vm3723_vm8 = vcmp.eq.f32.partialorder %v939_v55, 8.507059e+37  ;;  %v4094_v6 = vld [vmem:[#allocation48_spill] sm:$0xff] }
 0x1b9   : > { %v2172_v56 = vclamps-f32 %v1024_v41, 1.0  ;;  %v931_v13 = vmul.f32 %v2280_v16, %v3691_v58  ;;  %v942_v12 = vor.u32 1.1754944e-38, %v941_v35  ;;  %vm1136_vm9 = vweird.f32 %v2278_v26 }
 0x1ba   : > { %1993 = vmatpush.msrb.mxu2 %v1953_v1  ;;  %v1133_v36 = vmul.f32 %v2278_v26, %v1132_v49  ;;  %v847_v19 = vadd.f32 0.4994258, %v846_v57  ;;  %v964_v18 = vmul.f32 %v963_v42, %v4081_v60  ;;  %v1059_v34 = vand.u32 2147483647, %v3708_v51  ;;  %vm1137_vm10 = vmor %vm1135_vm5, %vm1136_vm9  ;;  %v4098_v49 = vld [vmem:[#allocation10_spill] sm:$0xff] }
 0x1bb   : > { %v1916_v44 = vadd.f32 1.0, %v2172_v56  ;;  %v932_v30 = vsub.f32 1.0, %v931_v13  ;;  %v761_v32 = vadd.f32 0.001143296, %v760_v46  ;;  %v880_v39 = vmul.f32 3.8918573e-05, %v4092_v0 }
 0x1bc   : > { %v1134_v53 = vadd.f32 %v2278_v26, %v1133_v36  ;;  %v848_v37 = vmul.f32 %v847_v19, %v4078_v31  ;;  %v965_v24 = vadd.f32 0.112945676, %v964_v18  ;;  %vm936_vm11 = vweird.f32 %v2280_v16  ;;  %v4099_v56 = vld [vmem:[#allocation55_spill] sm:$0xff]  ;;  %v4101_v36 = vld [vmem:[#allocation40_spill] sm:$0xff] }
 0x1bd   : > { %v2282_v15 = vpop.eup %2281  ;;  %v1948_v21 = vmul.f32 %v1916_v44, %v4093_v3  ;;  %v933_v38 = vmul.f32 %v2280_v16, %v932_v30  ;;  %v762_v7 = vmul.f32 %v761_v32, %v4084_v45  ;;  %v1061_v52 = vand.u32 2147483648, %v3708_v51  ;;  %vm937_vm12 = vmor %vm935_vm7, %vm936_vm11 }
 0x1be   : > { %v1138_v14 = vsel %vm1137_vm10, %v2278_v26, %v1134_v53  ;;  %v1051_v27 = vmul.f32 %v2282_v15, %v3708_v51  ;;  %v3737_v61 = vadd.f32 1.0, %v848_v37  ;;  %v966_v17 = vmul.f32 %v965_v24, %v4081_v60 }
 0x1bf   : > { %2019 = vmatpush.msrb.mxu3 %v1948_v21  ;;  %v1143_v31 = vsel %vm3714_vm6, %v1142_v8, %v1138_v14  ;;  %v934_v33 = vadd.f32 %v2280_v16, %v933_v38  ;;  %v763_v25 = vadd.f32 0.014752088, %v762_v7  ;;  %v881_v22 = vadd.f32 0.001143296, %v880_v39  ;;  %v4102_v7 = vld [vmem:[#allocation7_spill] sm:$0xff] }
 0x1c0   : > { %v1144_v48 = vmul.f32 %v1143_v31, %v3652_v10  ;;  %v1052_v40 = vsub.f32 1.0, %v1051_v27  ;;  %2283 = vrcp.f32 %v3737_v61  ;;  %vm1056_vm13 = vweird.f32 %v2282_v15 }
 0x1c1   : > { %v938_v62 = vsel %vm937_vm12, %v2280_v16, %v934_v33  ;;  %v967_v46 = vadd.f32 0.4994258, %v966_v17  ;;  %v681_v23 = vadd.f32 0.001143296, %v680_v63  ;;  %v764_v47 = vmul.f32 %v763_v25, %v4084_v45  ;;  %v4103_v25 = vld [vmem:[#allocation50_spill] sm:$0xff] }
 0x1c2   : > { %v2175_v50 = vclamps-f32 %v1144_v48, 1.0  ;;  %v943_v5 = vsel %vm3723_vm8, %v942_v12, %v938_v62  ;;  %v1053_v43 = vmul.f32 %v2282_v15, %v1052_v40  ;;  %vm1055_vm14 = vweird.f32 %v3708_v51 }
 0x1c3   : > { %v944_v10 = vmul.f32 %v943_v5, %v4094_v6  ;;  %vm3751_vm15 = vcmp.eq.f32.partialorder %v1059_v34, 8.507059e+37  ;;  %v968_v26 = vmul.f32 %v967_v46, %v4081_v60  ;;  %v765_v63 = vadd.f32 0.112945676, %v764_v47  ;;  %vm1057_vm0 = vmor %vm1055_vm14, %vm1056_vm13 }
 0x1c4   : > { %v1919_v28 = vadd.f32 1.0, %v2175_v50  ;;  %v1054_v55 = vadd.f32 %v2282_v15, %v1053_v43  ;;  %v882_v35 = vmul.f32 %v881_v22, %v4092_v0  ;;  %v1062_v29 = vor.u32 1.1754944e-38, %v1061_v52 }
 0x1c5   : > { %v2170_v59 = vclamps-f32 %v944_v10, 1.0  ;;  %v3758_v11 = vadd.f32 1.0, %v968_v26  ;;  %v682_v42 = vmul.f32 %v681_v23, %v4085_v4  ;;  %v766_v8 = vmul.f32 %v765_v63, %v4084_v45  ;;  %v4104_v23 = vld [vmem:[#allocation34_spill] sm:$0xff]  ;;  %v4106_v63 = vld [vmem:[#allocation29_spill] sm:$0xff] }
 0x1c6   : > { %v2284_v51 = vpop.eup %2283  ;;  %v1951_v41 = vmul.f32 %v1919_v28, %v4097_v9  ;;  %v1058_v20 = vsel %vm1057_vm0, %v2282_v15, %v1054_v55  ;;  %v883_v60 = vadd.f32 0.014752088, %v882_v35  ;;  %v800_v57 = vmul.f32 3.8918573e-05, %v4098_v49 }
 0x1c7   : > { %v1914_v16 = vadd.f32 1.0, %v2170_v59  ;;  %v1063_v54 = vsel %vm3751_vm15, %v1062_v29, %v1058_v20  ;;  %v851_v1 = vmul.f32 %v2284_v51, %v3737_v61  ;;  %v958_v13 = vadd.f32 1.1283791, %v4099_v56 }
 0x1c8   : > { %1994 = vmatpush.msrb.mxu2 %v1951_v41  ;;  %v1064_v12 = vmul.f32 %v1063_v54, %v4100_v2  ;;  %vm855_vm1 = vweird.f32 %v3737_v61  ;;  %2285 = vrcp.f32 %v3758_v11  ;;  %v861_v44 = vand.u32 2147483648, %v3737_v61 }
 0x1c9   : > { %v1946_v19 = vmul.f32 %v1914_v16, %v4101_v36  ;;  %v852_v18 = vsub.f32 1.0, %v851_v1  ;;  %v767_v30 = vadd.f32 0.4994258, %v766_v8  ;;  %v859_v32 = vand.u32 2147483647, %v3737_v61  ;;  %v4105_v61 = vld [vmem:[#allocation42_spill] sm:$0xff] }
 0x1ca   : > { %v2173_v34 = vclamps-f32 %v1064_v12, 1.0  ;;  %v884_v53 = vmul.f32 %v883_v60, %v4092_v0  ;;  %v683_v37 = vadd.f32 0.014752088, %v682_v42  ;;  %vm856_vm2 = vweird.f32 %v2284_v51 }
 0x1cb   : > { %2020 = vmatpush.msrb.mxu3 %v1946_v19  ;;  %v853_v24 = vmul.f32 %v2284_v51, %v852_v18  ;;  %v768_v39 = vmul.f32 %v767_v30, %v4084_v45  ;;  %v801_v15 = vadd.f32 0.001143296, %v800_v57  ;;  %v720_v14 = vmul.f32 3.8918573e-05, %v4102_v7  ;;  %vm857_vm3 = vmor %vm855_vm1, %vm856_vm2 }
 0x1cc   : > { %v1917_v3 = vadd.f32 1.0, %v2173_v34  ;;  %v885_v21 = vadd.f32 0.112945676, %v884_v53  ;;  %v684_v38 = vmul.f32 %v683_v37, %v4085_v4  ;;  %v862_v52 = vor.u32 1.1754944e-38, %v861_v44  ;;  %v4108_v37 = vld [vmem:[#allocation43_spill] sm:$0xff] }
 0x1cd   : > { %v854_v27 = vadd.f32 %v2284_v51, %v853_v24  ;;  %v3778_v31 = vadd.f32 1.0, %v768_v39  ;;  %v802_v33 = vmul.f32 %v801_v15, %v4098_v49  ;;  %v721_v22 = vadd.f32 0.001143296, %v720_v14 }
 0x1ce   : > { %v2286_v17 = vpop.eup %2285  ;;  %v1949_v48 = vmul.f32 %v1917_v3, %v4103_v25  ;;  %v886_v45 = vmul.f32 %v885_v21, %v4092_v0  ;;  %v685_v40 = vadd.f32 0.112945676, %v684_v38  ;;  %vm860_vm4 = vcmp.eq.f32.partialorder %v859_v32, 8.507059e+37  ;;  %v4109_v3 = vld [vmem:[#allocation47_spill] sm:$0xff]  ;;  %v4110_v38 = vld [vmem:[#allocation33_spill] sm:$0xff] }
 0x1cf   : > { %v858_v62 = vsel %vm857_vm3, %v2284_v51, %v854_v27  ;;  %v971_v46 = vmul.f32 %v2286_v17, %v3758_v11  ;;  %2287 = vrcp.f32 %v3778_v31  ;;  %v959_v50 = vmul.f32 %v958_v13, %v4104_v23 }
 0x1d0   : > { %1995 = vmatpush.msrb.mxu2 %v1949_v48  ;;  %v863_v5 = vsel %vm860_vm4, %v862_v52, %v858_v62  ;;  %v979_v43 = vand.u32 2147483647, %v3758_v11  ;;  %v981_v47 = vand.u32 2147483648, %v3758_v11  ;;  %v887_v58 = vadd.f32 0.4994258, %v886_v45 }
 0x1d1   : > { %v864_v6 = vmul.f32 %v863_v5, %v4105_v61  ;;  %v972_v10 = vsub.f32 1.0, %v971_v46  ;;  %v686_v26 = vmul.f32 %v685_v40, %v4085_v4  ;;  %vm976_vm5 = vweird.f32 %v2286_v17 }
 0x1d2   : > { %v803_v28 = vadd.f32 0.014752088, %v802_v33  ;;  %v722_v55 = vmul.f32 %v721_v22, %v4102_v7  ;;  %v640_v35 = vmul.f32 3.8918573e-05, %v4106_v63  ;;  %v888_v42 = vmul.f32 %v887_v58, %v4092_v0 }
 0x1d3   : > { %v2168_v59 = vclamps-f32 %v864_v6, 1.0  ;;  %v973_v29 = vmul.f32 %v2286_v17, %v972_v10  ;;  %v687_v51 = vadd.f32 0.4994258, %v686_v26  ;;  %vm975_vm6 = vweird.f32 %v3758_v11  ;;  %v4107_v11 = vld [vmem:[#allocation21_spill] sm:$0xff]  ;;  %v4112_v6 = vld [vmem:[#allocation31_spill] sm:$0xff] }
 0x1d4   : > { %v982_v9 = vor.u32 1.1754944e-38, %v981_v47  ;;  %v804_v41 = vmul.f32 %v803_v28, %v4098_v49  ;;  %v723_v20 = vadd.f32 0.014752088, %v722_v55  ;;  %v3797_v54 = vadd.f32 1.0, %v888_v42  ;;  %vm977_vm7 = vmor %vm975_vm6, %vm976_vm5  ;;  %v4113_v28 = vld [vmem:[#allocation22_spill] sm:$0xff] }
 0x1d5   : > { %v2288_v8 = vpop.eup %2287  ;;  %v1912_v60 = vadd.f32 1.0, %v2168_v59  ;;  %v974_v16 = vadd.f32 %v2286_v17, %v973_v29  ;;  %v688_v1 = vmul.f32 %v687_v51, %v4085_v4  ;;  %v641_v13 = vadd.f32 0.001143296, %v640_v35 }
 0x1d6   : > { %v771_v57 = vmul.f32 %v2288_v8, %v3778_v31  ;;  %v805_v56 = vadd.f32 0.112945676, %v804_v41  ;;  %v724_v0 = vmul.f32 %v723_v20, %v4102_v7  ;;  %vm980_vm8 = vcmp.eq.f32.partialorder %v979_v43, 8.507059e+37  ;;  %v4111_v43 = vld [vmem:[#allocation38_spill] sm:$0xff] }
 0x1d7   : > { %v1944_v2 = vmul.f32 %v1912_v60, %v4107_v11  ;;  %v978_v12 = vsel %vm977_vm7, %v2286_v17, %v974_v16  ;;  %2289 = vrcp.f32 %v3797_v54  ;;  %v779_v18 = vand.u32 2147483647, %v3778_v31 }
 0x1d8   : > { %v983_v36 = vsel %vm980_vm8, %v982_v9, %v978_v12  ;;  %v772_v19 = vsub.f32 1.0, %v771_v57  ;;  %v781_v44 = vand.u32 2147483648, %v3778_v31  ;;  %v3807_v34 = vadd.f32 1.0, %v688_v1 }
 0x1d9   : > { %2021 = vmatpush.msrb.mxu3 %v1944_v2  ;;  %v984_v30 = vmul.f32 %v983_v36, %v959_v50  ;;  %v806_v32 = vmul.f32 %v805_v56, %v4098_v49  ;;  %v725_v53 = vadd.f32 0.112945676, %v724_v0  ;;  %v677_v24 = vmul.f32 %v4108_v37, %v4085_v4  ;;  %v4117_v2 = vld [vmem:[#allocation27_spill] sm:$0xff] }
 0x1da   : > { %v773_v39 = vmul.f32 %v2288_v8, %v772_v19  ;;  %vm776_vm9 = vweird.f32 %v2288_v8  ;;  %v642_v15 = vmul.f32 %v641_v13, %v4106_v63  ;;  %v878_v21 = vadd.f32 1.1283791, %v4109_v3 }
 0x1db   : > { %v571_v14 = vmul.f32 0.5, %v4110_v38  ;;  %v2171_v27 = vclamps-f32 %v984_v30, 1.0  ;;  %2291 = vrcp.f32 %v3807_v34  ;;  %vm775_vm10 = vweird.f32 %v3778_v31 }
 0x1dc   : > { %v774_v52 = vadd.f32 %v2288_v8, %v773_v39  ;;  %v807_v33 = vadd.f32 0.4994258, %v806_v32  ;;  %v726_v17 = vmul.f32 %v725_v53, %v4102_v7  ;;  %vm777_vm11 = vmor %vm775_vm10, %vm776_vm9  ;;  %vm780_vm12 = vcmp.eq.f32.partialorder %v779_v18, 8.507059e+37  ;;  %v4118_v53 = vld [vmem:[#allocation32_spill] sm:$0xff] }
 0x1dd   : > { %v2290_v25 = vpop.eup %2289  ;;  %v1915_v48 = vadd.f32 1.0, %v2171_v27  ;;  %v782_v4 = vor.u32 1.1754944e-38, %v781_v44  ;;  %v643_v45 = vadd.f32 0.014752088, %v642_v15  ;;  %v899_v62 = vand.u32 2147483647, %v3797_v54 }
 0x1de   : > { %v778_v40 = vsel %vm777_vm11, %v2288_v8, %v774_v52  ;;  %v891_v22 = vmul.f32 %v2290_v25, %v3797_v54  ;;  %v901_v46 = vand.u32 2147483648, %v3797_v54  ;;  %v808_v31 = vmul.f32 %v807_v33, %v4098_v49  ;;  %v4120_v15 = vld [vmem:[#allocation17_spill] sm:$0xff] }
 0x1df   : > { %v1947_v23 = vmul.f32 %v1915_v48, %v571_v14  ;;  %v783_v50 = vsel %vm780_vm12, %v782_v4, %v778_v40  ;;  %v727_v5 = vadd.f32 0.4994258, %v726_v17  ;;  %v632_v47 = vadd.f32 0.0036580483, %v4111_v43 }
 0x1e0   : > { %v678_v61 = vadd.f32 1.1283791, %v677_v24  ;;  %v784_v10 = vmul.f32 %v783_v50, %v4112_v6  ;;  %v892_v58 = vsub.f32 1.0, %v891_v22  ;;  %v879_v55 = vmul.f32 %v878_v21, %v4113_v28  ;;  %v4119_v24 = vld [vmem:[#allocation12_spill] sm:$0xff] }
 0x1e1   : > { %v2292_v26 = vpop.eup %2291  ;;  %1996 = vmatpush.msrb.mxu2 %v1947_v23  ;;  %v3825_v35 = vadd.f32 1.0, %v808_v31  ;;  %v728_v59 = vmul.f32 %v727_v5, %v4102_v7  ;;  %v644_v29 = vmul.f32 %v643_v45, %v4106_v63  ;;  %vm896_vm13 = vweird.f32 %v2290_v25 }
 0x1e2   : > { %v2166_v42 = vclamps-f32 %v784_v10, 1.0  ;;  %v893_v51 = vmul.f32 %v2290_v25, %v892_v58  ;;  %v691_v9 = vmul.f32 %v2292_v26, %v3807_v34  ;;  %vm895_vm14 = vweird.f32 %v3797_v54  ;;  %v4116_v54 = vld [vmem:[#allocation15_spill] sm:$0xff] }
 0x1e3   : > { %vm3831_vm15 = vcmp.eq.f32.partialorder %v899_v62, 8.507059e+37  ;;  %v902_v20 = vor.u32 1.1754944e-38, %v901_v46  ;;  %2293 = vrcp.f32 %v3825_v35  ;;  %v3836_v7 = vadd.f32 1.0, %v728_v59  ;;  %vm897_vm0 = vmor %vm895_vm14, %vm896_vm13  ;;  %v4122_v59 = vld [vmem:[#allocation8_spill] sm:$0xff] }
 0x1e4   : > { %v1910_v8 = vadd.f32 1.0, %v2166_v42  ;;  %v894_v60 = vadd.f32 %v2290_v25, %v893_v51  ;;  %v692_v16 = vsub.f32 1.0, %v691_v9  ;;  %vm696_vm1 = vweird.f32 %v2292_v26 }
 0x1e5   : > { %v699_v1 = vand.u32 2147483647, %v3807_v34  ;;  %v701_v57 = vand.u32 2147483648, %v3807_v34  ;;  %v645_v56 = vadd.f32 0.112945676, %v644_v29  ;;  %2295 = vrcp.f32 %v3836_v7 }
 0x1e6   : > { %v1942_v0 = vmul.f32 %v1910_v8, %v4116_v54  ;;  %v898_v13 = vsel %vm897_vm0, %v2290_v25, %v894_v60  ;;  %v693_v11 = vmul.f32 %v2292_v26, %v692_v16  ;;  %v718_v12 = vadd.f32 1.1283791, %v4117_v2  ;;  %v4123_v16 = vld [vmem:[#allocation3_spill] sm:$0xff] }
 0x1e7   : > { %v633_v36 = vmul.f32 %v632_v47, %v4106_v63  ;;  %v903_v19 = vsel %vm3831_vm15, %v902_v20, %v898_v13  ;;  %vm695_vm2 = vweird.f32 %v3807_v34  ;;  %v646_v30 = vmul.f32 %v645_v56, %v4106_v63  ;;  %v4121_v34 = vld [vmem:[#allocation19_spill] sm:$0xff] }
 0x1e8   : > { %2022 = vmatpush.msrb.mxu3 %v1942_v0  ;;  %v904_v18 = vmul.f32 %v903_v19, %v879_v55  ;;  %v694_v44 = vadd.f32 %v2292_v26, %v693_v11  ;;  %v797_v37 = vmul.f32 %v4118_v53, %v4098_v49  ;;  %v564_v39 = vmul.f32 0.5, %v4119_v24  ;;  %vm697_vm3 = vmor %vm695_vm2, %vm696_vm1  ;;  %v4124_v11 = vld [vmem:[#allocation6_spill] sm:$0xff] }
 0x1e9   : > { %v2294_v32 = vpop.eup %2293  ;;  %v679_v3 = vmul.f32 %v678_v61, %v4120_v15  ;;  %v702_v21 = vor.u32 1.1754944e-38, %v701_v57  ;;  %vm700_vm4 = vcmp.eq.f32.partialorder %v699_v1, 8.507059e+37  ;;  %v634_v52 = vadd.f32 0.05243302, %v633_v36 }
 0x1ea   : > { %v2169_v38 = vclamps-f32 %v904_v18, 1.0  ;;  %v698_v14 = vsel %vm697_vm3, %v2292_v26, %v694_v44  ;;  %v811_v27 = vmul.f32 %v2294_v32, %v3825_v35  ;;  %v569_v33 = vmul.f32 0.5, %v4121_v34 }
 0x1eb   : > { %v703_v17 = vsel %vm700_vm4, %v702_v21, %v698_v14  ;;  %v647_v25 = vadd.f32 0.4994258, %v646_v30  ;;  %v2296_v48 = vpop.eup %2295  ;;  %v821_v40 = vand.u32 2147483648, %v3825_v35  ;;  %v798_v22 = vadd.f32 1.1283791, %v797_v37  ;;  %v4126_v14 = vld [vmem:[#allocation24_spill] sm:$0xff] }
 0x1ec   : > { %v1913_v4 = vadd.f32 1.0, %v2169_v38  ;;  %v704_v49 = vmul.f32 %v703_v17, %v679_v3  ;;  %v812_v45 = vsub.f32 1.0, %v811_v27  ;;  %v819_v62 = vand.u32 2147483647, %v3825_v35 }
 0x1ed   : > { %v731_v46 = vmul.f32 %v2296_v48, %v3836_v7  ;;  %v648_v23 = vmul.f32 %v647_v25, %v4106_v63  ;;  %vm816_vm5 = vweird.f32 %v2294_v32  ;;  %v635_v43 = vmul.f32 %v634_v52, %v4106_v63  ;;  %v4127_v25 = vld [vmem:[#allocation18_spill] sm:$0xff] }
 0x1ee   : > { %v1945_v50 = vmul.f32 %v1913_v4, %v569_v33  ;;  %v2164_v31 = vclamps-f32 %v704_v49, 1.0  ;;  %v813_v5 = vmul.f32 %v2294_v32, %v812_v45  ;;  %vm815_vm6 = vweird.f32 %v3825_v35  ;;  %v1971_v35 = vld [vmem:[%s3893_s3] sm:$0xff]  ;;  %v1978_v45 = vpop.permute.xlu1 %1977 }
 0x1ef   : > { %v732_v47 = vsub.f32 1.0, %v731_v46  ;;  %v649_v61 = vadd.f32 1.0, %v648_v23  ;;  %v822_v58 = vor.u32 1.1754944e-38, %v821_v40  ;;  %v741_v26 = vand.u32 2147483648, %v3836_v7  ;;  %vm817_vm7 = vmor %vm815_vm6, %vm816_vm5 }
 0x1f0   : > { %1997 = vmatpush.msrb.mxu2 %v1945_v50  ;;  %v1908_v6 = vadd.f32 1.0, %v2164_v31  ;;  %v814_v10 = vadd.f32 %v2294_v32, %v813_v5  ;;  %vm736_vm8 = vweird.f32 %v2296_v48  ;;  %v739_v55 = vand.u32 2147483647, %v3836_v7 }
 0x1f1   : > { %v733_v28 = vmul.f32 %v2296_v48, %v732_v47  ;;  %2297 = vrcp.f32 %v649_v61  ;;  %v799_v29 = vmul.f32 %v798_v22, %v4122_v59  ;;  %vm820_vm9 = vcmp.eq.f32.partialorder %v819_v62, 8.507059e+37  ;;  %v1983_v62 = vpop.permute.xlu2 %1982 }
 0x1f2   : > { %v1940_v42 = vmul.f32 %v1908_v6, %v564_v39  ;;  %v818_v51 = vsel %vm817_vm7, %v2294_v32, %v814_v10  ;;  %vm735_vm10 = vweird.f32 %v3836_v7  ;;  %v636_v20 = vadd.f32 0.18741608, %v635_v43  ;;  %v4125_v32 = vld [vmem:[#allocation2_spill] sm:$0xff] }
 0x1f3   : > { %v823_v9 = vsel %vm820_vm9, %v822_v58, %v818_v51  ;;  %v734_v41 = vadd.f32 %v2296_v48, %v733_v28  ;;  %vm737_vm11 = vmor %vm735_vm10, %vm736_vm8  ;;  %v742_v60 = vor.u32 1.1754944e-38, %v741_v26  ;;  %v719_v1 = vmul.f32 %v718_v12, %v4123_v16  ;;  %v1972_v12 = vld [vmem:[%s3893_s3 + $0x8] sm:$0x3] }
 0x1f4   : > { %2023 = vmatpush.msrb.mxu3 %v1940_v42  ;;  %v824_v8 = vmul.f32 %v823_v9, %v799_v29  ;;  %vm740_vm12 = vcmp.eq.f32.partialorder %v739_v55, 8.507059e+37  ;;  %v567_v2 = vmul.f32 0.5, %v4124_v11  ;;  %v637_v36 = vmul.f32 %v636_v20, %v4106_v63 }
 0x1f5   : > { %2024 = vmatmul.f32.vlgmr.msrb.gmra.mxu3 %v1971_v35  ;;  %v738_v57 = vsel %vm737_vm11, %v2296_v48, %v734_v41  ;;  %v565_v53 = vmul.f32 0.5, %v4125_v32  ;;  %v661_v24 = vand.u32 2147483648, %v649_v61  ;;  %v659_v3 = vand.u32 2147483647, %v649_v61 }
 0x1f6   : > { %v2167_v56 = vclamps-f32 %v824_v8, 1.0  ;;  %v743_v54 = vsel %vm740_vm12, %v742_v60, %v738_v57  ;;  %v638_v39 = vadd.f32 1.1283791, %v637_v36  ;;  %vm655_vm14 = vweird.f32 %v649_v61 }
 0x1f7   : > { %v2298_v0 = vpop.eup %2297  ;;  %v744_v13 = vmul.f32 %v743_v54, %v719_v1  ;;  %v662_v38 = vor.u32 1.1754944e-38, %v661_v24  ;;  %vm660_vm0 = vcmp.eq.f32.partialorder %v659_v3, 8.507059e+37  ;;  %v563_v48 = vmul.f32 0.5, %v4127_v25 }
 0x1f8   : > { %v1911_v19 = vadd.f32 1.0, %v2167_v56  ;;  %v651_v7 = vmul.f32 %v2298_v0, %v649_v61  ;;  %vm656_vm13 = vweird.f32 %v2298_v0  ;;  %v639_v27 = vmul.f32 %v638_v39, %v4126_v14 }
 0x1f9   : > { %v2165_v18 = vclamps-f32 %v744_v13, 1.0  ;;  %vm657_vm15 = vmor %vm655_vm14, %vm656_vm13 }
 0x1fa   : > { %v1943_v44 = vmul.f32 %v1911_v19, %v567_v2  ;;  %v652_v30 = vsub.f32 1.0, %v651_v7 }
 0x1fb   : > { %v1909_v37 = vadd.f32 1.0, %v2165_v18 }
 0x1fc   : > { %1998 = vmatpush.msrb.mxu2 %v1943_v44  ;;  %v653_v15 = vmul.f32 %v2298_v0, %v652_v30 }
 0x1fd   : > { %v1941_v21 = vmul.f32 %v1909_v37, %v565_v53  ;;  %2027 = vmatmul.f32.gmra.mxu3 %v1972_v12 }
 0x1fe   : > { %v654_v63 = vadd.f32 %v2298_v0, %v653_v15 }
 0x1ff   : > { %1999 = vmatpush.msrb.mxu2 %v1941_v21 }
 0x200   : > { %v658_v52 = vsel %vm657_vm15, %v2298_v0, %v654_v63 }
 0x201   : > { %v663_v34 = vsel %vm660_vm0, %v662_v38, %v658_v52 }
 0x202   : > { %v664_v33 = vmul.f32 %v663_v34, %v639_v27 }
 0x204   : > { %v2163_v17 = vclamps-f32 %v664_v33, 1.0 }
 0x206   : > { %v1907_v4 = vadd.f32 1.0, %v2163_v17 }
 0x208   : > { %v1939_v49 = vmul.f32 %v1907_v4, %v563_v48 }
 0x20a   : > { %2000 = vmatpush.msrb.mxu2 %v1939_v49 }
 0x20b   : > { %2001 = vmatmul.f32.vlgmr.msrb.gmra.mxu2 %v1971_v35 }
 0x213   : > { %2004 = vmatmul.f32.gmra.mxu2 %v1972_v12 }
 0x278   : > { %v2025_v40 = vpop.f32.mrf.mxu3 }
 0x279   : > { %v2026_v22 = vadd.f32 %v2025_v40, %v1978_v45 }
 0x27b   : > { %2032 = vst [vmem:[%s262_s13 + $0x8] sm:$0xff] %v2026_v22 }
 0x280   : > { %v2028_v46 = vpop.f32.mrf.mxu3 }
 0x281   : > { %v2029_v23 = vadd.f32 %v2028_v46, %v1983_v62 }
 0x283   : > { %2034 = vst [vmem:[%s262_s13 + $0x18] sm:$0x3] %v2029_v23 }
 0x28e   : > { %v2002_v50 = vpop.f32.mrf.mxu2 }
 0x28f   : > { %v2003_v31 = vadd.f32 %v2002_v50, %v1978_v45 }
 0x291   : > { %2031 = vst [vmem:[%s262_s13] sm:$0xff] %v2003_v31 }
 0x296   : > { %v2005_v5 = vpop.f32.mrf.mxu2 }
 0x297   : > { %v2006_v43 = vadd.f32 %v2005_v5, %v1983_v62 }
 0x299   : > { %2033 = vst [vmem:[%s262_s13 + $0x10] sm:$0x3] %v2006_v43 }
 0x29a PF: > { %s15_s20 = sadd.s32 1, %s2321_s20   ;;  %s4128_s18 = smov %s2317_s19 }
 0x29b   : > { %p12_p5 = scmp.ge.s32.totalorder %s15_s20, 4   ;;  %s4129_s19 = smov %s4131_s21 }
 0x29d   :  { %14 = sbr.rel (!%p12_p5) target bundleno = 2 (0x2), region = 70 }

// kernel: fno2d_forward.9
= control target key start
LH: loop header
LB: loop body
LE: loop exit
PB: predicated region body
PF: predicated region fallthrough
CT: control target
= control target key end

     0   :  { %s2278_s21 = smov 0   ;;  %s2280_s22 = smov 0   ;;  %s5919_s0 = inlined_call_operand.vmem [shape: f32[2,32,256], index: 0, kind: input, shape index: {}]   ;;  %s5920_s1 = inlined_call_operand.vmem [shape: f32[256,128], index: 1, kind: input, shape index: {}]   ;;  %s5921_s2 = inlined_call_operand.vmem [shape: f32[256,128], index: 2, kind: input, shape index: {}]   ;;  %s5922_s3 = inlined_call_operand.vmem [shape: f32[32,32,128], index: 3, kind: input, shape index: {}]   ;;  %s5923_s4 = inlined_call_operand.vmem [shape: f32[32,32,128], index: 4, kind: input, shape index: {}]   ;;  %s5924_s5 = inlined_call_operand.vmem [shape: f32[2,32,128], index: 5, kind: output, shape index: {0}]   ;;  %s5925_s6 = inlined_call_operand.vmem [shape: f32[2,32,128], index: 6, kind: output, shape index: {1}]  }
   0x1   :  { %s2282_s23 = smov 0  }
   0x2 LB: > { %s29_s24 = sadd.s32 1, %s2237_s22  ;;  %p2183_p0 = scmp.ge.s32.totalorder %s2241_s23, 1  ;;  %s2241_s23 = sphi %s2282_s23, %s17_s23   ;;  %s2237_s22 = sphi %s2280_s22, %s6747_s22   ;;  %s2233_s21 = sphi %s2278_s21, %s6746_s21  }
   0x3   : > { %p31_p1 = scmp.ge.s32.totalorder %s29_s24, 2  ;;  %p256_p2 = scmp.lt.s32.totalorder %s2241_s23, 3 }
   0x5   : > { %s6749_s24 = smov (%p31_p1, %s29_s24), 0  ;;  %p257_p3 = pnand %p2183_p0, %p256_p2 }
   0x7   : > { %260 = sbr.rel (%p257_p3) target bundleno = 652 (0x28c), region = 40 }
   0xc   : > { %v478_v0 = vld [vmem:[%s5921_s2 + $0x78] sm:$0xff]  ;;  %v477_v2 = vld [vmem:[%s5921_s2 + $0x70] sm:$0xff]  ;;  %v476_v4 = vld [vmem:[%s5921_s2 + $0x68] sm:$0xff]  ;;  %p306_p4 = scmp.lt.s32.totalorder %s2233_s21, 1 }
   0xd   : > { %v494_v1 = vld [vmem:[%s5921_s2 + $0xf8] sm:$0xff]  ;;  %495 = vmatpush.msra.mxu2 %v478_v0  ;;  %v493_v3 = vld [vmem:[%s5921_s2 + $0xf0] sm:$0xff]  ;;  %v492_v5 = vld [vmem:[%s5921_s2 + $0xe8] sm:$0xff] }
   0xe   : > { %524 = vmatpush.msra.mxu3 %v494_v1  ;;  %v376_v6 = vld [vmem:[%s5920_s1 + $0x78] sm:$0xff]  ;;  %v375_v8 = vld [vmem:[%s5920_s1 + $0x70] sm:$0xff]  ;;  %v475_v10 = vld [vmem:[%s5921_s2 + $0x60] sm:$0xff]  ;;  %s6751_s21 = smov (!%p306_p4, %s2233_s21), 1 }
   0xf   : > { %v392_v7 = vld [vmem:[%s5920_s1 + $0xf8] sm:$0xff]  ;;  %496 = vmatpush.msra.mxu2 %v477_v2  ;;  %v391_v9 = vld [vmem:[%s5920_s1 + $0xf0] sm:$0xff]  ;;  %393 = vmatpush.msra.mxu0 %v376_v6  ;;  %v491_v11 = vld [vmem:[%s5921_s2 + $0xe0] sm:$0xff]  ;;  %s2192_s25 = sshll.u32 %s6751_s21, 6  ;;  %s2193_s29 = sshll.u32 %s6751_s21, 5 }
  0x10   : > { %525 = vmatpush.msra.mxu3 %v493_v3  ;;  %422 = vmatpush.msra.mxu1 %v392_v7  ;;  %v374_v12 = vld [vmem:[%s5920_s1 + $0x68] sm:$0xff]  ;;  %v474_v14 = vld [vmem:[%s5921_s2 + $0x58] sm:$0xff]  ;;  %v373_v16 = vld [vmem:[%s5920_s1 + $0x60] sm:$0xff]  ;;  %s2476_s16 = scalar_lea.vmem %s5919_s0, %s2192_s25  ;;  %s331_s8 = scalar_lea.vmem %s5924_s5, %s2193_s29 }
  0x11   : > { %497 = vmatpush.msra.mxu2 %v476_v4  ;;  %v390_v13 = vld [vmem:[%s5920_s1 + $0xe8] sm:$0xff]  ;;  %394 = vmatpush.msra.mxu0 %v375_v8  ;;  %v490_v15 = vld [vmem:[%s5921_s2 + $0xd8] sm:$0xff]  ;;  %v389_v17 = vld [vmem:[%s5920_s1 + $0xe0] sm:$0xff]  ;;  %s336_s11 = scalar_lea.vmem %s5925_s6, %s2193_s29 }
  0x12   : > { %526 = vmatpush.msra.mxu3 %v492_v5  ;;  %423 = vmatpush.msra.mxu1 %v391_v9  ;;  %v473_v18 = vld [vmem:[%s5921_s2 + $0x50] sm:$0xff]  ;;  %v372_v20 = vld [vmem:[%s5920_s1 + $0x58] sm:$0xff]  ;;  %v472_v22 = vld [vmem:[%s5921_s2 + $0x48] sm:$0xff] }
  0x13   : > { %498 = vmatpush.msra.mxu2 %v475_v10  ;;  %395 = vmatpush.msra.mxu0 %v374_v12  ;;  %v489_v19 = vld [vmem:[%s5921_s2 + $0xd0] sm:$0xff]  ;;  %v388_v21 = vld [vmem:[%s5920_s1 + $0xd8] sm:$0xff]  ;;  %v488_v23 = vld [vmem:[%s5921_s2 + $0xc8] sm:$0xff] }
  0x14   : > { %527 = vmatpush.msra.mxu3 %v491_v11  ;;  %424 = vmatpush.msra.mxu1 %v390_v13  ;;  %v371_v24 = vld [vmem:[%s5920_s1 + $0x50] sm:$0xff]  ;;  %v471_v26 = vld [vmem:[%s5921_s2 + $0x40] sm:$0xff]  ;;  %v370_v28 = vld [vmem:[%s5920_s1 + $0x48] sm:$0xff] }
  0x15   : > { %499 = vmatpush.msra.mxu2 %v474_v14  ;;  %396 = vmatpush.msra.mxu0 %v373_v16  ;;  %v387_v25 = vld [vmem:[%s5920_s1 + $0xd0] sm:$0xff]  ;;  %v487_v27 = vld [vmem:[%s5921_s2 + $0xc0] sm:$0xff]  ;;  %v386_v29 = vld [vmem:[%s5920_s1 + $0xc8] sm:$0xff] }
  0x16   : > { %528 = vmatpush.msra.mxu3 %v490_v15  ;;  %425 = vmatpush.msra.mxu1 %v389_v17  ;;  %v470_v30 = vld [vmem:[%s5921_s2 + $0x38] sm:$0xff]  ;;  %v369_v32 = vld [vmem:[%s5920_s1 + $0x40] sm:$0xff]  ;;  %v469_v34 = vld [vmem:[%s5921_s2 + $0x30] sm:$0xff] }
  0x17   : > { %500 = vmatpush.msra.mxu2 %v473_v18  ;;  %397 = vmatpush.msra.mxu0 %v372_v20  ;;  %v486_v31 = vld [vmem:[%s5921_s2 + $0xb8] sm:$0xff]  ;;  %v385_v33 = vld [vmem:[%s5920_s1 + $0xc0] sm:$0xff]  ;;  %v485_v35 = vld [vmem:[%s5921_s2 + $0xb0] sm:$0xff] }
  0x18   : > { %529 = vmatpush.msra.mxu3 %v489_v19  ;;  %426 = vmatpush.msra.mxu1 %v388_v21  ;;  %v368_v36 = vld [vmem:[%s5920_s1 + $0x38] sm:$0xff]  ;;  %v468_v38 = vld [vmem:[%s5921_s2 + $0x28] sm:$0xff]  ;;  %v367_v40 = vld [vmem:[%s5920_s1 + $0x30] sm:$0xff] }
  0x19   : > { %501 = vmatpush.msra.mxu2 %v472_v22  ;;  %398 = vmatpush.msra.mxu0 %v371_v24  ;;  %v384_v37 = vld [vmem:[%s5920_s1 + $0xb8] sm:$0xff]  ;;  %v484_v39 = vld [vmem:[%s5921_s2 + $0xa8] sm:$0xff]  ;;  %v383_v41 = vld [vmem:[%s5920_s1 + $0xb0] sm:$0xff] }
  0x1a   : > { %530 = vmatpush.msra.mxu3 %v488_v23  ;;  %427 = vmatpush.msra.mxu1 %v387_v25  ;;  %v467_v42 = vld [vmem:[%s5921_s2 + $0x20] sm:$0xff]  ;;  %v366_v44 = vld [vmem:[%s5920_s1 + $0x28] sm:$0xff]  ;;  %v466_v46 = vld [vmem:[%s5921_s2 + $0x18] sm:$0xff] }
  0x1b   : > { %502 = vmatpush.msra.mxu2 %v471_v26  ;;  %399 = vmatpush.msra.mxu0 %v370_v28  ;;  %v483_v43 = vld [vmem:[%s5921_s2 + $0xa0] sm:$0xff]  ;;  %v382_v45 = vld [vmem:[%s5920_s1 + $0xa8] sm:$0xff]  ;;  %v482_v47 = vld [vmem:[%s5921_s2 + $0x98] sm:$0xff] }
  0x1c   : > { %531 = vmatpush.msra.mxu3 %v487_v27  ;;  %428 = vmatpush.msra.mxu1 %v386_v29  ;;  %v365_v48 = vld [vmem:[%s5920_s1 + $0x20] sm:$0xff]  ;;  %v465_v50 = vld [vmem:[%s5921_s2 + $0x10] sm:$0xff]  ;;  %v364_v52 = vld [vmem:[%s5920_s1 + $0x18] sm:$0xff] }
  0x1d   : > { %503 = vmatpush.msra.mxu2 %v470_v30  ;;  %400 = vmatpush.msra.mxu0 %v369_v32  ;;  %v381_v49 = vld [vmem:[%s5920_s1 + $0xa0] sm:$0xff]  ;;  %v481_v51 = vld [vmem:[%s5921_s2 + $0x90] sm:$0xff]  ;;  %v380_v53 = vld [vmem:[%s5920_s1 + $0x98] sm:$0xff] }
  0x1e   : > { %532 = vmatpush.msra.mxu3 %v486_v31  ;;  %429 = vmatpush.msra.mxu1 %v385_v33  ;;  %v464_v54 = vld [vmem:[%s5921_s2 + $0x8] sm:$0xff]  ;;  %v363_v56 = vld [vmem:[%s5920_s1 + $0x10] sm:$0xff]  ;;  %v463_v58 = vld [vmem:[%s5921_s2] sm:$0xff] }
  0x1f   : > { %504 = vmatpush.msra.mxu2 %v469_v34  ;;  %401 = vmatpush.msra.mxu0 %v368_v36  ;;  %v480_v55 = vld [vmem:[%s5921_s2 + $0x88] sm:$0xff]  ;;  %v379_v57 = vld [vmem:[%s5920_s1 + $0x90] sm:$0xff]  ;;  %v479_v59 = vld [vmem:[%s5921_s2 + $0x80] sm:$0xff] }
  0x20   : > { %533 = vmatpush.msra.mxu3 %v485_v35  ;;  %430 = vmatpush.msra.mxu1 %v384_v37  ;;  %v349_v60 = vld [vmem:[%s2476_s16] sm:$0xff]  ;;  %v350_v61 = vld [vmem:[%s2476_s16 + $0x8] sm:$0xff]  ;;  %v351_v2 = vld [vmem:[%s2476_s16 + $0x10] sm:$0xff] }
  0x21   : > { %505 = vmatpush.msra.mxu2 %v468_v38  ;;  %402 = vmatpush.msra.mxu0 %v367_v40  ;;  %v362_v62 = vld [vmem:[%s5920_s1 + $0x8] sm:$0xff]  ;;  %v361_v0 = vld [vmem:[%s5920_s1] sm:$0xff]  ;;  %v352_v3 = vld [vmem:[%s2476_s16 + $0x18] sm:$0xff] }
  0x22   : > { %534 = vmatpush.msra.mxu3 %v484_v39  ;;  %431 = vmatpush.msra.mxu1 %v383_v41  ;;  %v378_v63 = vld [vmem:[%s5920_s1 + $0x88] sm:$0xff]  ;;  %v377_v1 = vld [vmem:[%s5920_s1 + $0x80] sm:$0xff]  ;;  %v355_v6 = vld [vmem:[%s2476_s16 + $0x30] sm:$0xff] }
  0x23   : > { %506 = vmatpush.msra.mxu2 %v467_v42  ;;  %403 = vmatpush.msra.mxu0 %v366_v44  ;;  %v353_v4 = vld [vmem:[%s2476_s16 + $0x20] sm:$0xff]  ;;  %v354_v5 = vld [vmem:[%s2476_s16 + $0x28] sm:$0xff]  ;;  %v356_v7 = vld [vmem:[%s2476_s16 + $0x38] sm:$0xff] }
  0x24   : > { %535 = vmatpush.msra.mxu3 %v483_v43  ;;  %432 = vmatpush.msra.mxu1 %v382_v45  ;;  %v2513_v16 = vld [vmem:[%s5922_s3] sm:$0xff]  ;;  %v2518_v17 = vld [vmem:[%s5922_s3 + $0x8] sm:$0xff]  ;;  %v2523_v20 = vld [vmem:[%s5922_s3 + $0x10] sm:$0xff] }
  0x25   : > { %507 = vmatpush.msra.mxu2 %v466_v46  ;;  %404 = vmatpush.msra.mxu0 %v365_v48  ;;  %6056 = vst [vmem:[#allocation4_spill] sm:$0xff] %v2513_v16  ;;  %v2528_v21 = vld [vmem:[%s5922_s3 + $0x18] sm:$0xff]  ;;  %v2533_v22 = vld [vmem:[%s5922_s3 + $0x20] sm:$0xff]  ;;  %v2538_v23 = vld [vmem:[%s5922_s3 + $0x28] sm:$0xff] }
  0x26   : > { %536 = vmatpush.msra.mxu3 %v482_v47  ;;  %433 = vmatpush.msra.mxu1 %v381_v49  ;;  %6057 = vst [vmem:[#allocation5_spill] sm:$0xff] %v2518_v17  ;;  %v2545_v25 = vld [vmem:[%s5922_s3 + $0x30] sm:$0xff]  ;;  %v2550_v26 = vld [vmem:[%s5922_s3 + $0x38] sm:$0xff]  ;;  %v2555_v27 = vld [vmem:[%s5922_s3 + $0x40] sm:$0xff] }
  0x27   : > { %508 = vmatpush.msra.mxu2 %v465_v50  ;;  %405 = vmatpush.msra.mxu0 %v364_v52  ;;  %6058 = vst [vmem:[#allocation6_spill] sm:$0xff] %v2523_v20  ;;  %v2560_v28 = vld [vmem:[%s5922_s3 + $0x48] sm:$0xff]  ;;  %v2567_v30 = vld [vmem:[%s5922_s3 + $0x50] sm:$0xff]  ;;  %v2572_v31 = vld [vmem:[%s5922_s3 + $0x58] sm:$0xff] }
  0x28   : > { %537 = vmatpush.msra.mxu3 %v481_v51  ;;  %434 = vmatpush.msra.mxu1 %v380_v53  ;;  %6059 = vst [vmem:[#allocation7_spill] sm:$0xff] %v2528_v21  ;;  %v2577_v32 = vld [vmem:[%s5922_s3 + $0x60] sm:$0xff]  ;;  %v2582_v33 = vld [vmem:[%s5922_s3 + $0x68] sm:$0xff]  ;;  %v2589_v35 = vld [vmem:[%s5922_s3 + $0x70] sm:$0xff] }
  0x29   : > { %509 = vmatpush.msra.mxu2 %v464_v54  ;;  %406 = vmatpush.msra.mxu0 %v363_v56  ;;  %6060 = vst [vmem:[#allocation8_spill] sm:$0xff] %v2533_v22  ;;  %v2594_v36 = vld [vmem:[%s5922_s3 + $0x78] sm:$0xff]  ;;  %v2599_v37 = vld [vmem:[%s5922_s3 + $0x80] sm:$0xff]  ;;  %v2604_v38 = vld [vmem:[%s5922_s3 + $0x88] sm:$0xff] }
  0x2a   : > { %538 = vmatpush.msra.mxu3 %v480_v55  ;;  %435 = vmatpush.msra.mxu1 %v379_v57  ;;  %6061 = vst [vmem:[#allocation9_spill] sm:$0xff] %v2538_v23  ;;  %v2615_v42 = vld [vmem:[%s5922_s3 + $0x90] sm:$0xff]  ;;  %v2620_v43 = vld [vmem:[%s5922_s3 + $0x98] sm:$0xff]  ;;  %v2625_v44 = vld [vmem:[%s5922_s3 + $0xa0] sm:$0xff] }
  0x2b   : > { %510 = vmatpush.msra.mxu2 %v463_v58  ;;  %407 = vmatpush.msra.mxu0 %v362_v62  ;;  %6062 = vst [vmem:[#allocation10_spill] sm:$0xff] %v2545_v25  ;;  %v2630_v45 = vld [vmem:[%s5922_s3 + $0xa8] sm:$0xff]  ;;  %v2647_v50 = vld [vmem:[%s5922_s3 + $0xb0] sm:$0xff]  ;;  %v2652_v51 = vld [vmem:[%s5922_s3 + $0xb8] sm:$0xff] }
  0x2c   : > { %539 = vmatpush.msra.mxu3 %v479_v59  ;;  %511 = vmatmul.f32.vlgmr.msra.gmra.mxu2 %v349_v60  ;;  %6063 = vst [vmem:[#allocation11_spill] sm:$0xff] %v2550_v26  ;;  %v2657_v52 = vld [vmem:[%s5922_s3 + $0xc0] sm:$0xff]  ;;  %v2678_v57 = vld [vmem:[%s5922_s3 + $0xc8] sm:$0xff]  ;;  %v2683_v58 = vld [vmem:[%s5922_s3 + $0xd0] sm:$0xff] }
  0x2d   : > { %540 = vmatmul.f32.vlgmr.msra.gmra.mxu3 %v350_v61  ;;  %436 = vmatpush.msra.mxu1 %v378_v63  ;;  %6064 = vst [vmem:[#allocation12_spill] sm:$0xff] %v2555_v27  ;;  %v2688_v59 = vld [vmem:[%s5922_s3 + $0xd8] sm:$0xff] }
  0x2e   : > { %408 = vmatpush.msra.mxu0 %v361_v0  ;;  %6065 = vst [vmem:[#allocation13_spill] sm:$0xff] %v2560_v28  ;;  %v2709_v0 = vld [vmem:[%s5922_s3 + $0xe0] sm:$0xff] }
  0x2f   : > { %437 = vmatpush.msra.mxu1 %v377_v1  ;;  %409 = vmatmul.f32.vlgmr.msra.gmra.mxu0 %v349_v60  ;;  %6066 = vst [vmem:[#allocation14_spill] sm:$0xff] %v2567_v30  ;;  %v2714_v1 = vld [vmem:[%s5922_s3 + $0xe8] sm:$0xff] }
  0x30   : > { %438 = vmatmul.f32.vlgmr.msra.gmra.mxu1 %v350_v61  ;;  %6067 = vst [vmem:[#allocation15_spill] sm:$0xff] %v2572_v31 }
  0x31   : > { %6068 = vst [vmem:[#allocation16_spill] sm:$0xff] %v2577_v32 }
  0x32   : > { %6069 = vst [vmem:[#allocation17_spill] sm:$0xff] %v2582_v33 }
  0x33   : > { %6070 = vst [vmem:[#allocation18_spill] sm:$0xff] %v2589_v35 }
  0x34   : > { %514 = vmatmul.f32.gmra.mxu2 %v351_v2  ;;  %6071 = vst [vmem:[#allocation19_spill] sm:$0xff] %v2594_v36 }
  0x35   : > { %543 = vmatmul.f32.gmra.mxu3 %v352_v3  ;;  %6072 = vst [vmem:[#allocation20_spill] sm:$0xff] %v2599_v37 }
  0x36   : > { %6073 = vst [vmem:[#allocation21_spill] sm:$0xff] %v2604_v38 }
  0x37   : > { %412 = vmatmul.f32.gmra.mxu0 %v351_v2  ;;  %6074 = vst [vmem:[#allocation22_spill] sm:$0xff] %v2615_v42  ;;  %v2719_v2 = vld [vmem:[%s5922_s3 + $0xf0] sm:$0xff] }
  0x38   : > { %441 = vmatmul.f32.gmra.mxu1 %v352_v3  ;;  %6075 = vst [vmem:[#allocation23_spill] sm:$0xff] %v2620_v43 }
  0x39   : > { %6076 = vst [vmem:[#allocation24_spill] sm:$0xff] %v2625_v44 }
  0x3a   : > { %6077 = vst [vmem:[#allocation25_spill] sm:$0xff] %v2630_v45 }
  0x3b   : > { %6078 = vst [vmem:[#allocation26_spill] sm:$0xff] %v2647_v50 }
  0x3c   : > { %517 = vmatmul.f32.gmra.mxu2 %v353_v4  ;;  %6079 = vst [vmem:[#allocation27_spill] sm:$0xff] %v2652_v51 }
  0x3d   : > { %546 = vmatmul.f32.gmra.mxu3 %v354_v5  ;;  %6080 = vst [vmem:[#allocation28_spill] sm:$0xff] %v2657_v52 }
  0x3e   : > { %6081 = vst [vmem:[#allocation29_spill] sm:$0xff] %v2678_v57 }
  0x3f   : > { %415 = vmatmul.f32.gmra.mxu0 %v353_v4  ;;  %6082 = vst [vmem:[#allocation30_spill] sm:$0xff] %v2683_v58 }
  0x40   : > { %444 = vmatmul.f32.gmra.mxu1 %v354_v5  ;;  %6083 = vst [vmem:[#allocation31_spill] sm:$0xff] %v2688_v59 }
  0x41   : > { %6084 = vst [vmem:[#allocation32_spill] sm:$0xff] %v2709_v0 }
  0x42   : > { %6085 = vst [vmem:[#allocation33_spill] sm:$0xff] %v2714_v1 }
  0x43   : > { %6086 = vst [vmem:[#allocation34_spill] sm:$0xff] %v2719_v2 }
  0x44   : > { %520 = vmatmul.f32.gmra.mxu2 %v355_v6 }
  0x45   : > { %549 = vmatmul.f32.gmra.mxu3 %v356_v7 }
  0x47   : > { %418 = vmatmul.f32.gmra.mxu0 %v355_v6 }
  0x48   : > { %447 = vmatmul.f32.gmra.mxu1 %v356_v7  ;;  %v2740_v7 = vld [vmem:[%s5922_s3 + $0xf8] sm:$0xff] }
  0x49   : > { %6087 = vst [vmem:[#allocation35_spill] sm:$0xff] %v2740_v7 }
  0xac   : > { %v410_v8 = vpop.f32.mrf.mxu0 }
  0xad   : > { %v439_v9 = vpop.f32.mrf.mxu1 }
  0xae   : > { %v440_v10 = vadd.f32 %v439_v9, %v410_v8  ;;  %v2745_v8 = vld [vmem:[%s5923_s4] sm:$0xff]  ;;  %v2750_v9 = vld [vmem:[%s5923_s4 + $0x8] sm:$0xff] }
  0xb0   : > { %v572_v11 = vrot.slane %v440_v10, 1  ;;  %v573_v12 = vrot.slane %v440_v10, 2  ;;  %v574_v13 = vrot.slane %v440_v10, 3  ;;  %v575_v14 = vrot.slane %v440_v10, 4 }
  0xb1   : > { %v576_v15 = vrot.slane %v440_v10, 5  ;;  %v577_v18 = vrot.slane %v440_v10, 6  ;;  %v578_v19 = vrot.slane %v440_v10, 7  ;;  %v2540_v24 = vperm.slane %v440_v10, 0 }
  0xb2   : > { %v2562_v29 = vperm.slane %v572_v11, 0  ;;  %v2584_v34 = vperm.slane %v573_v12, 0  ;;  %v2606_v39 = vperm.slane %v574_v13, 0  ;;  %v2608_v40 = vperm.slane %v575_v14, 0  ;;  %v2771_v14 = vld [vmem:[%s5923_s4 + $0x10] sm:$0xff] }
  0xb3   : > { %v2610_v41 = vperm.slane %v576_v15, 0  ;;  %v2632_v46 = vperm.slane %v577_v18, 0  ;;  %v2634_v47 = vperm.slane %v578_v19, 0  ;;  %v2638_v48 = vmul.f32 %v2540_v24, %v2513_v16  ;;  %v2776_v15 = vld [vmem:[%s5923_s4 + $0x18] sm:$0xff]  ;;  %v2781_v18 = vld [vmem:[%s5923_s4 + $0x20] sm:$0xff] }
  0xb4   : > { %v2642_v49 = vmul.f32 %v2540_v24, %v2518_v17  ;;  %v2661_v53 = vmul.f32 %v2540_v24, %v2523_v20  ;;  %v2665_v54 = vmul.f32 %v2540_v24, %v2528_v21  ;;  %v2669_v55 = vmul.f32 %v2562_v29, %v2533_v22  ;;  %v2893_v21 = vld [vmem:[%s5923_s4 + $0x70] sm:$0xff]  ;;  %v2924_v17 = vld [vmem:[%s5923_s4 + $0x88] sm:$0xff] }
  0xb5   : > { %v2673_v56 = vmul.f32 %v2562_v29, %v2538_v23  ;;  %v2692_v60 = vmul.f32 %v2562_v29, %v2545_v25  ;;  %v2696_v61 = vmul.f32 %v2562_v29, %v2550_v26  ;;  %v2700_v62 = vmul.f32 %v2584_v34, %v2555_v27  ;;  %v2864_v25 = vld [vmem:[%s5923_s4 + $0x58] sm:$0xff] }
  0xb6   : > { %v2704_v63 = vmul.f32 %v2584_v34, %v2560_v28  ;;  %v2723_v3 = vmul.f32 %v2584_v34, %v2567_v30  ;;  %v2727_v4 = vmul.f32 %v2584_v34, %v2572_v31  ;;  %v2731_v5 = vmul.f32 %v2606_v39, %v2577_v32  ;;  %v2802_v32 = vld [vmem:[%s5923_s4 + $0x28] sm:$0xff]  ;;  %v2833_v28 = vld [vmem:[%s5923_s4 + $0x40] sm:$0xff] }
  0xb7   : > { %v2735_v6 = vmul.f32 %v2606_v39, %v2582_v33  ;;  %v2754_v10 = vmul.f32 %v2606_v39, %v2589_v35  ;;  %v2758_v11 = vmul.f32 %v2606_v39, %v2594_v36  ;;  %v2762_v12 = vmul.f32 %v2608_v40, %v2599_v37  ;;  %v512_v35 = vpop.f32.mrf.mxu2  ;;  %v541_v33 = vpop.f32.mrf.mxu3 }
  0xb8   : > { %v2766_v13 = vmul.f32 %v2608_v40, %v2604_v38  ;;  %v2785_v19 = vmul.f32 %v2608_v40, %v2615_v42  ;;  %v2789_v38 = vmul.f32 %v2608_v40, %v2620_v43  ;;  %v2793_v37 = vmul.f32 %v2610_v41, %v2625_v44  ;;  %v2807_v43 = vld [vmem:[%s5923_s4 + $0x30] sm:$0xff]  ;;  %v2812_v44 = vld [vmem:[%s5923_s4 + $0x38] sm:$0xff] }
  0xb9   : > { %6088 = vst [vmem:[#allocation36_spill] sm:$0xff] %v2758_v11  ;;  %v2797_v36 = vmul.f32 %v2610_v41, %v2630_v45  ;;  %v2816_v45 = vmul.f32 %v2610_v41, %v2647_v50  ;;  %v2820_v42 = vmul.f32 %v2610_v41, %v2652_v51  ;;  %v2824_v31 = vmul.f32 %v2632_v46, %v2657_v52  ;;  %v2838_v50 = vld [vmem:[%s5923_s4 + $0x48] sm:$0xff]  ;;  %v2843_v51 = vld [vmem:[%s5923_s4 + $0x50] sm:$0xff] }
  0xba   : > { %6089 = vst [vmem:[#allocation37_spill] sm:$0xff] %v2762_v12  ;;  %v2828_v30 = vmul.f32 %v2632_v46, %v2678_v57  ;;  %v2847_v52 = vmul.f32 %v2632_v46, %v2683_v58  ;;  %v2851_v57 = vmul.f32 %v2632_v46, %v2688_v59  ;;  %v2855_v27 = vmul.f32 %v2634_v47, %v2709_v0  ;;  %v2869_v58 = vld [vmem:[%s5923_s4 + $0x60] sm:$0xff]  ;;  %v2874_v59 = vld [vmem:[%s5923_s4 + $0x68] sm:$0xff] }
  0xbb   : > { %6090 = vst [vmem:[#allocation38_spill] sm:$0xff] %v2766_v13  ;;  %v2859_v26 = vmul.f32 %v2634_v47, %v2714_v1  ;;  %v2878_v0 = vmul.f32 %v2634_v47, %v2719_v2  ;;  %v2882_v1 = vmul.f32 %v2634_v47, %v2740_v7  ;;  %v2886_v23 = vmul.f32 %v2540_v24, %v2745_v8  ;;  %v2898_v2 = vld [vmem:[%s5923_s4 + $0x78] sm:$0xff]  ;;  %v2903_v7 = vld [vmem:[%s5923_s4 + $0x80] sm:$0xff] }
  0xbc   : > { %6091 = vst [vmem:[#allocation39_spill] sm:$0xff] %v2785_v19  ;;  %v2888_v22 = vadd.f32 %v541_v33, %v512_v35  ;;  %v2911_v33 = vmul.f32 %v2540_v24, %v2771_v14  ;;  %v2915_v35 = vmul.f32 %v2540_v24, %v2776_v15  ;;  %v2919_v20 = vmul.f32 %v2562_v29, %v2781_v18 }
  0xbd   : > { %6092 = vst [vmem:[#allocation40_spill] sm:$0xff] %v2789_v38  ;;  %v2950_v16 = vmul.f32 %v2584_v34, %v2833_v28 }
  0xbe   : > { %6093 = vst [vmem:[#allocation41_spill] sm:$0xff] %v2793_v37  ;;  %v614_v37 = vrot.slane %v2888_v22, 7  ;;  %v3080_v38 = vperm.slane %v2888_v22, 0 }
  0xbf   : > { %6094 = vst [vmem:[#allocation42_spill] sm:$0xff] %v2797_v36  ;;  %v613_v36 = vrot.slane %v2888_v22, 6 }
  0xc0   : > { %6095 = vst [vmem:[#allocation43_spill] sm:$0xff] %v2816_v45  ;;  %v3075_v45 = vld [vmem:[%s5923_s4 + $0xf8] sm:$0xff] }
  0xc1   : > { %6096 = vst [vmem:[#allocation44_spill] sm:$0xff] %v2820_v42  ;;  %v612_v42 = vrot.slane %v2888_v22, 5 }
  0xc2   : > { %6097 = vst [vmem:[#allocation45_spill] sm:$0xff] %v2824_v31  ;;  %v611_v31 = vrot.slane %v2888_v22, 4 }
  0xc3   : > { %6098 = vst [vmem:[#allocation46_spill] sm:$0xff] %v2828_v30  ;;  %v3058_v30 = vld [vmem:[%s5923_s4 + $0xe8] sm:$0xff]  ;;  %v3122_v11 = vperm.slane %v612_v42, 0  ;;  %v1151_v42 = vmul.f32 %v3080_v38, %v2776_v15 }
  0xc4   : > { %6099 = vst [vmem:[#allocation47_spill] sm:$0xff] %v2847_v52  ;;  %v3053_v52 = vld [vmem:[%s5923_s4 + $0xe0] sm:$0xff] }
  0xc5   : > { %6100 = vst [vmem:[#allocation48_spill] sm:$0xff] %v2851_v57  ;;  %v609_v57 = vrot.slane %v2888_v22, 2 }
  0xc6   : > { %6101 = vst [vmem:[#allocation49_spill] sm:$0xff] %v2855_v27  ;;  %v3008_v27 = vmul.f32 %v2608_v40, %v2903_v7 }
  0xc7   : > { %6102 = vst [vmem:[#allocation50_spill] sm:$0xff] %v2859_v26  ;;  %v2986_v26 = vld [vmem:[%s5923_s4 + $0xb8] sm:$0xff] }
  0xc8   : > { %6103 = vst [vmem:[#allocation51_spill] sm:$0xff] %v2878_v0  ;;  %v2981_v0 = vmul.f32 %v2606_v39, %v2869_v58 }
  0xc9   : > { %6104 = vst [vmem:[#allocation52_spill] sm:$0xff] %v2882_v1  ;;  %v2955_v1 = vld [vmem:[%s5923_s4 + $0xa0] sm:$0xff] }
  0xca   : > { %6105 = vst [vmem:[#allocation53_spill] sm:$0xff] %v2886_v23  ;;  %v2907_v23 = vmul.f32 %v2540_v24, %v2750_v9  ;;  %v2938_v24 = vmul.f32 %v2562_v29, %v2802_v32 }
  0xcb   : > { %6107 = vst [vmem:[#allocation55_spill] sm:$0xff] %v2911_v33  ;;  %v2934_v33 = vld [vmem:[%s5923_s4 + $0x98] sm:$0xff] }
  0xcc   : > { %6106 = vst [vmem:[#allocation54_spill] sm:$0xff] %v2907_v23  ;;  %v2929_v23 = vld [vmem:[%s5923_s4 + $0x90] sm:$0xff] }
  0xcd   : > { %6108 = vst [vmem:[#allocation56_spill] sm:$0xff] %v2915_v35  ;;  %v2942_v35 = vmul.f32 %v2562_v29, %v2807_v43 }
  0xce   : > { %6109 = vst [vmem:[#allocation57_spill] sm:$0xff] %v2919_v20  ;;  %v2946_v20 = vmul.f32 %v2562_v29, %v2812_v44  ;;  %v2969_v29 = vmul.f32 %v2584_v34, %v2838_v50 }
  0xcf   : > { %6110 = vst [vmem:[#allocation58_spill] sm:$0xff] %v2938_v24  ;;  %v2960_v24 = vld [vmem:[%s5923_s4 + $0xa8] sm:$0xff] }
  0xd0   : > { %6111 = vst [vmem:[#allocation59_spill] sm:$0xff] %v2942_v35  ;;  %v2965_v35 = vld [vmem:[%s5923_s4 + $0xb0] sm:$0xff] }
  0xd1   : > { %6112 = vst [vmem:[#allocation60_spill] sm:$0xff] %v2946_v20  ;;  %v2977_v20 = vmul.f32 %v2584_v34, %v2864_v25 }
  0xd2   : > { %6113 = vst [vmem:[#allocation61_spill] sm:$0xff] %v2950_v16  ;;  %v2973_v16 = vmul.f32 %v2584_v34, %v2843_v51  ;;  %v2998_v34 = vmul.f32 %v2606_v39, %v2898_v2 }
  0xd3   : > { %6114 = vst [vmem:[#allocation62_spill] sm:$0xff] %v2969_v29  ;;  %v2990_v29 = vmul.f32 %v2606_v39, %v2874_v59 }
  0xd4   : > { %6115 = vst [vmem:[#allocation63_spill] sm:$0xff] %v2973_v16  ;;  %v2994_v16 = vmul.f32 %v2606_v39, %v2893_v21  ;;  %v3020_v39 = vmul.f32 %v2608_v40, %v2934_v33 }
  0xd5   : > { %6116 = vst [vmem:[#allocation64_spill] sm:$0xff] %v2977_v20  ;;  %v608_v20 = vrot.slane %v2888_v22, 1 }
  0xd6   : > { %6117 = vst [vmem:[#allocation65_spill] sm:$0xff] %v2981_v0  ;;  %v3004_v0 = vld [vmem:[%s5923_s4 + $0xc0] sm:$0xff] }
  0xd7   : > { %6118 = vst [vmem:[#allocation66_spill] sm:$0xff] %v2990_v29  ;;  %v3012_v29 = vmul.f32 %v2608_v40, %v2924_v17 }
  0xd8   : > { %6119 = vst [vmem:[#allocation67_spill] sm:$0xff] %v2994_v16  ;;  %v3016_v16 = vmul.f32 %v2608_v40, %v2929_v23  ;;  %v3043_v40 = vmul.f32 %v2610_v41, %v2960_v24 }
  0xd9   : > { %6120 = vst [vmem:[#allocation68_spill] sm:$0xff] %v2998_v34  ;;  %v3025_v34 = vld [vmem:[%s5923_s4 + $0xc8] sm:$0xff] }
  0xda   : > { %6121 = vst [vmem:[#allocation69_spill] sm:$0xff] %v3008_v27  ;;  %v3030_v27 = vld [vmem:[%s5923_s4 + $0xd0] sm:$0xff]  ;;  %v3090_v19 = vmul.f32 %v2632_v46, %v3025_v34 }
  0xdb   : > { %6122 = vst [vmem:[#allocation70_spill] sm:$0xff] %v3012_v29  ;;  %v3035_v29 = vld [vmem:[%s5923_s4 + $0xd8] sm:$0xff]  ;;  %v3094_v13 = vmul.f32 %v2632_v46, %v3030_v27 }
  0xdc   : > { %6123 = vst [vmem:[#allocation71_spill] sm:$0xff] %v3016_v16  ;;  %v3039_v16 = vmul.f32 %v2610_v41, %v2955_v1  ;;  %v3098_v12 = vmul.f32 %v2632_v46, %v3035_v29 }
  0xdd   : > { %6124 = vst [vmem:[#allocation72_spill] sm:$0xff] %v3020_v39  ;;  %v3047_v39 = vmul.f32 %v2610_v41, %v2965_v35 }
  0xde   : > { %6125 = vst [vmem:[#allocation73_spill] sm:$0xff] %v3039_v16  ;;  %v610_v16 = vrot.slane %v2888_v22, 3  ;;  %v3106_v22 = vmul.f32 %v2634_v47, %v3058_v30 }
  0xdf   : > { %6126 = vst [vmem:[#allocation74_spill] sm:$0xff] %v3043_v40  ;;  %v3063_v40 = vld [vmem:[%s5923_s4 + $0xf0] sm:$0xff] }
  0xe0   : > { %6127 = vst [vmem:[#allocation75_spill] sm:$0xff] %v3047_v39  ;;  %v3067_v39 = vmul.f32 %v2610_v41, %v2986_v26  ;;  %v3082_v41 = vperm.slane %v608_v20, 0  ;;  %v3102_v20 = vmul.f32 %v2634_v47, %v3053_v52 }
  0xe1   : > { %6128 = vst [vmem:[#allocation76_spill] sm:$0xff] %v3058_v30  ;;  %v3126_v30 = vperm.slane %v614_v37, 0  ;;  %v1150_v37 = vmul.f32 %v3080_v38, %v2771_v14 }
  0xe2   : > { %6129 = vst [vmem:[#allocation77_spill] sm:$0xff] %v3067_v39  ;;  %v3086_v39 = vmul.f32 %v2632_v46, %v3004_v0  ;;  %v3118_v46 = vperm.slane %v610_v16, 0  ;;  %v1153_v16 = vmul.f32 %v3082_v41, %v2802_v32 }
  0xe3   : > { %6131 = vst [vmem:[#allocation79_spill] sm:$0xff] %v3090_v19  ;;  %v3112_v19 = vperm.slane %v609_v57, 0  ;;  %v1152_v57 = vmul.f32 %v3082_v41, %v2781_v18 }
  0xe4   : > { %6130 = vst [vmem:[#allocation78_spill] sm:$0xff] %v3086_v39  ;;  %v3110_v39 = vmul.f32 %v2634_v47, %v3063_v40  ;;  %v1161_v14 = vmul.f32 %v3118_v46, %v2874_v59  ;;  %v1162_v15 = vmul.f32 %v3118_v46, %v2893_v21  ;;  %v1281_v18 = vsub.f32 %v2673_v56, %v1153_v16 }
  0xe5   : > { %6132 = vst [vmem:[#allocation80_spill] sm:$0xff] %v3094_v13  ;;  %v3116_v13 = vmul.f32 %v2634_v47, %v3075_v45  ;;  %v1149_v47 = vmul.f32 %v3080_v38, %v2750_v9  ;;  %v1157_v9 = vmul.f32 %v3112_v19, %v2838_v50  ;;  %v1158_v32 = vmul.f32 %v3112_v19, %v2843_v51 }
  0xe6   : > { %6133 = vst [vmem:[#allocation81_spill] sm:$0xff] %v3098_v12  ;;  %v3120_v12 = vperm.slane %v611_v31, 0  ;;  %v1154_v31 = vmul.f32 %v3082_v41, %v2807_v43  ;;  %v1159_v43 = vmul.f32 %v3112_v19, %v2864_v25  ;;  %v1280_v51 = vsub.f32 %v2669_v55, %v1152_v57 }
  0xe7   : > { %6134 = vst [vmem:[#allocation82_spill] sm:$0xff] %v3102_v20  ;;  %v3124_v20 = vperm.slane %v613_v36, 0  ;;  %v1155_v36 = vmul.f32 %v3082_v41, %v2812_v44  ;;  %v1160_v44 = vmul.f32 %v3118_v46, %v2869_v58  ;;  %v1277_v56 = vsub.f32 %v2642_v49, %v1149_v47 }
  0xe8   : > { %6135 = vst [vmem:[#allocation83_spill] sm:$0xff] %v3106_v22  ;;  %v1148_v22 = vmul.f32 %v3080_v38, %v2745_v8  ;;  %v1156_v8 = vmul.f32 %v3112_v19, %v2833_v28  ;;  %v1163_v28 = vmul.f32 %v3118_v46, %v2898_v2  ;;  %v1164_v50 = vmul.f32 %v3120_v12, %v2903_v7 }
  0xe9   : > { %v1165_v25 = vmul.f32 %v3120_v12, %v2924_v17  ;;  %v1282_v58 = vsub.f32 %v2692_v60, %v1154_v31  ;;  %v1283_v59 = vsub.f32 %v2696_v61, %v1155_v36  ;;  %v1166_v21 = vmul.f32 %v3120_v12, %v2929_v23 }
  0xea   : > { %v1167_v2 = vmul.f32 %v3120_v12, %v2934_v33  ;;  %v1168_v7 = vmul.f32 %v3122_v11, %v2955_v1  ;;  %v1276_v55 = vsub.f32 %v2638_v48, %v1148_v22  ;;  %v1169_v17 = vmul.f32 %v3122_v11, %v2960_v24 }
  0xeb   : > { %v1278_v60 = vsub.f32 %v2661_v53, %v1150_v37  ;;  %v1279_v61 = vsub.f32 %v2665_v54, %v1151_v42  ;;  %v1284_v57 = vsub.f32 %v2700_v62, %v1156_v8  ;;  %v1285_v23 = vsub.f32 %v2704_v63, %v1157_v9  ;;  %v6136_v42 = vld [vmem:[#allocation36_spill] sm:$0xff] }
  0xec   : > { %v1286_v33 = vsub.f32 %v2723_v3, %v1158_v32  ;;  %v1404_v16 = vadd.f32 %v1280_v51, %v1276_v55  ;;  %v1287_v1 = vsub.f32 %v2727_v4, %v1159_v43  ;;  %v1435_v31 = vadd.f32 %v1281_v18, %v1277_v56  ;;  %v6137_v9 = vld [vmem:[#allocation76_spill] sm:$0xff] }
  0xed   : > { %v1466_v48 = vadd.f32 %v1282_v58, %v1278_v60  ;;  %v1497_v22 = vadd.f32 %v1283_v59, %v1279_v61  ;;  %v1170_v24 = vmul.f32 %v3122_v11, %v2965_v35  ;;  %v1171_v49 = vmul.f32 %v3122_v11, %v2986_v26  ;;  %v6141_v51 = vld [vmem:[#allocation40_spill] sm:$0xff]  ;;  %v6142_v58 = vld [vmem:[#allocation41_spill] sm:$0xff]  ;;  %v6144_v60 = vld [vmem:[#allocation43_spill] sm:$0xff] }
  0xee   : > { %v1288_v53 = vsub.f32 %v2731_v5, %v1160_v44  ;;  %v1405_v54 = vadd.f32 %v1404_v16, %v1284_v57  ;;  %v1172_v62 = vmul.f32 %v3124_v20, %v3004_v0  ;;  %v1436_v63 = vadd.f32 %v1435_v31, %v1285_v23  ;;  %v6145_v61 = vld [vmem:[#allocation44_spill] sm:$0xff]  ;;  %v6146_v23 = vld [vmem:[#allocation45_spill] sm:$0xff] }
  0xef   : > { %v1467_v3 = vadd.f32 %v1466_v48, %v1286_v33  ;;  %v1498_v47 = vadd.f32 %v1497_v22, %v1287_v1  ;;  %v1173_v4 = vmul.f32 %v3124_v20, %v3025_v34  ;;  %v1174_v36 = vmul.f32 %v3124_v20, %v3030_v27  ;;  %v6147_v33 = vld [vmem:[#allocation46_spill] sm:$0xff]  ;;  %v6149_v31 = vld [vmem:[#allocation48_spill] sm:$0xff]  ;;  %v6150_v22 = vld [vmem:[#allocation49_spill] sm:$0xff] }
  0xf0   : > { %v1289_v35 = vsub.f32 %v2735_v6, %v1161_v14  ;;  %v1406_v37 = vadd.f32 %v1405_v54, %v1288_v53  ;;  %v1175_v26 = vmul.f32 %v3124_v20, %v3035_v29  ;;  %v1176_v5 = vmul.f32 %v3126_v30, %v3053_v52  ;;  %v6138_v6 = vld [vmem:[#allocation37_spill] sm:$0xff]  ;;  %v6139_v52 = vld [vmem:[#allocation38_spill] sm:$0xff] }
  0xf1   : > { %v1290_v0 = vsub.f32 %v2754_v10, %v1162_v15  ;;  %v1291_v8 = vsub.f32 %v6136_v42, %v1163_v28  ;;  %v3204_v32 = vmul.f32 %v3126_v30, %v6137_v9  ;;  %v3208_v27 = vmul.f32 %v3126_v30, %v3063_v40  ;;  %v6140_v15 = vld [vmem:[#allocation39_spill] sm:$0xff]  ;;  %v6143_v40 = vld [vmem:[#allocation42_spill] sm:$0xff]  ;;  %v6158_v42 = vld [vmem:[#allocation8_spill] sm:$0xff] }
  0xf2   : > { %v1292_v34 = vsub.f32 %v6138_v6, %v1164_v50  ;;  %v1437_v43 = vadd.f32 %v1436_v63, %v1289_v35  ;;  %v3213_v29 = vmul.f32 %v3126_v30, %v3075_v45  ;;  %v1293_v44 = vsub.f32 %v6139_v52, %v1165_v25  ;;  %v6148_v25 = vld [vmem:[#allocation47_spill] sm:$0xff]  ;;  %v6160_v6 = vld [vmem:[#allocation10_spill] sm:$0xff] }
  0xf3   : > { %v1468_v10 = vadd.f32 %v1467_v3, %v1290_v0  ;;  %v1499_v14 = vadd.f32 %v1498_v47, %v1291_v8  ;;  %v1294_v28 = vsub.f32 %v6140_v15, %v1166_v21  ;;  %v1295_v18 = vsub.f32 %v6141_v51, %v1167_v2  ;;  %v6154_v47 = vld [vmem:[#allocation4_spill] sm:$0xff]  ;;  %v6163_v15 = vld [vmem:[#allocation13_spill] sm:$0xff]  ;;  %v6164_v51 = vld [vmem:[#allocation14_spill] sm:$0xff] }
  0xf4   : > { %v1296_v59 = vsub.f32 %v6142_v58, %v1168_v7  ;;  %v1407_v55 = vadd.f32 %v1406_v37, %v1292_v34  ;;  %v1297_v56 = vsub.f32 %v6143_v40, %v1169_v17  ;;  %v1298_v50 = vsub.f32 %v6144_v60, %v1170_v24  ;;  %v6151_v7 = vld [vmem:[#allocation50_spill] sm:$0xff]  ;;  %v6152_v24 = vld [vmem:[#allocation51_spill] sm:$0xff] }
  0xf5   : > { %v1299_v57 = vsub.f32 %v6145_v61, %v1171_v49  ;;  %v1300_v45 = vsub.f32 %v6146_v23, %v1172_v62  ;;  %v1301_v16 = vsub.f32 %v6147_v33, %v1173_v4  ;;  %v1302_v1 = vsub.f32 %v6148_v25, %v1174_v36  ;;  %v6153_v49 = vld [vmem:[#allocation52_spill] sm:$0xff]  ;;  %v6155_v36 = vld [vmem:[#allocation5_spill] sm:$0xff]  ;;  %v6156_v37 = vld [vmem:[#allocation6_spill] sm:$0xff] }
  0xf6   : > { %v1303_v48 = vsub.f32 %v6149_v31, %v1175_v26  ;;  %v1438_v21 = vadd.f32 %v1437_v43, %v1293_v44  ;;  %v1304_v2 = vsub.f32 %v6150_v22, %v1176_v5  ;;  %v1305_v53 = vsub.f32 %v6151_v7, %v3204_v32  ;;  %v6157_v5 = vld [vmem:[#allocation7_spill] sm:$0xff]  ;;  %v6159_v32 = vld [vmem:[#allocation9_spill] sm:$0xff]  ;;  %v6168_v60 = vld [vmem:[#allocation18_spill] sm:$0xff] }
  0xf7   : > { %v1469_v54 = vadd.f32 %v1468_v10, %v1294_v28  ;;  %v1500_v17 = vadd.f32 %v1499_v14, %v1295_v18  ;;  %v1306_v63 = vsub.f32 %v6152_v24, %v3208_v27  ;;  %v1307_v62 = vsub.f32 %v6153_v49, %v3213_v29  ;;  %v6161_v43 = vld [vmem:[#allocation11_spill] sm:$0xff]  ;;  %v6162_v10 = vld [vmem:[#allocation12_spill] sm:$0xff]  ;;  %v6171_v25 = vld [vmem:[#allocation21_spill] sm:$0xff] }
  0xf8   : > { %v1408_v3 = vadd.f32 %v1407_v55, %v1296_v59  ;;  %v1660_v4 = vmul.f32 %v3080_v38, %v6154_v47  ;;  %v1661_v35 = vmul.f32 %v3080_v38, %v6155_v36  ;;  %v1662_v26 = vmul.f32 %v3080_v38, %v6156_v37  ;;  %v6165_v58 = vld [vmem:[#allocation15_spill] sm:$0xff]  ;;  %v6166_v55 = vld [vmem:[#allocation16_spill] sm:$0xff]  ;;  %v6176_v36 = vld [vmem:[#allocation58_spill] sm:$0xff] }
  0xf9   : > { %v1663_v0 = vmul.f32 %v3080_v38, %v6157_v5  ;;  %v1664_v8 = vmul.f32 %v3082_v41, %v6158_v42  ;;  %v1439_v9 = vadd.f32 %v1438_v21, %v1297_v56  ;;  %v1665_v27 = vmul.f32 %v3082_v41, %v6159_v32  ;;  %v6167_v56 = vld [vmem:[#allocation17_spill] sm:$0xff]  ;;  %v6169_v61 = vld [vmem:[#allocation19_spill] sm:$0xff]  ;;  %v6170_v23 = vld [vmem:[#allocation20_spill] sm:$0xff] }
  0xfa   : > { %v1666_v34 = vmul.f32 %v3082_v41, %v6160_v6  ;;  %v1667_v29 = vmul.f32 %v3082_v41, %v6161_v43  ;;  %v1470_v52 = vadd.f32 %v1469_v54, %v1298_v50  ;;  %v1501_v44 = vadd.f32 %v1500_v17, %v1299_v57  ;;  %v6173_v22 = vld [vmem:[#allocation23_spill] sm:$0xff]  ;;  %v6174_v24 = vld [vmem:[#allocation24_spill] sm:$0xff]  ;;  %v6179_v32 = vld [vmem:[#allocation25_spill] sm:$0xff] }
  0xfb   : > { %v1668_v14 = vmul.f32 %v3112_v19, %v6162_v10  ;;  %v1669_v38 = vmul.f32 %v3112_v19, %v6163_v15  ;;  %v1409_v28 = vadd.f32 %v1408_v3, %v1300_v45  ;;  %v1670_v18 = vmul.f32 %v3112_v19, %v6164_v51  ;;  %v6175_v3 = vld [vmem:[#allocation57_spill] sm:$0xff]  ;;  %v6177_v37 = vld [vmem:[#allocation59_spill] sm:$0xff]  ;;  %v6178_v42 = vld [vmem:[#allocation60_spill] sm:$0xff] }
  0xfc   : > { %v1671_v59 = vmul.f32 %v3112_v19, %v6165_v58  ;;  %v1672_v40 = vmul.f32 %v3118_v46, %v6166_v55  ;;  %v1673_v41 = vmul.f32 %v3118_v46, %v6167_v56  ;;  %v1674_v50 = vmul.f32 %v3118_v46, %v6168_v60  ;;  %v6172_v19 = vld [vmem:[#allocation22_spill] sm:$0xff]  ;;  %v6188_v56 = vld [vmem:[#allocation63_spill] sm:$0xff] }
  0xfd   : > { %v1675_v57 = vmul.f32 %v3118_v46, %v6169_v61  ;;  %v1676_v45 = vmul.f32 %v3120_v12, %v6170_v23  ;;  %v1440_v33 = vadd.f32 %v1439_v9, %v1301_v16  ;;  %v1677_v31 = vmul.f32 %v3120_v12, %v6171_v25  ;;  %v6180_v43 = vld [vmem:[#allocation26_spill] sm:$0xff]  ;;  %v6189_v23 = vld [vmem:[#allocation64_spill] sm:$0xff] }
  0xfe   : > { %v1678_v21 = vmul.f32 %v3120_v12, %v6172_v19  ;;  %v1679_v7 = vmul.f32 %v3120_v12, %v6173_v22  ;;  %v1471_v54 = vadd.f32 %v1470_v52, %v1302_v1  ;;  %v1502_v17 = vadd.f32 %v1501_v44, %v1303_v48  ;;  %v6181_v1 = vld [vmem:[#allocation27_spill] sm:$0xff]  ;;  %v6182_v52 = vld [vmem:[#allocation53_spill] sm:$0xff]  ;;  %v6187_v58 = vld [vmem:[#allocation62_spill] sm:$0xff] }
  0xff   : > { %v1680_v49 = vmul.f32 %v3122_v11, %v6174_v24  ;;  %v1792_v46 = vadd.f32 %v1664_v8, %v6175_v3  ;;  %v3276_v47 = vadd.f32 %v1409_v28, %v1304_v2  ;;  %v1793_v16 = vadd.f32 %v1665_v27, %v6176_v36  ;;  %v6183_v2 = vld [vmem:[#allocation54_spill] sm:$0xff]  ;;  %v6184_v27 = vld [vmem:[#allocation55_spill] sm:$0xff] }
 0x100   : > { %v1794_v5 = vadd.f32 %v1666_v34, %v6177_v37  ;;  %v1795_v9 = vadd.f32 %v1667_v29, %v6178_v42  ;;  %v1681_v6 = vmul.f32 %v3122_v11, %v6179_v32  ;;  %v1682_v12 = vmul.f32 %v3122_v11, %v6180_v43  ;;  %v6185_v34 = vld [vmem:[#allocation56_spill] sm:$0xff]  ;;  %v6186_v29 = vld [vmem:[#allocation61_spill] sm:$0xff]  ;;  %v6191_v22 = vld [vmem:[#allocation66_spill] sm:$0xff]  ;;  %v442_v43 = vpop.f32.mrf.mxu1 }
 0x101   : > { %v1683_v48 = vmul.f32 %v3122_v11, %v6181_v1  ;;  %v1788_v44 = vadd.f32 %v1660_v4, %v6182_v52  ;;  %v3288_v8 = vadd.f32 %v1440_v33, %v1305_v53  ;;  %v1789_v10 = vadd.f32 %v1661_v35, %v6183_v2  ;;  %v6190_v53 = vld [vmem:[#allocation65_spill] sm:$0xff]  ;;  %v6192_v24 = vld [vmem:[#allocation67_spill] sm:$0xff]  ;;  %v6197_v52 = vld [vmem:[#allocation70_spill] sm:$0xff] }
 0x102   : > { %v1790_v15 = vadd.f32 %v1662_v26, %v6184_v27  ;;  %v1791_v28 = vadd.f32 %v1663_v0, %v6185_v34  ;;  %v1796_v51 = vadd.f32 %v1668_v14, %v6186_v29  ;;  %v1797_v55 = vadd.f32 %v1669_v38, %v6187_v58  ;;  %v6193_v0 = vld [vmem:[#allocation68_spill] sm:$0xff]  ;;  %v6196_v1 = vld [vmem:[#allocation29_spill] sm:$0xff]  ;;  %v6200_v2 = vld [vmem:[#allocation30_spill] sm:$0xff] }
 0x103   : > { %v1798_v60 = vadd.f32 %v1670_v18, %v6188_v56  ;;  %v1916_v61 = vadd.f32 %v1792_v46, %v1788_v44  ;;  %v1799_v25 = vadd.f32 %v1671_v59, %v6189_v23  ;;  %v1947_v11 = vadd.f32 %v1793_v16, %v1789_v10  ;;  %v6194_v59 = vld [vmem:[#allocation28_spill] sm:$0xff]  ;;  %v6201_v27 = vld [vmem:[#allocation31_spill] sm:$0xff]  ;;  %v6203_v56 = vld [vmem:[#allocation33_spill] sm:$0xff] }
 0x104   : > { %v1978_v19 = vadd.f32 %v1794_v5, %v1790_v15  ;;  %v2009_v4 = vadd.f32 %v1795_v9, %v1791_v28  ;;  %v1800_v33 = vadd.f32 %v1672_v40, %v6190_v53  ;;  %v1801_v35 = vadd.f32 %v1673_v41, %v6191_v22  ;;  %v6195_v5 = vld [vmem:[#allocation69_spill] sm:$0xff]  ;;  %v6202_v15 = vld [vmem:[#allocation32_spill] sm:$0xff]  ;;  %v6210_v22 = vld [vmem:[#allocation78_spill] sm:$0xff] }
 0x105   : > { %v1802_v26 = vadd.f32 %v1674_v50, %v6192_v24  ;;  %v1917_v3 = vadd.f32 %v1916_v61, %v1796_v51  ;;  %v1803_v36 = vadd.f32 %v1675_v57, %v6193_v0  ;;  %v1948_v14 = vadd.f32 %v1947_v11, %v1797_v55  ;;  %v413_v50 = vpop.f32.mrf.mxu0  ;;  %v6206_v23 = vld [vmem:[#allocation73_spill] sm:$0xff]  ;;  %v6211_v24 = vld [vmem:[#allocation79_spill] sm:$0xff] }
 0x106   : > { %v1979_v37 = vadd.f32 %v1978_v19, %v1798_v60  ;;  %v2010_v38 = vadd.f32 %v2009_v4, %v1799_v25  ;;  %v3301_v42 = vadd.f32 %v1471_v54, %v1306_v63  ;;  %v3303_v18 = vadd.f32 %v1502_v17, %v1307_v62  ;;  %v6198_v63 = vld [vmem:[#allocation71_spill] sm:$0xff]  ;;  %v6199_v62 = vld [vmem:[#allocation72_spill] sm:$0xff]  ;;  %v6209_v53 = vld [vmem:[#allocation77_spill] sm:$0xff] }
 0x107   : > { %v1684_v46 = vmul.f32 %v3124_v20, %v6194_v59  ;;  %v1918_v16 = vadd.f32 %v1917_v3, %v1800_v33  ;;  %v1804_v40 = vadd.f32 %v1676_v45, %v6195_v5  ;;  %v1949_v9 = vadd.f32 %v1948_v14, %v1801_v35  ;;  %v6205_v60 = vld [vmem:[#allocation35_spill] sm:$0xff]  ;;  %v6212_v3 = vld [vmem:[#allocation80_spill] sm:$0xff] }
 0x108   : > { %v1980_v41 = vadd.f32 %v1979_v37, %v1802_v26  ;;  %v2011_v32 = vadd.f32 %v2010_v38, %v1803_v36  ;;  %v1685_v57 = vmul.f32 %v3124_v20, %v6196_v1  ;;  %v1805_v44 = vadd.f32 %v1677_v31, %v6197_v52  ;;  %v6208_v19 = vld [vmem:[#allocation75_spill] sm:$0xff]  ;;  %v6213_v36 = vld [vmem:[#allocation81_spill] sm:$0xff]  ;;  %v544_v1 = vpop.f32.mrf.mxu3 }
 0x109   : > { %v1806_v54 = vadd.f32 %v1678_v21, %v6198_v63  ;;  %v1807_v17 = vadd.f32 %v1679_v7, %v6199_v62  ;;  %v1686_v10 = vmul.f32 %v3124_v20, %v6200_v2  ;;  %v1687_v45 = vmul.f32 %v3124_v20, %v6201_v27  ;;  %v6204_v21 = vld [vmem:[#allocation34_spill] sm:$0xff]  ;;  %v3362_v2 = vld [vmem:[%s5922_s3 + $0x120] sm:$0xff] }
 0x10a   : > { %v1688_v34 = vmul.f32 %v3126_v30, %v6202_v15  ;;  %v1919_v28 = vadd.f32 %v1918_v16, %v1804_v40  ;;  %v1950_v29 = vadd.f32 %v1949_v9, %v1805_v44  ;;  %v443_v55 = vadd.f32 %v442_v43, %v413_v50  ;;  %v6207_v20 = vld [vmem:[#allocation74_spill] sm:$0xff]  ;;  %v515_v43 = vpop.f32.mrf.mxu2  ;;  %6220 = vst [vmem:[#allocation39_spill] sm:$0xff] %v3362_v2  ;;  %v3377_v15 = vld [vmem:[%s5922_s3 + $0x138] sm:$0xff] }
 0x10b   : > { %v1981_v51 = vadd.f32 %v1980_v41, %v1806_v54  ;;  %v2012_v58 = vadd.f32 %v2011_v32, %v1807_v17  ;;  %v1689_v31 = vmul.f32 %v3126_v30, %v6203_v56  ;;  %v1690_v7 = vmul.f32 %v3126_v30, %v6204_v21  ;;  %v3342_v32 = vld [vmem:[%s5922_s3 + $0x108] sm:$0xff]  ;;  %v3352_v62 = vld [vmem:[%s5922_s3 + $0x110] sm:$0xff]  ;;  %v3357_v17 = vld [vmem:[%s5922_s3 + $0x118] sm:$0xff]  ;;  %6223 = vst [vmem:[#allocation42_spill] sm:$0xff] %v3377_v15 }
 0x10c   : > { %v1691_v61 = vmul.f32 %v3126_v30, %v6205_v60  ;;  %v1808_v25 = vadd.f32 %v1680_v49, %v6206_v23  ;;  %v1809_v11 = vadd.f32 %v1681_v6, %v6207_v20  ;;  %v1810_v4 = vadd.f32 %v1682_v12, %v6208_v19  ;;  %v6214_v49 = vld [vmem:[#allocation82_spill] sm:$0xff]  ;;  %6216 = vst [vmem:[#allocation76_spill] sm:$0xff] %v3342_v32  ;;  %v3417_v60 = vld [vmem:[%s5922_s3 + $0x168] sm:$0xff]  ;;  %v3427_v23 = vld [vmem:[%s5922_s3 + $0x178] sm:$0xff] }
 0x10d   : > { %v1811_v33 = vadd.f32 %v1683_v48, %v6209_v53  ;;  %v1812_v35 = vadd.f32 %v1684_v46, %v6210_v22  ;;  %v1813_v26 = vadd.f32 %v1685_v57, %v6211_v24  ;;  %v1814_v0 = vadd.f32 %v1686_v10, %v6212_v3  ;;  %v3337_v46 = vld [vmem:[%s5922_s3 + $0x100] sm:$0xff]  ;;  %v6217_v57 = vld [vmem:[#allocation83_spill] sm:$0xff]  ;;  %6218 = vst [vmem:[#allocation37_spill] sm:$0xff] %v3352_v62  ;;  %v3454_v22 = vld [vmem:[%s5922_s3 + $0x190] sm:$0xff] }
 0x10e   : > { %v1815_v14 = vadd.f32 %v1687_v45, %v6213_v36  ;;  %v1920_v37 = vadd.f32 %v1919_v28, %v1808_v25  ;;  %v1951_v38 = vadd.f32 %v1950_v29, %v1809_v11  ;;  %v1982_v59 = vadd.f32 %v1981_v51, %v1810_v4  ;;  %6215 = vst [vmem:[#allocation36_spill] sm:$0xff] %v3337_v46  ;;  %v3372_v45 = vld [vmem:[%s5922_s3 + $0x130] sm:$0xff]  ;;  %v3389_v29 = vld [vmem:[%s5922_s3 + $0x148] sm:$0xff]  ;;  %v3432_v25 = vld [vmem:[%s5922_s3 + $0x180] sm:$0xff] }
 0x10f   : > { %v2013_v30 = vadd.f32 %v2012_v58, %v1811_v33  ;;  %v579_v16 = vrot.slane %v443_v55, 1  ;;  %v1816_v5 = vadd.f32 %v1688_v34, %v6214_v49  ;;  %v580_v6 = vrot.slane %v443_v55, 2  ;;  %6219 = vst [vmem:[#allocation38_spill] sm:$0xff] %v3357_v17  ;;  %v3382_v34 = vld [vmem:[%s5922_s3 + $0x140] sm:$0xff]  ;;  %v3394_v51 = vld [vmem:[%s5922_s3 + $0x150] sm:$0xff]  ;;  %v3399_v58 = vld [vmem:[%s5922_s3 + $0x158] sm:$0xff] }
 0x110   : > { %v581_v40 = vrot.slane %v443_v55, 3  ;;  %v582_v12 = vrot.slane %v443_v55, 4  ;;  %v583_v9 = vrot.slane %v443_v55, 5  ;;  %v584_v48 = vrot.slane %v443_v55, 6  ;;  %6222 = vst [vmem:[#allocation41_spill] sm:$0xff] %v3372_v45  ;;  %v3449_v33 = vld [vmem:[%s5922_s3 + $0x188] sm:$0xff] }
 0x111   : > { %v585_v41 = vrot.slane %v443_v55, 7  ;;  %v3344_v50 = vperm.slane %v443_v55, 0  ;;  %v1817_v52 = vadd.f32 %v1689_v31, %v6217_v57  ;;  %v1818_v44 = vadd.f32 %v1690_v7, %v3110_v39  ;;  %6224 = vst [vmem:[#allocation43_spill] sm:$0xff] %v3382_v34  ;;  %v3404_v55 = vld [vmem:[%s5922_s3 + $0x160] sm:$0xff] }
 0x112   : > { %v1819_v63 = vadd.f32 %v1691_v61, %v3116_v13  ;;  %v1921_v54 = vadd.f32 %v1920_v37, %v1812_v35  ;;  %v1952_v10 = vadd.f32 %v1951_v38, %v1813_v26  ;;  %v1983_v39 = vadd.f32 %v1982_v59, %v1814_v0  ;;  %v3367_v13 = vld [vmem:[%s5922_s3 + $0x128] sm:$0xff]  ;;  %6225 = vst [vmem:[#allocation44_spill] sm:$0xff] %v3389_v29  ;;  %v3422_v61 = vld [vmem:[%s5922_s3 + $0x170] sm:$0xff]  ;;  %v3459_v35 = vld [vmem:[%s5922_s3 + $0x198] sm:$0xff] }
 0x113   : > { %v2014_v27 = vadd.f32 %v2013_v30, %v1815_v14  ;;  %6221 = vst [vmem:[#allocation40_spill] sm:$0xff] %v3367_v13  ;;  %v3384_v28 = vperm.slane %v579_v16, 0  ;;  %v3406_v56 = vperm.slane %v580_v6, 0  ;;  %v3408_v31 = vperm.slane %v581_v40, 0  ;;  %v3482_v37 = vld [vmem:[%s5922_s3 + $0x1a0] sm:$0xff]  ;;  %v3487_v38 = vld [vmem:[%s5922_s3 + $0x1a8] sm:$0xff] }
 0x114   : > { %6226 = vst [vmem:[#allocation45_spill] sm:$0xff] %v3394_v51  ;;  %v3410_v21 = vperm.slane %v582_v12, 0  ;;  %v3412_v7 = vadd.f32 %v544_v1, %v515_v43  ;;  %v3434_v20 = vperm.slane %v583_v9, 0  ;;  %v3436_v11 = vperm.slane %v584_v48, 0  ;;  %v3492_v59 = vld [vmem:[%s5922_s3 + $0x1b0] sm:$0xff]  ;;  %v3501_v16 = vld [vmem:[%s5922_s3 + $0x1b8] sm:$0xff] }
 0x115   : > { %6227 = vst [vmem:[#allocation46_spill] sm:$0xff] %v3399_v58  ;;  %v3438_v19 = vperm.slane %v585_v41, 0  ;;  %v3442_v4 = vmul.f32 %v3344_v50, %v3337_v46  ;;  %v3444_v53 = vadd.f32 %v1921_v54, %v1816_v5  ;;  %v3463_v24 = vmul.f32 %v3344_v50, %v3342_v32  ;;  %v3506_v49 = vld [vmem:[%s5922_s3 + $0x1c0] sm:$0xff]  ;;  %v3511_v5 = vld [vmem:[%s5922_s3 + $0x1c8] sm:$0xff]  ;;  %v3532_v48 = vld [vmem:[%s5922_s3 + $0x1d0] sm:$0xff] }
 0x116   : > { %6228 = vst [vmem:[#allocation47_spill] sm:$0xff] %v3404_v55  ;;  %v3467_v26 = vmul.f32 %v3344_v50, %v3352_v62  ;;  %v3471_v3 = vmul.f32 %v3344_v50, %v3357_v17  ;;  %v3473_v0 = vadd.f32 %v1952_v10, %v1817_v52  ;;  %v3475_v36 = vadd.f32 %v1983_v39, %v1818_v44  ;;  %v3537_v41 = vld [vmem:[%s5922_s3 + $0x1d8] sm:$0xff]  ;;  %v3542_v43 = vld [vmem:[%s5922_s3 + $0x1e0] sm:$0xff]  ;;  %v3568_v54 = vld [vmem:[%s5922_s3 + $0x1e8] sm:$0xff] }
 0x117   : > { %6229 = vst [vmem:[#allocation48_spill] sm:$0xff] %v3417_v60  ;;  %v3477_v14 = vadd.f32 %v2014_v27, %v1819_v63  ;;  %v3496_v30 = vmul.f32 %v3384_v28, %v3362_v2  ;;  %v3515_v6 = vmul.f32 %v3384_v28, %v3367_v13  ;;  %v3519_v40 = vmul.f32 %v3384_v28, %v3372_v45  ;;  %v3547_v1 = vld [vmem:[%s5923_s4 + $0x100] sm:$0xff]  ;;  %v3573_v10 = vld [vmem:[%s5922_s3 + $0x1f0] sm:$0xff]  ;;  %v3578_v39 = vld [vmem:[%s5922_s3 + $0x1f8] sm:$0xff] }
 0x118   : > { %6230 = vst [vmem:[#allocation49_spill] sm:$0xff] %v3422_v61  ;;  %v3523_v12 = vmul.f32 %v3384_v28, %v3377_v15  ;;  %v3527_v9 = vmul.f32 %v3406_v56, %v3382_v34  ;;  %v3551_v57 = vmul.f32 %v3406_v56, %v3389_v29  ;;  %v3555_v52 = vmul.f32 %v3406_v56, %v3394_v51  ;;  %v3583_v27 = vld [vmem:[%s5923_s4 + $0x108] sm:$0xff]  ;;  %v3666_v45 = vld [vmem:[%s5923_s4 + $0x140] sm:$0xff]  ;;  %v3697_v17 = vld [vmem:[%s5923_s4 + $0x158] sm:$0xff] }
 0x119   : > { %6231 = vst [vmem:[#allocation50_spill] sm:$0xff] %v3427_v23  ;;  %v3559_v44 = vmul.f32 %v3406_v56, %v3399_v58  ;;  %v3563_v63 = vmul.f32 %v3408_v31, %v3404_v55  ;;  %v3604_v55 = vld [vmem:[%s5923_s4 + $0x110] sm:$0xff]  ;;  %v3626_v58 = vmul.f32 %v3410_v21, %v3459_v35  ;;  %v3630_v51 = vmul.f32 %v3434_v20, %v3482_v37  ;;  %v3635_v29 = vld [vmem:[%s5923_s4 + $0x128] sm:$0xff] }
 0x11a   : > { %6232 = vst [vmem:[#allocation51_spill] sm:$0xff] %v3432_v25  ;;  %v3657_v34 = vmul.f32 %v3434_v20, %v3501_v16  ;;  %v3661_v15 = vmul.f32 %v3436_v11, %v3506_v49  ;;  %v3688_v13 = vmul.f32 %v3436_v11, %v3537_v41  ;;  %v3692_v2 = vmul.f32 %v3438_v19, %v3542_v43  ;;  %v3728_v46 = vld [vmem:[%s5923_s4 + $0x170] sm:$0xff] }
 0x11b   : > { %6233 = vst [vmem:[#allocation52_spill] sm:$0xff] %v3444_v53  ;;  %v3599_v53 = vmul.f32 %v3410_v21, %v3432_v25  ;;  %v3622_v25 = vmul.f32 %v3410_v21, %v3454_v22  ;;  %v3719_v62 = vmul.f32 %v3438_v19, %v3578_v39  ;;  %v3723_v32 = vmul.f32 %v3344_v50, %v3547_v1 }
 0x11c   : > { %6234 = vst [vmem:[#allocation4_spill] sm:$0xff] %v3449_v33 }
 0x11d   : > { %6235 = vst [vmem:[#allocation5_spill] sm:$0xff] %v3454_v22  ;;  %v3645_v22 = vld [vmem:[%s5923_s4 + $0x138] sm:$0xff] }
 0x11e   : > { %6236 = vst [vmem:[#allocation6_spill] sm:$0xff] %v3459_v35  ;;  %v3649_v35 = vmul.f32 %v3434_v20, %v3487_v38 }
 0x11f   : > { %6237 = vst [vmem:[#allocation7_spill] sm:$0xff] %v3473_v0  ;;  %v3595_v0 = vmul.f32 %v3408_v31, %v3427_v23  ;;  %v3618_v23 = vmul.f32 %v3410_v21, %v3449_v33  ;;  %v3640_v33 = vld [vmem:[%s5923_s4 + $0x130] sm:$0xff] }
 0x120   : > { %6238 = vst [vmem:[#allocation8_spill] sm:$0xff] %v3475_v36  ;;  %v3591_v36 = vmul.f32 %v3408_v31, %v3422_v61  ;;  %v3614_v61 = vld [vmem:[%s5923_s4 + $0x120] sm:$0xff] }
 0x121   : > { %6239 = vst [vmem:[#allocation9_spill] sm:$0xff] %v3477_v14  ;;  %v3587_v14 = vmul.f32 %v3408_v31, %v3417_v60  ;;  %v3609_v60 = vld [vmem:[%s5923_s4 + $0x118] sm:$0xff] }
 0x122   : > { %6240 = vst [vmem:[#allocation10_spill] sm:$0xff] %v3482_v37  ;;  %v3653_v37 = vmul.f32 %v3434_v20, %v3492_v59 }
 0x123   : > { %6241 = vst [vmem:[#allocation11_spill] sm:$0xff] %v3487_v38  ;;  %v3671_v38 = vld [vmem:[%s5923_s4 + $0x148] sm:$0xff] }
 0x124   : > { %6242 = vst [vmem:[#allocation12_spill] sm:$0xff] %v3492_v59  ;;  %v3676_v59 = vld [vmem:[%s5923_s4 + $0x150] sm:$0xff] }
 0x125   : > { %6243 = vst [vmem:[#allocation13_spill] sm:$0xff] %v3501_v16  ;;  %v3680_v16 = vmul.f32 %v3436_v11, %v3511_v5 }
 0x126   : > { %6244 = vst [vmem:[#allocation14_spill] sm:$0xff] %v3506_v49  ;;  %v3684_v49 = vmul.f32 %v3436_v11, %v3532_v48 }
 0x127   : > { %6245 = vst [vmem:[#allocation15_spill] sm:$0xff] %v3511_v5  ;;  %v3702_v5 = vld [vmem:[%s5923_s4 + $0x160] sm:$0xff] }
 0x128   : > { %6246 = vst [vmem:[#allocation16_spill] sm:$0xff] %v3532_v48  ;;  %v3707_v48 = vld [vmem:[%s5923_s4 + $0x168] sm:$0xff] }
 0x129   : > { %6247 = vst [vmem:[#allocation17_spill] sm:$0xff] %v3537_v41  ;;  %v3711_v41 = vmul.f32 %v3438_v19, %v3568_v54 }
 0x12a   : > { %6248 = vst [vmem:[#allocation18_spill] sm:$0xff] %v3542_v43  ;;  %v3715_v43 = vmul.f32 %v3438_v19, %v3573_v10 }
 0x12b   : > { %6249 = vst [vmem:[#allocation19_spill] sm:$0xff] %v3559_v44 }
 0x12c   : > { %6250 = vst [vmem:[#allocation20_spill] sm:$0xff] %v3563_v63 }
 0x12d   : > { %6251 = vst [vmem:[#allocation21_spill] sm:$0xff] %v3568_v54  ;;  %v3733_v54 = vld [vmem:[%s5923_s4 + $0x178] sm:$0xff] }
 0x12e   : > { %6252 = vst [vmem:[#allocation22_spill] sm:$0xff] %v3573_v10  ;;  %v3738_v10 = vld [vmem:[%s5923_s4 + $0x180] sm:$0xff] }
 0x12f   : > { %6253 = vst [vmem:[#allocation23_spill] sm:$0xff] %v3578_v39  ;;  %v3742_v39 = vmul.f32 %v3344_v50, %v3583_v27 }
 0x130   : > { %6254 = vst [vmem:[#allocation24_spill] sm:$0xff] %v3587_v14 }
 0x131   : > { %6255 = vst [vmem:[#allocation57_spill] sm:$0xff] %v3591_v36 }
 0x132   : > { %6256 = vst [vmem:[#allocation58_spill] sm:$0xff] %v3595_v0 }
 0x133   : > { %6257 = vst [vmem:[#allocation59_spill] sm:$0xff] %v3599_v53  ;;  %v620_v53 = vrot.slane %v3412_v7, 6 }
 0x134   : > { %6258 = vst [vmem:[#allocation60_spill] sm:$0xff] %v3618_v23 }
 0x135   : > { %6259 = vst [vmem:[#allocation25_spill] sm:$0xff] %v3622_v25  ;;  %v3910_v25 = vld [vmem:[%s5923_s4 + $0x1f8] sm:$0xff] }
 0x136   : > { %6260 = vst [vmem:[#allocation26_spill] sm:$0xff] %v3626_v58  ;;  %v619_v58 = vrot.slane %v3412_v7, 5 }
 0x137   : > { %6261 = vst [vmem:[#allocation27_spill] sm:$0xff] %v3630_v51  ;;  %v618_v51 = vrot.slane %v3412_v7, 4 }
 0x138   : > { %6262 = vst [vmem:[#allocation53_spill] sm:$0xff] %v3649_v35  ;;  %v3893_v35 = vld [vmem:[%s5923_s4 + $0x1e8] sm:$0xff] }
 0x139   : > { %6263 = vst [vmem:[#allocation54_spill] sm:$0xff] %v3653_v37  ;;  %v3888_v37 = vld [vmem:[%s5923_s4 + $0x1e0] sm:$0xff] }
 0x13a   : > { %6264 = vst [vmem:[#allocation55_spill] sm:$0xff] %v3657_v34  ;;  %v616_v34 = vrot.slane %v3412_v7, 2  ;;  %v3937_v63 = vmul.f32 %v3438_v19, %v3888_v37 }
 0x13b   : > { %6265 = vst [vmem:[#allocation56_spill] sm:$0xff] %v3661_v15  ;;  %v3865_v15 = vld [vmem:[%s5923_s4 + $0x1d0] sm:$0xff] }
 0x13c   : > { %6266 = vst [vmem:[#allocation61_spill] sm:$0xff] %v3680_v16  ;;  %v3821_v16 = vld [vmem:[%s5923_s4 + $0x1b8] sm:$0xff]  ;;  %v3927_v36 = vmul.f32 %v3436_v11, %v3865_v15  ;;  %v3947_v44 = vperm.slane %v616_v34, 0 }
 0x13d   : > { %6267 = vst [vmem:[#allocation62_spill] sm:$0xff] %v3684_v49  ;;  %v3816_v49 = vmul.f32 %v3408_v31, %v3702_v5 }
 0x13e   : > { %6268 = vst [vmem:[#allocation63_spill] sm:$0xff] %v3688_v13  ;;  %v3790_v13 = vld [vmem:[%s5923_s4 + $0x1a0] sm:$0xff] }
 0x13f   : > { %6269 = vst [vmem:[#allocation64_spill] sm:$0xff] %v3692_v2  ;;  %v3785_v2 = vmul.f32 %v3406_v56, %v3666_v45 }
 0x140   : > { %6270 = vst [vmem:[#allocation65_spill] sm:$0xff] %v3711_v41  ;;  %v3759_v41 = vld [vmem:[%s5923_s4 + $0x188] sm:$0xff] }
 0x141   : > { %6271 = vst [vmem:[#allocation66_spill] sm:$0xff] %v3715_v43  ;;  %v3754_v43 = vmul.f32 %v3384_v28, %v3614_v61 }
 0x142   : > { %6272 = vst [vmem:[#allocation67_spill] sm:$0xff] %v3719_v62  ;;  %v3750_v62 = vmul.f32 %v3344_v50, %v3609_v60 }
 0x143   : > { %6273 = vst [vmem:[#allocation68_spill] sm:$0xff] %v3723_v32  ;;  %v3746_v32 = vmul.f32 %v3344_v50, %v3604_v55  ;;  %v3773_v50 = vmul.f32 %v3384_v28, %v3635_v29 }
 0x144   : > { %6274 = vst [vmem:[#allocation28_spill] sm:$0xff] %v3742_v39  ;;  %v3764_v39 = vld [vmem:[%s5923_s4 + $0x190] sm:$0xff] }
 0x145   : > { %6275 = vst [vmem:[#allocation69_spill] sm:$0xff] %v3746_v32  ;;  %v3769_v32 = vld [vmem:[%s5923_s4 + $0x198] sm:$0xff] }
 0x146   : > { %6276 = vst [vmem:[#allocation29_spill] sm:$0xff] %v3750_v62  ;;  %v3781_v62 = vmul.f32 %v3384_v28, %v3645_v22 }
 0x147   : > { %6277 = vst [vmem:[#allocation70_spill] sm:$0xff] %v3754_v43  ;;  %v3777_v43 = vmul.f32 %v3384_v28, %v3640_v33  ;;  %v3804_v28 = vmul.f32 %v3406_v56, %v3671_v38 }
 0x148   : > { %6278 = vst [vmem:[#allocation71_spill] sm:$0xff] %v3773_v50  ;;  %v3795_v50 = vld [vmem:[%s5923_s4 + $0x1a8] sm:$0xff] }
 0x149   : > { %6279 = vst [vmem:[#allocation72_spill] sm:$0xff] %v3777_v43  ;;  %v3800_v43 = vld [vmem:[%s5923_s4 + $0x1b0] sm:$0xff] }
 0x14a   : > { %6280 = vst [vmem:[#allocation30_spill] sm:$0xff] %v3781_v62  ;;  %v3812_v62 = vmul.f32 %v3406_v56, %v3697_v17 }
 0x14b   : > { %6281 = vst [vmem:[#allocation31_spill] sm:$0xff] %v3785_v2  ;;  %v3808_v2 = vmul.f32 %v3406_v56, %v3676_v59  ;;  %v3833_v56 = vmul.f32 %v3408_v31, %v3733_v54 }
 0x14c   : > { %6282 = vst [vmem:[#allocation32_spill] sm:$0xff] %v3804_v28  ;;  %v3825_v28 = vmul.f32 %v3408_v31, %v3707_v48 }
 0x14d   : > { %6283 = vst [vmem:[#allocation33_spill] sm:$0xff] %v3808_v2  ;;  %v3829_v2 = vmul.f32 %v3408_v31, %v3728_v46  ;;  %v3854_v31 = vmul.f32 %v3410_v21, %v3769_v32 }
 0x14e   : > { %6284 = vst [vmem:[#allocation34_spill] sm:$0xff] %v3812_v62  ;;  %v3842_v62 = vld [vmem:[%s5923_s4 + $0x1c0] sm:$0xff] }
 0x14f   : > { %6285 = vst [vmem:[#allocation35_spill] sm:$0xff] %v3816_v49  ;;  %v3837_v49 = vmul.f32 %v3410_v21, %v3738_v10  ;;  %v3914_v23 = vmul.f32 %v3436_v11, %v3842_v62 }
 0x150   : > { %6286 = vst [vmem:[#allocation73_spill] sm:$0xff] %v3825_v28  ;;  %v3846_v28 = vmul.f32 %v3410_v21, %v3759_v41 }
 0x151   : > { %6287 = vst [vmem:[#allocation74_spill] sm:$0xff] %v3829_v2  ;;  %v3850_v2 = vmul.f32 %v3410_v21, %v3764_v39  ;;  %v3874_v21 = vmul.f32 %v3434_v20, %v3790_v13 }
 0x152   : > { %6288 = vst [vmem:[#allocation75_spill] sm:$0xff] %v3833_v56  ;;  %v615_v56 = vrot.slane %v3412_v7, 1 }
 0x153   : > { %6289 = vst [vmem:[#allocation77_spill] sm:$0xff] %v3837_v49  ;;  %v3860_v49 = vld [vmem:[%s5923_s4 + $0x1c8] sm:$0xff] }
 0x154   : > { %6290 = vst [vmem:[#allocation78_spill] sm:$0xff] %v3846_v28  ;;  %v3882_v28 = vmul.f32 %v3434_v20, %v3800_v43  ;;  %v3923_v0 = vmul.f32 %v3436_v11, %v3860_v49 }
 0x155   : > { %6291 = vst [vmem:[#allocation79_spill] sm:$0xff] %v3850_v2  ;;  %v3870_v2 = vld [vmem:[%s5923_s4 + $0x1d8] sm:$0xff] }
 0x156   : > { %6292 = vst [vmem:[#allocation80_spill] sm:$0xff] %v3854_v31  ;;  %v3878_v31 = vmul.f32 %v3434_v20, %v3795_v50  ;;  %v3931_v14 = vmul.f32 %v3436_v11, %v3870_v2  ;;  %v3951_v11 = vmul.f32 %v3438_v19, %v3910_v25 }
 0x157   : > { %6293 = vst [vmem:[#allocation81_spill] sm:$0xff] %v3874_v21  ;;  %v617_v21 = vrot.slane %v3412_v7, 3 }
 0x158   : > { %6294 = vst [vmem:[#allocation82_spill] sm:$0xff] %v3878_v31  ;;  %v3898_v31 = vld [vmem:[%s5923_s4 + $0x1f0] sm:$0xff] }
 0x159   : > { %6295 = vst [vmem:[#allocation83_spill] sm:$0xff] %v3882_v28  ;;  %v3902_v28 = vmul.f32 %v3434_v20, %v3821_v16  ;;  %v621_v20 = vrot.slane %v3412_v7, 7 }
 0x15a   : > { %6296 = vst [vmem:[#allocation84_spill] sm:$0xff] %v3893_v35 }
 0x15b   : > { %6297 = vst [vmem:[#allocation85_spill] sm:$0xff] %v3902_v28  ;;  %v3919_v28 = vperm.slane %v3412_v7, 0  ;;  %v3941_v7 = vmul.f32 %v3438_v19, %v3893_v35  ;;  %v3961_v35 = vperm.slane %v621_v20, 0 }
 0x15c   : > { %6298 = vst [vmem:[#allocation86_spill] sm:$0xff] %v3914_v23  ;;  %v3933_v23 = vperm.slane %v615_v56, 0  ;;  %v3953_v56 = vperm.slane %v617_v21, 0 }
 0x15d   : > { %6299 = vst [vmem:[#allocation87_spill] sm:$0xff] %v3923_v0  ;;  %v3945_v0 = vmul.f32 %v3438_v19, %v3898_v31  ;;  %v1181_v34 = vmul.f32 %v3919_v28, %v3583_v27  ;;  %v1182_v19 = vmul.f32 %v3919_v28, %v3604_v55  ;;  %v1183_v21 = vmul.f32 %v3919_v28, %v3609_v60 }
 0x15e   : > { %6300 = vst [vmem:[#allocation88_spill] sm:$0xff] %v3927_v36  ;;  %v3957_v36 = vperm.slane %v619_v58, 0  ;;  %v1185_v58 = vmul.f32 %v3933_v23, %v3635_v29  ;;  %v1188_v27 = vmul.f32 %v3947_v44, %v3666_v45  ;;  %v1189_v55 = vmul.f32 %v3947_v44, %v3671_v38 }
 0x15f   : > { %6301 = vst [vmem:[#allocation89_spill] sm:$0xff] %v3931_v14  ;;  %v3955_v14 = vperm.slane %v618_v51, 0  ;;  %v1184_v51 = vmul.f32 %v3933_v23, %v3614_v61  ;;  %v1190_v60 = vmul.f32 %v3947_v44, %v3676_v59  ;;  %v1191_v61 = vmul.f32 %v3947_v44, %v3697_v17 }
 0x160   : > { %6302 = vst [vmem:[#allocation90_spill] sm:$0xff] %v3937_v63  ;;  %v3959_v63 = vperm.slane %v620_v53, 0  ;;  %v1186_v53 = vmul.f32 %v3933_v23, %v3640_v33  ;;  %v1192_v29 = vmul.f32 %v3953_v56, %v3702_v5  ;;  %v1193_v33 = vmul.f32 %v3953_v56, %v3707_v48 }
 0x161   : > { %6303 = vst [vmem:[#allocation91_spill] sm:$0xff] %v3941_v7  ;;  %v1180_v7 = vmul.f32 %v3919_v28, %v3547_v1  ;;  %v1187_v1 = vmul.f32 %v3933_v23, %v3645_v22  ;;  %v1194_v22 = vmul.f32 %v3953_v56, %v3728_v46  ;;  %v1195_v45 = vmul.f32 %v3953_v56, %v3733_v54 }
 0x162   : > { %v3997_v38 = vmul.f32 %v3955_v14, %v3738_v10  ;;  %v4001_v59 = vmul.f32 %v3955_v14, %v3759_v41  ;;  %v4005_v17 = vmul.f32 %v3955_v14, %v3764_v39  ;;  %v1309_v48 = vsub.f32 %v3463_v24, %v1181_v34 }
 0x163   : > { %v1308_v5 = vsub.f32 %v3442_v4, %v1180_v7  ;;  %v1310_v46 = vsub.f32 %v3467_v26, %v1182_v19  ;;  %v4012_v54 = vmul.f32 %v3955_v14, %v3769_v32  ;;  %v4016_v10 = vmul.f32 %v3957_v36, %v3790_v13 }
 0x164   : > { %v4020_v41 = vmul.f32 %v3957_v36, %v3795_v50  ;;  %v1311_v39 = vsub.f32 %v3471_v3, %v1183_v21  ;;  %v4025_v4 = vmul.f32 %v3957_v36, %v3800_v43  ;;  %v1312_v24 = vsub.f32 %v3496_v30, %v1184_v51 }
 0x165   : > { %v1313_v26 = vsub.f32 %v3515_v6, %v1185_v58  ;;  %v1314_v32 = vsub.f32 %v3519_v40, %v1186_v53  ;;  %v4032_v13 = vmul.f32 %v3957_v36, %v3821_v16  ;;  %v4036_v50 = vmul.f32 %v3959_v63, %v3842_v62  ;;  %v6306_v58 = vld [vmem:[#allocation20_spill] sm:$0xff] }
 0x166   : > { %v4040_v3 = vmul.f32 %v3959_v63, %v3860_v49  ;;  %v1315_v43 = vsub.f32 %v3523_v12, %v1187_v1  ;;  %v4045_v30 = vmul.f32 %v3959_v63, %v3865_v15  ;;  %v1411_v6 = vadd.f32 %v3276_v47, %v1308_v5  ;;  %v6307_v1 = vld [vmem:[#allocation24_spill] sm:$0xff] }
 0x167   : > { %v1442_v40 = vadd.f32 %v3288_v8, %v1309_v48  ;;  %v1473_v16 = vadd.f32 %v3301_v42, %v1310_v46  ;;  %v4052_v62 = vmul.f32 %v3959_v63, %v3870_v2  ;;  %v1316_v20 = vsub.f32 %v3527_v9, %v1188_v27  ;;  %v6304_v8 = vld [vmem:[#allocation84_spill] sm:$0xff]  ;;  %v6305_v2 = vld [vmem:[#allocation19_spill] sm:$0xff] }
 0x168   : > { %v1317_v49 = vsub.f32 %v3551_v57, %v1189_v55  ;;  %v1504_v12 = vadd.f32 %v3303_v18, %v1311_v39  ;;  %v1318_v7 = vsub.f32 %v3555_v52, %v1190_v60  ;;  %v1412_v15 = vadd.f32 %v1411_v6, %v1312_v24  ;;  %v6310_v46 = vld [vmem:[#allocation59_spill] sm:$0xff]  ;;  %v6311_v39 = vld [vmem:[#allocation60_spill] sm:$0xff] }
 0x169   : > { %v1443_v34 = vadd.f32 %v1442_v40, %v1313_v26  ;;  %v1474_v19 = vadd.f32 %v1473_v16, %v1314_v32  ;;  %v4060_v47 = vmul.f32 %v3961_v35, %v3888_v37  ;;  %v4064_v42 = vmul.f32 %v3961_v35, %v6304_v8  ;;  %v6308_v37 = vld [vmem:[#allocation57_spill] sm:$0xff] }
 0x16a   : > { %v1319_v21 = vsub.f32 %v6305_v2, %v1191_v61  ;;  %v1505_v9 = vadd.f32 %v1504_v12, %v1315_v43  ;;  %v4069_v57 = vmul.f32 %v3961_v35, %v3898_v31  ;;  %v1413_v18 = vadd.f32 %v1412_v15, %v1316_v20  ;;  %v6309_v61 = vld [vmem:[#allocation58_spill] sm:$0xff]  ;;  %v6312_v26 = vld [vmem:[#allocation25_spill] sm:$0xff] }
 0x16b   : > { %v1444_v52 = vadd.f32 %v1443_v34, %v1317_v49  ;;  %v1475_v51 = vadd.f32 %v1474_v19, %v1318_v7  ;;  %v1320_v53 = vsub.f32 %v6306_v58, %v1192_v29  ;;  %v1321_v27 = vsub.f32 %v6307_v1, %v1193_v33  ;;  %v6319_v7 = vld [vmem:[#allocation61_spill] sm:$0xff]  ;;  %v6326_v58 = vld [vmem:[#allocation36_spill] sm:$0xff] }
 0x16c   : > { %v1322_v55 = vsub.f32 %v6308_v37, %v1194_v22  ;;  %v1506_v60 = vadd.f32 %v1505_v9, %v1319_v21  ;;  %v4076_v5 = vmul.f32 %v3961_v35, %v3910_v25  ;;  %v1323_v48 = vsub.f32 %v6309_v61, %v1195_v45  ;;  %v6313_v22 = vld [vmem:[#allocation26_spill] sm:$0xff]  ;;  %v6314_v25 = vld [vmem:[#allocation27_spill] sm:$0xff]  ;;  %v6315_v45 = vld [vmem:[#allocation53_spill] sm:$0xff] }
 0x16d   : > { %v1324_v31 = vsub.f32 %v6310_v46, %v3997_v38  ;;  %v1325_v24 = vsub.f32 %v6311_v39, %v4001_v59  ;;  %v1326_v29 = vsub.f32 %v6312_v26, %v4005_v17  ;;  %v1414_v32 = vadd.f32 %v1413_v18, %v1320_v53  ;;  %v6316_v38 = vld [vmem:[#allocation54_spill] sm:$0xff]  ;;  %v6317_v59 = vld [vmem:[#allocation55_spill] sm:$0xff]  ;;  %v6318_v17 = vld [vmem:[#allocation56_spill] sm:$0xff] }
 0x16e   : > { %v1445_v33 = vadd.f32 %v1444_v52, %v1321_v27  ;;  %v1476_v43 = vadd.f32 %v1475_v51, %v1322_v55  ;;  %v1327_v6 = vsub.f32 %v6313_v22, %v4012_v54  ;;  %v1328_v40 = vsub.f32 %v6314_v25, %v4016_v10  ;;  %v6320_v54 = vld [vmem:[#allocation62_spill] sm:$0xff]  ;;  %v6321_v10 = vld [vmem:[#allocation63_spill] sm:$0xff]  ;;  %v6327_v53 = vld [vmem:[#allocation76_spill] sm:$0xff] }
 0x16f   : > { %v1329_v16 = vsub.f32 %v6315_v45, %v4020_v41  ;;  %v1330_v20 = vsub.f32 %v6316_v38, %v4025_v4  ;;  %v1331_v49 = vsub.f32 %v6317_v59, %v4032_v13  ;;  %v1332_v12 = vsub.f32 %v6318_v17, %v4036_v50  ;;  %v6322_v41 = vld [vmem:[#allocation64_spill] sm:$0xff]  ;;  %v6323_v4 = vld [vmem:[#allocation65_spill] sm:$0xff]  ;;  %v6324_v13 = vld [vmem:[#allocation66_spill] sm:$0xff] }
 0x170   : > { %v1333_v15 = vsub.f32 %v6319_v7, %v4040_v3  ;;  %v1507_v34 = vadd.f32 %v1506_v60, %v1323_v48  ;;  %v1334_v19 = vsub.f32 %v6320_v54, %v4045_v30  ;;  %v1335_v8 = vsub.f32 %v6321_v10, %v4052_v62  ;;  %v6325_v3 = vld [vmem:[#allocation67_spill] sm:$0xff]  ;;  %v6328_v1 = vld [vmem:[#allocation37_spill] sm:$0xff]  ;;  %v6331_v60 = vld [vmem:[#allocation40_spill] sm:$0xff] }
 0x171   : > { %v1336_v2 = vsub.f32 %v6322_v41, %v4060_v47  ;;  %v1337_v21 = vsub.f32 %v6323_v4, %v4064_v42  ;;  %v1338_v9 = vsub.f32 %v6324_v13, %v4069_v57  ;;  %v1415_v50 = vadd.f32 %v1414_v32, %v1324_v31  ;;  %v6329_v42 = vld [vmem:[#allocation38_spill] sm:$0xff]  ;;  %v6330_v57 = vld [vmem:[#allocation39_spill] sm:$0xff]  ;;  %v6335_v26 = vld [vmem:[#allocation44_spill] sm:$0xff] }
 0x172   : > { %v1446_v18 = vadd.f32 %v1445_v33, %v1325_v24  ;;  %v1477_v52 = vadd.f32 %v1476_v43, %v1326_v29  ;;  %v1339_v51 = vsub.f32 %v6325_v3, %v4076_v5  ;;  %v1692_v30 = vmul.f32 %v3919_v28, %v6326_v58  ;;  %v6332_v5 = vld [vmem:[#allocation41_spill] sm:$0xff]  ;;  %v6333_v46 = vld [vmem:[#allocation42_spill] sm:$0xff]  ;;  %v6334_v39 = vld [vmem:[#allocation43_spill] sm:$0xff] }
 0x173   : > { %v1693_v62 = vmul.f32 %v3919_v28, %v6327_v53  ;;  %v1694_v47 = vmul.f32 %v3919_v28, %v6328_v1  ;;  %v1508_v27 = vadd.f32 %v1507_v34, %v1327_v6  ;;  %v1695_v37 = vmul.f32 %v3919_v28, %v6329_v42  ;;  %v6336_v43 = vld [vmem:[#allocation45_spill] sm:$0xff]  ;;  %v6337_v6 = vld [vmem:[#allocation46_spill] sm:$0xff]  ;;  %v6338_v45 = vld [vmem:[#allocation47_spill] sm:$0xff] }
 0x174   : > { %v1696_v55 = vmul.f32 %v3933_v23, %v6330_v57  ;;  %v1697_v61 = vmul.f32 %v3933_v23, %v6331_v60  ;;  %v1698_v48 = vmul.f32 %v3933_v23, %v6332_v5  ;;  %v1699_v31 = vmul.f32 %v3933_v23, %v6333_v46  ;;  %v6339_v59 = vld [vmem:[#allocation48_spill] sm:$0xff]  ;;  %v6340_v17 = vld [vmem:[#allocation49_spill] sm:$0xff]  ;;  %v6341_v54 = vld [vmem:[#allocation50_spill] sm:$0xff] }
 0x175   : > { %v1700_v24 = vmul.f32 %v3947_v44, %v6334_v39  ;;  %v1701_v29 = vmul.f32 %v3947_v44, %v6335_v26  ;;  %v1416_v32 = vadd.f32 %v1415_v50, %v1328_v40  ;;  %v1447_v28 = vadd.f32 %v1446_v18, %v1329_v16  ;;  %v6342_v16 = vld [vmem:[#allocation51_spill] sm:$0xff]  ;;  %v6343_v10 = vld [vmem:[#allocation4_spill] sm:$0xff]  ;;  %v6345_v13 = vld [vmem:[#allocation6_spill] sm:$0xff] }
 0x176   : > { %v1478_v33 = vadd.f32 %v1477_v52, %v1330_v20  ;;  %v1702_v22 = vmul.f32 %v3947_v44, %v6336_v43  ;;  %v1703_v25 = vmul.f32 %v3947_v44, %v6337_v6  ;;  %v1704_v38 = vmul.f32 %v3953_v56, %v6338_v45  ;;  %v6344_v44 = vld [vmem:[#allocation5_spill] sm:$0xff]  ;;  %v6346_v18 = vld [vmem:[#allocation10_spill] sm:$0xff]  ;;  %v6347_v3 = vld [vmem:[#allocation11_spill] sm:$0xff] }
 0x177   : > { %v1705_v23 = vmul.f32 %v3953_v56, %v6339_v59  ;;  %v1706_v7 = vmul.f32 %v3953_v56, %v6340_v17  ;;  %v1509_v34 = vadd.f32 %v1508_v27, %v1331_v49  ;;  %v1707_v40 = vmul.f32 %v3953_v56, %v6341_v54  ;;  %v6348_v1 = vld [vmem:[#allocation12_spill] sm:$0xff]  ;;  %v6349_v42 = vld [vmem:[#allocation13_spill] sm:$0xff]  ;;  %v6353_v6 = vld [vmem:[#allocation14_spill] sm:$0xff] }
 0x178   : > { %v1708_v20 = vmul.f32 %v3955_v14, %v6342_v16  ;;  %v1709_v41 = vmul.f32 %v3955_v14, %v6343_v10  ;;  %v1710_v4 = vmul.f32 %v3955_v14, %v6344_v44  ;;  %v1711_v50 = vmul.f32 %v3955_v14, %v6345_v13  ;;  %v6350_v60 = vld [vmem:[#allocation68_spill] sm:$0xff]  ;;  %v6352_v39 = vld [vmem:[#allocation69_spill] sm:$0xff]  ;;  %v6354_v59 = vld [vmem:[#allocation15_spill] sm:$0xff] }
 0x179   : > { %v1712_v52 = vmul.f32 %v3957_v36, %v6346_v18  ;;  %v4155_v49 = vmul.f32 %v3957_v36, %v6347_v3  ;;  %v1417_v56 = vadd.f32 %v1416_v32, %v1332_v12  ;;  %v1448_v58 = vadd.f32 %v1447_v28, %v1333_v15  ;;  %v6351_v46 = vld [vmem:[#allocation28_spill] sm:$0xff]  ;;  %v6355_v15 = vld [vmem:[#allocation29_spill] sm:$0xff]  ;;  %v6358_v17 = vld [vmem:[#allocation71_spill] sm:$0xff] }
 0x17a   : > { %v1479_v53 = vadd.f32 %v1478_v33, %v1334_v19  ;;  %v1714_v27 = vmul.f32 %v3957_v36, %v6348_v1  ;;  %v1715_v57 = vmul.f32 %v3957_v36, %v6349_v42  ;;  %v1820_v5 = vadd.f32 %v1692_v30, %v6350_v60  ;;  %v6356_v32 = vld [vmem:[#allocation16_spill] sm:$0xff]  ;;  %v6357_v33 = vld [vmem:[#allocation70_spill] sm:$0xff]  ;;  %v6361_v44 = vld [vmem:[#allocation17_spill] sm:$0xff] }
 0x17b   : > { %v1821_v14 = vadd.f32 %v1693_v62, %v6351_v46  ;;  %v1822_v26 = vadd.f32 %v1694_v47, %v6352_v39  ;;  %v1510_v43 = vadd.f32 %v1509_v34, %v1335_v8  ;;  %v1716_v45 = vmul.f32 %v3959_v63, %v6353_v6  ;;  %v6359_v54 = vld [vmem:[#allocation72_spill] sm:$0xff]  ;;  %v6360_v34 = vld [vmem:[#allocation30_spill] sm:$0xff]  ;;  %v6363_v3 = vld [vmem:[#allocation7_spill] sm:$0xff] }
 0x17c   : > { %v1717_v12 = vmul.f32 %v3959_v63, %v6354_v59  ;;  %v1823_v19 = vadd.f32 %v1695_v37, %v6355_v15  ;;  %v1718_v28 = vmul.f32 %v3959_v63, %v6356_v32  ;;  %v1824_v36 = vadd.f32 %v1696_v55, %v6357_v33  ;;  %v6362_v13 = vld [vmem:[#allocation52_spill] sm:$0xff] }
 0x17d   : > { %v1825_v30 = vadd.f32 %v1697_v61, %v6358_v17  ;;  %v1826_v62 = vadd.f32 %v1698_v48, %v6359_v54  ;;  %v4174_v16 = vadd.f32 %v1417_v56, %v1336_v2  ;;  %v4176_v8 = vadd.f32 %v1448_v58, %v1337_v21  ;;  %v6364_v55 = vld [vmem:[#allocation8_spill] sm:$0xff]  ;;  %v6365_v48 = vld [vmem:[#allocation31_spill] sm:$0xff]  ;;  %v6367_v58 = vld [vmem:[#allocation9_spill] sm:$0xff]  ;;  %v445_v17 = vpop.f32.mrf.mxu1 }
 0x17e   : > { %v4178_v47 = vadd.f32 %v1479_v53, %v1338_v9  ;;  %v1827_v10 = vadd.f32 %v1699_v31, %v6360_v34  ;;  %v1719_v37 = vmul.f32 %v3959_v63, %v6361_v44  ;;  %v1923_v18 = vadd.f32 %v6362_v13, %v1820_v5  ;;  %v6366_v56 = vld [vmem:[#allocation32_spill] sm:$0xff]  ;;  %v6368_v53 = vld [vmem:[#allocation33_spill] sm:$0xff]  ;;  %v6369_v63 = vld [vmem:[#allocation34_spill] sm:$0xff] }
 0x17f   : > { %v1954_v1 = vadd.f32 %v6363_v3, %v1821_v14  ;;  %v1985_v42 = vadd.f32 %v6364_v55, %v1822_v26  ;;  %v4186_v61 = vadd.f32 %v1510_v43, %v1339_v51  ;;  %v1828_v2 = vadd.f32 %v1700_v24, %v6365_v48  ;;  %v6370_v5 = vld [vmem:[#allocation35_spill] sm:$0xff]  ;;  %v6371_v14 = vld [vmem:[#allocation73_spill] sm:$0xff]  ;;  %v6372_v51 = vld [vmem:[#allocation74_spill] sm:$0xff] }
 0x180   : > { %v1829_v21 = vadd.f32 %v1701_v29, %v6366_v56  ;;  %v2016_v9 = vadd.f32 %v6367_v58, %v1823_v19  ;;  %v1830_v60 = vadd.f32 %v1702_v22, %v6368_v53  ;;  %v1924_v31 = vadd.f32 %v1923_v18, %v1824_v36  ;;  %v416_v29 = vpop.f32.mrf.mxu0  ;;  %v6373_v19 = vld [vmem:[#allocation18_spill] sm:$0xff]  ;;  %v6374_v36 = vld [vmem:[#allocation75_spill] sm:$0xff]  ;;  %v6375_v54 = vld [vmem:[#allocation77_spill] sm:$0xff] }
 0x181   : > { %v1955_v46 = vadd.f32 %v1954_v1, %v1825_v30  ;;  %v1986_v39 = vadd.f32 %v1985_v42, %v1826_v62  ;;  %v1831_v6 = vadd.f32 %v1703_v25, %v6369_v63  ;;  %v1832_v59 = vadd.f32 %v1704_v38, %v6370_v5  ;;  %v6376_v34 = vld [vmem:[#allocation78_spill] sm:$0xff]  ;;  %v6377_v13 = vld [vmem:[#allocation79_spill] sm:$0xff]  ;;  %v6378_v18 = vld [vmem:[#allocation80_spill] sm:$0xff] }
 0x182   : > { %v1833_v15 = vadd.f32 %v1705_v23, %v6371_v14  ;;  %v2017_v26 = vadd.f32 %v2016_v9, %v1827_v10  ;;  %v1834_v43 = vadd.f32 %v1706_v7, %v6372_v51  ;;  %v1925_v32 = vadd.f32 %v1924_v31, %v1828_v2  ;;  %v6379_v42 = vld [vmem:[#allocation21_spill] sm:$0xff]  ;;  %v6380_v2 = vld [vmem:[#allocation22_spill] sm:$0xff]  ;;  %v6381_v56 = vld [vmem:[#allocation23_spill] sm:$0xff] }
 0x183   : > { %v1956_v24 = vadd.f32 %v1955_v46, %v1829_v21  ;;  %v1987_v33 = vadd.f32 %v1986_v39, %v1830_v60  ;;  %v1720_v22 = vmul.f32 %v3961_v35, %v6373_v19  ;;  %v1835_v30 = vadd.f32 %v1707_v40, %v6374_v36  ;;  %v6384_v31 = vld [vmem:[#allocation83_spill] sm:$0xff]  ;;  %v6385_v39 = vld [vmem:[#allocation85_spill] sm:$0xff] }
 0x184   : > { %v1836_v62 = vadd.f32 %v1708_v20, %v6375_v54  ;;  %v2018_v25 = vadd.f32 %v2017_v26, %v1831_v6  ;;  %v1837_v38 = vadd.f32 %v1709_v41, %v6376_v34  ;;  %v1926_v44 = vadd.f32 %v1925_v32, %v1832_v59  ;;  %v6382_v41 = vld [vmem:[#allocation81_spill] sm:$0xff]  ;;  %v6386_v6 = vld [vmem:[#allocation86_spill] sm:$0xff]  ;;  %v6387_v59 = vld [vmem:[#allocation87_spill] sm:$0xff] }
 0x185   : > { %v1957_v23 = vadd.f32 %v1956_v24, %v1833_v15  ;;  %v1988_v10 = vadd.f32 %v1987_v33, %v1834_v43  ;;  %v1838_v7 = vadd.f32 %v1710_v4, %v6377_v13  ;;  %v1839_v3 = vadd.f32 %v1711_v50, %v6378_v18  ;;  %v6383_v4 = vld [vmem:[#allocation82_spill] sm:$0xff]  ;;  %v6388_v15 = vld [vmem:[#allocation88_spill] sm:$0xff] }
 0x186   : > { %v2019_v1 = vadd.f32 %v2018_v25, %v1835_v30  ;;  %v446_v55 = vadd.f32 %v445_v17, %v416_v29  ;;  %v1721_v48 = vmul.f32 %v3961_v35, %v6379_v42  ;;  %v1722_v40 = vmul.f32 %v3961_v35, %v6380_v2  ;;  %v4232_v30 = vld [vmem:[%s5922_s3 + $0x210] sm:$0xff]  ;;  %v4269_v18 = vld [vmem:[%s5922_s3 + $0x240] sm:$0xff] }
 0x187   : > { %v1723_v20 = vmul.f32 %v3961_v35, %v6381_v56  ;;  %v1927_v21 = vadd.f32 %v1926_v44, %v1836_v62  ;;  %v1840_v58 = vadd.f32 %v1712_v52, %v6382_v41  ;;  %v1958_v9 = vadd.f32 %v1957_v23, %v1837_v38  ;;  %v6389_v35 = vld [vmem:[#allocation89_spill] sm:$0xff]  ;;  %v6390_v52 = vld [vmem:[#allocation90_spill] sm:$0xff]  ;;  %6393 = vst [vmem:[#allocation20_spill] sm:$0xff] %v4232_v30  ;;  %v6394_v62 = vld [vmem:[#allocation91_spill] sm:$0xff] }
 0x188   : > { %v1989_v53 = vadd.f32 %v1988_v10, %v1838_v7  ;;  %v2020_v60 = vadd.f32 %v2019_v1, %v1839_v3  ;;  %v1841_v50 = vadd.f32 %v4155_v49, %v6383_v4  ;;  %v1842_v46 = vadd.f32 %v1714_v27, %v6384_v31  ;;  %v4242_v44 = vld [vmem:[%s5922_s3 + $0x218] sm:$0xff]  ;;  %v4247_v23 = vld [vmem:[%s5922_s3 + $0x220] sm:$0xff]  ;;  %v4252_v10 = vld [vmem:[%s5922_s3 + $0x228] sm:$0xff]  ;;  %6400 = vst [vmem:[#allocation25_spill] sm:$0xff] %v4269_v18 }
 0x189   : > { %v1843_v63 = vadd.f32 %v1715_v57, %v6385_v39  ;;  %v1844_v5 = vadd.f32 %v1716_v45, %v6386_v6  ;;  %v1845_v14 = vadd.f32 %v1717_v12, %v6387_v59  ;;  %v1846_v26 = vadd.f32 %v1718_v28, %v6388_v15  ;;  %v4222_v57 = vld [vmem:[%s5922_s3 + $0x200] sm:$0xff]  ;;  %v518_v45 = vpop.f32.mrf.mxu2  ;;  %v547_v12 = vpop.f32.mrf.mxu3  ;;  %6395 = vst [vmem:[#allocation24_spill] sm:$0xff] %v4242_v44  ;;  %v4264_v7 = vld [vmem:[%s5922_s3 + $0x238] sm:$0xff]  ;;  %v4285_v56 = vld [vmem:[%s5922_s3 + $0x250] sm:$0xff] }
 0x18a   : > { %v1847_v51 = vadd.f32 %v1719_v37, %v6389_v35  ;;  %v586_v43 = vrot.slane %v446_v55, 1  ;;  %v1848_v32 = vadd.f32 %v1720_v22, %v6390_v52  ;;  %v1928_v24 = vadd.f32 %v1927_v21, %v1840_v58  ;;  %6391 = vst [vmem:[#allocation84_spill] sm:$0xff] %v4222_v57  ;;  %v4227_v22 = vld [vmem:[%s5922_s3 + $0x208] sm:$0xff]  ;;  %v4295_v21 = vld [vmem:[%s5922_s3 + $0x260] sm:$0xff]  ;;  %v4342_v6 = vld [vmem:[%s5922_s3 + $0x298] sm:$0xff] }
 0x18b   : > { %v587_v33 = vrot.slane %v446_v55, 2  ;;  %v588_v29 = vrot.slane %v446_v55, 3  ;;  %v1959_v17 = vadd.f32 %v1958_v9, %v1841_v50  ;;  %v1990_v49 = vadd.f32 %v1989_v53, %v1842_v46  ;;  %6392 = vst [vmem:[#allocation19_spill] sm:$0xff] %v4227_v22  ;;  %v4302_v58 = vld [vmem:[%s5922_s3 + $0x268] sm:$0xff]  ;;  %v4307_v9 = vld [vmem:[%s5922_s3 + $0x270] sm:$0xff]  ;;  %v4312_v53 = vld [vmem:[%s5922_s3 + $0x278] sm:$0xff] }
 0x18c   : > { %v2021_v19 = vadd.f32 %v2020_v60, %v1843_v63  ;;  %v589_v27 = vrot.slane %v446_v55, 4  ;;  %v590_v28 = vrot.slane %v446_v55, 5  ;;  %v591_v36 = vrot.slane %v446_v55, 6  ;;  %6396 = vst [vmem:[#allocation57_spill] sm:$0xff] %v4247_v23  ;;  %v4317_v60 = vld [vmem:[%s5922_s3 + $0x280] sm:$0xff]  ;;  %v4332_v39 = vld [vmem:[%s5922_s3 + $0x288] sm:$0xff] }
 0x18d   : > { %v592_v37 = vrot.slane %v446_v55, 7  ;;  %v4234_v54 = vperm.slane %v446_v55, 0  ;;  %v1849_v25 = vadd.f32 %v1721_v48, %v6394_v62  ;;  %v1850_v34 = vadd.f32 %v1722_v40, %v3945_v0  ;;  %6397 = vst [vmem:[#allocation58_spill] sm:$0xff] %v4252_v10  ;;  %v4280_v40 = vld [vmem:[%s5922_s3 + $0x248] sm:$0xff]  ;;  %v4337_v63 = vld [vmem:[%s5922_s3 + $0x290] sm:$0xff]  ;;  %v4365_v35 = vld [vmem:[%s5922_s3 + $0x2a0] sm:$0xff] }
 0x18e   : > { %v1851_v38 = vadd.f32 %v1723_v20, %v3951_v11  ;;  %v4254_v13 = vperm.slane %v586_v43, 0  ;;  %v1929_v0 = vadd.f32 %v1928_v24, %v1844_v5  ;;  %v4259_v11 = vld [vmem:[%s5922_s3 + $0x230] sm:$0xff]  ;;  %6399 = vst [vmem:[#allocation60_spill] sm:$0xff] %v4264_v7  ;;  %v4271_v3 = vperm.slane %v587_v33, 0  ;;  %v4290_v20 = vld [vmem:[%s5922_s3 + $0x258] sm:$0xff] }
 0x18f   : > { %6398 = vst [vmem:[#allocation59_spill] sm:$0xff] %v4259_v11  ;;  %v4273_v1 = vperm.slane %v588_v29, 0  ;;  %v4275_v55 = vadd.f32 %v547_v12, %v518_v45  ;;  %v1960_v42 = vadd.f32 %v1959_v17, %v1845_v14  ;;  %v1991_v48 = vadd.f32 %v1990_v49, %v1846_v26  ;;  %v4375_v43 = vld [vmem:[%s5922_s3 + $0x2b0] sm:$0xff]  ;;  %v4398_v49 = vld [vmem:[%s5922_s3 + $0x2b8] sm:$0xff] }
 0x190   : > { %v2022_v2 = vadd.f32 %v2021_v19, %v1847_v51  ;;  %6401 = vst [vmem:[#allocation26_spill] sm:$0xff] %v4280_v40  ;;  %v4297_v41 = vperm.slane %v589_v27, 0  ;;  %v4319_v4 = vperm.slane %v590_v28, 0  ;;  %v4321_v50 = vperm.slane %v591_v36, 0  ;;  %v4370_v51 = vld [vmem:[%s5922_s3 + $0x2a8] sm:$0xff]  ;;  %v4403_v19 = vld [vmem:[%s5922_s3 + $0x2c0] sm:$0xff] }
 0x191   : > { %6402 = vst [vmem:[#allocation27_spill] sm:$0xff] %v4285_v56  ;;  %v4323_v31 = vperm.slane %v592_v37, 0  ;;  %v4327_v46 = vmul.f32 %v4234_v54, %v4222_v57  ;;  %v4346_v5 = vmul.f32 %v4234_v54, %v4227_v22  ;;  %v4350_v59 = vmul.f32 %v4234_v54, %v4232_v30  ;;  %v4408_v27 = vld [vmem:[%s5922_s3 + $0x2c8] sm:$0xff]  ;;  %v4417_v12 = vld [vmem:[%s5922_s3 + $0x2d0] sm:$0xff]  ;;  %v4422_v28 = vld [vmem:[%s5922_s3 + $0x2d8] sm:$0xff] }
 0x192   : > { %6403 = vst [vmem:[#allocation53_spill] sm:$0xff] %v4290_v20  ;;  %v4354_v14 = vmul.f32 %v4234_v54, %v4242_v44  ;;  %v4358_v15 = vmul.f32 %v4254_v13, %v4247_v23  ;;  %v4360_v26 = vadd.f32 %v1929_v0, %v1848_v32  ;;  %v4379_v52 = vmul.f32 %v4254_v13, %v4252_v10  ;;  %v4427_v36 = vld [vmem:[%s5922_s3 + $0x2e0] sm:$0xff]  ;;  %v4453_v0 = vld [vmem:[%s5922_s3 + $0x2e8] sm:$0xff]  ;;  %v4582_v44 = vld [vmem:[%s5923_s4 + $0x258] sm:$0xff] }
 0x193   : > { %6404 = vst [vmem:[#allocation54_spill] sm:$0xff] %v4295_v21  ;;  %v4383_v32 = vmul.f32 %v4254_v13, %v4259_v11  ;;  %v4387_v24 = vmul.f32 %v4254_v13, %v4264_v7  ;;  %v4389_v33 = vadd.f32 %v1960_v42, %v1849_v25  ;;  %v4391_v29 = vadd.f32 %v1991_v48, %v1850_v34  ;;  %v4432_v37 = vld [vmem:[%s5923_s4 + $0x200] sm:$0xff]  ;;  %v4458_v42 = vld [vmem:[%s5922_s3 + $0x2f0] sm:$0xff]  ;;  %v4463_v48 = vld [vmem:[%s5922_s3 + $0x2f8] sm:$0xff] }
 0x194   : > { %6405 = vst [vmem:[#allocation55_spill] sm:$0xff] %v4302_v58  ;;  %v4393_v17 = vadd.f32 %v2022_v2, %v1851_v38  ;;  %v4412_v45 = vmul.f32 %v4271_v3, %v4269_v18  ;;  %v4436_v62 = vmul.f32 %v4271_v3, %v4280_v40  ;;  %v4440_v25 = vmul.f32 %v4271_v3, %v4285_v56  ;;  %v4468_v2 = vld [vmem:[%s5923_s4 + $0x208] sm:$0xff]  ;;  %v4551_v11 = vld [vmem:[%s5923_s4 + $0x240] sm:$0xff]  ;;  %v4613_v57 = vld [vmem:[%s5923_s4 + $0x270] sm:$0xff] }
 0x195   : > { %6406 = vst [vmem:[#allocation56_spill] sm:$0xff] %v4307_v9  ;;  %v4444_v34 = vmul.f32 %v4271_v3, %v4290_v20  ;;  %v4448_v38 = vmul.f32 %v4273_v1, %v4295_v21  ;;  %v4489_v21 = vld [vmem:[%s5923_s4 + $0x210] sm:$0xff]  ;;  %v4511_v20 = vmul.f32 %v4297_v41, %v4342_v6  ;;  %v4515_v56 = vmul.f32 %v4319_v4, %v4365_v35  ;;  %v4520_v40 = vld [vmem:[%s5923_s4 + $0x228] sm:$0xff] }
 0x196   : > { %6407 = vst [vmem:[#allocation61_spill] sm:$0xff] %v4312_v53  ;;  %v4542_v18 = vmul.f32 %v4319_v4, %v4398_v49  ;;  %v4546_v7 = vmul.f32 %v4321_v50, %v4403_v19  ;;  %v4573_v10 = vmul.f32 %v4321_v50, %v4422_v28  ;;  %v4577_v23 = vmul.f32 %v4323_v31, %v4427_v36 }
 0x197   : > { %6408 = vst [vmem:[#allocation62_spill] sm:$0xff] %v4317_v60  ;;  %v4604_v30 = vmul.f32 %v4323_v31, %v4463_v48  ;;  %v4608_v22 = vmul.f32 %v4234_v54, %v4432_v37 }
 0x198   : > { %6409 = vst [vmem:[#allocation63_spill] sm:$0xff] %v4332_v39 }
 0x199   : > { %6410 = vst [vmem:[#allocation64_spill] sm:$0xff] %v4337_v63 }
 0x19a   : > { %6411 = vst [vmem:[#allocation65_spill] sm:$0xff] %v4342_v6  ;;  %v4534_v6 = vmul.f32 %v4319_v4, %v4370_v51 }
 0x19b   : > { %6412 = vst [vmem:[#allocation66_spill] sm:$0xff] %v4360_v26  ;;  %v4484_v26 = vmul.f32 %v4297_v41, %v4317_v60  ;;  %v4507_v60 = vmul.f32 %v4297_v41, %v4337_v63  ;;  %v4530_v63 = vld [vmem:[%s5923_s4 + $0x238] sm:$0xff] }
 0x19c   : > { %6413 = vst [vmem:[#allocation67_spill] sm:$0xff] %v4365_v35  ;;  %v4538_v35 = vmul.f32 %v4319_v4, %v4375_v43 }
 0x19d   : > { %6414 = vst [vmem:[#allocation36_spill] sm:$0xff] %v4370_v51  ;;  %v4556_v51 = vld [vmem:[%s5923_s4 + $0x248] sm:$0xff] }
 0x19e   : > { %6415 = vst [vmem:[#allocation76_spill] sm:$0xff] %v4375_v43  ;;  %v4561_v43 = vld [vmem:[%s5923_s4 + $0x250] sm:$0xff] }
 0x19f   : > { %6416 = vst [vmem:[#allocation37_spill] sm:$0xff] %v4389_v33  ;;  %v4480_v33 = vmul.f32 %v4273_v1, %v4312_v53  ;;  %v4503_v53 = vmul.f32 %v4297_v41, %v4332_v39  ;;  %v4525_v39 = vld [vmem:[%s5923_s4 + $0x230] sm:$0xff] }
 0x1a0   : > { %6417 = vst [vmem:[#allocation38_spill] sm:$0xff] %v4391_v29  ;;  %v4476_v29 = vmul.f32 %v4273_v1, %v4307_v9  ;;  %v4499_v9 = vld [vmem:[%s5923_s4 + $0x220] sm:$0xff] }
 0x1a1   : > { %6418 = vst [vmem:[#allocation39_spill] sm:$0xff] %v4393_v17  ;;  %v4472_v17 = vmul.f32 %v4273_v1, %v4302_v58  ;;  %v4494_v58 = vld [vmem:[%s5923_s4 + $0x218] sm:$0xff] }
 0x1a2   : > { %6419 = vst [vmem:[#allocation40_spill] sm:$0xff] %v4398_v49  ;;  %v4565_v49 = vmul.f32 %v4321_v50, %v4408_v27 }
 0x1a3   : > { %6420 = vst [vmem:[#allocation41_spill] sm:$0xff] %v4403_v19  ;;  %v4569_v19 = vmul.f32 %v4321_v50, %v4417_v12 }
 0x1a4   : > { %6421 = vst [vmem:[#allocation42_spill] sm:$0xff] %v4408_v27  ;;  %v4587_v27 = vld [vmem:[%s5923_s4 + $0x260] sm:$0xff] }
 0x1a5   : > { %6422 = vst [vmem:[#allocation43_spill] sm:$0xff] %v4417_v12  ;;  %v4592_v12 = vld [vmem:[%s5923_s4 + $0x268] sm:$0xff] }
 0x1a6   : > { %6423 = vst [vmem:[#allocation44_spill] sm:$0xff] %v4422_v28  ;;  %v4596_v28 = vmul.f32 %v4323_v31, %v4453_v0 }
 0x1a7   : > { %6424 = vst [vmem:[#allocation45_spill] sm:$0xff] %v4427_v36  ;;  %v4600_v36 = vmul.f32 %v4323_v31, %v4458_v42 }
 0x1a8   : > { %6425 = vst [vmem:[#allocation46_spill] sm:$0xff] %v4440_v25 }
 0x1a9   : > { %6426 = vst [vmem:[#allocation47_spill] sm:$0xff] %v4444_v34 }
 0x1aa   : > { %6427 = vst [vmem:[#allocation48_spill] sm:$0xff] %v4448_v38 }
 0x1ab   : > { %6428 = vst [vmem:[#allocation49_spill] sm:$0xff] %v4453_v0  ;;  %v4618_v0 = vld [vmem:[%s5923_s4 + $0x278] sm:$0xff] }
 0x1ac   : > { %6429 = vst [vmem:[#allocation50_spill] sm:$0xff] %v4458_v42  ;;  %v4623_v42 = vld [vmem:[%s5923_s4 + $0x280] sm:$0xff] }
 0x1ad   : > { %6430 = vst [vmem:[#allocation51_spill] sm:$0xff] %v4463_v48  ;;  %v4627_v48 = vmul.f32 %v4234_v54, %v4468_v2 }
 0x1ae   : > { %6431 = vst [vmem:[#allocation4_spill] sm:$0xff] %v4472_v17 }
 0x1af   : > { %6432 = vst [vmem:[#allocation5_spill] sm:$0xff] %v4476_v29 }
 0x1b0   : > { %6433 = vst [vmem:[#allocation6_spill] sm:$0xff] %v4480_v33 }
 0x1b1   : > { %6434 = vst [vmem:[#allocation10_spill] sm:$0xff] %v4484_v26  ;;  %v627_v26 = vrot.slane %v4275_v55, 6 }
 0x1b2   : > { %6435 = vst [vmem:[#allocation11_spill] sm:$0xff] %v4503_v53 }
 0x1b3   : > { %6436 = vst [vmem:[#allocation12_spill] sm:$0xff] %v4507_v60  ;;  %v4793_v60 = vld [vmem:[%s5923_s4 + $0x2f8] sm:$0xff] }
 0x1b4   : > { %6437 = vst [vmem:[#allocation13_spill] sm:$0xff] %v4511_v20  ;;  %v626_v20 = vrot.slane %v4275_v55, 5 }
 0x1b5   : > { %6438 = vst [vmem:[#allocation68_spill] sm:$0xff] %v4515_v56  ;;  %v625_v56 = vrot.slane %v4275_v55, 4 }
 0x1b6   : > { %6439 = vst [vmem:[#allocation28_spill] sm:$0xff] %v4534_v6  ;;  %v4776_v6 = vld [vmem:[%s5923_s4 + $0x2e8] sm:$0xff] }
 0x1b7   : > { %6440 = vst [vmem:[#allocation69_spill] sm:$0xff] %v4538_v35  ;;  %v856_v35 = vld [vmem:[%s5923_s4 + $0x2e0] sm:$0xff] }
 0x1b8   : > { %6441 = vst [vmem:[#allocation14_spill] sm:$0xff] %v4542_v18  ;;  %v623_v18 = vrot.slane %v4275_v55, 2  ;;  %v4819_v38 = vmul.f32 %v4323_v31, %v856_v35 }
 0x1b9   : > { %6442 = vst [vmem:[#allocation15_spill] sm:$0xff] %v4546_v7  ;;  %v4750_v7 = vld [vmem:[%s5923_s4 + $0x2d0] sm:$0xff] }
 0x1ba   : > { %6443 = vst [vmem:[#allocation29_spill] sm:$0xff] %v4565_v49  ;;  %v4706_v49 = vld [vmem:[%s5923_s4 + $0x2b8] sm:$0xff]  ;;  %v4810_v29 = vmul.f32 %v4321_v50, %v4750_v7  ;;  %v4829_v34 = vperm.slane %v623_v18, 0 }
 0x1bb   : > { %6444 = vst [vmem:[#allocation16_spill] sm:$0xff] %v4569_v19  ;;  %v4701_v19 = vmul.f32 %v4273_v1, %v4587_v27 }
 0x1bc   : > { %6445 = vst [vmem:[#allocation70_spill] sm:$0xff] %v4573_v10  ;;  %v4675_v10 = vld [vmem:[%s5923_s4 + $0x2a0] sm:$0xff] }
 0x1bd   : > { %6446 = vst [vmem:[#allocation71_spill] sm:$0xff] %v4577_v23  ;;  %v4670_v23 = vmul.f32 %v4271_v3, %v4551_v11 }
 0x1be   : > { %6447 = vst [vmem:[#allocation72_spill] sm:$0xff] %v4596_v28  ;;  %v4644_v28 = vld [vmem:[%s5923_s4 + $0x288] sm:$0xff] }
 0x1bf   : > { %6448 = vst [vmem:[#allocation30_spill] sm:$0xff] %v4600_v36  ;;  %v4639_v36 = vmul.f32 %v4254_v13, %v4499_v9 }
 0x1c0   : > { %6449 = vst [vmem:[#allocation17_spill] sm:$0xff] %v4604_v30  ;;  %v4635_v30 = vmul.f32 %v4234_v54, %v4494_v58 }
 0x1c1   : > { %6450 = vst [vmem:[#allocation52_spill] sm:$0xff] %v4608_v22  ;;  %v4631_v22 = vmul.f32 %v4234_v54, %v4489_v21  ;;  %v4658_v54 = vmul.f32 %v4254_v13, %v4520_v40 }
 0x1c2   : > { %6451 = vst [vmem:[#allocation7_spill] sm:$0xff] %v4627_v48  ;;  %v4649_v48 = vld [vmem:[%s5923_s4 + $0x290] sm:$0xff] }
 0x1c3   : > { %6452 = vst [vmem:[#allocation8_spill] sm:$0xff] %v4631_v22  ;;  %v4654_v22 = vld [vmem:[%s5923_s4 + $0x298] sm:$0xff] }
 0x1c4   : > { %6453 = vst [vmem:[#allocation31_spill] sm:$0xff] %v4635_v30  ;;  %v4666_v30 = vmul.f32 %v4254_v13, %v4530_v63 }
 0x1c5   : > { %6454 = vst [vmem:[#allocation32_spill] sm:$0xff] %v4639_v36  ;;  %v4662_v36 = vmul.f32 %v4254_v13, %v4525_v39  ;;  %v4689_v13 = vmul.f32 %v4271_v3, %v4556_v51 }
 0x1c6   : > { %6455 = vst [vmem:[#allocation9_spill] sm:$0xff] %v4658_v54  ;;  %v4680_v54 = vld [vmem:[%s5923_s4 + $0x2a8] sm:$0xff] }
 0x1c7   : > { %6456 = vst [vmem:[#allocation33_spill] sm:$0xff] %v4662_v36  ;;  %v4685_v36 = vld [vmem:[%s5923_s4 + $0x2b0] sm:$0xff] }
 0x1c8   : > { %6457 = vst [vmem:[#allocation34_spill] sm:$0xff] %v4666_v30  ;;  %v4697_v30 = vmul.f32 %v4271_v3, %v4582_v44 }
 0x1c9   : > { %6458 = vst [vmem:[#allocation35_spill] sm:$0xff] %v4670_v23  ;;  %v4693_v23 = vmul.f32 %v4271_v3, %v4561_v43  ;;  %v4718_v3 = vmul.f32 %v4273_v1, %v4618_v0 }
 0x1ca   : > { %6459 = vst [vmem:[#allocation73_spill] sm:$0xff] %v4689_v13  ;;  %v4710_v13 = vmul.f32 %v4273_v1, %v4592_v12 }
 0x1cb   : > { %6460 = vst [vmem:[#allocation74_spill] sm:$0xff] %v4693_v23  ;;  %v4714_v23 = vmul.f32 %v4273_v1, %v4613_v57  ;;  %v4739_v1 = vmul.f32 %v4297_v41, %v4654_v22 }
 0x1cc   : > { %6461 = vst [vmem:[#allocation18_spill] sm:$0xff] %v4697_v30  ;;  %v4727_v30 = vld [vmem:[%s5923_s4 + $0x2c0] sm:$0xff] }
 0x1cd   : > { %6462 = vst [vmem:[#allocation75_spill] sm:$0xff] %v4701_v19  ;;  %v4722_v19 = vmul.f32 %v4297_v41, %v4623_v42  ;;  %v4797_v53 = vmul.f32 %v4321_v50, %v4727_v30 }
 0x1ce   : > { %6463 = vst [vmem:[#allocation77_spill] sm:$0xff] %v4710_v13  ;;  %v4731_v13 = vmul.f32 %v4297_v41, %v4644_v28 }
 0x1cf   : > { %6464 = vst [vmem:[#allocation78_spill] sm:$0xff] %v4714_v23  ;;  %v4735_v23 = vmul.f32 %v4297_v41, %v4649_v48  ;;  %v4759_v41 = vmul.f32 %v4319_v4, %v4675_v10 }
 0x1d0   : > { %6465 = vst [vmem:[#allocation79_spill] sm:$0xff] %v4718_v3  ;;  %v622_v3 = vrot.slane %v4275_v55, 1 }
 0x1d1   : > { %6466 = vst [vmem:[#allocation80_spill] sm:$0xff] %v4722_v19  ;;  %v4745_v19 = vld [vmem:[%s5923_s4 + $0x2c8] sm:$0xff] }
 0x1d2   : > { %6467 = vst [vmem:[#allocation21_spill] sm:$0xff] %v4731_v13  ;;  %v4767_v13 = vmul.f32 %v4319_v4, %v4685_v36  ;;  %v4806_v33 = vmul.f32 %v4321_v50, %v4745_v19 }
 0x1d3   : > { %6468 = vst [vmem:[#allocation22_spill] sm:$0xff] %v4735_v23  ;;  %v4755_v23 = vld [vmem:[%s5923_s4 + $0x2d8] sm:$0xff] }
 0x1d4   : > { %6469 = vst [vmem:[#allocation23_spill] sm:$0xff] %v4739_v1  ;;  %v4763_v1 = vmul.f32 %v4319_v4, %v4680_v54  ;;  %v4814_v17 = vmul.f32 %v4321_v50, %v4755_v23 }
 0x1d5   : > { %6470 = vst [vmem:[#allocation81_spill] sm:$0xff] %v4759_v41  ;;  %v4781_v41 = vld [vmem:[%s5923_s4 + $0x2f0] sm:$0xff] }
 0x1d6   : > { %6471 = vst [vmem:[#allocation82_spill] sm:$0xff] %v4763_v1  ;;  %v4785_v1 = vmul.f32 %v4319_v4, %v4706_v49  ;;  %v628_v4 = vrot.slane %v4275_v55, 7 }
 0x1d7   : > { %6472 = vst [vmem:[#allocation83_spill] sm:$0xff] %v4767_v13  ;;  %v624_v13 = vrot.slane %v4275_v55, 3 }
 0x1d8   : > { %6473 = vst [vmem:[#allocation85_spill] sm:$0xff] %v4785_v1  ;;  %v4802_v1 = vperm.slane %v4275_v55, 0  ;;  %v4823_v55 = vmul.f32 %v4323_v31, %v4776_v6  ;;  %v4843_v25 = vperm.slane %v628_v4, 0 }
 0x1d9   : > { %6474 = vst [vmem:[#allocation86_spill] sm:$0xff] %v4797_v53  ;;  %v4816_v53 = vperm.slane %v622_v3, 0  ;;  %v4835_v50 = vperm.slane %v624_v13, 0  ;;  %v4837_v3 = vperm.slane %v625_v56, 0 }
 0x1da   : > { %6475 = vst [vmem:[#allocation87_spill] sm:$0xff] %v4806_v33  ;;  %v4827_v33 = vmul.f32 %v4323_v31, %v4781_v41  ;;  %v1213_v18 = vmul.f32 %v4802_v1, %v4468_v2  ;;  %v1215_v13 = vmul.f32 %v4802_v1, %v4494_v58  ;;  %v1220_v2 = vmul.f32 %v4829_v34, %v4551_v11 }
 0x1db   : > { %6476 = vst [vmem:[#allocation88_spill] sm:$0xff] %v4810_v29  ;;  %v4833_v29 = vmul.f32 %v4323_v31, %v4793_v60  ;;  %v1214_v31 = vmul.f32 %v4802_v1, %v4489_v21  ;;  %v1216_v56 = vmul.f32 %v4816_v53, %v4499_v9  ;;  %v1221_v21 = vmul.f32 %v4829_v34, %v4556_v51 }
 0x1dc   : > { %6477 = vst [vmem:[#allocation89_spill] sm:$0xff] %v4814_v17  ;;  %v4839_v17 = vperm.slane %v626_v20, 0  ;;  %v1217_v20 = vmul.f32 %v4816_v53, %v4520_v40  ;;  %v1222_v58 = vmul.f32 %v4829_v34, %v4561_v43  ;;  %v1223_v9 = vmul.f32 %v4829_v34, %v4582_v44 }
 0x1dd   : > { %6478 = vst [vmem:[#allocation90_spill] sm:$0xff] %v4819_v38  ;;  %v4841_v38 = vperm.slane %v627_v26, 0  ;;  %v1218_v26 = vmul.f32 %v4816_v53, %v4525_v39  ;;  %v1224_v40 = vmul.f32 %v4835_v50, %v4587_v27  ;;  %v1225_v39 = vmul.f32 %v4835_v50, %v4592_v12 }
 0x1de   : > { %6479 = vst [vmem:[#allocation91_spill] sm:$0xff] %v4823_v55  ;;  %v1212_v55 = vmul.f32 %v4802_v1, %v4432_v37  ;;  %v1219_v37 = vmul.f32 %v4816_v53, %v4530_v63  ;;  %v1226_v63 = vmul.f32 %v4835_v50, %v4613_v57  ;;  %v1227_v11 = vmul.f32 %v4835_v50, %v4618_v0 }
 0x1df   : > { %v1228_v51 = vmul.f32 %v4837_v3, %v4623_v42  ;;  %v4881_v43 = vmul.f32 %v4837_v3, %v4644_v28  ;;  %v4885_v44 = vmul.f32 %v4837_v3, %v4649_v48  ;;  %v4889_v27 = vmul.f32 %v4837_v3, %v4654_v22 }
 0x1e0   : > { %v4893_v57 = vmul.f32 %v4839_v17, %v4675_v10  ;;  %v1340_v12 = vsub.f32 %v4327_v46, %v1212_v55  ;;  %v4898_v0 = vmul.f32 %v4839_v17, %v4680_v54  ;;  %v1341_v28 = vsub.f32 %v4346_v5, %v1213_v18  ;;  %v6480_v55 = vld [vmem:[#allocation46_spill] sm:$0xff] }
 0x1e1   : > { %v1342_v42 = vsub.f32 %v4350_v59, %v1214_v31  ;;  %v1343_v48 = vsub.f32 %v4354_v14, %v1215_v13  ;;  %v4905_v22 = vmul.f32 %v4839_v17, %v4685_v36  ;;  %v4909_v10 = vmul.f32 %v4839_v17, %v4706_v49  ;;  %v6481_v31 = vld [vmem:[#allocation47_spill] sm:$0xff] }
 0x1e2   : > { %v4913_v46 = vmul.f32 %v4841_v38, %v4727_v30  ;;  %v1344_v54 = vsub.f32 %v4358_v15, %v1216_v56  ;;  %v4918_v5 = vmul.f32 %v4841_v38, %v4745_v19  ;;  %v1345_v59 = vsub.f32 %v4379_v52, %v1217_v20 }
 0x1e3   : > { %v1346_v14 = vsub.f32 %v4383_v32, %v1218_v26  ;;  %v1347_v36 = vsub.f32 %v4387_v24, %v1219_v37  ;;  %v4925_v49 = vmul.f32 %v4841_v38, %v4750_v7  ;;  %v4929_v30 = vmul.f32 %v4841_v38, %v4755_v23 }
 0x1e4   : > { %v4932_v15 = vmul.f32 %v4843_v25, %v856_v35  ;;  %v1419_v19 = vadd.f32 %v4174_v16, %v1340_v12  ;;  %v4937_v52 = vmul.f32 %v4843_v25, %v4776_v6  ;;  %v1450_v32 = vadd.f32 %v4176_v8, %v1341_v28  ;;  %v6485_v12 = vld [vmem:[#allocation6_spill] sm:$0xff] }
 0x1e5   : > { %v1481_v24 = vadd.f32 %v4178_v47, %v1342_v42  ;;  %v1512_v7 = vadd.f32 %v4186_v61, %v1343_v48  ;;  %v1348_v4 = vsub.f32 %v4412_v45, %v1220_v2  ;;  %v1349_v23 = vsub.f32 %v4436_v62, %v1221_v21  ;;  %v6482_v47 = vld [vmem:[#allocation48_spill] sm:$0xff]  ;;  %v6486_v42 = vld [vmem:[#allocation10_spill] sm:$0xff] }
 0x1e6   : > { %v1350_v18 = vsub.f32 %v6480_v55, %v1222_v58  ;;  %v1420_v35 = vadd.f32 %v1419_v19, %v1344_v54  ;;  %v1351_v13 = vsub.f32 %v6481_v31, %v1223_v9  ;;  %v1451_v16 = vadd.f32 %v1450_v32, %v1345_v59  ;;  %v6483_v62 = vld [vmem:[#allocation4_spill] sm:$0xff]  ;;  %v6484_v58 = vld [vmem:[#allocation5_spill] sm:$0xff]  ;;  %v6487_v54 = vld [vmem:[#allocation11_spill] sm:$0xff] }
 0x1e7   : > { %v1482_v56 = vadd.f32 %v1481_v24, %v1346_v14  ;;  %v1513_v20 = vadd.f32 %v1512_v7, %v1347_v36  ;;  %v4948_v6 = vmul.f32 %v4843_v25, %v4781_v41  ;;  %v4952_v8 = vmul.f32 %v4843_v25, %v4793_v60  ;;  %v6488_v60 = vld [vmem:[#allocation12_spill] sm:$0xff] }
 0x1e8   : > { %v1352_v61 = vsub.f32 %v6482_v47, %v1224_v40  ;;  %v1421_v45 = vadd.f32 %v1420_v35, %v1348_v4  ;;  %v1353_v26 = vsub.f32 %v6483_v62, %v1225_v39  ;;  %v1452_v37 = vadd.f32 %v1451_v16, %v1349_v23  ;;  %v6489_v40 = vld [vmem:[#allocation13_spill] sm:$0xff]  ;;  %v6490_v19 = vld [vmem:[#allocation68_spill] sm:$0xff]  ;;  %v6498_v16 = vld [vmem:[#allocation71_spill] sm:$0xff] }
 0x1e9   : > { %v1483_v2 = vadd.f32 %v1482_v56, %v1350_v18  ;;  %v1514_v21 = vadd.f32 %v1513_v20, %v1351_v13  ;;  %v1354_v9 = vsub.f32 %v6484_v58, %v1226_v63  ;;  %v1355_v28 = vsub.f32 %v6485_v12, %v1227_v11  ;;  %v6491_v63 = vld [vmem:[#allocation28_spill] sm:$0xff] }
 0x1ea   : > { %v1356_v48 = vsub.f32 %v6486_v42, %v1228_v51  ;;  %v1422_v41 = vadd.f32 %v1421_v45, %v1352_v61  ;;  %v1357_v59 = vsub.f32 %v6487_v54, %v4881_v43  ;;  %v1358_v14 = vsub.f32 %v6488_v60, %v4885_v44  ;;  %v6492_v51 = vld [vmem:[#allocation69_spill] sm:$0xff]  ;;  %v6493_v43 = vld [vmem:[#allocation14_spill] sm:$0xff]  ;;  %v6494_v44 = vld [vmem:[#allocation15_spill] sm:$0xff] }
 0x1eb   : > { %v1359_v36 = vsub.f32 %v6489_v40, %v4889_v27  ;;  %v1453_v39 = vadd.f32 %v1452_v37, %v1353_v26  ;;  %v1360_v32 = vsub.f32 %v6490_v19, %v4893_v57  ;;  %v1361_v24 = vsub.f32 %v6491_v63, %v4898_v0  ;;  %v6495_v27 = vld [vmem:[#allocation29_spill] sm:$0xff]  ;;  %v6496_v57 = vld [vmem:[#allocation16_spill] sm:$0xff]  ;;  %v6497_v0 = vld [vmem:[#allocation70_spill] sm:$0xff] }
 0x1ec   : > { %v1484_v11 = vadd.f32 %v1483_v2, %v1354_v9  ;;  %v1515_v7 = vadd.f32 %v1514_v21, %v1355_v28  ;;  %v1362_v4 = vsub.f32 %v6492_v51, %v4905_v22  ;;  %v1363_v23 = vsub.f32 %v6493_v43, %v4909_v10  ;;  %v6499_v22 = vld [vmem:[#allocation72_spill] sm:$0xff]  ;;  %v6500_v10 = vld [vmem:[#allocation30_spill] sm:$0xff]  ;;  %v6503_v37 = vld [vmem:[#allocation19_spill] sm:$0xff] }
 0x1ed   : > { %v1364_v55 = vsub.f32 %v6494_v44, %v4913_v46  ;;  %v1423_v18 = vadd.f32 %v1422_v41, %v1356_v48  ;;  %v1365_v35 = vsub.f32 %v6495_v27, %v4918_v5  ;;  %v1366_v31 = vsub.f32 %v6496_v57, %v4925_v49  ;;  %v6501_v46 = vld [vmem:[#allocation17_spill] sm:$0xff]  ;;  %v6502_v26 = vld [vmem:[#allocation84_spill] sm:$0xff]  ;;  %v6508_v28 = vld [vmem:[#allocation59_spill] sm:$0xff] }
 0x1ee   : > { %v1367_v13 = vsub.f32 %v6497_v0, %v4929_v30  ;;  %v1368_v56 = vsub.f32 %v6498_v16, %v4932_v15  ;;  %v1369_v20 = vsub.f32 %v6499_v22, %v4937_v52  ;;  %v1370_v47 = vsub.f32 %v6500_v10, %v4948_v6  ;;  %v6504_v15 = vld [vmem:[#allocation20_spill] sm:$0xff]  ;;  %v6506_v6 = vld [vmem:[#allocation57_spill] sm:$0xff]  ;;  %v6515_v51 = vld [vmem:[#allocation55_spill] sm:$0xff] }
 0x1ef   : > { %v1371_v61 = vsub.f32 %v6501_v46, %v4952_v8  ;;  %v1454_v45 = vadd.f32 %v1453_v39, %v1357_v59  ;;  %v1485_v5 = vadd.f32 %v1484_v11, %v1358_v14  ;;  %v1516_v62 = vadd.f32 %v1515_v7, %v1359_v36  ;;  %v6505_v52 = vld [vmem:[#allocation24_spill] sm:$0xff]  ;;  %v6507_v8 = vld [vmem:[#allocation58_spill] sm:$0xff]  ;;  %v6510_v54 = vld [vmem:[#allocation25_spill] sm:$0xff] }
 0x1f0   : > { %v1724_v49 = vmul.f32 %v4802_v1, %v6502_v26  ;;  %v1725_v30 = vmul.f32 %v4802_v1, %v6503_v37  ;;  %v1424_v2 = vadd.f32 %v1423_v18, %v1360_v32  ;;  %v1726_v21 = vmul.f32 %v4802_v1, %v6504_v15  ;;  %v6509_v48 = vld [vmem:[#allocation60_spill] sm:$0xff]  ;;  %v6511_v14 = vld [vmem:[#allocation26_spill] sm:$0xff]  ;;  %v6513_v39 = vld [vmem:[#allocation53_spill] sm:$0xff] }
 0x1f1   : > { %v1727_v58 = vmul.f32 %v4802_v1, %v6505_v52  ;;  %v1728_v9 = vmul.f32 %v4816_v53, %v6506_v6  ;;  %v1729_v12 = vmul.f32 %v4816_v53, %v6507_v8  ;;  %v1730_v42 = vmul.f32 %v4816_v53, %v6508_v28  ;;  %v6512_v1 = vld [vmem:[#allocation27_spill] sm:$0xff]  ;;  %v6514_v11 = vld [vmem:[#allocation54_spill] sm:$0xff]  ;;  %v6516_v44 = vld [vmem:[#allocation56_spill] sm:$0xff] }
 0x1f2   : > { %v1731_v41 = vmul.f32 %v4816_v53, %v6509_v48  ;;  %v1732_v59 = vmul.f32 %v4829_v34, %v6510_v54  ;;  %v1455_v60 = vadd.f32 %v1454_v45, %v1361_v24  ;;  %v1733_v40 = vmul.f32 %v4829_v34, %v6511_v14  ;;  %v6517_v18 = vld [vmem:[#allocation61_spill] sm:$0xff]  ;;  %v6518_v57 = vld [vmem:[#allocation62_spill] sm:$0xff]  ;;  %v6519_v16 = vld [vmem:[#allocation63_spill] sm:$0xff] }
 0x1f3   : > { %v1734_v36 = vmul.f32 %v4829_v34, %v6512_v1  ;;  %v1735_v19 = vmul.f32 %v4829_v34, %v6513_v39  ;;  %v1486_v32 = vadd.f32 %v1485_v5, %v1362_v4  ;;  %v1517_v63 = vadd.f32 %v1516_v62, %v1363_v23  ;;  %v6520_v4 = vld [vmem:[#allocation64_spill] sm:$0xff]  ;;  %v6521_v22 = vld [vmem:[#allocation65_spill] sm:$0xff]  ;;  %v6522_v46 = vld [vmem:[#allocation67_spill] sm:$0xff] }
 0x1f4   : > { %v1736_v7 = vmul.f32 %v4835_v50, %v6514_v11  ;;  %v1737_v53 = vmul.f32 %v4835_v50, %v6515_v51  ;;  %v1425_v43 = vadd.f32 %v1424_v2, %v1364_v55  ;;  %v1738_v24 = vmul.f32 %v4835_v50, %v6516_v44  ;;  %v6523_v5 = vld [vmem:[#allocation36_spill] sm:$0xff]  ;;  %v6526_v6 = vld [vmem:[#allocation41_spill] sm:$0xff]  ;;  %v6528_v54 = vld [vmem:[#allocation7_spill] sm:$0xff] }
 0x1f5   : > { %v1739_v27 = vmul.f32 %v4835_v50, %v6517_v18  ;;  %v1740_v0 = vmul.f32 %v4837_v3, %v6518_v57  ;;  %v1741_v34 = vmul.f32 %v4837_v3, %v6519_v16  ;;  %v1742_v23 = vmul.f32 %v4837_v3, %v6520_v4  ;;  %v6524_v50 = vld [vmem:[#allocation76_spill] sm:$0xff]  ;;  %v6530_v1 = vld [vmem:[#allocation31_spill] sm:$0xff]  ;;  %v6531_v11 = vld [vmem:[#allocation42_spill] sm:$0xff] }
 0x1f6   : > { %v1743_v10 = vmul.f32 %v4837_v3, %v6521_v22  ;;  %v1744_v55 = vmul.f32 %v4839_v17, %v6522_v46  ;;  %v1456_v45 = vadd.f32 %v1455_v60, %v1365_v35  ;;  %v1745_v62 = vmul.f32 %v4839_v17, %v6523_v5  ;;  %v6525_v37 = vld [vmem:[#allocation40_spill] sm:$0xff]  ;;  %v6532_v44 = vld [vmem:[#allocation43_spill] sm:$0xff]  ;;  %v6538_v4 = vld [vmem:[#allocation45_spill] sm:$0xff] }
 0x1f7   : > { %v1746_v26 = vmul.f32 %v4839_v17, %v6524_v50  ;;  %v1747_v2 = vmul.f32 %v4839_v17, %v6525_v37  ;;  %v1487_v15 = vadd.f32 %v1486_v32, %v1366_v31  ;;  %v1518_v52 = vadd.f32 %v1517_v63, %v1367_v13  ;;  %v6527_v28 = vld [vmem:[#allocation52_spill] sm:$0xff]  ;;  %v6539_v46 = vld [vmem:[#allocation66_spill] sm:$0xff] }
 0x1f8   : > { %v1748_v8 = vmul.f32 %v4841_v38, %v6526_v6  ;;  %v1852_v3 = vadd.f32 %v1724_v49, %v6527_v28  ;;  %v5040_v48 = vadd.f32 %v1425_v43, %v1368_v56  ;;  %v1853_v35 = vadd.f32 %v1725_v30, %v6528_v54  ;;  %v6529_v60 = vld [vmem:[#allocation8_spill] sm:$0xff]  ;;  %v6535_v56 = vld [vmem:[#allocation9_spill] sm:$0xff]  ;;  %v6547_v54 = vld [vmem:[#allocation75_spill] sm:$0xff] }
 0x1f9   : > { %v1854_v14 = vadd.f32 %v1726_v21, %v6529_v60  ;;  %v1855_v39 = vadd.f32 %v1727_v58, %v6530_v1  ;;  %v1749_v51 = vmul.f32 %v4841_v38, %v6531_v11  ;;  %v1750_v17 = vmul.f32 %v4841_v38, %v6532_v44  ;;  %v6533_v31 = vld [vmem:[#allocation44_spill] sm:$0xff]  ;;  %v6536_v30 = vld [vmem:[#allocation33_spill] sm:$0xff]  ;;  %v6537_v21 = vld [vmem:[#allocation34_spill] sm:$0xff] }
 0x1fa   : > { %v1751_v13 = vmul.f32 %v4841_v38, %v6533_v31  ;;  %v6534_v32 = vld [vmem:[#allocation32_spill] sm:$0xff]  ;;  %v5052_v49 = vadd.f32 %v1456_v45, %v1369_v20  ;;  %v1857_v43 = vadd.f32 %v1729_v12, %v6535_v56  ;;  %v1858_v18 = vadd.f32 %v1730_v42, %v6536_v30  ;;  %v6540_v38 = vld [vmem:[#allocation35_spill] sm:$0xff]  ;;  %v6542_v45 = vld [vmem:[#allocation38_spill] sm:$0xff]  ;;  %v448_v30 = vpop.f32.mrf.mxu1 }
 0x1fb   : > { %v1856_v63 = vadd.f32 %v1728_v9, %v6534_v32  ;;  %v1859_v57 = vadd.f32 %v1731_v41, %v6537_v21  ;;  %v5057_v58 = vadd.f32 %v1487_v15, %v1370_v47  ;;  %v5059_v16 = vadd.f32 %v1518_v52, %v1371_v61  ;;  %v6541_v9 = vld [vmem:[#allocation37_spill] sm:$0xff]  ;;  %v6543_v12 = vld [vmem:[#allocation39_spill] sm:$0xff]  ;;  %v6545_v41 = vld [vmem:[#allocation74_spill] sm:$0xff] }
 0x1fc   : > { %v1752_v22 = vmul.f32 %v4843_v25, %v6538_v4  ;;  %v1931_v5 = vadd.f32 %v6539_v46, %v1852_v3  ;;  %v1860_v50 = vadd.f32 %v1732_v59, %v6540_v38  ;;  %v1962_v20 = vadd.f32 %v6541_v9, %v1853_v35  ;;  %v6544_v42 = vld [vmem:[#allocation73_spill] sm:$0xff]  ;;  %v6546_v15 = vld [vmem:[#allocation18_spill] sm:$0xff]  ;;  %v6550_v32 = vld [vmem:[#allocation79_spill] sm:$0xff] }
 0x1fd   : > { %v1993_v37 = vadd.f32 %v6542_v45, %v1854_v14  ;;  %v2024_v6 = vadd.f32 %v6543_v12, %v1855_v39  ;;  %v1861_v28 = vadd.f32 %v1733_v40, %v6544_v42  ;;  %v1862_v47 = vadd.f32 %v1734_v36, %v6545_v41  ;;  %v6548_v44 = vld [vmem:[#allocation77_spill] sm:$0xff]  ;;  %v6549_v31 = vld [vmem:[#allocation78_spill] sm:$0xff]  ;;  %v419_v39 = vpop.f32.mrf.mxu0  ;;  %v6551_v40 = vld [vmem:[#allocation80_spill] sm:$0xff] }
 0x1fe   : > { %v1863_v61 = vadd.f32 %v1735_v19, %v6546_v15  ;;  %v1932_v52 = vadd.f32 %v1931_v5, %v1856_v63  ;;  %v1864_v60 = vadd.f32 %v1736_v7, %v6547_v54  ;;  %v1963_v1 = vadd.f32 %v1962_v20, %v1857_v43  ;;  %v6552_v63 = vld [vmem:[#allocation21_spill] sm:$0xff]  ;;  %v6553_v7 = vld [vmem:[#allocation22_spill] sm:$0xff]  ;;  %v6557_v45 = vld [vmem:[#allocation51_spill] sm:$0xff] }
 0x1ff   : > { %v1994_v11 = vadd.f32 %v1993_v37, %v1858_v18  ;;  %v2025_v3 = vadd.f32 %v2024_v6, %v1859_v57  ;;  %v1865_v59 = vadd.f32 %v1737_v53, %v6548_v44  ;;  %v1866_v35 = vadd.f32 %v1738_v24, %v6549_v31  ;;  %v6554_v18 = vld [vmem:[#allocation23_spill] sm:$0xff]  ;;  %v6556_v20 = vld [vmem:[#allocation50_spill] sm:$0xff] }
 0x200   : > { %v1867_v14 = vadd.f32 %v1739_v27, %v6550_v32  ;;  %v1933_v56 = vadd.f32 %v1932_v52, %v1860_v50  ;;  %v1868_v21 = vadd.f32 %v1740_v0, %v6551_v40  ;;  %v1964_v36 = vadd.f32 %v1963_v1, %v1861_v28  ;;  %v6555_v27 = vld [vmem:[#allocation49_spill] sm:$0xff]  ;;  %v6559_v28 = vld [vmem:[#allocation82_spill] sm:$0xff]  ;;  %v6563_v1 = vld [vmem:[#allocation87_spill] sm:$0xff] }
 0x201   : > { %v1995_v4 = vadd.f32 %v1994_v11, %v1862_v47  ;;  %v2026_v19 = vadd.f32 %v2025_v3, %v1863_v61  ;;  %v1869_v46 = vadd.f32 %v1741_v34, %v6552_v63  ;;  %v1870_v43 = vadd.f32 %v1742_v23, %v6553_v7  ;;  %v6558_v34 = vld [vmem:[#allocation81_spill] sm:$0xff]  ;;  %v6560_v47 = vld [vmem:[#allocation83_spill] sm:$0xff]  ;;  %v6562_v54 = vld [vmem:[#allocation86_spill] sm:$0xff] }
 0x202   : > { %v1871_v57 = vadd.f32 %v1743_v10, %v6554_v18  ;;  %v1934_v5 = vadd.f32 %v1933_v56, %v1864_v60  ;;  %v1965_v53 = vadd.f32 %v1964_v36, %v1865_v59  ;;  %v449_v9 = vadd.f32 %v448_v30, %v419_v39  ;;  %v6561_v61 = vld [vmem:[#allocation85_spill] sm:$0xff]  ;;  %v6564_v3 = vld [vmem:[#allocation88_spill] sm:$0xff]  ;;  %v5117_v7 = vld [vmem:[%s5922_s3 + $0x318] sm:$0xff] }
 0x203   : > { %v1996_v38 = vadd.f32 %v1995_v4, %v1866_v35  ;;  %v2027_v24 = vadd.f32 %v2026_v19, %v1867_v14  ;;  %v1753_v50 = vmul.f32 %v4843_v25, %v6555_v27  ;;  %v1754_v0 = vmul.f32 %v4843_v25, %v6556_v20  ;;  %v6565_v59 = vld [vmem:[#allocation89_spill] sm:$0xff]  ;;  %v6566_v35 = vld [vmem:[#allocation90_spill] sm:$0xff]  ;;  %v6570_v4 = vld [vmem:[#allocation91_spill] sm:$0xff]  ;;  %6571 = vst [vmem:[#allocation4_spill] sm:$0xff] %v5117_v7 }
 0x204   : > { %v1755_v37 = vmul.f32 %v4843_v25, %v6557_v45  ;;  %v1935_v12 = vadd.f32 %v1934_v5, %v1868_v21  ;;  %v1872_v6 = vadd.f32 %v1744_v55, %v6558_v34  ;;  %v1966_v23 = vadd.f32 %v1965_v53, %v1869_v46  ;;  %v5107_v21 = vld [vmem:[%s5922_s3 + $0x310] sm:$0xff]  ;;  %v5127_v18 = vld [vmem:[%s5922_s3 + $0x328] sm:$0xff]  ;;  %v5139_v5 = vld [vmem:[%s5922_s3 + $0x338] sm:$0xff] }
 0x205   : > { %v1997_v42 = vadd.f32 %v1996_v38, %v1870_v43  ;;  %v2028_v10 = vadd.f32 %v2027_v24, %v1871_v57  ;;  %v1873_v41 = vadd.f32 %v1745_v62, %v6559_v28  ;;  %v1874_v15 = vadd.f32 %v1746_v26, %v6560_v47  ;;  %6569 = vst [vmem:[#allocation48_spill] sm:$0xff] %v5107_v21  ;;  %v5122_v43 = vld [vmem:[%s5922_s3 + $0x320] sm:$0xff]  ;;  %v5160_v45 = vld [vmem:[%s5922_s3 + $0x350] sm:$0xff] }
 0x206   : > { %v1875_v52 = vadd.f32 %v1747_v2, %v6561_v61  ;;  %v1876_v60 = vadd.f32 %v1748_v8, %v6562_v54  ;;  %v1877_v11 = vadd.f32 %v1749_v51, %v6563_v1  ;;  %v1878_v44 = vadd.f32 %v1750_v17, %v6564_v3  ;;  %v5097_v2 = vld [vmem:[%s5922_s3 + $0x300] sm:$0xff]  ;;  %v521_v8 = vpop.f32.mrf.mxu2  ;;  %v550_v51 = vpop.f32.mrf.mxu3  ;;  %6572 = vst [vmem:[#allocation5_spill] sm:$0xff] %v5122_v43  ;;  %v5207_v61 = vld [vmem:[%s5922_s3 + $0x388] sm:$0xff]  ;;  %v5217_v54 = vld [vmem:[%s5922_s3 + $0x398] sm:$0xff] }
 0x207   : > { %v1879_v25 = vadd.f32 %v1751_v13, %v6565_v59  ;;  %v593_v31 = vrot.slane %v449_v9, 1  ;;  %v1880_v55 = vadd.f32 %v1752_v22, %v6566_v35  ;;  %v1936_v32 = vadd.f32 %v1935_v12, %v1872_v6  ;;  %6567 = vst [vmem:[#allocation46_spill] sm:$0xff] %v5097_v2  ;;  %v5102_v22 = vld [vmem:[%s5922_s3 + $0x308] sm:$0xff]  ;;  %v5144_v53 = vld [vmem:[%s5922_s3 + $0x340] sm:$0xff] }
 0x208   : > { %v594_v14 = vrot.slane %v449_v9, 2  ;;  %v595_v56 = vrot.slane %v449_v9, 3  ;;  %v1967_v39 = vadd.f32 %v1966_v23, %v1873_v41  ;;  %v1998_v62 = vadd.f32 %v1997_v42, %v1874_v15  ;;  %6568 = vst [vmem:[#allocation47_spill] sm:$0xff] %v5102_v22  ;;  %v5170_v12 = vld [vmem:[%s5922_s3 + $0x360] sm:$0xff]  ;;  %v5177_v6 = vld [vmem:[%s5922_s3 + $0x368] sm:$0xff]  ;;  %v5182_v23 = vld [vmem:[%s5922_s3 + $0x370] sm:$0xff] }
 0x209   : > { %v2029_v30 = vadd.f32 %v2028_v10, %v1875_v52  ;;  %v596_v26 = vrot.slane %v449_v9, 4  ;;  %v597_v17 = vrot.slane %v449_v9, 5  ;;  %v598_v40 = vrot.slane %v449_v9, 6  ;;  %6573 = vst [vmem:[#allocation6_spill] sm:$0xff] %v5127_v18  ;;  %v5187_v42 = vld [vmem:[%s5922_s3 + $0x378] sm:$0xff]  ;;  %v5192_v10 = vld [vmem:[%s5922_s3 + $0x380] sm:$0xff] }
 0x20a   : > { %v599_v13 = vrot.slane %v449_v9, 7  ;;  %v5109_v36 = vperm.slane %v449_v9, 0  ;;  %v1881_v19 = vadd.f32 %v1753_v50, %v6570_v4  ;;  %v1882_v63 = vadd.f32 %v1754_v0, %v4827_v33  ;;  %6575 = vst [vmem:[#allocation11_spill] sm:$0xff] %v5139_v5  ;;  %v5155_v0 = vld [vmem:[%s5922_s3 + $0x348] sm:$0xff]  ;;  %v5212_v52 = vld [vmem:[%s5922_s3 + $0x390] sm:$0xff]  ;;  %v5240_v59 = vld [vmem:[%s5922_s3 + $0x3a0] sm:$0xff] }
 0x20b   : > { %v1883_v46 = vadd.f32 %v1755_v37, %v4833_v29  ;;  %v5129_v57 = vperm.slane %v593_v31, 0  ;;  %v1937_v33 = vadd.f32 %v1936_v32, %v1876_v60  ;;  %v5134_v29 = vld [vmem:[%s5922_s3 + $0x330] sm:$0xff]  ;;  %6576 = vst [vmem:[#allocation12_spill] sm:$0xff] %v5144_v53  ;;  %v5146_v38 = vperm.slane %v594_v14, 0  ;;  %v5165_v37 = vld [vmem:[%s5922_s3 + $0x358] sm:$0xff] }
 0x20c   : > { %6574 = vst [vmem:[#allocation10_spill] sm:$0xff] %v5134_v29  ;;  %v5148_v24 = vperm.slane %v595_v56, 0  ;;  %v5150_v9 = vadd.f32 %v550_v51, %v521_v8  ;;  %v1968_v27 = vadd.f32 %v1967_v39, %v1877_v11  ;;  %v1999_v50 = vadd.f32 %v1998_v62, %v1878_v44  ;;  %v5250_v31 = vld [vmem:[%s5922_s3 + $0x3b0] sm:$0xff]  ;;  %v5273_v62 = vld [vmem:[%s5922_s3 + $0x3b8] sm:$0xff] }
 0x20d   : > { %v2030_v20 = vadd.f32 %v2029_v30, %v1879_v25  ;;  %6577 = vst [vmem:[#allocation13_spill] sm:$0xff] %v5155_v0  ;;  %v5172_v34 = vperm.slane %v596_v26, 0  ;;  %v5194_v28 = vperm.slane %v597_v17, 0  ;;  %v5196_v41 = vperm.slane %v598_v40, 0  ;;  %v5245_v25 = vld [vmem:[%s5922_s3 + $0x3a8] sm:$0xff]  ;;  %v5278_v30 = vld [vmem:[%s5922_s3 + $0x3c0] sm:$0xff] }
 0x20e   : > { %6578 = vst [vmem:[#allocation68_spill] sm:$0xff] %v5160_v45  ;;  %v5198_v47 = vperm.slane %v599_v13, 0  ;;  %v5202_v15 = vmul.f32 %v5109_v36, %v5097_v2  ;;  %v5221_v60 = vmul.f32 %v5109_v36, %v5102_v22  ;;  %v5225_v1 = vmul.f32 %v5109_v36, %v5107_v21  ;;  %v5283_v26 = vld [vmem:[%s5922_s3 + $0x3c8] sm:$0xff]  ;;  %v5292_v51 = vld [vmem:[%s5922_s3 + $0x3d0] sm:$0xff]  ;;  %v5297_v17 = vld [vmem:[%s5922_s3 + $0x3d8] sm:$0xff] }
 0x20f   : > { %6579 = vst [vmem:[#allocation28_spill] sm:$0xff] %v5165_v37  ;;  %v5229_v11 = vmul.f32 %v5109_v36, %v5117_v7  ;;  %v5233_v3 = vmul.f32 %v5129_v57, %v5122_v43  ;;  %v5235_v44 = vadd.f32 %v1937_v33, %v1880_v55  ;;  %v5254_v35 = vmul.f32 %v5129_v57, %v5127_v18  ;;  %v5302_v40 = vld [vmem:[%s5922_s3 + $0x3e0] sm:$0xff]  ;;  %v5328_v33 = vld [vmem:[%s5922_s3 + $0x3e8] sm:$0xff]  ;;  %v5457_v7 = vld [vmem:[%s5923_s4 + $0x358] sm:$0xff] }
 0x210   : > { %6580 = vst [vmem:[#allocation69_spill] sm:$0xff] %v5170_v12  ;;  %v5258_v55 = vmul.f32 %v5129_v57, %v5134_v29  ;;  %v5262_v32 = vmul.f32 %v5129_v57, %v5139_v5  ;;  %v5264_v14 = vadd.f32 %v1968_v27, %v1881_v19  ;;  %v5266_v56 = vadd.f32 %v1999_v50, %v1882_v63  ;;  %v5307_v13 = vld [vmem:[%s5923_s4 + $0x300] sm:$0xff]  ;;  %v5333_v27 = vld [vmem:[%s5922_s3 + $0x3f0] sm:$0xff]  ;;  %v5338_v50 = vld [vmem:[%s5922_s3 + $0x3f8] sm:$0xff] }
 0x211   : > { %6581 = vst [vmem:[#allocation14_spill] sm:$0xff] %v5177_v6  ;;  %v5268_v39 = vadd.f32 %v2030_v20, %v1883_v46  ;;  %v5287_v8 = vmul.f32 %v5146_v38, %v5144_v53  ;;  %v5311_v4 = vmul.f32 %v5146_v38, %v5155_v0  ;;  %v5315_v19 = vmul.f32 %v5146_v38, %v5160_v45  ;;  %v5343_v20 = vld [vmem:[%s5923_s4 + $0x308] sm:$0xff]  ;;  %v5426_v29 = vld [vmem:[%s5923_s4 + $0x340] sm:$0xff]  ;;  %v5488_v2 = vld [vmem:[%s5923_s4 + $0x370] sm:$0xff] }
 0x212   : > { %6582 = vst [vmem:[#allocation15_spill] sm:$0xff] %v5182_v23  ;;  %v5319_v63 = vmul.f32 %v5146_v38, %v5165_v37  ;;  %v5323_v46 = vmul.f32 %v5148_v24, %v5170_v12  ;;  %v5364_v12 = vld [vmem:[%s5923_s4 + $0x310] sm:$0xff]  ;;  %v5386_v37 = vmul.f32 %v5172_v34, %v5217_v54  ;;  %v5390_v45 = vmul.f32 %v5194_v28, %v5240_v59  ;;  %v5395_v0 = vld [vmem:[%s5923_s4 + $0x328] sm:$0xff] }
 0x213   : > { %6583 = vst [vmem:[#allocation29_spill] sm:$0xff] %v5187_v42  ;;  %v5417_v53 = vmul.f32 %v5194_v28, %v5273_v62  ;;  %v5421_v5 = vmul.f32 %v5196_v41, %v5278_v30  ;;  %v5448_v18 = vmul.f32 %v5196_v41, %v5297_v17  ;;  %v5452_v43 = vmul.f32 %v5198_v47, %v5302_v40 }
 0x214   : > { %6584 = vst [vmem:[#allocation16_spill] sm:$0xff] %v5192_v10  ;;  %v5479_v21 = vmul.f32 %v5198_v47, %v5338_v50  ;;  %v5483_v22 = vmul.f32 %v5109_v36, %v5307_v13 }
 0x215   : > { %6585 = vst [vmem:[#allocation70_spill] sm:$0xff] %v5207_v61 }
 0x216   : > { %6586 = vst [vmem:[#allocation71_spill] sm:$0xff] %v5212_v52 }
 0x217   : > { %6587 = vst [vmem:[#allocation72_spill] sm:$0xff] %v5217_v54  ;;  %v5409_v54 = vmul.f32 %v5194_v28, %v5245_v25 }
 0x218   : > { %6588 = vst [vmem:[#allocation30_spill] sm:$0xff] %v5235_v44  ;;  %v5359_v44 = vmul.f32 %v5172_v34, %v5192_v10  ;;  %v5382_v10 = vmul.f32 %v5172_v34, %v5212_v52  ;;  %v5405_v52 = vld [vmem:[%s5923_s4 + $0x338] sm:$0xff] }
 0x219   : > { %6589 = vst [vmem:[#allocation17_spill] sm:$0xff] %v5240_v59  ;;  %v5413_v59 = vmul.f32 %v5194_v28, %v5250_v31 }
 0x21a   : > { %6590 = vst [vmem:[#allocation84_spill] sm:$0xff] %v5245_v25  ;;  %v5431_v25 = vld [vmem:[%s5923_s4 + $0x348] sm:$0xff] }
 0x21b   : > { %6591 = vst [vmem:[#allocation19_spill] sm:$0xff] %v5250_v31  ;;  %v5436_v31 = vld [vmem:[%s5923_s4 + $0x350] sm:$0xff] }
 0x21c   : > { %6592 = vst [vmem:[#allocation20_spill] sm:$0xff] %v5264_v14  ;;  %v5355_v14 = vmul.f32 %v5148_v24, %v5187_v42  ;;  %v5378_v42 = vmul.f32 %v5172_v34, %v5207_v61  ;;  %v5400_v61 = vld [vmem:[%s5923_s4 + $0x330] sm:$0xff] }
 0x21d   : > { %6593 = vst [vmem:[#allocation24_spill] sm:$0xff] %v5266_v56  ;;  %v5351_v56 = vmul.f32 %v5148_v24, %v5182_v23  ;;  %v5374_v23 = vld [vmem:[%s5923_s4 + $0x320] sm:$0xff] }
 0x21e   : > { %6594 = vst [vmem:[#allocation57_spill] sm:$0xff] %v5268_v39  ;;  %v5347_v39 = vmul.f32 %v5148_v24, %v5177_v6  ;;  %v5369_v6 = vld [vmem:[%s5923_s4 + $0x318] sm:$0xff] }
 0x21f   : > { %6595 = vst [vmem:[#allocation58_spill] sm:$0xff] %v5273_v62  ;;  %v5440_v62 = vmul.f32 %v5196_v41, %v5283_v26 }
 0x220   : > { %6596 = vst [vmem:[#allocation59_spill] sm:$0xff] %v5278_v30  ;;  %v5444_v30 = vmul.f32 %v5196_v41, %v5292_v51 }
 0x221   : > { %6597 = vst [vmem:[#allocation60_spill] sm:$0xff] %v5283_v26  ;;  %v5462_v26 = vld [vmem:[%s5923_s4 + $0x360] sm:$0xff] }
 0x222   : > { %6598 = vst [vmem:[#allocation25_spill] sm:$0xff] %v5292_v51  ;;  %v5467_v51 = vld [vmem:[%s5923_s4 + $0x368] sm:$0xff] }
 0x223   : > { %6599 = vst [vmem:[#allocation26_spill] sm:$0xff] %v5297_v17  ;;  %v5471_v17 = vmul.f32 %v5198_v47, %v5328_v33 }
 0x224   : > { %6600 = vst [vmem:[#allocation27_spill] sm:$0xff] %v5302_v40  ;;  %v5475_v40 = vmul.f32 %v5198_v47, %v5333_v27 }
 0x225   : > { %6601 = vst [vmem:[#allocation53_spill] sm:$0xff] %v5315_v19 }
 0x226   : > { %6602 = vst [vmem:[#allocation54_spill] sm:$0xff] %v5319_v63 }
 0x227   : > { %6603 = vst [vmem:[#allocation55_spill] sm:$0xff] %v5323_v46 }
 0x228   : > { %6604 = vst [vmem:[#allocation56_spill] sm:$0xff] %v5328_v33  ;;  %v5493_v33 = vld [vmem:[%s5923_s4 + $0x378] sm:$0xff] }
 0x229   : > { %6605 = vst [vmem:[#allocation61_spill] sm:$0xff] %v5333_v27  ;;  %v5498_v27 = vld [vmem:[%s5923_s4 + $0x380] sm:$0xff] }
 0x22a   : > { %6606 = vst [vmem:[#allocation62_spill] sm:$0xff] %v5338_v50  ;;  %v5502_v50 = vmul.f32 %v5109_v36, %v5343_v20 }
 0x22b   : > { %6607 = vst [vmem:[#allocation63_spill] sm:$0xff] %v5347_v39 }
 0x22c   : > { %6608 = vst [vmem:[#allocation64_spill] sm:$0xff] %v5351_v56 }
 0x22d   : > { %6609 = vst [vmem:[#allocation65_spill] sm:$0xff] %v5355_v14  ;;  %v635_v14 = vrot.slane %v5150_v9, 7 }
 0x22e   : > { %6610 = vst [vmem:[#allocation67_spill] sm:$0xff] %v5359_v44  ;;  %v634_v44 = vrot.slane %v5150_v9, 6 }
 0x22f   : > { %6611 = vst [vmem:[#allocation36_spill] sm:$0xff] %v5378_v42 }
 0x230   : > { %6612 = vst [vmem:[#allocation76_spill] sm:$0xff] %v5382_v10  ;;  %v891_v10 = vld [vmem:[%s5923_s4 + $0x3f8] sm:$0xff] }
 0x231   : > { %6613 = vst [vmem:[#allocation40_spill] sm:$0xff] %v5386_v37  ;;  %v633_v37 = vrot.slane %v5150_v9, 5 }
 0x232   : > { %6614 = vst [vmem:[#allocation41_spill] sm:$0xff] %v5390_v45  ;;  %v632_v45 = vrot.slane %v5150_v9, 4 }
 0x233   : > { %6615 = vst [vmem:[#allocation52_spill] sm:$0xff] %v5409_v54  ;;  %v889_v54 = vld [vmem:[%s5923_s4 + $0x3e8] sm:$0xff] }
 0x234   : > { %6616 = vst [vmem:[#allocation7_spill] sm:$0xff] %v5413_v59  ;;  %v888_v59 = vld [vmem:[%s5923_s4 + $0x3e0] sm:$0xff]  ;;  %v5685_v63 = vmul.f32 %v5198_v47, %v889_v54 }
 0x235   : > { %6617 = vst [vmem:[#allocation8_spill] sm:$0xff] %v5417_v53  ;;  %v630_v53 = vrot.slane %v5150_v9, 2 }
 0x236   : > { %6618 = vst [vmem:[#allocation31_spill] sm:$0xff] %v5421_v5  ;;  %v886_v5 = vld [vmem:[%s5923_s4 + $0x3d0] sm:$0xff] }
 0x237   : > { %6619 = vst [vmem:[#allocation42_spill] sm:$0xff] %v5440_v62  ;;  %v5581_v62 = vld [vmem:[%s5923_s4 + $0x3b8] sm:$0xff]  ;;  %v5673_v56 = vmul.f32 %v5196_v41, %v886_v5  ;;  %v5690_v19 = vperm.slane %v630_v53, 0 }
 0x238   : > { %6620 = vst [vmem:[#allocation43_spill] sm:$0xff] %v5444_v30  ;;  %v5576_v30 = vmul.f32 %v5148_v24, %v5462_v26 }
 0x239   : > { %6621 = vst [vmem:[#allocation44_spill] sm:$0xff] %v5448_v18  ;;  %v5550_v18 = vld [vmem:[%s5923_s4 + $0x3a0] sm:$0xff] }
 0x23a   : > { %6622 = vst [vmem:[#allocation32_spill] sm:$0xff] %v5452_v43  ;;  %v5545_v43 = vmul.f32 %v5146_v38, %v5426_v29 }
 0x23b   : > { %6623 = vst [vmem:[#allocation9_spill] sm:$0xff] %v5471_v17  ;;  %v5519_v17 = vld [vmem:[%s5923_s4 + $0x388] sm:$0xff] }
 0x23c   : > { %6624 = vst [vmem:[#allocation33_spill] sm:$0xff] %v5475_v40  ;;  %v5514_v40 = vmul.f32 %v5129_v57, %v5374_v23 }
 0x23d   : > { %6625 = vst [vmem:[#allocation34_spill] sm:$0xff] %v5479_v21  ;;  %v5510_v21 = vmul.f32 %v5109_v36, %v5369_v6 }
 0x23e   : > { %6626 = vst [vmem:[#allocation45_spill] sm:$0xff] %v5483_v22  ;;  %v5506_v22 = vmul.f32 %v5109_v36, %v5364_v12  ;;  %v5533_v36 = vmul.f32 %v5129_v57, %v5395_v0 }
 0x23f   : > { %6627 = vst [vmem:[#allocation66_spill] sm:$0xff] %v5502_v50  ;;  %v5524_v50 = vld [vmem:[%s5923_s4 + $0x390] sm:$0xff] }
 0x240   : > { %6628 = vst [vmem:[#allocation35_spill] sm:$0xff] %v5506_v22  ;;  %v5529_v22 = vld [vmem:[%s5923_s4 + $0x398] sm:$0xff] }
 0x241   : > { %6629 = vst [vmem:[#allocation37_spill] sm:$0xff] %v5510_v21  ;;  %v5541_v21 = vmul.f32 %v5129_v57, %v5405_v52 }
 0x242   : > { %6630 = vst [vmem:[#allocation38_spill] sm:$0xff] %v5514_v40  ;;  %v5537_v40 = vmul.f32 %v5129_v57, %v5400_v61  ;;  %v5564_v57 = vmul.f32 %v5146_v38, %v5431_v25 }
 0x243   : > { %6631 = vst [vmem:[#allocation39_spill] sm:$0xff] %v5533_v36  ;;  %v5555_v36 = vld [vmem:[%s5923_s4 + $0x3a8] sm:$0xff] }
 0x244   : > { %6632 = vst [vmem:[#allocation73_spill] sm:$0xff] %v5537_v40  ;;  %v5560_v40 = vld [vmem:[%s5923_s4 + $0x3b0] sm:$0xff] }
 0x245   : > { %6633 = vst [vmem:[#allocation74_spill] sm:$0xff] %v5541_v21  ;;  %v5572_v21 = vmul.f32 %v5146_v38, %v5457_v7 }
 0x246   : > { %6634 = vst [vmem:[#allocation18_spill] sm:$0xff] %v5545_v43  ;;  %v5568_v43 = vmul.f32 %v5146_v38, %v5436_v31  ;;  %v5593_v38 = vmul.f32 %v5148_v24, %v5493_v33 }
 0x247   : > { %6635 = vst [vmem:[#allocation75_spill] sm:$0xff] %v5564_v57  ;;  %v5585_v57 = vmul.f32 %v5148_v24, %v5467_v51 }
 0x248   : > { %6636 = vst [vmem:[#allocation77_spill] sm:$0xff] %v5568_v43  ;;  %v5589_v43 = vmul.f32 %v5148_v24, %v5488_v2  ;;  %v5614_v24 = vmul.f32 %v5172_v34, %v5529_v22 }
 0x249   : > { %6637 = vst [vmem:[#allocation78_spill] sm:$0xff] %v5572_v21  ;;  %v5602_v21 = vld [vmem:[%s5923_s4 + $0x3c0] sm:$0xff] }
 0x24a   : > { %6638 = vst [vmem:[#allocation79_spill] sm:$0xff] %v5576_v30  ;;  %v5597_v30 = vmul.f32 %v5172_v34, %v5498_v27  ;;  %v5662_v42 = vmul.f32 %v5196_v41, %v5602_v21 }
 0x24b   : > { %6639 = vst [vmem:[#allocation80_spill] sm:$0xff] %v5585_v57  ;;  %v5606_v57 = vmul.f32 %v5172_v34, %v5519_v17 }
 0x24c   : > { %6640 = vst [vmem:[#allocation21_spill] sm:$0xff] %v5589_v43  ;;  %v5610_v43 = vmul.f32 %v5172_v34, %v5524_v50  ;;  %v5634_v34 = vmul.f32 %v5194_v28, %v5555_v36 }
 0x24d   : > { %6641 = vst [vmem:[#allocation22_spill] sm:$0xff] %v5593_v38  ;;  %v629_v38 = vrot.slane %v5150_v9, 1 }
 0x24e   : > { %6642 = vst [vmem:[#allocation23_spill] sm:$0xff] %v5597_v30  ;;  %v885_v30 = vld [vmem:[%s5923_s4 + $0x3c8] sm:$0xff] }
 0x24f   : > { %6643 = vst [vmem:[#allocation49_spill] sm:$0xff] %v5606_v57  ;;  %v5626_v57 = vld [vmem:[%s5923_s4 + $0x3d8] sm:$0xff]  ;;  %v5679_v46 = vperm.slane %v629_v38, 0  ;;  %v5699_v38 = vperm.slane %v633_v37, 0 }
 0x250   : > { %6644 = vst [vmem:[#allocation50_spill] sm:$0xff] %v5610_v43  ;;  %v5630_v43 = vmul.f32 %v5194_v28, %v5550_v18  ;;  %v5677_v39 = vmul.f32 %v5196_v41, %v5626_v57 }
 0x251   : > { %6645 = vst [vmem:[#allocation51_spill] sm:$0xff] %v5614_v24  ;;  %v5638_v24 = vmul.f32 %v5194_v28, %v5560_v40  ;;  %v1249_v37 = vmul.f32 %v5679_v46, %v5395_v0 }
 0x252   : > { %6646 = vst [vmem:[#allocation81_spill] sm:$0xff] %v5630_v43  ;;  %v890_v43 = vld [vmem:[%s5923_s4 + $0x3f0] sm:$0xff] }
 0x253   : > { %6647 = vst [vmem:[#allocation82_spill] sm:$0xff] %v5634_v34  ;;  %v5652_v34 = vmul.f32 %v5194_v28, %v5581_v62  ;;  %v5667_v28 = vperm.slane %v5150_v9, 0 }
 0x254   : > { %6648 = vst [vmem:[#allocation83_spill] sm:$0xff] %v5638_v24  ;;  %v631_v24 = vrot.slane %v5150_v9, 3  ;;  %v5688_v9 = vmul.f32 %v5198_v47, %v890_v43 }
 0x255   : > { %6649 = vst [vmem:[#allocation85_spill] sm:$0xff] %v5652_v34  ;;  %v5670_v34 = vmul.f32 %v5196_v41, %v885_v30  ;;  %v5697_v41 = vperm.slane %v632_v45, 0  ;;  %v1245_v53 = vmul.f32 %v5667_v28, %v5343_v20  ;;  %v1248_v45 = vmul.f32 %v5679_v46, %v5374_v23 }
 0x256   : > { %6650 = vst [vmem:[#allocation86_spill] sm:$0xff] %v5662_v42  ;;  %v5682_v42 = vmul.f32 %v5198_v47, %v888_v59  ;;  %v1255_v23 = vmul.f32 %v5690_v19, %v5457_v7 }
 0x257   : > { %6651 = vst [vmem:[#allocation87_spill] sm:$0xff] %v5670_v34  ;;  %v5693_v34 = vmul.f32 %v5198_v47, %v891_v10  ;;  %v1246_v47 = vmul.f32 %v5667_v28, %v5364_v12  ;;  %v1253_v12 = vmul.f32 %v5690_v19, %v5431_v25  ;;  %v1260_v25 = vmul.f32 %v5697_v41, %v5498_v27 }
 0x258   : > { %6652 = vst [vmem:[#allocation88_spill] sm:$0xff] %v5673_v56  ;;  %v5695_v56 = vperm.slane %v631_v24, 0  ;;  %v1247_v24 = vmul.f32 %v5667_v28, %v5369_v6  ;;  %v1254_v6 = vmul.f32 %v5690_v19, %v5436_v31  ;;  %v1261_v31 = vmul.f32 %v5697_v41, %v5519_v17 }
 0x259   : > { %6653 = vst [vmem:[#allocation89_spill] sm:$0xff] %v5677_v39  ;;  %v5701_v39 = vperm.slane %v634_v44, 0  ;;  %v1250_v44 = vmul.f32 %v5679_v46, %v5400_v61  ;;  %v1262_v7 = vmul.f32 %v5697_v41, %v5524_v50  ;;  %v1373_v20 = vsub.f32 %v5221_v60, %v1245_v53  ;;  %v6657_v53 = vld [vmem:[#allocation53_spill] sm:$0xff] }
 0x25a   : > { %6654 = vst [vmem:[#allocation90_spill] sm:$0xff] %v5682_v42  ;;  %v5703_v42 = vperm.slane %v635_v14, 0  ;;  %v1251_v14 = vmul.f32 %v5679_v46, %v5405_v52  ;;  %v1256_v0 = vmul.f32 %v5695_v56, %v5462_v26  ;;  %v1257_v61 = vmul.f32 %v5695_v56, %v5467_v51 }
 0x25b   : > { %6655 = vst [vmem:[#allocation91_spill] sm:$0xff] %v5685_v63  ;;  %v1244_v63 = vmul.f32 %v5667_v28, %v5307_v13  ;;  %v1252_v13 = vmul.f32 %v5690_v19, %v5426_v29  ;;  %v1258_v52 = vmul.f32 %v5695_v56, %v5488_v2  ;;  %v1259_v29 = vmul.f32 %v5695_v56, %v5493_v33 }
 0x25c   : > { %6656 = vst [vmem:[#allocation92_spill] sm:$0xff] %v5693_v34  ;;  %v1263_v26 = vmul.f32 %v5697_v41, %v5529_v22  ;;  %v1264_v51 = vmul.f32 %v5699_v38, %v5550_v18  ;;  %v1265_v2 = vmul.f32 %v5699_v38, %v5555_v36  ;;  %v1266_v33 = vmul.f32 %v5699_v38, %v5560_v40 }
 0x25d   : > { %v1372_v27 = vsub.f32 %v5202_v15, %v1244_v63  ;;  %v1374_v17 = vsub.f32 %v5225_v1, %v1246_v47  ;;  %v1267_v50 = vmul.f32 %v5699_v38, %v5581_v62  ;;  %v1268_v22 = vmul.f32 %v5701_v39, %v5602_v21 }
 0x25e   : > { %v1269_v18 = vmul.f32 %v5701_v39, %v885_v30  ;;  %v1375_v34 = vsub.f32 %v5229_v11, %v1247_v24  ;;  %v1270_v36 = vmul.f32 %v5701_v39, %v886_v5  ;;  %v1376_v40 = vsub.f32 %v5233_v3, %v1248_v45 }
 0x25f   : > { %v1377_v15 = vsub.f32 %v5254_v35, %v1249_v37  ;;  %v1378_v60 = vsub.f32 %v5258_v55, %v1250_v44  ;;  %v1271_v1 = vmul.f32 %v5701_v39, %v5626_v57  ;;  %v1272_v62 = vmul.f32 %v5703_v42, %v888_v59 }
 0x260   : > { %v1273_v63 = vmul.f32 %v5703_v42, %v889_v54  ;;  %v1379_v21 = vsub.f32 %v5262_v32, %v1251_v14  ;;  %v1274_v30 = vmul.f32 %v5703_v42, %v890_v43  ;;  %v1427_v11 = vadd.f32 %v5040_v48, %v1372_v27  ;;  %v6658_v43 = vld [vmem:[#allocation54_spill] sm:$0xff]  ;;  %v6659_v48 = vld [vmem:[#allocation55_spill] sm:$0xff]  ;;  %v6661_v14 = vld [vmem:[#allocation64_spill] sm:$0xff] }
 0x261   : > { %v1458_v5 = vadd.f32 %v5052_v49, %v1373_v20  ;;  %v1489_v3 = vadd.f32 %v5057_v58, %v1374_v17  ;;  %v1275_v35 = vmul.f32 %v5703_v42, %v891_v10  ;;  %v1380_v55 = vsub.f32 %v5287_v8, %v1252_v13  ;;  %v6660_v49 = vld [vmem:[#allocation63_spill] sm:$0xff] }
 0x262   : > { %v1381_v57 = vsub.f32 %v5311_v4, %v1253_v12  ;;  %v1520_v59 = vadd.f32 %v5059_v16, %v1375_v34  ;;  %v1382_v54 = vsub.f32 %v6657_v53, %v1254_v6  ;;  %v1428_v47 = vadd.f32 %v1427_v11, %v1376_v40  ;;  %v6662_v4 = vld [vmem:[#allocation65_spill] sm:$0xff]  ;;  %v6663_v16 = vld [vmem:[#allocation67_spill] sm:$0xff]  ;;  %v6664_v6 = vld [vmem:[#allocation36_spill] sm:$0xff] }
 0x263   : > { %v1459_v32 = vadd.f32 %v1458_v5, %v1377_v15  ;;  %v1490_v24 = vadd.f32 %v1489_v3, %v1378_v60  ;;  %v1383_v45 = vsub.f32 %v6658_v43, %v1255_v23  ;;  %v1384_v37 = vsub.f32 %v6659_v48, %v1256_v0  ;;  %v6665_v40 = vld [vmem:[#allocation76_spill] sm:$0xff]  ;;  %v6667_v11 = vld [vmem:[#allocation41_spill] sm:$0xff] }
 0x264   : > { %v1385_v44 = vsub.f32 %v6660_v49, %v1257_v61  ;;  %v1521_v58 = vadd.f32 %v1520_v59, %v1379_v21  ;;  %v1386_v10 = vsub.f32 %v6661_v14, %v1258_v52  ;;  %v1429_v27 = vadd.f32 %v1428_v47, %v1380_v55  ;;  %v6666_v61 = vld [vmem:[#allocation40_spill] sm:$0xff]  ;;  %v6671_v47 = vld [vmem:[#allocation31_spill] sm:$0xff] }
 0x265   : > { %v1460_v8 = vadd.f32 %v1459_v32, %v1381_v57  ;;  %v1491_v13 = vadd.f32 %v1490_v24, %v1382_v54  ;;  %v1387_v12 = vsub.f32 %v6662_v4, %v1259_v29  ;;  %v1388_v34 = vsub.f32 %v6663_v16, %v1260_v25  ;;  %v6668_v5 = vld [vmem:[#allocation52_spill] sm:$0xff]  ;;  %v6669_v57 = vld [vmem:[#allocation7_spill] sm:$0xff]  ;;  %v6672_v32 = vld [vmem:[#allocation42_spill] sm:$0xff] }
 0x266   : > { %v1389_v20 = vsub.f32 %v6664_v6, %v1261_v31  ;;  %v1522_v17 = vadd.f32 %v1521_v58, %v1383_v45  ;;  %v1390_v15 = vsub.f32 %v6665_v40, %v1262_v7  ;;  %v1430_v23 = vadd.f32 %v1429_v27, %v1384_v37  ;;  %v6670_v31 = vld [vmem:[#allocation8_spill] sm:$0xff]  ;;  %v6676_v58 = vld [vmem:[#allocation9_spill] sm:$0xff] }
 0x267   : > { %v1461_v0 = vadd.f32 %v1460_v8, %v1385_v44  ;;  %v1492_v60 = vadd.f32 %v1491_v13, %v1386_v10  ;;  %v1391_v21 = vsub.f32 %v6666_v61, %v1263_v26  ;;  %v1392_v52 = vsub.f32 %v6667_v11, %v1264_v51  ;;  %v6673_v26 = vld [vmem:[#allocation43_spill] sm:$0xff]  ;;  %v6674_v37 = vld [vmem:[#allocation44_spill] sm:$0xff]  ;;  %v6685_v61 = vld [vmem:[#allocation10_spill] sm:$0xff] }
 0x268   : > { %v1393_v3 = vsub.f32 %v6668_v5, %v1265_v2  ;;  %v1523_v55 = vadd.f32 %v1522_v17, %v1387_v12  ;;  %v1394_v29 = vsub.f32 %v6669_v57, %v1266_v33  ;;  %v1431_v59 = vadd.f32 %v1430_v23, %v1388_v34  ;;  %v6675_v33 = vld [vmem:[#allocation32_spill] sm:$0xff]  ;;  %v6679_v12 = vld [vmem:[#allocation46_spill] sm:$0xff]  ;;  %v6683_v23 = vld [vmem:[#allocation5_spill] sm:$0xff] }
 0x269   : > { %v1462_v25 = vadd.f32 %v1461_v0, %v1389_v20  ;;  %v1493_v53 = vadd.f32 %v1492_v60, %v1390_v15  ;;  %v1395_v54 = vsub.f32 %v6670_v31, %v1267_v50  ;;  %v1396_v7 = vsub.f32 %v6671_v47, %v1268_v22  ;;  %v6677_v50 = vld [vmem:[#allocation33_spill] sm:$0xff]  ;;  %v6681_v6 = vld [vmem:[#allocation48_spill] sm:$0xff]  ;;  %v6684_v0 = vld [vmem:[#allocation6_spill] sm:$0xff] }
 0x26a   : > { %v1397_v24 = vsub.f32 %v6672_v32, %v1269_v18  ;;  %v1524_v43 = vadd.f32 %v1523_v55, %v1391_v21  ;;  %v1398_v45 = vsub.f32 %v6673_v26, %v1270_v36  ;;  %v1432_v51 = vadd.f32 %v1431_v59, %v1392_v52  ;;  %v6678_v18 = vld [vmem:[#allocation34_spill] sm:$0xff]  ;;  %v6682_v40 = vld [vmem:[#allocation4_spill] sm:$0xff]  ;;  %v6686_v11 = vld [vmem:[#allocation11_spill] sm:$0xff] }
 0x26b   : > { %v1463_v48 = vadd.f32 %v1462_v25, %v1393_v3  ;;  %v1494_v2 = vadd.f32 %v1493_v53, %v1394_v29  ;;  %v1399_v49 = vsub.f32 %v6674_v37, %v1271_v1  ;;  %v1400_v44 = vsub.f32 %v6675_v33, %v1272_v62  ;;  %v6680_v62 = vld [vmem:[#allocation47_spill] sm:$0xff]  ;;  %v6687_v5 = vld [vmem:[#allocation12_spill] sm:$0xff]  ;;  %v6688_v55 = vld [vmem:[#allocation13_spill] sm:$0xff] }
 0x26c   : > { %v1401_v14 = vsub.f32 %v6676_v58, %v1273_v63  ;;  %v1525_v10 = vadd.f32 %v1524_v43, %v1395_v54  ;;  %v1402_v27 = vsub.f32 %v6677_v50, %v1274_v30  ;;  %v1433_v22 = vadd.f32 %v1432_v51, %v1396_v7  ;;  %v6690_v59 = vld [vmem:[#allocation28_spill] sm:$0xff]  ;;  %v6691_v53 = vld [vmem:[#allocation69_spill] sm:$0xff]  ;;  %v6692_v54 = vld [vmem:[#allocation14_spill] sm:$0xff] }
 0x26d   : > { %v1464_v8 = vadd.f32 %v1463_v48, %v1397_v24  ;;  %v1495_v13 = vadd.f32 %v1494_v2, %v1398_v45  ;;  %v1403_v36 = vsub.f32 %v6678_v18, %v1275_v35  ;;  %v1756_v1 = vmul.f32 %v5667_v28, %v6679_v12  ;;  %v6694_v32 = vld [vmem:[#allocation29_spill] sm:$0xff]  ;;  %v6695_v43 = vld [vmem:[#allocation16_spill] sm:$0xff]  ;;  %v6696_v45 = vld [vmem:[#allocation70_spill] sm:$0xff] }
 0x26e   : > { %v1526_v4 = vadd.f32 %v1525_v10, %v1399_v49  ;;  %v1757_v63 = vmul.f32 %v5667_v28, %v6680_v62  ;;  %v1434_v16 = vadd.f32 %v1433_v22, %v1400_v44  ;;  %v1758_v20 = vmul.f32 %v5667_v28, %v6681_v6  ;;  %v6698_v2 = vld [vmem:[#allocation72_spill] sm:$0xff]  ;;  %v6699_v49 = vld [vmem:[#allocation17_spill] sm:$0xff]  ;;  %v6705_v18 = vld [vmem:[#allocation58_spill] sm:$0xff] }
 0x26f   : > { %v1465_v34 = vadd.f32 %v1464_v8, %v1401_v14  ;;  %v1496_v30 = vadd.f32 %v1495_v13, %v1402_v27  ;;  %v1759_v15 = vmul.f32 %v5667_v28, %v6682_v40  ;;  %v1760_v35 = vmul.f32 %v5679_v46, %v6683_v23  ;;  %v6689_v28 = vld [vmem:[#allocation68_spill] sm:$0xff]  ;;  %v6702_v10 = vld [vmem:[#allocation45_spill] sm:$0xff]  ;;  %v6703_v27 = vld [vmem:[#allocation66_spill] sm:$0xff] }
 0x270   : > { %v1527_v17 = vadd.f32 %v1526_v4, %v1403_v36  ;;  %v1761_v60 = vmul.f32 %v5679_v46, %v6684_v0  ;;  %1528 = vst [vmem:[%s331_s8] sm:$0xff] %v1434_v16  ;;  %v1762_v21 = vmul.f32 %v5679_v46, %v6685_v61  ;;  %v1763_v52 = vmul.f32 %v5679_v46, %v6686_v11  ;;  %v6693_v46 = vld [vmem:[#allocation15_spill] sm:$0xff]  ;;  %v6700_v44 = vld [vmem:[#allocation84_spill] sm:$0xff]  ;;  %v6708_v16 = vld [vmem:[#allocation37_spill] sm:$0xff] }
 0x271   : > { %v1764_v3 = vmul.f32 %v5690_v19, %v6687_v5  ;;  %v1765_v57 = vmul.f32 %v5690_v19, %v6688_v55  ;;  %1529 = vst [vmem:[%s331_s8 + $0x8] sm:$0xff] %v1465_v34  ;;  %v1766_v29 = vmul.f32 %v5690_v19, %v6689_v28  ;;  %v1767_v25 = vmul.f32 %v5690_v19, %v6690_v59  ;;  %v6697_v19 = vld [vmem:[#allocation71_spill] sm:$0xff]  ;;  %v6707_v12 = vld [vmem:[#allocation60_spill] sm:$0xff]  ;;  %v6712_v23 = vld [vmem:[#allocation73_spill] sm:$0xff] }
 0x272   : > { %v1768_v31 = vmul.f32 %v5695_v56, %v6691_v53  ;;  %v1769_v47 = vmul.f32 %v5695_v56, %v6692_v54  ;;  %1530 = vst [vmem:[%s331_s8 + $0x10] sm:$0xff] %v1496_v30  ;;  %v1770_v7 = vmul.f32 %v5695_v56, %v6693_v46  ;;  %v1771_v24 = vmul.f32 %v5695_v56, %v6694_v32  ;;  %v6701_v56 = vld [vmem:[#allocation19_spill] sm:$0xff]  ;;  %v6709_v30 = vld [vmem:[#allocation25_spill] sm:$0xff]  ;;  %v6713_v0 = vld [vmem:[#allocation26_spill] sm:$0xff] }
 0x273   : > { %v1772_v26 = vmul.f32 %v5697_v41, %v6695_v43  ;;  %v1773_v51 = vmul.f32 %v5697_v41, %v6696_v45  ;;  %1531 = vst [vmem:[%s331_s8 + $0x18] sm:$0xff] %v1527_v17  ;;  %v1774_v48 = vmul.f32 %v5697_v41, %v6697_v19  ;;  %v1775_v37 = vmul.f32 %v5697_v41, %v6698_v2  ;;  %v6704_v8 = vld [vmem:[#allocation35_spill] sm:$0xff]  ;;  %v6710_v17 = vld [vmem:[#allocation38_spill] sm:$0xff]  ;;  %v6715_v5 = vld [vmem:[#allocation56_spill] sm:$0xff] }
 0x274   : > { %v1776_v33 = vmul.f32 %v5699_v38, %v6699_v49  ;;  %v1777_v58 = vmul.f32 %v5699_v38, %v6700_v44  ;;  %v1778_v14 = vmul.f32 %v5699_v38, %v6701_v56  ;;  %v1884_v50 = vadd.f32 %v1756_v1, %v6702_v10  ;;  %v6706_v4 = vld [vmem:[#allocation59_spill] sm:$0xff]  ;;  %v6716_v28 = vld [vmem:[#allocation74_spill] sm:$0xff]  ;;  %v6717_v59 = vld [vmem:[#allocation61_spill] sm:$0xff] }
 0x275   : > { %v1885_v22 = vadd.f32 %v1757_v63, %v6703_v27  ;;  %v1886_v13 = vadd.f32 %v1758_v20, %v6704_v8  ;;  %v1779_v36 = vmul.f32 %v5699_v38, %v6705_v18  ;;  %v1780_v41 = vmul.f32 %v5701_v39, %v6706_v4  ;;  %v6711_v40 = vld [vmem:[#allocation39_spill] sm:$0xff]  ;;  %v6718_v54 = vld [vmem:[#allocation30_spill] sm:$0xff]  ;;  %v6719_v46 = vld [vmem:[#allocation20_spill] sm:$0xff] }
 0x276   : > { %v1781_v62 = vmul.f32 %v5701_v39, %v6707_v12  ;;  %v1887_v34 = vadd.f32 %v1759_v15, %v6708_v16  ;;  %v1782_v6 = vmul.f32 %v5701_v39, %v6709_v30  ;;  %v1888_v1 = vadd.f32 %v1760_v35, %v6710_v17  ;;  %v6714_v61 = vld [vmem:[#allocation27_spill] sm:$0xff]  ;;  %v6720_v32 = vld [vmem:[#allocation24_spill] sm:$0xff]  ;;  %v6721_v43 = vld [vmem:[#allocation62_spill] sm:$0xff] }
 0x277   : > { %v1889_v63 = vadd.f32 %v1761_v60, %v6711_v40  ;;  %v1890_v20 = vadd.f32 %v1762_v21, %v6712_v23  ;;  %v1783_v38 = vmul.f32 %v5701_v39, %v6713_v0  ;;  %v1784_v11 = vmul.f32 %v5703_v42, %v6714_v61  ;;  %v6722_v45 = vld [vmem:[#allocation18_spill] sm:$0xff]  ;;  %v6723_v2 = vld [vmem:[#allocation75_spill] sm:$0xff]  ;;  %v6724_v44 = vld [vmem:[#allocation57_spill] sm:$0xff] }
 0x278   : > { %v1785_v55 = vmul.f32 %v5703_v42, %v6715_v5  ;;  %v1891_v15 = vadd.f32 %v1763_v52, %v6716_v28  ;;  %v1786_v53 = vmul.f32 %v5703_v42, %v6717_v59  ;;  %v1939_v35 = vadd.f32 %v6718_v54, %v1884_v50  ;;  %v6725_v10 = vld [vmem:[#allocation77_spill] sm:$0xff]  ;;  %v6726_v4 = vld [vmem:[#allocation78_spill] sm:$0xff]  ;;  %v6727_v12 = vld [vmem:[#allocation79_spill] sm:$0xff] }
 0x279   : > { %v1970_v60 = vadd.f32 %v6719_v46, %v1885_v22  ;;  %v2001_v21 = vadd.f32 %v6720_v32, %v1886_v13  ;;  %v1787_v39 = vmul.f32 %v5703_v42, %v6721_v43  ;;  %v1892_v19 = vadd.f32 %v1764_v3, %v6722_v45  ;;  %v6728_v16 = vld [vmem:[#allocation80_spill] sm:$0xff]  ;;  %v6729_v17 = vld [vmem:[#allocation21_spill] sm:$0xff]  ;;  %v6734_v59 = vld [vmem:[#allocation51_spill] sm:$0xff] }
 0x27a   : > { %v1893_v49 = vadd.f32 %v1765_v57, %v6723_v2  ;;  %v2032_v56 = vadd.f32 %v6724_v44, %v1887_v34  ;;  %v1894_v52 = vadd.f32 %v1766_v29, %v6725_v10  ;;  %v1940_v27 = vadd.f32 %v1939_v35, %v1888_v1  ;;  %v6730_v57 = vld [vmem:[#allocation22_spill] sm:$0xff]  ;;  %v6731_v34 = vld [vmem:[#allocation23_spill] sm:$0xff]  ;;  %v6732_v29 = vld [vmem:[#allocation49_spill] sm:$0xff] }
 0x27b   : > { %v1971_v8 = vadd.f32 %v1970_v60, %v1889_v63  ;;  %v2002_v18 = vadd.f32 %v2001_v21, %v1890_v20  ;;  %v1895_v50 = vadd.f32 %v1767_v25, %v6726_v4  ;;  %v1896_v22 = vadd.f32 %v1768_v31, %v6727_v12  ;;  %v6733_v20 = vld [vmem:[#allocation50_spill] sm:$0xff]  ;;  %v6737_v60 = vld [vmem:[#allocation83_spill] sm:$0xff]  ;;  %v6738_v43 = vld [vmem:[#allocation85_spill] sm:$0xff] }
 0x27c   : > { %v1897_v13 = vadd.f32 %v1769_v47, %v6728_v16  ;;  %v2033_v30 = vadd.f32 %v2032_v56, %v1891_v15  ;;  %v1898_v42 = vadd.f32 %v1770_v7, %v6729_v17  ;;  %v1941_v40 = vadd.f32 %v1940_v27, %v1892_v19  ;;  %v6735_v15 = vld [vmem:[#allocation81_spill] sm:$0xff]  ;;  %v6736_v7 = vld [vmem:[#allocation82_spill] sm:$0xff]  ;;  %v6740_v19 = vld [vmem:[#allocation87_spill] sm:$0xff] }
 0x27d   : > { %v1972_v3 = vadd.f32 %v1971_v8, %v1893_v49  ;;  %v2003_v23 = vadd.f32 %v2002_v18, %v1894_v52  ;;  %v1899_v0 = vadd.f32 %v1771_v24, %v6730_v57  ;;  %v1900_v61 = vadd.f32 %v1772_v26, %v6731_v34  ;;  %v6739_v45 = vld [vmem:[#allocation86_spill] sm:$0xff]  ;;  %v6741_v44 = vld [vmem:[#allocation88_spill] sm:$0xff]  ;;  %v6744_v8 = vld [vmem:[#allocation91_spill] sm:$0xff] }
 0x27e   : > { %v1901_v1 = vadd.f32 %v1773_v51, %v6732_v29  ;;  %v2034_v63 = vadd.f32 %v2033_v30, %v1895_v50  ;;  %v1902_v5 = vadd.f32 %v1774_v48, %v6733_v20  ;;  %v1942_v25 = vadd.f32 %v1941_v40, %v1896_v22  ;;  %v6743_v27 = vld [vmem:[#allocation90_spill] sm:$0xff] }
 0x27f   : > { %v1973_v28 = vadd.f32 %v1972_v3, %v1897_v13  ;;  %v2004_v31 = vadd.f32 %v2003_v23, %v1898_v42  ;;  %v1903_v47 = vadd.f32 %v1775_v37, %v6734_v59  ;;  %v1904_v54 = vadd.f32 %v1776_v33, %v6735_v15 }
 0x280   : > { %v1905_v35 = vadd.f32 %v1777_v58, %v6736_v7  ;;  %v2035_v46 = vadd.f32 %v2034_v63, %v1899_v0  ;;  %v1906_v32 = vadd.f32 %v1778_v14, %v6737_v60  ;;  %v1943_v24 = vadd.f32 %v1942_v25, %v1900_v61  ;;  %v6742_v58 = vld [vmem:[#allocation89_spill] sm:$0xff] }
 0x281   : > { %v1974_v21 = vadd.f32 %v1973_v28, %v1901_v1  ;;  %v2005_v26 = vadd.f32 %v2004_v31, %v1902_v5  ;;  %v1907_v51 = vadd.f32 %v1779_v36, %v6738_v43  ;;  %v1908_v48 = vadd.f32 %v1780_v41, %v6739_v45 }
 0x282   : > { %v1909_v2 = vadd.f32 %v1781_v62, %v6740_v19  ;;  %v2036_v49 = vadd.f32 %v2035_v46, %v1903_v47  ;;  %v1910_v37 = vadd.f32 %v1782_v6, %v6741_v44  ;;  %v1944_v56 = vadd.f32 %v1943_v24, %v1904_v54  ;;  %v6745_v62 = vld [vmem:[#allocation92_spill] sm:$0xff] }
 0x283   : > { %v1975_v33 = vadd.f32 %v1974_v21, %v1905_v35  ;;  %v2006_v10 = vadd.f32 %v2005_v26, %v1906_v32  ;;  %v1911_v52 = vadd.f32 %v1783_v38, %v6742_v58  ;;  %v1912_v14 = vadd.f32 %v1784_v11, %v6743_v27 }
 0x284   : > { %v1913_v18 = vadd.f32 %v1785_v55, %v6744_v8  ;;  %v2037_v4 = vadd.f32 %v2036_v49, %v1907_v51  ;;  %v1914_v36 = vadd.f32 %v1786_v53, %v5688_v9  ;;  %v1945_v50 = vadd.f32 %v1944_v56, %v1908_v48 }
 0x285   : > { %v1976_v12 = vadd.f32 %v1975_v33, %v1909_v2  ;;  %v2007_v41 = vadd.f32 %v2006_v10, %v1910_v37  ;;  %v1915_v6 = vadd.f32 %v1787_v39, %v6745_v62 }
 0x286   : > { %v2038_v22 = vadd.f32 %v2037_v4, %v1911_v52  ;;  %v1946_v16 = vadd.f32 %v1945_v50, %v1912_v14 }
 0x287   : > { %v1977_v38 = vadd.f32 %v1976_v12, %v1913_v18  ;;  %v2008_v13 = vadd.f32 %v2007_v41, %v1914_v36 }
 0x288   : > { %v2039_v11 = vadd.f32 %v2038_v22, %v1915_v6  ;;  %2040 = vst [vmem:[%s336_s11] sm:$0xff] %v1946_v16 }
 0x289   : > { %2041 = vst [vmem:[%s336_s11 + $0x8] sm:$0xff] %v1977_v38 }
 0x28a   : > { %2042 = vst [vmem:[%s336_s11 + $0x10] sm:$0xff] %v2008_v13 }
 0x28b   : > { %2043 = vst [vmem:[%s336_s11 + $0x18] sm:$0xff] %v2039_v11 }
 0x28c PF: > { %s17_s23 = sadd.s32 1, %s2241_s23   ;;  %s6746_s21 = smov %s2237_s22 }
 0x28d   : > { %p14_p5 = scmp.ge.s32.totalorder %s17_s23, 4   ;;  %s6747_s22 = smov %s6749_s24 }
 0x28f   :  { %16 = sbr.rel (!%p14_p5) target bundleno = 2 (0x2), region = 96 }

</bundles_post_ra>
